<compile_context>
chip_gen: v6e
topology: v6e:2x2x1
jax: 0.10.0
libtpu: 0.0.40
codegen_flags: <defaults>
</compile_context>

<pallas_src>
import jax
import jax.numpy as jnp
import numpy as np
from jax.experimental import pallas as pl
from jax.experimental.pallas import tpu as pltpu

EPS = 1e-5                                    # BatchNorm2d default eps
_TAPS = tuple((dy, dx) for dy in range(3) for dx in range(3))


def _row_mod(n_rows, period):
    """(n_rows, 1) int32 of row_index % period without integer div/mod on the VPU.

    Uses float reciprocal + truncation; the +0.5 keeps the truncation exact for
    the small non-negative integers used here."""
    r_i = jax.lax.broadcasted_iota(jnp.int32, (n_rows, 1), 0)
    q = ((r_i.astype(jnp.float32) + 0.5) * (1.0 / period)).astype(jnp.int32)
    return r_i - q * period


# ---------------------------------------------------------------------------
# Kernel 1: conv3x3 ('same') on one image + per-image BN partial sums.
# Output is written into the padded inter-block slab block 2 reads directly.
# ---------------------------------------------------------------------------
def _make_conv1_kernel(Wp, HWp, W, base, f2):
    def kernel(x_ref, w_ref, y_ref, part_ref):
        # x_ref:    (1, F1, Cin)  bf16  spatially padded, row-flattened image
        # w_ref:    (9, Cin, Chid) bf16 taps (dy,dx) row-major
        # y_ref:    (1, F2, Chid) f32   inter-block slab (raw conv values)
        # part_ref: (1, 2, Chid)  f32   per-image [sum, sum_sq] over valid pixels
        xs = x_ref[0]                                      # aligned full load
        acc = jnp.dot(xs, w_ref[0],
                      preferred_element_type=jnp.float32)[0:HWp, :]
        for t in range(1, 9):
            dy, dx = _TAPS[t]
            off = dy * Wp + dx
            p = jnp.dot(xs, w_ref[t], preferred_element_type=jnp.float32)
            acc = acc + p[off:off + HWp, :]                # shift product, not input

        # Write conv result at an 8-aligned offset inside the padded slab and
        # zero the halo rows so the slab is fully deterministic.
        nchan = y_ref.shape[2]
        y_ref[0, 0:base, :] = jnp.zeros((base, nchan), y_ref.dtype)
        y_ref[0, base:base + HWp, :] = acc
        y_ref[0, base + HWp:f2, :] = jnp.zeros((f2 - base - HWp, nchan),
                                               y_ref.dtype)

        # BN partial stats over valid pixels only (slack columns masked out).
        maskf = (_row_mod(HWp, Wp) < W).astype(jnp.float32)
        accm = acc * maskf
        part_ref[0, 0:1, :] = jnp.sum(accm, axis=0, keepdims=True)
        part_ref[0, 1:2, :] = jnp.sum(accm * accm, axis=0, keepdims=True)

    return kernel


# ---------------------------------------------------------------------------
# Kernel 2: fused BN1 + ReLU epilogue + conv3x3 + per-image BN2 partial sums.
# ---------------------------------------------------------------------------
def _make_conv2_kernel(Wp, HWp, W, base, f2):
    off0 = base - Wp - 1                                   # >= 0 by construction

    def kernel(y1_ref, scale_ref, shift_ref, w_ref, y_ref, part_ref):
        # y1_ref:      (1, F2, Chid) f32  raw conv1 slab from block 1
        # scale/shift: (1, Chid)     f32  fused BN1 affine (batch statistics)
        # w_ref:       (9, Chid, Cout) bf16
        # y_ref:       (1, HWp, Cout) f32 raw conv2 output (compact rows)
        # part_ref:    (1, 2, Cout)  f32
        # Valid-pixel mask for the slab (halo rows / slack columns -> False).
        s_i = jax.lax.broadcasted_iota(jnp.int32, (f2, 1), 0)
        u_i = s_i - base
        q = ((u_i.astype(jnp.float32) + 0.5) * (1.0 / Wp)).astype(jnp.int32)
        col = u_i - q * Wp
        valid = jnp.logical_and(jnp.logical_and(u_i >= 0, u_i < HWp), col < W)

        # Fused BN1 + ReLU.  Invalid positions are forced back to zero so the
        # 'same' zero padding is preserved (shift1 != 0 would otherwise leak
        # into the border).  Single cast to bf16 for the MXU.
        a = jnp.maximum(y1_ref[0] * scale_ref[...] + shift_ref[...], 0.0)
        act = jnp.where(valid, a, 0.0).astype(jnp.bfloat16)     # (F2, Chid)

        acc = jnp.dot(act, w_ref[0],
                      preferred_element_type=jnp.float32)[off0:off0 + HWp, :]
        for t in range(1, 9):
            dy, dx = _TAPS[t]
            off = off0 + dy * Wp + dx
            p = jnp.dot(act, w_ref[t], preferred_element_type=jnp.float32)
            acc = acc + p[off:off + HWp, :]
        y_ref[0] = acc

        maskf = (_row_mod(HWp, Wp) < W).astype(jnp.float32)
        accm = acc * maskf
        part_ref[0, 0:1, :] = jnp.sum(accm, axis=0, keepdims=True)
        part_ref[0, 1:2, :] = jnp.sum(accm * accm, axis=0, keepdims=True)

    return kernel


# ---------------------------------------------------------------------------
# Wrapper
# ---------------------------------------------------------------------------
def _bn_scale_shift(partials, gamma, beta, count):
    """Combine per-image [sum, sum_sq] partials into fused BN scale/shift."""
    tot = jnp.sum(partials, axis=0)                        # (2, C)
    mean = tot[0] / count
    var = jnp.maximum(tot[1] / count - mean * mean, 0.0)   # biased (PyTorch train)
    inv_std = jax.lax.rsqrt(var + EPS)
    scale = gamma.astype(jnp.float32) * inv_std
    shift = beta.astype(jnp.float32) - mean * scale
    return scale.reshape(1, -1), shift.reshape(1, -1)


def double_conv_forward(x_nchw, params):
    """Equivalent of DoubleConv.forward (training-mode BatchNorm), NCHW in/out."""
    w1, g1, b1, w2, g2, b2 = params
    N, Cin, H, W = x_nchw.shape
    Chid = w1.shape[-1]
    Cout = w2.shape[-1]

    Wp = W + 2                          # padded row width (1 left + 1 right)
    HWp = H * Wp                        # compact conv-output rows per image
    F1 = (H + 3) * Wp                   # input slab rows (1 top + 2 bottom pad)
    BASE = ((Wp + 1 + 7) // 8) * 8      # 8-aligned slab offset of pixel (0,0)
    F2 = BASE + HWp + Wp + 1            # inter-block slab rows (covers all taps)

    # NCHW -> NHWC -> spatially padded, row-flattened bf16 slab (built once).
    x = jnp.transpose(x_nchw, (0, 2, 3, 1)).astype(jnp.float32)
    x_slab = jnp.pad(x, ((0, 0), (1, 2), (1, 1), (0, 0))
                     ).reshape(N, F1, Cin).astype(jnp.bfloat16)

    # Weights: (3,3,Ci,Co) -> (9,Ci,Co) bf16, tap-major, prepared in the wrapper.
    w1k = w1.reshape(9, Cin, Chid).astype(jnp.bfloat16)
    w2k = w2.reshape(9, Chid, Cout).astype(jnp.bfloat16)

    count = float(N * H * W)

    # ---- Block 1: conv1 + per-image BN1 partial sums ------------------------
    y1_slab, part1 = pl.pallas_call(
        _make_conv1_kernel(Wp, HWp, W, BASE, F2),
        grid=(N,),
        in_specs=[
            pl.BlockSpec((1, F1, Cin), lambda n: (n, 0, 0)),
            pl.BlockSpec((9, Cin, Chid), lambda n: (0, 0, 0)),
        ],
        out_specs=[
            pl.BlockSpec((1, F2, Chid), lambda n: (n, 0, 0)),
            pl.BlockSpec((1, 2, Chid), lambda n: (n, 0, 0)),
        ],
        out_shape=(
            jax.ShapeDtypeStruct((N, F2, Chid), jnp.float32),
            jax.ShapeDtypeStruct((N, 2, Chid), jnp.float32),
        ),
        compiler_params=pltpu.CompilerParams(
            dimension_semantics=("parallel",)),
    )(x_slab, w1k)

    scale1, shift1 = _bn_scale_shift(part1, g1, b1, count)

    # ---- Block 2: fused BN1+ReLU + conv2 + per-image BN2 partial sums -------
    y2, part2 = pl.pallas_call(
        _make_conv2_kernel(Wp, HWp, W, BASE, F2),
        grid=(N,),
        in_specs=[
            pl.BlockSpec((1, F2, Chid), lambda n: (n, 0, 0)),
            pl.BlockSpec((1, Chid), lambda n: (0, 0)),
            pl.BlockSpec((1, Chid), lambda n: (0, 0)),
            pl.BlockSpec((9, Chid, Cout), lambda n: (0, 0, 0)),
        ],
        out_specs=[
            pl.BlockSpec((1, HWp, Cout), lambda n: (n, 0, 0)),
            pl.BlockSpec((1, 2, Cout), lambda n: (n, 0, 0)),
        ],
        out_shape=(
            jax.ShapeDtypeStruct((N, HWp, Cout), jnp.float32),
            jax.ShapeDtypeStruct((N, 2, Cout), jnp.float32),
        ),
        compiler_params=pltpu.CompilerParams(
            dimension_semantics=("parallel",)),
    )(y1_slab, scale1, shift1, w2k)

    scale2, shift2 = _bn_scale_shift(part2, g2, b2, count)

    # ---- Final BN2 + ReLU + de-slab: tiny, left to XLA (fuses elementwise) ---
    y2 = y2.reshape(N, H, Wp, Cout)[:, :, :W, :]
    out = jnp.maximum(y2 * scale2.reshape(1, 1, 1, -1)
                      + shift2.reshape(1, 1, 1, -1), 0.0)
    return jnp.transpose(out, (0, 3, 1, 2))                # NHWC -> NCHW


# ---------------------------------------------------------------------------
# Pure-JAX reference (same semantics) for the correctness check
# ---------------------------------------------------------------------------
def _ref_block(x_nhwc, w_hwio, gamma, beta):
    y = jax.lax.conv_general_dilated(
        x_nhwc, w_hwio, window_strides=(1, 1), padding="SAME",
        dimension_numbers=("NHWC", "HWIO", "NHWC"),
        precision=jax.lax.Precision.HIGHEST)
    mean = jnp.mean(y, axis=(0, 1, 2), keepdims=True)
    var = jnp.mean((y - mean) ** 2, axis=(0, 1, 2), keepdims=True)
    y = (y - mean) * jax.lax.rsqrt(var + EPS) * gamma.reshape(1, 1, 1, -1) \
        + beta.reshape(1, 1, 1, -1)
    return jnp.maximum(y, 0.0)


def double_conv_reference(x_nchw, params):
    w1, g1, b1, w2, g2, b2 = params
    x = jnp.transpose(x_nchw, (0, 2, 3, 1))
    y = _ref_block(_ref_block(x, w1, g1, b1), w2, g2, b2)
    return jnp.transpose(y, (0, 3, 1, 2))


# ---------------------------------------------------------------------------
if __name__ == "__main__":
    # DoubleConv(in_channels=4, out_channels=8)  (hidden_channels=None -> 8)
    N, Cin, Chid, Cout, H, W = 2, 4, 8, 8, 16, 16

    key = jax.random.PRNGKey(0)
    k_x, k_w1, k_g1, k_b1, k_w2, k_g2, k_b2 = jax.random.split(key, 7)

    x = jax.random.normal(k_x, (N, Cin, H, W), dtype=jnp.float32)

    # Conv weights in HWIO layout (3, 3, in, out); BN gamma/beta per channel.
    w1 = 0.1 * jax.random.normal(k_w1, (3, 3, Cin, Chid), dtype=jnp.float32)
    g1 = 1.0 + 0.1 * jax.random.normal(k_g1, (Chid,), dtype=jnp.float32)
    b1 = 0.1 * jax.random.normal(k_b1, (Chid,), dtype=jnp.float32)
    w2 = 0.1 * jax.random.normal(k_w2, (3, 3, Chid, Cout), dtype=jnp.float32)
    g2 = 1.0 + 0.1 * jax.random.normal(k_g2, (Cout,), dtype=jnp.float32)
    b2 = 0.1 * jax.random.normal(k_b2, (Cout,), dtype=jnp.float32)

    params = (w1, g1, b1, w2, g2, b2)

    fwd = jax.jit(double_conv_forward)
    out = jax.block_until_ready(fwd(x, params))
    ref = jax.block_until_ready(double_conv_reference(x, params))

    assert out.shape == (N, Cout, H, W), out.shape
    # bf16 MXU operands vs. an f32-HIGHEST reference -> ~1e-2-scale differences.
    np.testing.assert_allclose(np.asarray(out), np.asarray(ref),
                               rtol=3e-2, atol=3e-2)
    print("KERNEL_OK")
</pallas_src>

<mosaic_0001>
module attributes {stable_mosaic.version = 11 : i64} {
  func.func @kernel(%arg0: i32, %arg1: memref<1x342x4xbf16, #tpu.memory_space<vmem>>, %arg2: memref<9x4x8xbf16, #tpu.memory_space<vmem>>, %arg3: memref<1x331x8xf32, #tpu.memory_space<vmem>>, %arg4: memref<1x2x8xf32, #tpu.memory_space<vmem>>) attributes {dimension_semantics = [#tpu.dimension_semantics<parallel>], iteration_bounds = array<i64: 2>, scalar_prefetch = 0 : i64, scratch_operands = 0 : i64, tpu.core_type = #tpu.core_type<tc>, window_params = [{transform_indices = @transform_0, window_bounds = array<i64: 1, 342, 4>}, {pipeline_mode = #tpu.pipeline_mode<synchronous>, transform_indices = @transform_1, window_bounds = array<i64: 9, 4, 8>}, {transform_indices = @transform_2, window_bounds = array<i64: 1, 331, 8>}, {transform_indices = @transform_3, window_bounds = array<i64: 1, 2, 8>}]} {
    %c0 = arith.constant 0 : index
    %c0_0 = arith.constant 0 : index
    %c0_1 = arith.constant 0 : index
    %0 = vector.load %arg1[%c0, %c0_0, %c0_1] : memref<1x342x4xbf16, #tpu.memory_space<vmem>>, vector<1x342x4xbf16>
    %1 = vector.shape_cast %0 : vector<1x342x4xbf16> to vector<342x4xbf16>
    %c0_2 = arith.constant 0 : index
    %c0_3 = arith.constant 0 : index
    %c0_4 = arith.constant 0 : index
    %2 = vector.load %arg2[%c0_2, %c0_3, %c0_4] : memref<9x4x8xbf16, #tpu.memory_space<vmem>>, vector<1x4x8xbf16>
    %3 = vector.shape_cast %2 : vector<1x4x8xbf16> to vector<4x8xbf16>
    %cst = arith.constant dense<0.000000e+00> : vector<342x8xf32>
    %4 = tpu.matmul %1, %3, %cst {dimension_numbers = #tpu.dot_dimension_numbers<[1], [0], [0], [1], [0, 0, 1, 1], [], []>} : vector<342x4xbf16>, vector<4x8xbf16>, vector<342x8xf32> -> vector<342x8xf32>
    %5 = vector.extract_strided_slice %4 {offsets = [0, 0], sizes = [288, 8], strides = [1, 1]} : vector<342x8xf32> to vector<288x8xf32>
    %c1 = arith.constant 1 : index
    %c0_5 = arith.constant 0 : index
    %c0_6 = arith.constant 0 : index
    %6 = vector.load %arg2[%c1, %c0_5, %c0_6] : memref<9x4x8xbf16, #tpu.memory_space<vmem>>, vector<1x4x8xbf16>
    %7 = vector.shape_cast %6 : vector<1x4x8xbf16> to vector<4x8xbf16>
    %cst_7 = arith.constant dense<0.000000e+00> : vector<342x8xf32>
    %8 = tpu.matmul %1, %7, %cst_7 {dimension_numbers = #tpu.dot_dimension_numbers<[1], [0], [0], [1], [0, 0, 1, 1], [], []>} : vector<342x4xbf16>, vector<4x8xbf16>, vector<342x8xf32> -> vector<342x8xf32>
    %9 = vector.extract_strided_slice %8 {offsets = [1, 0], sizes = [288, 8], strides = [1, 1]} : vector<342x8xf32> to vector<288x8xf32>
    %10 = arith.addf %5, %9 : vector<288x8xf32>
    %c2 = arith.constant 2 : index
    %c0_8 = arith.constant 0 : index
    %c0_9 = arith.constant 0 : index
    %11 = vector.load %arg2[%c2, %c0_8, %c0_9] : memref<9x4x8xbf16, #tpu.memory_space<vmem>>, vector<1x4x8xbf16>
    %12 = vector.shape_cast %11 : vector<1x4x8xbf16> to vector<4x8xbf16>
    %cst_10 = arith.constant dense<0.000000e+00> : vector<342x8xf32>
    %13 = tpu.matmul %1, %12, %cst_10 {dimension_numbers = #tpu.dot_dimension_numbers<[1], [0], [0], [1], [0, 0, 1, 1], [], []>} : vector<342x4xbf16>, vector<4x8xbf16>, vector<342x8xf32> -> vector<342x8xf32>
    %14 = vector.extract_strided_slice %13 {offsets = [2, 0], sizes = [288, 8], strides = [1, 1]} : vector<342x8xf32> to vector<288x8xf32>
    %15 = arith.addf %10, %14 : vector<288x8xf32>
    %c3 = arith.constant 3 : index
    %c0_11 = arith.constant 0 : index
    %c0_12 = arith.constant 0 : index
    %16 = vector.load %arg2[%c3, %c0_11, %c0_12] : memref<9x4x8xbf16, #tpu.memory_space<vmem>>, vector<1x4x8xbf16>
    %17 = vector.shape_cast %16 : vector<1x4x8xbf16> to vector<4x8xbf16>
    %cst_13 = arith.constant dense<0.000000e+00> : vector<342x8xf32>
    %18 = tpu.matmul %1, %17, %cst_13 {dimension_numbers = #tpu.dot_dimension_numbers<[1], [0], [0], [1], [0, 0, 1, 1], [], []>} : vector<342x4xbf16>, vector<4x8xbf16>, vector<342x8xf32> -> vector<342x8xf32>
    %19 = vector.extract_strided_slice %18 {offsets = [18, 0], sizes = [288, 8], strides = [1, 1]} : vector<342x8xf32> to vector<288x8xf32>
    %20 = arith.addf %15, %19 : vector<288x8xf32>
    %c4 = arith.constant 4 : index
    %c0_14 = arith.constant 0 : index
    %c0_15 = arith.constant 0 : index
    %21 = vector.load %arg2[%c4, %c0_14, %c0_15] : memref<9x4x8xbf16, #tpu.memory_space<vmem>>, vector<1x4x8xbf16>
    %22 = vector.shape_cast %21 : vector<1x4x8xbf16> to vector<4x8xbf16>
    %cst_16 = arith.constant dense<0.000000e+00> : vector<342x8xf32>
    %23 = tpu.matmul %1, %22, %cst_16 {dimension_numbers = #tpu.dot_dimension_numbers<[1], [0], [0], [1], [0, 0, 1, 1], [], []>} : vector<342x4xbf16>, vector<4x8xbf16>, vector<342x8xf32> -> vector<342x8xf32>
    %24 = vector.extract_strided_slice %23 {offsets = [19, 0], sizes = [288, 8], strides = [1, 1]} : vector<342x8xf32> to vector<288x8xf32>
    %25 = arith.addf %20, %24 : vector<288x8xf32>
    %c5 = arith.constant 5 : index
    %c0_17 = arith.constant 0 : index
    %c0_18 = arith.constant 0 : index
    %26 = vector.load %arg2[%c5, %c0_17, %c0_18] : memref<9x4x8xbf16, #tpu.memory_space<vmem>>, vector<1x4x8xbf16>
    %27 = vector.shape_cast %26 : vector<1x4x8xbf16> to vector<4x8xbf16>
    %cst_19 = arith.constant dense<0.000000e+00> : vector<342x8xf32>
    %28 = tpu.matmul %1, %27, %cst_19 {dimension_numbers = #tpu.dot_dimension_numbers<[1], [0], [0], [1], [0, 0, 1, 1], [], []>} : vector<342x4xbf16>, vector<4x8xbf16>, vector<342x8xf32> -> vector<342x8xf32>
    %29 = vector.extract_strided_slice %28 {offsets = [20, 0], sizes = [288, 8], strides = [1, 1]} : vector<342x8xf32> to vector<288x8xf32>
    %30 = arith.addf %25, %29 : vector<288x8xf32>
    %c6 = arith.constant 6 : index
    %c0_20 = arith.constant 0 : index
    %c0_21 = arith.constant 0 : index
    %31 = vector.load %arg2[%c6, %c0_20, %c0_21] : memref<9x4x8xbf16, #tpu.memory_space<vmem>>, vector<1x4x8xbf16>
    %32 = vector.shape_cast %31 : vector<1x4x8xbf16> to vector<4x8xbf16>
    %cst_22 = arith.constant dense<0.000000e+00> : vector<342x8xf32>
    %33 = tpu.matmul %1, %32, %cst_22 {dimension_numbers = #tpu.dot_dimension_numbers<[1], [0], [0], [1], [0, 0, 1, 1], [], []>} : vector<342x4xbf16>, vector<4x8xbf16>, vector<342x8xf32> -> vector<342x8xf32>
    %34 = vector.extract_strided_slice %33 {offsets = [36, 0], sizes = [288, 8], strides = [1, 1]} : vector<342x8xf32> to vector<288x8xf32>
    %35 = arith.addf %30, %34 : vector<288x8xf32>
    %c7 = arith.constant 7 : index
    %c0_23 = arith.constant 0 : index
    %c0_24 = arith.constant 0 : index
    %36 = vector.load %arg2[%c7, %c0_23, %c0_24] : memref<9x4x8xbf16, #tpu.memory_space<vmem>>, vector<1x4x8xbf16>
    %37 = vector.shape_cast %36 : vector<1x4x8xbf16> to vector<4x8xbf16>
    %cst_25 = arith.constant dense<0.000000e+00> : vector<342x8xf32>
    %38 = tpu.matmul %1, %37, %cst_25 {dimension_numbers = #tpu.dot_dimension_numbers<[1], [0], [0], [1], [0, 0, 1, 1], [], []>} : vector<342x4xbf16>, vector<4x8xbf16>, vector<342x8xf32> -> vector<342x8xf32>
    %39 = vector.extract_strided_slice %38 {offsets = [37, 0], sizes = [288, 8], strides = [1, 1]} : vector<342x8xf32> to vector<288x8xf32>
    %40 = arith.addf %35, %39 : vector<288x8xf32>
    %c8 = arith.constant 8 : index
    %c0_26 = arith.constant 0 : index
    %c0_27 = arith.constant 0 : index
    %41 = vector.load %arg2[%c8, %c0_26, %c0_27] : memref<9x4x8xbf16, #tpu.memory_space<vmem>>, vector<1x4x8xbf16>
    %42 = vector.shape_cast %41 : vector<1x4x8xbf16> to vector<4x8xbf16>
    %cst_28 = arith.constant dense<0.000000e+00> : vector<342x8xf32>
    %43 = tpu.matmul %1, %42, %cst_28 {dimension_numbers = #tpu.dot_dimension_numbers<[1], [0], [0], [1], [0, 0, 1, 1], [], []>} : vector<342x4xbf16>, vector<4x8xbf16>, vector<342x8xf32> -> vector<342x8xf32>
    %44 = vector.extract_strided_slice %43 {offsets = [38, 0], sizes = [288, 8], strides = [1, 1]} : vector<342x8xf32> to vector<288x8xf32>
    %45 = arith.addf %40, %44 : vector<288x8xf32>
    %cst_29 = arith.constant 0.000000e+00 : f32
    %46 = vector.broadcast %cst_29 : f32 to vector<24x8xf32>
    %c0_30 = arith.constant 0 : index
    %c0_31 = arith.constant 0 : index
    %c0_32 = arith.constant 0 : index
    %47 = vector.load %arg3[%c0_30, %c0_31, %c0_32] : memref<1x331x8xf32, #tpu.memory_space<vmem>>, vector<1x24x8xf32>
    %48 = vector.shape_cast %47 : vector<1x24x8xf32> to vector<24x8xf32>
    %49 = vector.shape_cast %46 : vector<24x8xf32> to vector<1x24x8xf32>
    tpu.vector_store %arg3[%c0_30, %c0_31, %c0_32], %49 {strides = array<i32>} : memref<1x331x8xf32, #tpu.memory_space<vmem>>, vector<1x24x8xf32>,
    %c0_33 = arith.constant 0 : index
    %c24 = arith.constant 24 : index
    %c0_34 = arith.constant 0 : index
    %50 = vector.load %arg3[%c0_33, %c24, %c0_34] : memref<1x331x8xf32, #tpu.memory_space<vmem>>, vector<1x288x8xf32>
    %51 = vector.shape_cast %50 : vector<1x288x8xf32> to vector<288x8xf32>
    %52 = vector.shape_cast %45 : vector<288x8xf32> to vector<1x288x8xf32>
    tpu.vector_store %arg3[%c0_33, %c24, %c0_34], %52 {strides = array<i32>} : memref<1x331x8xf32, #tpu.memory_space<vmem>>, vector<1x288x8xf32>,
    %cst_35 = arith.constant 0.000000e+00 : f32
    %53 = vector.broadcast %cst_35 : f32 to vector<19x8xf32>
    %c0_36 = arith.constant 0 : index
    %c312 = arith.constant 312 : index
    %c0_37 = arith.constant 0 : index
    %54 = vector.load %arg3[%c0_36, %c312, %c0_37] : memref<1x331x8xf32, #tpu.memory_space<vmem>>, vector<1x19x8xf32>
    %55 = vector.shape_cast %54 : vector<1x19x8xf32> to vector<19x8xf32>
    %56 = vector.shape_cast %53 : vector<19x8xf32> to vector<1x19x8xf32>
    tpu.vector_store %arg3[%c0_36, %c312, %c0_37], %56 {strides = array<i32>} : memref<1x331x8xf32, #tpu.memory_space<vmem>>, vector<1x19x8xf32>,
    %57 = tpu.iota {dimensions = array<i32: 0>} : vector<288x1xi32>
    %58 = arith.sitofp %57 : vector<288x1xi32> to vector<288x1xf32>
    %cst_38 = arith.constant 5.000000e-01 : f32
    %59 = vector.broadcast %cst_38 : f32 to vector<288x1xf32>
    %60 = arith.addf %58, %59 : vector<288x1xf32>
    %cst_39 = arith.constant 0.055555556 : f32
    %61 = vector.broadcast %cst_39 : f32 to vector<288x1xf32>
    %62 = arith.mulf %60, %61 : vector<288x1xf32>
    %63 = arith.fptosi %62 : vector<288x1xf32> to vector<288x1xi32>
    %c18_i32 = arith.constant 18 : i32
    %64 = vector.broadcast %c18_i32 : i32 to vector<288x1xi32>
    %65 = arith.muli %63, %64 : vector<288x1xi32>
    %66 = arith.subi %57, %65 : vector<288x1xi32>
    %c16_i32 = arith.constant 16 : i32
    %67 = vector.broadcast %c16_i32 : i32 to vector<288x1xi32>
    %68 = arith.cmpi slt, %66, %67 : vector<288x1xi32>
    %69 = arith.extui %68 : vector<288x1xi1> to vector<288x1xi32>
    %70 = arith.sitofp %69 : vector<288x1xi32> to vector<288x1xf32>
    %71 = vector.broadcast %70 : vector<288x1xf32> to vector<288x8xf32>
    %72 = arith.mulf %45, %71 : vector<288x8xf32>
    %cst_40 = arith.constant dense<0.000000e+00> : vector<8xf32>
    %73 = vector.multi_reduction <add>, %72, %cst_40 [0] : vector<288x8xf32> to vector<8xf32>
    %74 = vector.shape_cast %73 : vector<8xf32> to vector<1x8xf32>
    %c0_41 = arith.constant 0 : index
    %c0_42 = arith.constant 0 : index
    %c0_43 = arith.constant 0 : index
    %75 = vector.load %arg4[%c0_41, %c0_42, %c0_43] : memref<1x2x8xf32, #tpu.memory_space<vmem>>, vector<1x1x8xf32>
    %76 = vector.shape_cast %75 : vector<1x1x8xf32> to vector<1x8xf32>
    %77 = vector.shape_cast %74 : vector<1x8xf32> to vector<1x1x8xf32>
    tpu.vector_store %arg4[%c0_41, %c0_42, %c0_43], %77 {strides = array<i32>} : memref<1x2x8xf32, #tpu.memory_space<vmem>>, vector<1x1x8xf32>,
    %78 = arith.mulf %72, %72 : vector<288x8xf32>
    %cst_44 = arith.constant dense<0.000000e+00> : vector<8xf32>
    %79 = vector.multi_reduction <add>, %78, %cst_44 [0] : vector<288x8xf32> to vector<8xf32>
    %80 = vector.shape_cast %79 : vector<8xf32> to vector<1x8xf32>
    %c0_45 = arith.constant 0 : index
    %c1_46 = arith.constant 1 : index
    %c0_47 = arith.constant 0 : index
    %81 = vector.load %arg4[%c0_45, %c1_46, %c0_47] : memref<1x2x8xf32, #tpu.memory_space<vmem>>, vector<1x1x8xf32>
    %82 = vector.shape_cast %81 : vector<1x1x8xf32> to vector<1x8xf32>
    %83 = vector.shape_cast %80 : vector<1x8xf32> to vector<1x1x8xf32>
    tpu.vector_store %arg4[%c0_45, %c1_46, %c0_47], %83 {strides = array<i32>} : memref<1x2x8xf32, #tpu.memory_space<vmem>>, vector<1x1x8xf32>,
    return
  }
  func.func @transform_0(%arg0: i32) -> (i32, i32, i32) {
    %c0_i32 = arith.constant 0 : i32
    %c0_i32_0 = arith.constant 0 : i32
    %c0_i32_1 = arith.constant 0 : i32
    return %arg0, %c0_i32, %c0_i32_0 : i32, i32, i32
  }
  func.func @transform_1(%arg0: i32) -> (i32, i32, i32) {
    %c0_i32 = arith.constant 0 : i32
    %c0_i32_0 = arith.constant 0 : i32
    %c0_i32_1 = arith.constant 0 : i32
    %c0_i32_2 = arith.constant 0 : i32
    return %c0_i32, %c0_i32_0, %c0_i32_1 : i32, i32, i32
  }
  func.func @transform_2(%arg0: i32) -> (i32, i32, i32) {
    %c0_i32 = arith.constant 0 : i32
    %c0_i32_0 = arith.constant 0 : i32
    %c0_i32_1 = arith.constant 0 : i32
    return %arg0, %c0_i32, %c0_i32_0 : i32, i32, i32
  }
  func.func @transform_3(%arg0: i32) -> (i32, i32, i32) {
    %c0_i32 = arith.constant 0 : i32
    %c0_i32_0 = arith.constant 0 : i32
    %c0_i32_1 = arith.constant 0 : i32
    return %arg0, %c0_i32, %c0_i32_0 : i32, i32, i32
  }
}

module attributes {stable_mosaic.version = 11 : i64} {
  func.func @kernel(%arg0: i32, %arg1: memref<1x331x8xf32, #tpu.memory_space<vmem>>, %arg2: memref<1x8xf32, #tpu.memory_space<vmem>>, %arg3: memref<1x8xf32, #tpu.memory_space<vmem>>, %arg4: memref<9x8x8xbf16, #tpu.memory_space<vmem>>, %arg5: memref<1x288x8xf32, #tpu.memory_space<vmem>>, %arg6: memref<1x2x8xf32, #tpu.memory_space<vmem>>) attributes {dimension_semantics = [#tpu.dimension_semantics<parallel>], iteration_bounds = array<i64: 2>, scalar_prefetch = 0 : i64, scratch_operands = 0 : i64, tpu.core_type = #tpu.core_type<tc>, window_params = [{transform_indices = @transform_0, window_bounds = array<i64: 1, 331, 8>}, {pipeline_mode = #tpu.pipeline_mode<synchronous>, transform_indices = @transform_1, window_bounds = array<i64: 1, 8>}, {pipeline_mode = #tpu.pipeline_mode<synchronous>, transform_indices = @transform_2, window_bounds = array<i64: 1, 8>}, {pipeline_mode = #tpu.pipeline_mode<synchronous>, transform_indices = @transform_3, window_bounds = array<i64: 9, 8, 8>}, {transform_indices = @transform_4, window_bounds = array<i64: 1, 288, 8>}, {transform_indices = @transform_5, window_bounds = array<i64: 1, 2, 8>}]} {
    %0 = tpu.iota {dimensions = array<i32: 0>} : vector<331x1xi32>
    %c24_i32 = arith.constant 24 : i32
    %1 = vector.broadcast %c24_i32 : i32 to vector<331x1xi32>
    %2 = arith.subi %0, %1 : vector<331x1xi32>
    %3 = arith.sitofp %2 : vector<331x1xi32> to vector<331x1xf32>
    %cst = arith.constant 5.000000e-01 : f32
    %4 = vector.broadcast %cst : f32 to vector<331x1xf32>
    %5 = arith.addf %3, %4 : vector<331x1xf32>
    %cst_0 = arith.constant 0.055555556 : f32
    %6 = vector.broadcast %cst_0 : f32 to vector<331x1xf32>
    %7 = arith.mulf %5, %6 : vector<331x1xf32>
    %8 = arith.fptosi %7 : vector<331x1xf32> to vector<331x1xi32>
    %c18_i32 = arith.constant 18 : i32
    %9 = vector.broadcast %c18_i32 : i32 to vector<331x1xi32>
    %10 = arith.muli %8, %9 : vector<331x1xi32>
    %11 = arith.subi %2, %10 : vector<331x1xi32>
    %c0_i32 = arith.constant 0 : i32
    %12 = vector.broadcast %c0_i32 : i32 to vector<331x1xi32>
    %13 = arith.cmpi sge, %2, %12 : vector<331x1xi32>
    %c288_i32 = arith.constant 288 : i32
    %14 = vector.broadcast %c288_i32 : i32 to vector<331x1xi32>
    %15 = arith.cmpi slt, %2, %14 : vector<331x1xi32>
    %16 = arith.andi %13, %15 : vector<331x1xi1>
    %c16_i32 = arith.constant 16 : i32
    %17 = vector.broadcast %c16_i32 : i32 to vector<331x1xi32>
    %18 = arith.cmpi slt, %11, %17 : vector<331x1xi32>
    %19 = arith.andi %16, %18 : vector<331x1xi1>
    %c0 = arith.constant 0 : index
    %c0_1 = arith.constant 0 : index
    %c0_2 = arith.constant 0 : index
    %20 = vector.load %arg1[%c0, %c0_1, %c0_2] : memref<1x331x8xf32, #tpu.memory_space<vmem>>, vector<1x331x8xf32>
    %21 = vector.shape_cast %20 : vector<1x331x8xf32> to vector<331x8xf32>
    %c0_3 = arith.constant 0 : index
    %c0_4 = arith.constant 0 : index
    %22 = vector.load %arg2[%c0_3, %c0_4] : memref<1x8xf32, #tpu.memory_space<vmem>>, vector<1x8xf32>
    %23 = vector.broadcast %22 : vector<1x8xf32> to vector<331x8xf32>
    %24 = arith.mulf %21, %23 : vector<331x8xf32>
    %c0_5 = arith.constant 0 : index
    %c0_6 = arith.constant 0 : index
    %25 = vector.load %arg3[%c0_5, %c0_6] : memref<1x8xf32, #tpu.memory_space<vmem>>, vector<1x8xf32>
    %26 = vector.broadcast %25 : vector<1x8xf32> to vector<331x8xf32>
    %27 = arith.addf %24, %26 : vector<331x8xf32>
    %cst_7 = arith.constant 0.000000e+00 : f32
    %28 = vector.broadcast %cst_7 : f32 to vector<331x8xf32>
    %29 = arith.maximumf %27, %28 : vector<331x8xf32>
    %cst_8 = arith.constant 0.000000e+00 : f32
    %30 = vector.shape_cast %19 : vector<331x1xi1> to vector<331x1xi1>
    %31 = vector.broadcast %30 : vector<331x1xi1> to vector<331x8xi1>
    %32 = vector.broadcast %cst_8 : f32 to vector<331x8xf32>
    %33 = arith.select %31, %29, %32 : vector<331x8xi1>, vector<331x8xf32>
    %34 = arith.truncf %33 : vector<331x8xf32> to vector<331x8xbf16>
    %c0_9 = arith.constant 0 : index
    %c0_10 = arith.constant 0 : index
    %c0_11 = arith.constant 0 : index
    %35 = vector.load %arg4[%c0_9, %c0_10, %c0_11] : memref<9x8x8xbf16, #tpu.memory_space<vmem>>, vector<1x8x8xbf16>
    %36 = vector.shape_cast %35 : vector<1x8x8xbf16> to vector<8x8xbf16>
    %cst_12 = arith.constant dense<0.000000e+00> : vector<331x8xf32>
    %37 = tpu.matmul %34, %36, %cst_12 {dimension_numbers = #tpu.dot_dimension_numbers<[1], [0], [0], [1], [0, 0, 1, 1], [], []>} : vector<331x8xbf16>, vector<8x8xbf16>, vector<331x8xf32> -> vector<331x8xf32>
    %38 = vector.extract_strided_slice %37 {offsets = [5, 0], sizes = [288, 8], strides = [1, 1]} : vector<331x8xf32> to vector<288x8xf32>
    %c1 = arith.constant 1 : index
    %c0_13 = arith.constant 0 : index
    %c0_14 = arith.constant 0 : index
    %39 = vector.load %arg4[%c1, %c0_13, %c0_14] : memref<9x8x8xbf16, #tpu.memory_space<vmem>>, vector<1x8x8xbf16>
    %40 = vector.shape_cast %39 : vector<1x8x8xbf16> to vector<8x8xbf16>
    %cst_15 = arith.constant dense<0.000000e+00> : vector<331x8xf32>
    %41 = tpu.matmul %34, %40, %cst_15 {dimension_numbers = #tpu.dot_dimension_numbers<[1], [0], [0], [1], [0, 0, 1, 1], [], []>} : vector<331x8xbf16>, vector<8x8xbf16>, vector<331x8xf32> -> vector<331x8xf32>
    %42 = vector.extract_strided_slice %41 {offsets = [6, 0], sizes = [288, 8], strides = [1, 1]} : vector<331x8xf32> to vector<288x8xf32>
    %43 = arith.addf %38, %42 : vector<288x8xf32>
    %c2 = arith.constant 2 : index
    %c0_16 = arith.constant 0 : index
    %c0_17 = arith.constant 0 : index
    %44 = vector.load %arg4[%c2, %c0_16, %c0_17] : memref<9x8x8xbf16, #tpu.memory_space<vmem>>, vector<1x8x8xbf16>
    %45 = vector.shape_cast %44 : vector<1x8x8xbf16> to vector<8x8xbf16>
    %cst_18 = arith.constant dense<0.000000e+00> : vector<331x8xf32>
    %46 = tpu.matmul %34, %45, %cst_18 {dimension_numbers = #tpu.dot_dimension_numbers<[1], [0], [0], [1], [0, 0, 1, 1], [], []>} : vector<331x8xbf16>, vector<8x8xbf16>, vector<331x8xf32> -> vector<331x8xf32>
    %47 = vector.extract_strided_slice %46 {offsets = [7, 0], sizes = [288, 8], strides = [1, 1]} : vector<331x8xf32> to vector<288x8xf32>
    %48 = arith.addf %43, %47 : vector<288x8xf32>
    %c3 = arith.constant 3 : index
    %c0_19 = arith.constant 0 : index
    %c0_20 = arith.constant 0 : index
    %49 = vector.load %arg4[%c3, %c0_19, %c0_20] : memref<9x8x8xbf16, #tpu.memory_space<vmem>>, vector<1x8x8xbf16>
    %50 = vector.shape_cast %49 : vector<1x8x8xbf16> to vector<8x8xbf16>
    %cst_21 = arith.constant dense<0.000000e+00> : vector<331x8xf32>
    %51 = tpu.matmul %34, %50, %cst_21 {dimension_numbers = #tpu.dot_dimension_numbers<[1], [0], [0], [1], [0, 0, 1, 1], [], []>} : vector<331x8xbf16>, vector<8x8xbf16>, vector<331x8xf32> -> vector<331x8xf32>
    %52 = vector.extract_strided_slice %51 {offsets = [23, 0], sizes = [288, 8], strides = [1, 1]} : vector<331x8xf32> to vector<288x8xf32>
    %53 = arith.addf %48, %52 : vector<288x8xf32>
    %c4 = arith.constant 4 : index
    %c0_22 = arith.constant 0 : index
    %c0_23 = arith.constant 0 : index
    %54 = vector.load %arg4[%c4, %c0_22, %c0_23] : memref<9x8x8xbf16, #tpu.memory_space<vmem>>, vector<1x8x8xbf16>
    %55 = vector.shape_cast %54 : vector<1x8x8xbf16> to vector<8x8xbf16>
    %cst_24 = arith.constant dense<0.000000e+00> : vector<331x8xf32>
    %56 = tpu.matmul %34, %55, %cst_24 {dimension_numbers = #tpu.dot_dimension_numbers<[1], [0], [0], [1], [0, 0, 1, 1], [], []>} : vector<331x8xbf16>, vector<8x8xbf16>, vector<331x8xf32> -> vector<331x8xf32>
    %57 = vector.extract_strided_slice %56 {offsets = [24, 0], sizes = [288, 8], strides = [1, 1]} : vector<331x8xf32> to vector<288x8xf32>
    %58 = arith.addf %53, %57 : vector<288x8xf32>
    %c5 = arith.constant 5 : index
    %c0_25 = arith.constant 0 : index
    %c0_26 = arith.constant 0 : index
    %59 = vector.load %arg4[%c5, %c0_25, %c0_26] : memref<9x8x8xbf16, #tpu.memory_space<vmem>>, vector<1x8x8xbf16>
    %60 = vector.shape_cast %59 : vector<1x8x8xbf16> to vector<8x8xbf16>
    %cst_27 = arith.constant dense<0.000000e+00> : vector<331x8xf32>
    %61 = tpu.matmul %34, %60, %cst_27 {dimension_numbers = #tpu.dot_dimension_numbers<[1], [0], [0], [1], [0, 0, 1, 1], [], []>} : vector<331x8xbf16>, vector<8x8xbf16>, vector<331x8xf32> -> vector<331x8xf32>
    %62 = vector.extract_strided_slice %61 {offsets = [25, 0], sizes = [288, 8], strides = [1, 1]} : vector<331x8xf32> to vector<288x8xf32>
    %63 = arith.addf %58, %62 : vector<288x8xf32>
    %c6 = arith.constant 6 : index
    %c0_28 = arith.constant 0 : index
    %c0_29 = arith.constant 0 : index
    %64 = vector.load %arg4[%c6, %c0_28, %c0_29] : memref<9x8x8xbf16, #tpu.memory_space<vmem>>, vector<1x8x8xbf16>
    %65 = vector.shape_cast %64 : vector<1x8x8xbf16> to vector<8x8xbf16>
    %cst_30 = arith.constant dense<0.000000e+00> : vector<331x8xf32>
    %66 = tpu.matmul %34, %65, %cst_30 {dimension_numbers = #tpu.dot_dimension_numbers<[1], [0], [0], [1], [0, 0, 1, 1], [], []>} : vector<331x8xbf16>, vector<8x8xbf16>, vector<331x8xf32> -> vector<331x8xf32>
    %67 = vector.extract_strided_slice %66 {offsets = [41, 0], sizes = [288, 8], strides = [1, 1]} : vector<331x8xf32> to vector<288x8xf32>
    %68 = arith.addf %63, %67 : vector<288x8xf32>
    %c7 = arith.constant 7 : index
    %c0_31 = arith.constant 0 : index
    %c0_32 = arith.constant 0 : index
    %69 = vector.load %arg4[%c7, %c0_31, %c0_32] : memref<9x8x8xbf16, #tpu.memory_space<vmem>>, vector<1x8x8xbf16>
    %70 = vector.shape_cast %69 : vector<1x8x8xbf16> to vector<8x8xbf16>
    %cst_33 = arith.constant dense<0.000000e+00> : vector<331x8xf32>
    %71 = tpu.matmul %34, %70, %cst_33 {dimension_numbers = #tpu.dot_dimension_numbers<[1], [0], [0], [1], [0, 0, 1, 1], [], []>} : vector<331x8xbf16>, vector<8x8xbf16>, vector<331x8xf32> -> vector<331x8xf32>
    %72 = vector.extract_strided_slice %71 {offsets = [42, 0], sizes = [288, 8], strides = [1, 1]} : vector<331x8xf32> to vector<288x8xf32>
    %73 = arith.addf %68, %72 : vector<288x8xf32>
    %c8 = arith.constant 8 : index
    %c0_34 = arith.constant 0 : index
    %c0_35 = arith.constant 0 : index
    %74 = vector.load %arg4[%c8, %c0_34, %c0_35] : memref<9x8x8xbf16, #tpu.memory_space<vmem>>, vector<1x8x8xbf16>
    %75 = vector.shape_cast %74 : vector<1x8x8xbf16> to vector<8x8xbf16>
    %cst_36 = arith.constant dense<0.000000e+00> : vector<331x8xf32>
    %76 = tpu.matmul %34, %75, %cst_36 {dimension_numbers = #tpu.dot_dimension_numbers<[1], [0], [0], [1], [0, 0, 1, 1], [], []>} : vector<331x8xbf16>, vector<8x8xbf16>, vector<331x8xf32> -> vector<331x8xf32>
    %77 = vector.extract_strided_slice %76 {offsets = [43, 0], sizes = [288, 8], strides = [1, 1]} : vector<331x8xf32> to vector<288x8xf32>
    %78 = arith.addf %73, %77 : vector<288x8xf32>
    %c0_37 = arith.constant 0 : index
    %c0_38 = arith.constant 0 : index
    %c0_39 = arith.constant 0 : index
    %79 = vector.load %arg5[%c0_37, %c0_38, %c0_39] : memref<1x288x8xf32, #tpu.memory_space<vmem>>, vector<1x288x8xf32>
    %80 = vector.shape_cast %79 : vector<1x288x8xf32> to vector<288x8xf32>
    %81 = vector.shape_cast %78 : vector<288x8xf32> to vector<1x288x8xf32>
    tpu.vector_store %arg5[%c0_37, %c0_38, %c0_39], %81 {strides = array<i32>} : memref<1x288x8xf32, #tpu.memory_space<vmem>>, vector<1x288x8xf32>,
    %82 = tpu.iota {dimensions = array<i32: 0>} : vector<288x1xi32>
    %83 = arith.sitofp %82 : vector<288x1xi32> to vector<288x1xf32>
    %cst_40 = arith.constant 5.000000e-01 : f32
    %84 = vector.broadcast %cst_40 : f32 to vector<288x1xf32>
    %85 = arith.addf %83, %84 : vector<288x1xf32>
    %cst_41 = arith.constant 0.055555556 : f32
    %86 = vector.broadcast %cst_41 : f32 to vector<288x1xf32>
    %87 = arith.mulf %85, %86 : vector<288x1xf32>
    %88 = arith.fptosi %87 : vector<288x1xf32> to vector<288x1xi32>
    %c18_i32_42 = arith.constant 18 : i32
    %89 = vector.broadcast %c18_i32_42 : i32 to vector<288x1xi32>
    %90 = arith.muli %88, %89 : vector<288x1xi32>
    %91 = arith.subi %82, %90 : vector<288x1xi32>
    %c16_i32_43 = arith.constant 16 : i32
    %92 = vector.broadcast %c16_i32_43 : i32 to vector<288x1xi32>
    %93 = arith.cmpi slt, %91, %92 : vector<288x1xi32>
    %94 = arith.extui %93 : vector<288x1xi1> to vector<288x1xi32>
    %95 = arith.sitofp %94 : vector<288x1xi32> to vector<288x1xf32>
    %96 = vector.broadcast %95 : vector<288x1xf32> to vector<288x8xf32>
    %97 = arith.mulf %78, %96 : vector<288x8xf32>
    %cst_44 = arith.constant dense<0.000000e+00> : vector<8xf32>
    %98 = vector.multi_reduction <add>, %97, %cst_44 [0] : vector<288x8xf32> to vector<8xf32>
    %99 = vector.shape_cast %98 : vector<8xf32> to vector<1x8xf32>
    %c0_45 = arith.constant 0 : index
    %c0_46 = arith.constant 0 : index
    %c0_47 = arith.constant 0 : index
    %100 = vector.load %arg6[%c0_45, %c0_46, %c0_47] : memref<1x2x8xf32, #tpu.memory_space<vmem>>, vector<1x1x8xf32>
    %101 = vector.shape_cast %100 : vector<1x1x8xf32> to vector<1x8xf32>
    %102 = vector.shape_cast %99 : vector<1x8xf32> to vector<1x1x8xf32>
    tpu.vector_store %arg6[%c0_45, %c0_46, %c0_47], %102 {strides = array<i32>} : memref<1x2x8xf32, #tpu.memory_space<vmem>>, vector<1x1x8xf32>,
    %103 = arith.mulf %97, %97 : vector<288x8xf32>
    %cst_48 = arith.constant dense<0.000000e+00> : vector<8xf32>
    %104 = vector.multi_reduction <add>, %103, %cst_48 [0] : vector<288x8xf32> to vector<8xf32>
    %105 = vector.shape_cast %104 : vector<8xf32> to vector<1x8xf32>
    %c0_49 = arith.constant 0 : index
    %c1_50 = arith.constant 1 : index
    %c0_51 = arith.constant 0 : index
    %106 = vector.load %arg6[%c0_49, %c1_50, %c0_51] : memref<1x2x8xf32, #tpu.memory_space<vmem>>, vector<1x1x8xf32>
    %107 = vector.shape_cast %106 : vector<1x1x8xf32> to vector<1x8xf32>
    %108 = vector.shape_cast %105 : vector<1x8xf32> to vector<1x1x8xf32>
    tpu.vector_store %arg6[%c0_49, %c1_50, %c0_51], %108 {strides = array<i32>} : memref<1x2x8xf32, #tpu.memory_space<vmem>>, vector<1x1x8xf32>,
    return
  }
  func.func @transform_0(%arg0: i32) -> (i32, i32, i32) {
    %c0_i32 = arith.constant 0 : i32
    %c0_i32_0 = arith.constant 0 : i32
    %c0_i32_1 = arith.constant 0 : i32
    return %arg0, %c0_i32, %c0_i32_0 : i32, i32, i32
  }
  func.func @transform_1(%arg0: i32) -> (i32, i32) {
    %c0_i32 = arith.constant 0 : i32
    %c0_i32_0 = arith.constant 0 : i32
    %c0_i32_1 = arith.constant 0 : i32
    return %c0_i32, %c0_i32_0 : i32, i32
  }
  func.func @transform_2(%arg0: i32) -> (i32, i32) {
    %c0_i32 = arith.constant 0 : i32
    %c0_i32_0 = arith.constant 0 : i32
    %c0_i32_1 = arith.constant 0 : i32
    return %c0_i32, %c0_i32_0 : i32, i32
  }
  func.func @transform_3(%arg0: i32) -> (i32, i32, i32) {
    %c0_i32 = arith.constant 0 : i32
    %c0_i32_0 = arith.constant 0 : i32
    %c0_i32_1 = arith.constant 0 : i32
    %c0_i32_2 = arith.constant 0 : i32
    return %c0_i32, %c0_i32_0, %c0_i32_1 : i32, i32, i32
  }
  func.func @transform_4(%arg0: i32) -> (i32, i32, i32) {
    %c0_i32 = arith.constant 0 : i32
    %c0_i32_0 = arith.constant 0 : i32
    %c0_i32_1 = arith.constant 0 : i32
    return %arg0, %c0_i32, %c0_i32_0 : i32, i32, i32
  }
  func.func @transform_5(%arg0: i32) -> (i32, i32, i32) {
    %c0_i32 = arith.constant 0 : i32
    %c0_i32_0 = arith.constant 0 : i32
    %c0_i32_1 = arith.constant 0 : i32
    return %arg0, %c0_i32, %c0_i32_0 : i32, i32, i32
  }
}

</mosaic_0001>

<bundles_post_ra>
// kernel: double_conv_forward.2
= control target key start
LH: loop header
LB: loop body
LE: loop exit
PB: predicated region body
PF: predicated region fallthrough
CT: control target
= control target key end

     0   :  { %s5507_s12 = smov 0   ;;  %s7550_s0 = inlined_call_operand.vmem [shape: bf16[2,342,4], index: 0, kind: input, shape index: {}]   ;;  %s7551_s1 = inlined_call_operand.vmem [shape: bf16[9,4,8], index: 1, kind: input, shape index: {}]   ;;  %s7552_s2 = inlined_call_operand.vmem [shape: f32[2,331,8], index: 2, kind: output, shape index: {0}]   ;;  %s7553_s3 = inlined_call_operand.vmem [shape: f32[2,2,8], index: 3, kind: output, shape index: {1}]  }
   0x1 LB: > { %s4444_s13 = sadd.s32 4294967295, %s5484_s12   ;;  %p4448_p0 = scmp.ge.s32.totalorder %s5484_s12, 1  ;;  %s5484_s12 = sphi %s5507_s12, %s14_s12  }
   0x2   : > { %p140_p1 = scmp.lt.s32.totalorder %s5484_s12, 3 }
   0x4   : > { %p141_p2 = pnand %p4448_p0, %p140_p1 }
   0x6   : > { %144 = sbr.rel (%p141_p2) target bundleno = 694 (0x2b6), region = 28 }
   0xb   : > { %v226_v0 = vld [vmem:[%s7551_s1] sm:$0x3]  ;;  %vm402_vm0 = vcmask 1041408   ;;  %p168_p3 = scmp.lt.s32.totalorder %s4444_s13, 1  ;;  %v4519_v2 = vld [vmem:[%s7551_s1 + $0x4] sm:$0x3] }
   0xc   : > { %5341 = vmatprep.subr.msk.bf16.mxu0 %vm402_vm0, %v226_v0  ;;  %5342 = vmatprep.subr.msk.bf16.mxu1 %vm402_vm0, %v226_v0  ;;  %v404_v1 = vsel %vm402_vm0, %v226_v0, 0  ;;  %v4496_v3 = vld [vmem:[%s7551_s1 + $0x2] sm:$0x3]  ;;  %vm335_vm1 = vcmask 31744   ;;  %v1000_v7 = vsel %vm402_vm0, %v4519_v2, 0  ;;  %vm851_vm2 = vcmask 1046528  }
   0xd   : > { %4926 = vmatpush3.bf16.msra.mxu0 %v404_v1  ;;  %5340 = vmatpush3.bf16.msra.mxu1 %v404_v1  ;;  %s7663_s13 = smov (!%p168_p3, %s4444_s13), 1  ;;  %v4542_v8 = vld [vmem:[%s7551_s1 + $0x6] sm:$0x3]  ;;  %v610_v10 = vsel %vm402_vm0, %v4496_v3, 0  ;;  %v4565_v11 = vld [vmem:[%s7551_s1 + $0x8] sm:$0x3] }
   0xe   : > { %5344 = vmatprep.subr.msk.bf16.mxu0 %vm402_vm0, %v4519_v2  ;;  %5343 = vmatprep.subr.msk.bf16.mxu1 %vm402_vm0, %v4496_v3  ;;  %s5351_s20 = smul.u32 172, %s7663_s13  ;;  %v1390_v30 = vsel %vm402_vm0, %v4542_v8, 0  ;;  %v4588_v31 = vld [vmem:[%s7551_s1 + $0xa] sm:$0x3]  ;;  %v1779_v32 = vsel %vm402_vm0, %v4565_v11, 0  ;;  %vm1241_vm3 = vcmask 1045504  }
   0xf   : > { %v4611_v33 = vld [vmem:[%s7551_s1 + $0xc] sm:$0x3]  ;;  %v2169_v34 = vsel %vm402_vm0, %v4588_v31, 0  ;;  %v5761_v35 = vld [vmem:[%s7551_s1 + $0xe] sm:$0x3]  ;;  %vm2020_vm4 = vcmask 1044480  }
  0x10   : > { %s5535_s23 = scalar_lea.vmem %s7550_s0, %s5351_s20  ;;  %v2559_v36 = vsel %vm402_vm0, %v4611_v33, 0  ;;  %v5777_v37 = vld [vmem:[%s7551_s1 + $0x10] sm:$0x3]  ;;  %v2948_v62 = vsel %vm402_vm0, %v5761_v35, 0  ;;  %s5352_s9 = smul.u32 336, %s7663_s13  ;;  %vm3724_vm5 = vcmask 64512  }
  0x11   : > { %v5538_v4 = vld [vmem:[%s5535_s23] sm:$0xff]   ;;  %v5546_v6 = vld [vmem:[%s5535_s23 + $0x8] sm:$0xff]   ;;  %v5564_v12 = vld [vmem:[%s5535_s23 + $0x10] sm:$0xff]   ;;  %vm2410_vm7 = vcmask 1043456   ;;  %s4451_s15 = sshll.u32 %s7663_s13, 1 }
  0x12   : > { %v5541_v5 = vld [vmem:[%s5535_s23 + $0x60] sm:$0xff]   ;;  %4927 = vmatprep.mubr.msk.bf16.mxu0 %vm335_vm1, %v5538_v4  ;;  %v5555_v9 = vld [vmem:[%s5535_s23 + $0x68] sm:$0xff]   ;;  %v5569_v13 = vld [vmem:[%s5535_s23 + $0x70] sm:$0xff]   ;;  %s6443_s14 = scalar_lea.vmem %s7552_s2, %s5352_s9  ;;  %s181_s18 = scalar_lea.vmem %s7553_s3, %s4451_s15 }
  0x13   : > { %4951 = vmatprep.mubr.msk.bf16.mxu1 %vm335_vm1, %v5541_v5  ;;  %4928 = vmatmul.mubr.msk.bf16.vlgmr.msra.gmra.mxu0 %vm335_vm1, %v5546_v6  ;;  %v5576_v14 = vld [vmem:[%s5535_s23 + $0x18] sm:$0xff]   ;;  %v5584_v16 = vld [vmem:[%s5535_s23 + $0x20] sm:$0xff]   ;;  %v5598_v18 = vld [vmem:[%s5535_s23 + $0x28] sm:$0xff]  }
  0x14   : > { %4952 = vmatmul.mubr.msk.bf16.vlgmr.msra.gmra.mxu1 %vm335_vm1, %v5555_v9  ;;  %5018 = vmatpush3.bf16.msra.mxu0 %v1000_v7  ;;  %v5580_v15 = vld [vmem:[%s5535_s23 + $0x78] sm:$0xff]   ;;  %v5587_v17 = vld [vmem:[%s5535_s23 + $0x80] sm:$0xff]   ;;  %v5601_v19 = vld [vmem:[%s5535_s23 + $0x88] sm:$0xff]  }
  0x15   : > { %4972 = vmatpush3.bf16.msra.mxu1 %v610_v10  ;;  %4931 = vmatprep.mubr.msk.bf16.mxu0 %vm335_vm1, %v5564_v12  ;;  %v5604_v20 = vld [vmem:[%s5535_s23 + $0x30] sm:$0xff]   ;;  %v5618_v22 = vld [vmem:[%s5535_s23 + $0x38] sm:$0xff]   ;;  %v5624_v24 = vld [vmem:[%s5535_s23 + $0x40] sm:$0xff]   ;;  %v3338_v10 = vsel %vm402_vm0, %v5777_v37, 0 }
  0x16   : > { %4955 = vmatprep.mubr.msk.bf16.mxu1 %vm335_vm1, %v5569_v13  ;;  %5345 = vmatprep.subr.msk.bf16.mxu1 %vm402_vm0, %v4542_v8  ;;  %v5607_v21 = vld [vmem:[%s5535_s23 + $0x90] sm:$0xff]   ;;  %v5621_v23 = vld [vmem:[%s5535_s23 + $0x98] sm:$0xff]   ;;  %v5627_v25 = vld [vmem:[%s5535_s23 + $0xa0] sm:$0xff]  }
  0x17   : > { %5346 = vmatprep.subr.msk.bf16.mxu0 %vm402_vm0, %v4565_v11  ;;  %v5638_v26 = vld [vmem:[%s5535_s23 + $0x48] sm:$0xff]   ;;  %v5644_v28 = vld [vmem:[%s5535_s23 + $0x50] sm:$0xff]   ;;  %v5655_v29 = vld [vmem:[%s5535_s23 + $0x58] sm:$0xff]  }
  0x18   : > { %v5641_v27 = vld [vmem:[%s5535_s23 + $0xa8] ss:$0 sps:$4 sm:$0x77]  }
  0x1b   : > { %4932 = vmatmul.mubr.msk.bf16.gmra.mxu0 %vm335_vm1, %v5576_v14 }
  0x1c   : > { %4956 = vmatmul.mubr.msk.bf16.gmra.mxu1 %vm335_vm1, %v5580_v15  ;;  %4935 = vmatprep.mubr.msk.bf16.mxu0 %vm335_vm1, %v5584_v16 }
  0x1d   : > { %4959 = vmatprep.mubr.msk.bf16.mxu1 %vm335_vm1, %v5587_v17 }
  0x23   : > { %4936 = vmatmul.mubr.msk.bf16.gmra.mxu0 %vm335_vm1, %v5598_v18 }
  0x24   : > { %4960 = vmatmul.mubr.msk.bf16.gmra.mxu1 %vm335_vm1, %v5601_v19  ;;  %4939 = vmatprep.mubr.msk.bf16.mxu0 %vm335_vm1, %v5604_v20 }
  0x25   : > { %4963 = vmatprep.mubr.msk.bf16.mxu1 %vm335_vm1, %v5607_v21 }
  0x2b   : > { %4940 = vmatmul.mubr.msk.bf16.gmra.mxu0 %vm335_vm1, %v5618_v22 }
  0x2c   : > { %4964 = vmatmul.mubr.msk.bf16.gmra.mxu1 %vm335_vm1, %v5621_v23  ;;  %4943 = vmatprep.mubr.msk.bf16.mxu0 %vm335_vm1, %v5624_v24 }
  0x2d   : > { %4967 = vmatprep.mubr.msk.bf16.mxu1 %vm335_vm1, %v5627_v25 }
  0x33   : > { %4944 = vmatmul.mubr.msk.bf16.gmra.mxu0 %vm335_vm1, %v5638_v26 }
  0x34   : > { %4968 = vmatmul.mubr.msk.bf16.gmra.mxu1 %vm335_vm1, %v5641_v27  ;;  %4947 = vmatprep.mubr.msk.bf16.mxu0 %vm335_vm1, %v5644_v28 }
  0x35   : > { %4973 = vmatprep.mubr.msk.bf16.mxu1 %vm335_vm1, %v5538_v4 }
  0x3b   : > { %4948 = vmatmul.mubr.msk.bf16.gmra.mxu0 %vm335_vm1, %v5655_v29 }
  0x3c   : > { %4974 = vmatmul.mubr.msk.bf16.vlgmr.msra.gmra.mxu1 %vm335_vm1, %v5546_v6  ;;  %5019 = vmatprep.mubr.msk.bf16.mxu0 %vm335_vm1, %v5538_v4 }
  0x3d   : > { %5064 = vmatpush3.bf16.msra.mxu1 %v1390_v30  ;;  %4977 = vmatprep.mubr.msk.bf16.mxu1 %vm335_vm1, %v5564_v12 }
  0x3e   : > { %5347 = vmatprep.subr.msk.bf16.mxu1 %vm402_vm0, %v4588_v31 }
  0x43   : > { %5020 = vmatmul.mubr.msk.bf16.vlgmr.msra.gmra.mxu0 %vm335_vm1, %v5546_v6 }
  0x44   : > { %4978 = vmatmul.mubr.msk.bf16.gmra.mxu1 %vm335_vm1, %v5576_v14  ;;  %5110 = vmatpush3.bf16.msra.mxu0 %v1779_v32 }
  0x45   : > { %4981 = vmatprep.mubr.msk.bf16.mxu1 %vm335_vm1, %v5584_v16  ;;  %5023 = vmatprep.mubr.msk.bf16.mxu0 %vm335_vm1, %v5564_v12 }
  0x46   : > { %5348 = vmatprep.subr.msk.bf16.mxu0 %vm402_vm0, %v4611_v33 }
  0x4b   : > { %5024 = vmatmul.mubr.msk.bf16.gmra.mxu0 %vm335_vm1, %v5576_v14 }
  0x4c   : > { %4982 = vmatmul.mubr.msk.bf16.gmra.mxu1 %vm335_vm1, %v5598_v18  ;;  %5027 = vmatprep.mubr.msk.bf16.mxu0 %vm335_vm1, %v5584_v16 }
  0x4d   : > { %4985 = vmatprep.mubr.msk.bf16.mxu1 %vm335_vm1, %v5604_v20 }
  0x53   : > { %5028 = vmatmul.mubr.msk.bf16.gmra.mxu0 %vm335_vm1, %v5598_v18 }
  0x54   : > { %4986 = vmatmul.mubr.msk.bf16.gmra.mxu1 %vm335_vm1, %v5618_v22  ;;  %5031 = vmatprep.mubr.msk.bf16.mxu0 %vm335_vm1, %v5604_v20 }
  0x55   : > { %4989 = vmatprep.mubr.msk.bf16.mxu1 %vm335_vm1, %v5624_v24 }
  0x5b   : > { %5032 = vmatmul.mubr.msk.bf16.gmra.mxu0 %vm335_vm1, %v5618_v22 }
  0x5c   : > { %4990 = vmatmul.mubr.msk.bf16.gmra.mxu1 %vm335_vm1, %v5638_v26  ;;  %5035 = vmatprep.mubr.msk.bf16.mxu0 %vm335_vm1, %v5624_v24 }
  0x5d   : > { %4993 = vmatprep.mubr.msk.bf16.mxu1 %vm335_vm1, %v5644_v28 }
  0x63   : > { %5036 = vmatmul.mubr.msk.bf16.gmra.mxu0 %vm335_vm1, %v5638_v26 }
  0x64   : > { %4994 = vmatmul.mubr.msk.bf16.gmra.mxu1 %vm335_vm1, %v5655_v29  ;;  %5039 = vmatprep.mubr.msk.bf16.mxu0 %vm335_vm1, %v5644_v28 }
  0x65   : > { %4997 = vmatprep.mubr.msk.bf16.mxu1 %vm335_vm1, %v5541_v5 }
  0x6b   : > { %5040 = vmatmul.mubr.msk.bf16.gmra.mxu0 %vm335_vm1, %v5655_v29 }
  0x6c   : > { %4998 = vmatmul.mubr.msk.bf16.gmra.mxu1 %vm335_vm1, %v5555_v9  ;;  %5043 = vmatprep.mubr.msk.bf16.mxu0 %vm335_vm1, %v5541_v5 }
  0x6d   : > { %5001 = vmatprep.mubr.msk.bf16.mxu1 %vm335_vm1, %v5569_v13 }
  0x73   : > { %5044 = vmatmul.mubr.msk.bf16.gmra.mxu0 %vm335_vm1, %v5555_v9 }
  0x74   : > { %5002 = vmatmul.mubr.msk.bf16.gmra.mxu1 %vm335_vm1, %v5580_v15  ;;  %5047 = vmatprep.mubr.msk.bf16.mxu0 %vm335_vm1, %v5569_v13 }
  0x75   : > { %5005 = vmatprep.mubr.msk.bf16.mxu1 %vm335_vm1, %v5587_v17 }
  0x7b   : > { %5048 = vmatmul.mubr.msk.bf16.gmra.mxu0 %vm335_vm1, %v5580_v15 }
  0x7c   : > { %5006 = vmatmul.mubr.msk.bf16.gmra.mxu1 %vm335_vm1, %v5601_v19  ;;  %5051 = vmatprep.mubr.msk.bf16.mxu0 %vm335_vm1, %v5587_v17 }
  0x7d   : > { %5009 = vmatprep.mubr.msk.bf16.mxu1 %vm335_vm1, %v5607_v21 }
  0x83   : > { %5052 = vmatmul.mubr.msk.bf16.gmra.mxu0 %vm335_vm1, %v5601_v19 }
  0x84   : > { %5010 = vmatmul.mubr.msk.bf16.gmra.mxu1 %vm335_vm1, %v5621_v23  ;;  %5055 = vmatprep.mubr.msk.bf16.mxu0 %vm335_vm1, %v5607_v21 }
  0x85   : > { %5013 = vmatprep.mubr.msk.bf16.mxu1 %vm335_vm1, %v5627_v25 }
  0x8b   : > { %5056 = vmatmul.mubr.msk.bf16.gmra.mxu0 %vm335_vm1, %v5621_v23 }
  0x8c   : > { %5014 = vmatmul.mubr.msk.bf16.gmra.mxu1 %vm335_vm1, %v5641_v27  ;;  %5059 = vmatprep.mubr.msk.bf16.mxu0 %vm335_vm1, %v5627_v25 }
  0x8d   : > { %5065 = vmatprep.mubr.msk.bf16.mxu1 %vm335_vm1, %v5538_v4 }
  0x93   : > { %5060 = vmatmul.mubr.msk.bf16.gmra.mxu0 %vm335_vm1, %v5641_v27 }
  0x94   : > { %5066 = vmatmul.mubr.msk.bf16.vlgmr.msra.gmra.mxu1 %vm335_vm1, %v5546_v6  ;;  %5111 = vmatprep.mubr.msk.bf16.mxu0 %vm335_vm1, %v5538_v4 }
  0x95   : > { %5156 = vmatpush3.bf16.msra.mxu1 %v2169_v34  ;;  %5069 = vmatprep.mubr.msk.bf16.mxu1 %vm335_vm1, %v5564_v12 }
  0x96   : > { %5349 = vmatprep.subr.msk.bf16.mxu1 %vm402_vm0, %v5761_v35 }
  0x9b   : > { %5112 = vmatmul.mubr.msk.bf16.vlgmr.msra.gmra.mxu0 %vm335_vm1, %v5546_v6 }
  0x9c   : > { %5070 = vmatmul.mubr.msk.bf16.gmra.mxu1 %vm335_vm1, %v5576_v14  ;;  %5202 = vmatpush3.bf16.msra.mxu0 %v2559_v36 }
  0x9d   : > { %5073 = vmatprep.mubr.msk.bf16.mxu1 %vm335_vm1, %v5584_v16  ;;  %5115 = vmatprep.mubr.msk.bf16.mxu0 %vm335_vm1, %v5564_v12 }
  0x9e   : > { %5350 = vmatprep.subr.msk.bf16.mxu0 %vm402_vm0, %v5777_v37 }
  0xa3   : > { %5116 = vmatmul.mubr.msk.bf16.gmra.mxu0 %vm335_vm1, %v5576_v14 }
  0xa4   : > { %5074 = vmatmul.mubr.msk.bf16.gmra.mxu1 %vm335_vm1, %v5598_v18  ;;  %5119 = vmatprep.mubr.msk.bf16.mxu0 %vm335_vm1, %v5584_v16 }
  0xa5   : > { %5077 = vmatprep.mubr.msk.bf16.mxu1 %vm335_vm1, %v5604_v20 }
  0xab   : > { %5120 = vmatmul.mubr.msk.bf16.gmra.mxu0 %vm335_vm1, %v5598_v18 }
  0xac   : > { %5078 = vmatmul.mubr.msk.bf16.gmra.mxu1 %vm335_vm1, %v5618_v22  ;;  %5123 = vmatprep.mubr.msk.bf16.mxu0 %vm335_vm1, %v5604_v20 }
  0xad   : > { %5081 = vmatprep.mubr.msk.bf16.mxu1 %vm335_vm1, %v5624_v24 }
  0xb3   : > { %5124 = vmatmul.mubr.msk.bf16.gmra.mxu0 %vm335_vm1, %v5618_v22 }
  0xb4   : > { %5082 = vmatmul.mubr.msk.bf16.gmra.mxu1 %vm335_vm1, %v5638_v26  ;;  %5127 = vmatprep.mubr.msk.bf16.mxu0 %vm335_vm1, %v5624_v24 }
  0xb5   : > { %5085 = vmatprep.mubr.msk.bf16.mxu1 %vm335_vm1, %v5644_v28 }
  0xbb   : > { %5128 = vmatmul.mubr.msk.bf16.gmra.mxu0 %vm335_vm1, %v5638_v26 }
  0xbc   : > { %5086 = vmatmul.mubr.msk.bf16.gmra.mxu1 %vm335_vm1, %v5655_v29  ;;  %5131 = vmatprep.mubr.msk.bf16.mxu0 %vm335_vm1, %v5644_v28 }
  0xbd   : > { %5089 = vmatprep.mubr.msk.bf16.mxu1 %vm335_vm1, %v5541_v5 }
  0xc3   : > { %5132 = vmatmul.mubr.msk.bf16.gmra.mxu0 %vm335_vm1, %v5655_v29 }
  0xc4   : > { %5090 = vmatmul.mubr.msk.bf16.gmra.mxu1 %vm335_vm1, %v5555_v9  ;;  %5135 = vmatprep.mubr.msk.bf16.mxu0 %vm335_vm1, %v5541_v5 }
  0xc5   : > { %5093 = vmatprep.mubr.msk.bf16.mxu1 %vm335_vm1, %v5569_v13 }
  0xcb   : > { %5136 = vmatmul.mubr.msk.bf16.gmra.mxu0 %vm335_vm1, %v5555_v9 }
  0xcc   : > { %5094 = vmatmul.mubr.msk.bf16.gmra.mxu1 %vm335_vm1, %v5580_v15  ;;  %5139 = vmatprep.mubr.msk.bf16.mxu0 %vm335_vm1, %v5569_v13 }
  0xcd   : > { %5097 = vmatprep.mubr.msk.bf16.mxu1 %vm335_vm1, %v5587_v17 }
  0xd3   : > { %v5835_v38 = vpop.f32.mrf.mxu0  ;;  %5140 = vmatmul.mubr.msk.bf16.gmra.mxu0 %vm335_vm1, %v5580_v15 }
  0xd4   : > { %v5839_v39 = vpop.f32.mrf.mxu1  ;;  %5098 = vmatmul.mubr.msk.bf16.gmra.mxu1 %vm335_vm1, %v5601_v19  ;;  %5143 = vmatprep.mubr.msk.bf16.mxu0 %vm335_vm1, %v5587_v17 }
  0xd5   : > { %v5845_v40 = vpop.f32.mrf.mxu0  ;;  %5101 = vmatprep.mubr.msk.bf16.mxu1 %vm335_vm1, %v5607_v21 }
  0xd6   : > { %v5849_v41 = vpop.f32.mrf.mxu1 }
  0xd7   : > { %v5851_v42 = vpop.f32.mrf.mxu0 }
  0xd8   : > { %v5853_v43 = vpop.f32.mrf.mxu1 }
  0xd9   : > { %v5855_v44 = vpop.f32.mrf.mxu0 }
  0xda   : > { %v5857_v45 = vpop.f32.mrf.mxu1 }
  0xdb   : > { %v5859_v46 = vpop.f32.mrf.mxu0  ;;  %5144 = vmatmul.mubr.msk.bf16.gmra.mxu0 %vm335_vm1, %v5601_v19 }
  0xdc   : > { %v5863_v47 = vpop.f32.mrf.mxu1  ;;  %5102 = vmatmul.mubr.msk.bf16.gmra.mxu1 %vm335_vm1, %v5621_v23  ;;  %5147 = vmatprep.mubr.msk.bf16.mxu0 %vm335_vm1, %v5607_v21 }
  0xdd   : > { %7568 = vst [vmem:[#allocation2_spill] sm:$0xff] %v5863_v47  ;;  %v5869_v48 = vpop.f32.mrf.mxu0  ;;  %5105 = vmatprep.mubr.msk.bf16.mxu1 %vm335_vm1, %v5627_v25 }
  0xde   : > { %v5873_v49 = vpop.f32.mrf.mxu1 }
  0xdf   : > { %7569 = vst [vmem:[#allocation3_spill] sm:$0xff] %v5873_v49  ;;  %v5875_v50 = vpop.f32.mrf.mxu0 }
  0xe0   : > { %v5877_v51 = vpop.f32.mrf.mxu1 }
  0xe1   : > { %7570 = vst [vmem:[#allocation4_spill] sm:$0xff] %v5877_v51  ;;  %v5879_v52 = vpop.f32.mrf.mxu0 }
  0xe2   : > { %v5881_v53 = vpop.f32.mrf.mxu1 }
  0xe3   : > { %7571 = vst [vmem:[#allocation5_spill] sm:$0xff] %v5881_v53  ;;  %v5883_v54 = vpop.f32.mrf.mxu0  ;;  %5148 = vmatmul.mubr.msk.bf16.gmra.mxu0 %vm335_vm1, %v5621_v23 }
  0xe4   : > { %v5887_v55 = vpop.f32.mrf.mxu1  ;;  %5106 = vmatmul.mubr.msk.bf16.gmra.mxu1 %vm335_vm1, %v5641_v27  ;;  %5151 = vmatprep.mubr.msk.bf16.mxu0 %vm335_vm1, %v5627_v25 }
  0xe5   : > { %7572 = vst [vmem:[#allocation6_spill] sm:$0xff] %v5887_v55  ;;  %v5893_v56 = vpop.f32.mrf.mxu0  ;;  %5157 = vmatprep.mubr.msk.bf16.mxu1 %vm335_vm1, %v5538_v4 }
  0xe6   : > { %v5897_v57 = vpop.f32.mrf.mxu1 }
  0xe7   : > { %7573 = vst [vmem:[#allocation7_spill] sm:$0xff] %v5897_v57  ;;  %v5899_v58 = vpop.f32.mrf.mxu0 }
  0xe8   : > { %v5901_v59 = vpop.f32.mrf.mxu1 }
  0xe9   : > { %7574 = vst [vmem:[#allocation8_spill] sm:$0xff] %v5901_v59  ;;  %v5903_v60 = vpop.f32.mrf.mxu0 }
  0xea   : > { %v5905_v61 = vpop.f32.mrf.mxu1 }
  0xeb   : > { %7575 = vst [vmem:[#allocation9_spill] sm:$0xff] %v5905_v61  ;;  %v5909_v63 = vpop.f32.mrf.mxu0  ;;  %5152 = vmatmul.mubr.msk.bf16.gmra.mxu0 %vm335_vm1, %v5641_v27 }
  0xec   : > { %v4965_v0 = vpop.f32.mrf.mxu1  ;;  %5158 = vmatmul.mubr.msk.bf16.vlgmr.msra.gmra.mxu1 %vm335_vm1, %v5546_v6  ;;  %5203 = vmatprep.mubr.msk.bf16.mxu0 %vm335_vm1, %v5538_v4 }
  0xed   : > { %v5917_v1 = vpop.f32.mrf.mxu0  ;;  %5248 = vmatpush3.bf16.msra.mxu1 %v2948_v62  ;;  %5161 = vmatprep.mubr.msk.bf16.mxu1 %vm335_vm1, %v5564_v12 }
  0xee   : > { %v584_v2 = vpop.f32.mrf.mxu1 }
  0xef   : > { %v5921_v3 = vpop.f32.mrf.mxu0 }
  0xf0   : > { %v4966_v7 = vpop.f32.mrf.mxu1 }
  0xf1   : > { %v5923_v8 = vpop.f32.mrf.mxu0 }
  0xf2   : > { %v586_v11 = vpop.f32.mrf.mxu1 }
  0xf3   : > { %v5927_v30 = vpop.f32.mrf.mxu0  ;;  %5204 = vmatmul.mubr.msk.bf16.vlgmr.msra.gmra.mxu0 %vm335_vm1, %v5546_v6 }
  0xf4   : > { %v4969_v4 = vpop.f32.mrf.mxu1  ;;  %5162 = vmatmul.mubr.msk.bf16.gmra.mxu1 %vm335_vm1, %v5576_v14  ;;  %5294 = vmatpush3.bf16.msra.mxu0 %v3338_v10 }
  0xf5   : > { %v5933_v31 = vpop.f32.mrf.mxu0  ;;  %5165 = vmatprep.mubr.msk.bf16.mxu1 %vm335_vm1, %v5584_v16  ;;  %5207 = vmatprep.mubr.msk.bf16.mxu0 %vm335_vm1, %v5564_v12 }
  0xf6   : > { %v596_v32 = vpop.f32.mrf.mxu1 }
  0xf7   : > { %v5939_v33 = vpop.f32.mrf.mxu0 }
  0xf8   : > { %v4970_v34 = vpop.f32.mrf.mxu1 }
  0xf9   : > { %v5941_v35 = vpop.f32.mrf.mxu0 }
  0xfa   : > { %v598_v6 = vpop.f32.mrf.mxu1 }
  0xfb   : > { %v5943_v36 = vpop.f32.mrf.mxu0  ;;  %5208 = vmatmul.mubr.msk.bf16.gmra.mxu0 %vm335_vm1, %v5576_v14 }
  0xfc   : > { %v4975_v37 = vpop.f32.mrf.mxu1  ;;  %5166 = vmatmul.mubr.msk.bf16.gmra.mxu1 %vm335_vm1, %v5598_v18  ;;  %5211 = vmatprep.mubr.msk.bf16.mxu0 %vm335_vm1, %v5584_v16 }
  0xfd   : > { %v5951_v12 = vpop.f32.mrf.mxu0  ;;  %5169 = vmatprep.mubr.msk.bf16.mxu1 %vm335_vm1, %v5604_v20  ;;  %v855_v0 = vrot.slane %v4975_v37, 1 }
  0xfe   : > { %v646_v62 = vpop.f32.mrf.mxu1 }
  0xff   : > { %v5955_v2 = vpop.f32.mrf.mxu0  ;;  %v852_v10 = vrot.slane %v646_v62, 1 }
 0x100   : > { %v4976_v7 = vpop.f32.mrf.mxu1 }
 0x101   : > { %v857_v14 = vrot.slane %v4976_v7, 1  ;;  %v5957_v11 = vpop.f32.mrf.mxu0 }
 0x102   : > { %v649_v4 = vpop.f32.mrf.mxu1 }
 0x103   : > { %v858_v32 = vsel %vm851_vm2, %v855_v0, %v857_v14  ;;  %v853_v34 = vrot.slane %v649_v4, 1  ;;  %v5021_v16 = vpop.f32.mrf.mxu0  ;;  %5212 = vmatmul.mubr.msk.bf16.gmra.mxu0 %vm335_vm1, %v5598_v18 }
 0x104   : > { %v963_v6 = vadd.f32 %v5835_v38, %v858_v32  ;;  %v4979_v59 = vpop.f32.mrf.mxu1  ;;  %5170 = vmatmul.mubr.msk.bf16.gmra.mxu1 %vm335_vm1, %v5618_v22  ;;  %5215 = vmatprep.mubr.msk.bf16.mxu0 %vm335_vm1, %v5604_v20  ;;  %v1245_v55 = vrot.slane %v5021_v16, 2 }
 0x105   : > { %v854_v37 = vsel %vm851_vm2, %v852_v10, %v853_v34  ;;  %v856_v62 = vsel %vm851_vm2, %v853_v34, %v855_v0  ;;  %v1036_v7 = vpop.f32.mrf.mxu0  ;;  %5173 = vmatprep.mubr.msk.bf16.mxu1 %vm335_vm1, %v5624_v24  ;;  %v863_v32 = vrot.slane %v4979_v59, 1 }
 0x106   : > { %v961_v4 = vadd.f32 %v854_v37, %v5845_v40  ;;  %v962_v18 = vadd.f32 %v856_v62, %v5855_v44  ;;  %v662_v38 = vpop.f32.mrf.mxu1  ;;  %v1242_v49 = vrot.slane %v1036_v7, 2 }
 0x107   : > { %v859_v61 = vrot.slane %v662_v38, 1  ;;  %v5022_v57 = vpop.f32.mrf.mxu0 }
 0x108   : > { %v4980_v51 = vpop.f32.mrf.mxu1  ;;  %v1247_v20 = vrot.slane %v5022_v57, 2 }
 0x109   : > { %v860_v10 = vsel %vm851_vm2, %v857_v14, %v859_v61  ;;  %v865_v53 = vrot.slane %v4980_v51, 1  ;;  %v1039_v0 = vpop.f32.mrf.mxu0 }
 0x10a   : > { %v964_v34 = vadd.f32 %v5851_v42, %v860_v10  ;;  %v1248_v47 = vsel %vm1241_vm3, %v1245_v55, %v1247_v20  ;;  %v665_v40 = vpop.f32.mrf.mxu1  ;;  %v1243_v37 = vrot.slane %v1039_v0, 2 }
 0x10b   : > { %v866_v44 = vsel %vm851_vm2, %v863_v32, %v865_v53  ;;  %v5977_v59 = vadd.f32 %v1248_v47, %v963_v6  ;;  %v861_v62 = vrot.slane %v665_v40, 1  ;;  %v5025_v38 = vpop.f32.mrf.mxu0  ;;  %5216 = vmatmul.mubr.msk.bf16.gmra.mxu0 %vm335_vm1, %v5618_v22 }
 0x10c   : > { %v967_v57 = vadd.f32 %v5859_v46, %v866_v44  ;;  %v1244_v51 = vsel %vm1241_vm3, %v1242_v49, %v1243_v37  ;;  %v1246_v42 = vsel %vm1241_vm3, %v1243_v37, %v1245_v55  ;;  %v4983_v14 = vpop.f32.mrf.mxu1  ;;  %5174 = vmatmul.mubr.msk.bf16.gmra.mxu1 %vm335_vm1, %v5638_v26  ;;  %5219 = vmatprep.mubr.msk.bf16.mxu0 %vm335_vm1, %v5624_v24 }
 0x10d   : > { %v862_v47 = vsel %vm851_vm2, %v859_v61, %v861_v62  ;;  %v864_v16 = vsel %vm851_vm2, %v861_v62, %v863_v32  ;;  %v5990_v6 = vadd.f32 %v1244_v51, %v961_v4  ;;  %v5992_v22 = vadd.f32 %v1246_v42, %v962_v18  ;;  %v1052_v46 = vpop.f32.mrf.mxu0  ;;  %5177 = vmatprep.mubr.msk.bf16.mxu1 %vm335_vm1, %v5644_v28 }
 0x10e   : > { %v965_v49 = vadd.f32 %v862_v47, %v5869_v48  ;;  %v966_v55 = vadd.f32 %v864_v16, %v5879_v52  ;;  %v678_v7 = vpop.f32.mrf.mxu1  ;;  %v1249_v10 = vrot.slane %v1052_v46, 2  ;;  %v871_v0 = vrot.slane %v4983_v14, 1 }
 0x10f   : > { %v867_v24 = vrot.slane %v678_v7, 1  ;;  %v5026_v40 = vpop.f32.mrf.mxu0  ;;  %v1253_v61 = vrot.slane %v5025_v38, 2 }
 0x110   : > { %v1250_v32 = vsel %vm1241_vm3, %v1247_v20, %v1249_v10  ;;  %v4984_v4 = vpop.f32.mrf.mxu1  ;;  %v1255_v37 = vrot.slane %v5026_v40, 2 }
 0x111   : > { %v868_v18 = vsel %vm851_vm2, %v865_v53, %v867_v24  ;;  %v6000_v44 = vadd.f32 %v1250_v32, %v964_v34  ;;  %v873_v62 = vrot.slane %v4984_v4, 1  ;;  %v1055_v51 = vpop.f32.mrf.mxu0 }
 0x112   : > { %v968_v48 = vadd.f32 %v5875_v50, %v868_v18  ;;  %v1256_v52 = vsel %vm1241_vm3, %v1253_v61, %v1255_v37  ;;  %v681_v42 = vpop.f32.mrf.mxu1  ;;  %v1251_v47 = vrot.slane %v1055_v51, 2 }
 0x113   : > { %v874_v14 = vsel %vm851_vm2, %v871_v0, %v873_v62  ;;  %v6005_v16 = vadd.f32 %v1256_v52, %v967_v57  ;;  %v869_v38 = vrot.slane %v681_v42, 1  ;;  %v5029_v20 = vpop.f32.mrf.mxu0  ;;  %5220 = vmatmul.mubr.msk.bf16.gmra.mxu0 %vm335_vm1, %v5638_v26 }
 0x114   : > { %v971_v53 = vadd.f32 %v5883_v54, %v874_v14  ;;  %v1252_v34 = vsel %vm1241_vm3, %v1249_v10, %v1251_v47  ;;  %v1254_v46 = vsel %vm1241_vm3, %v1251_v47, %v1253_v61  ;;  %v4987_v50 = vpop.f32.mrf.mxu1  ;;  %5178 = vmatmul.mubr.msk.bf16.gmra.mxu1 %vm335_vm1, %v5655_v29  ;;  %5223 = vmatprep.mubr.msk.bf16.mxu0 %vm335_vm1, %v5644_v28 }
 0x115   : > { %v870_v57 = vsel %vm851_vm2, %v867_v24, %v869_v38  ;;  %v872_v7 = vsel %vm851_vm2, %v869_v38, %v871_v0  ;;  %v6018_v40 = vadd.f32 %v1252_v34, %v965_v49  ;;  %v6020_v26 = vadd.f32 %v1254_v46, %v966_v55  ;;  %v1068_v54 = vpop.f32.mrf.mxu0  ;;  %5181 = vmatprep.mubr.msk.bf16.mxu1 %vm335_vm1, %v5541_v5 }
 0x116   : > { %v969_v10 = vadd.f32 %v870_v57, %v5893_v56  ;;  %v970_v61 = vadd.f32 %v872_v7, %v5903_v60  ;;  %v694_v32 = vpop.f32.mrf.mxu1  ;;  %v1257_v4 = vrot.slane %v1068_v54, 2  ;;  %v879_v18 = vrot.slane %v4987_v50, 1 }
 0x117   : > { %v875_v28 = vrot.slane %v694_v32, 1  ;;  %v5030_v51 = vpop.f32.mrf.mxu0  ;;  %v1261_v24 = vrot.slane %v5029_v20, 2 }
 0x118   : > { %v1258_v0 = vsel %vm1241_vm3, %v1255_v37, %v1257_v4  ;;  %v4988_v49 = vpop.f32.mrf.mxu1  ;;  %v1263_v52 = vrot.slane %v5030_v51, 2 }
 0x119   : > { %v876_v55 = vsel %vm851_vm2, %v873_v62, %v875_v28  ;;  %v6028_v42 = vadd.f32 %v1258_v0, %v968_v48  ;;  %v881_v47 = vrot.slane %v4988_v49, 1  ;;  %v1071_v14 = vpop.f32.mrf.mxu0 }
 0x11a   : > { %v972_v56 = vadd.f32 %v5899_v58, %v876_v55  ;;  %v1264_v60 = vsel %vm1241_vm3, %v1261_v24, %v1263_v52  ;;  %v697_v38 = vpop.f32.mrf.mxu1  ;;  %v1259_v34 = vrot.slane %v1071_v14, 2 }
 0x11b   : > { %v882_v46 = vsel %vm851_vm2, %v879_v18, %v881_v47  ;;  %v6033_v50 = vadd.f32 %v1264_v60, %v971_v53  ;;  %v877_v20 = vrot.slane %v697_v38, 1  ;;  %v5033_v37 = vpop.f32.mrf.mxu0  ;;  %5224 = vmatmul.mubr.msk.bf16.gmra.mxu0 %vm335_vm1, %v5655_v29 }
 0x11c   : > { %v975_v62 = vadd.f32 %v5909_v63, %v882_v46  ;;  %v1260_v48 = vsel %vm1241_vm3, %v1257_v4, %v1259_v34  ;;  %v1262_v57 = vsel %vm1241_vm3, %v1259_v34, %v1261_v24  ;;  %v4991_v58 = vpop.f32.mrf.mxu1  ;;  %5182 = vmatmul.mubr.msk.bf16.gmra.mxu1 %vm335_vm1, %v5555_v9  ;;  %5227 = vmatprep.mubr.msk.bf16.mxu0 %vm335_vm1, %v5541_v5 }
 0x11d   : > { %v878_v53 = vsel %vm851_vm2, %v875_v28, %v877_v20  ;;  %v880_v7 = vsel %vm851_vm2, %v877_v20, %v879_v18  ;;  %v6046_v54 = vadd.f32 %v1260_v48, %v969_v10  ;;  %v6048_v29 = vadd.f32 %v1262_v57, %v970_v61  ;;  %v1084_v63 = vpop.f32.mrf.mxu0  ;;  %5185 = vmatprep.mubr.msk.bf16.mxu1 %vm335_vm1, %v5569_v13 }
 0x11e   : > { %v973_v32 = vadd.f32 %v878_v53, %v5917_v1  ;;  %v974_v4 = vadd.f32 %v880_v7, %v5923_v8  ;;  %v710_v51 = vpop.f32.mrf.mxu1  ;;  %v1265_v24 = vrot.slane %v1084_v63, 2  ;;  %v887_v0 = vrot.slane %v4991_v58, 1 }
 0x11f   : > { %v883_v5 = vrot.slane %v710_v51, 1  ;;  %v5034_v49 = vpop.f32.mrf.mxu0  ;;  %v1269_v28 = vrot.slane %v5033_v37, 2 }
 0x120   : > { %v1266_v18 = vsel %vm1241_vm3, %v1263_v52, %v1265_v24  ;;  %v4992_v10 = vpop.f32.mrf.mxu1  ;;  %v1271_v55 = vrot.slane %v5034_v49, 2 }
 0x121   : > { %v884_v61 = vsel %vm851_vm2, %v881_v47, %v883_v5  ;;  %v6056_v14 = vadd.f32 %v1266_v18, %v972_v56  ;;  %v889_v60 = vrot.slane %v4992_v10, 1  ;;  %v1087_v38 = vpop.f32.mrf.mxu0 }
 0x122   : > { %v976_v1 = vadd.f32 %v5921_v3, %v884_v61  ;;  %v1272_v8 = vsel %vm1241_vm3, %v1269_v28, %v1271_v55  ;;  %v713_v34 = vpop.f32.mrf.mxu1  ;;  %v1267_v46 = vrot.slane %v1087_v38, 2 }
 0x123   : > { %v890_v20 = vsel %vm851_vm2, %v887_v0, %v889_v60  ;;  %v6061_v48 = vadd.f32 %v1272_v8, %v975_v62  ;;  %v885_v37 = vrot.slane %v713_v34, 1  ;;  %v5037_v52 = vpop.f32.mrf.mxu0  ;;  %5228 = vmatmul.mubr.msk.bf16.gmra.mxu0 %vm335_vm1, %v5555_v9 }
 0x124   : > { %v979_v47 = vadd.f32 %v5927_v30, %v890_v20  ;;  %v1268_v56 = vsel %vm1241_vm3, %v1265_v24, %v1267_v46  ;;  %v1270_v57 = vsel %vm1241_vm3, %v1267_v46, %v1269_v28  ;;  %v4995_v3 = vpop.f32.mrf.mxu1  ;;  %5186 = vmatmul.mubr.msk.bf16.gmra.mxu1 %vm335_vm1, %v5580_v15  ;;  %5231 = vmatprep.mubr.msk.bf16.mxu0 %vm335_vm1, %v5569_v13 }
 0x125   : > { %v886_v62 = vsel %vm851_vm2, %v883_v5, %v885_v37  ;;  %v888_v58 = vsel %vm851_vm2, %v885_v37, %v887_v0  ;;  %v6074_v53 = vadd.f32 %v1268_v56, %v973_v32  ;;  %v6076_v9 = vadd.f32 %v1270_v57, %v974_v4  ;;  %v1100_v30 = vpop.f32.mrf.mxu0  ;;  %5189 = vmatprep.mubr.msk.bf16.mxu1 %vm335_vm1, %v5587_v17 }
 0x126   : > { %v977_v7 = vadd.f32 %v886_v62, %v5933_v31  ;;  %v978_v63 = vadd.f32 %v888_v58, %v5941_v35  ;;  %v726_v51 = vpop.f32.mrf.mxu1  ;;  %v1273_v24 = vrot.slane %v1100_v30, 2  ;;  %v895_v49 = vrot.slane %v4995_v3, 1 }
 0x127   : > { %v891_v13 = vrot.slane %v726_v51, 1  ;;  %v5038_v28 = vpop.f32.mrf.mxu0  ;;  %v1277_v5 = vrot.slane %v5037_v52, 2 }
 0x128   : > { %v1274_v0 = vsel %vm1241_vm3, %v1271_v55, %v1273_v24  ;;  %v4996_v32 = vpop.f32.mrf.mxu1  ;;  %v1279_v18 = vrot.slane %v5038_v28, 2 }
 0x129   : > { %v892_v4 = vsel %vm851_vm2, %v889_v60, %v891_v13  ;;  %v6084_v10 = vadd.f32 %v1274_v0, %v976_v1  ;;  %v897_v61 = vrot.slane %v4996_v32, 1  ;;  %v1103_v38 = vpop.f32.mrf.mxu0 }
 0x12a   : > { %v980_v31 = vadd.f32 %v5939_v33, %v892_v4  ;;  %v1280_v35 = vsel %vm1241_vm3, %v1277_v5, %v1279_v18  ;;  %v729_v8 = vpop.f32.mrf.mxu1  ;;  %v1275_v34 = vrot.slane %v1103_v38, 2 }
 0x12b   : > { %v898_v46 = vsel %vm851_vm2, %v895_v49, %v897_v61  ;;  %v6089_v20 = vadd.f32 %v1280_v35, %v979_v47  ;;  %v893_v37 = vrot.slane %v729_v8, 1  ;;  %v5041_v55 = vpop.f32.mrf.mxu0  ;;  %5232 = vmatmul.mubr.msk.bf16.gmra.mxu0 %vm335_vm1, %v5580_v15 }
 0x12c   : > { %v983_v60 = vadd.f32 %v5943_v36, %v898_v46  ;;  %v1276_v1 = vsel %vm1241_vm3, %v1273_v24, %v1275_v34  ;;  %v1278_v52 = vsel %vm1241_vm3, %v1275_v34, %v1277_v5  ;;  %v4999_v33 = vpop.f32.mrf.mxu1  ;;  %5190 = vmatmul.mubr.msk.bf16.gmra.mxu1 %vm335_vm1, %v5601_v19  ;;  %5235 = vmatprep.mubr.msk.bf16.mxu0 %vm335_vm1, %v5587_v17 }
 0x12d   : > { %v894_v47 = vsel %vm851_vm2, %v891_v13, %v893_v37  ;;  %v896_v56 = vsel %vm851_vm2, %v893_v37, %v895_v49  ;;  %v6102_v57 = vadd.f32 %v1276_v1, %v977_v7  ;;  %v6104_v15 = vadd.f32 %v1278_v52, %v978_v63  ;;  %v1116_v36 = vpop.f32.mrf.mxu0  ;;  %5193 = vmatprep.mubr.msk.bf16.mxu1 %vm335_vm1, %v5607_v21 }
 0x12e   : > { %v981_v3 = vadd.f32 %v894_v47, %v5951_v12  ;;  %v982_v62 = vadd.f32 %v896_v56, %v5957_v11  ;;  %v742_v58 = vpop.f32.mrf.mxu1  ;;  %v1281_v30 = vrot.slane %v1116_v36, 2  ;;  %v903_v51 = vrot.slane %v4999_v33, 1 }
 0x12f   : > { %v899_v17 = vrot.slane %v742_v58, 1  ;;  %v5042_v24 = vpop.f32.mrf.mxu0  ;;  %v1285_v13 = vrot.slane %v5041_v55, 2 }
 0x130   : > { %v1282_v49 = vsel %vm1241_vm3, %v1279_v18, %v1281_v30  ;;  %v5000_v7 = vpop.f32.mrf.mxu1  ;;  %v1287_v28 = vrot.slane %v5042_v24, 2 }
 0x131   : > { %v900_v63 = vsel %vm851_vm2, %v897_v61, %v899_v17  ;;  %v6112_v5 = vadd.f32 %v1282_v49, %v980_v31  ;;  %v905_v0 = vrot.slane %v5000_v7, 1  ;;  %v1119_v32 = vpop.f32.mrf.mxu0 }
 0x132   : > { %v984_v12 = vadd.f32 %v5955_v2, %v900_v63  ;;  %v1288_v11 = vsel %vm1241_vm3, %v1285_v13, %v1287_v28  ;;  %v745_v4 = vpop.f32.mrf.mxu1  ;;  %v1283_v38 = vrot.slane %v1119_v32, 2 }
 0x133   : > { %v906_v35 = vsel %vm851_vm2, %v903_v51, %v905_v0  ;;  %v6117_v8 = vadd.f32 %v1288_v11, %v983_v60  ;;  %v901_v34 = vrot.slane %v745_v4, 1  ;;  %v5045_v18 = vpop.f32.mrf.mxu0  ;;  %5236 = vmatmul.mubr.msk.bf16.gmra.mxu0 %vm335_vm1, %v5601_v19 }
 0x134   : > { %v1284_v61 = vsel %vm1241_vm3, %v1281_v30, %v1283_v38  ;;  %v1286_v31 = vsel %vm1241_vm3, %v1283_v38, %v1285_v13  ;;  %v5003_v46 = vpop.f32.mrf.mxu1  ;;  %5194 = vmatmul.mubr.msk.bf16.gmra.mxu1 %vm335_vm1, %v5621_v23  ;;  %5239 = vmatprep.mubr.msk.bf16.mxu0 %vm335_vm1, %v5607_v21  ;;  %v1293_v36 = vrot.slane %v5045_v18, 2  ;;  %v5456_v18 = vld [vmem:[%s5535_s23] sm:$0xff]  }
 0x135   : > { %v902_v2 = vsel %vm851_vm2, %v899_v17, %v901_v34  ;;  %v904_v37 = vsel %vm851_vm2, %v901_v34, %v903_v51  ;;  %v6129_v55 = vadd.f32 %v1284_v61, %v981_v3  ;;  %v6131_v60 = vadd.f32 %v1286_v31, %v982_v62  ;;  %v1132_v19 = vpop.f32.mrf.mxu0  ;;  %5197 = vmatprep.mubr.msk.bf16.mxu1 %vm335_vm1, %v5627_v25 }
 0x136   : > { %v758_v1 = vpop.f32.mrf.mxu1  ;;  %v1289_v52 = vrot.slane %v1132_v19, 2  ;;  %v911_v33 = vrot.slane %v5003_v46, 1  ;;  %v987_v51 = vadd.f32 %v5839_v39, %v906_v35  ;;  %v985_v13 = vadd.f32 %v902_v2, %v5849_v41 }
 0x137   : > { %v907_v47 = vrot.slane %v758_v1, 1  ;;  %v5046_v56 = vpop.f32.mrf.mxu0  ;;  %v986_v32 = vadd.f32 %v904_v37, %v5857_v45 }
 0x138   : > { %v1290_v21 = vsel %vm1241_vm3, %v1287_v28, %v1289_v52  ;;  %v5004_v58 = vpop.f32.mrf.mxu1  ;;  %v1295_v30 = vrot.slane %v5046_v56, 2 }
 0x139   : > { %v908_v3 = vsel %vm851_vm2, %v905_v0, %v907_v47  ;;  %v6138_v62 = vadd.f32 %v1290_v21, %v984_v12  ;;  %v913_v17 = vrot.slane %v5004_v58, 1  ;;  %v1135_v24 = vpop.f32.mrf.mxu0 }
 0x13a   : > { %v1296_v49 = vsel %vm1241_vm3, %v1293_v36, %v1295_v30  ;;  %v761_v7 = vpop.f32.mrf.mxu1  ;;  %v1291_v63 = vrot.slane %v1135_v24, 2  ;;  %v988_v46 = vadd.f32 %v5853_v43, %v908_v3  ;;  %v7577_v24 = vld [vmem:[#allocation3_spill] sm:$0xff] }
 0x13b   : > { %v914_v28 = vsel %vm851_vm2, %v911_v33, %v913_v17  ;;  %v6144_v11 = vadd.f32 %v1296_v49, %v987_v51  ;;  %v909_v39 = vrot.slane %v761_v7, 1  ;;  %v5049_v4 = vpop.f32.mrf.mxu0  ;;  %5240 = vmatmul.mubr.msk.bf16.gmra.mxu0 %vm335_vm1, %v5621_v23  ;;  %v7578_v7 = vld [vmem:[#allocation5_spill] sm:$0xff] }
 0x13c   : > { %v1292_v0 = vsel %vm1241_vm3, %v1289_v52, %v1291_v63  ;;  %v1294_v41 = vsel %vm1241_vm3, %v1291_v63, %v1293_v36  ;;  %v5007_v12 = vpop.f32.mrf.mxu1  ;;  %5198 = vmatmul.mubr.msk.bf16.gmra.mxu1 %vm335_vm1, %v5641_v27  ;;  %5243 = vmatprep.mubr.msk.bf16.mxu0 %vm335_vm1, %v5627_v25  ;;  %v1301_v25 = vrot.slane %v5049_v4, 2 }
 0x13d   : > { %v910_v45 = vsel %vm851_vm2, %v907_v47, %v909_v39  ;;  %v912_v38 = vsel %vm851_vm2, %v909_v39, %v911_v33  ;;  %v6156_v35 = vadd.f32 %v1292_v0, %v985_v13  ;;  %v6158_v34 = vadd.f32 %v1294_v41, %v986_v32  ;;  %v1148_v23 = vpop.f32.mrf.mxu0  ;;  %5249 = vmatprep.mubr.msk.bf16.mxu1 %vm335_vm1, %v5456_v18  ;;  %v7576_v47 = vld [vmem:[#allocation2_spill] sm:$0xff]  ;;  %v5457_v41 = vld [vmem:[%s5535_s23 + $0x8] sm:$0xff]  }
 0x13e   : > { %v774_v61 = vpop.f32.mrf.mxu1  ;;  %v1297_v31 = vrot.slane %v1148_v23, 2  ;;  %v919_v2 = vrot.slane %v5007_v12, 1  ;;  %v991_v56 = vadd.f32 %v7576_v47, %v914_v28  ;;  %v989_v13 = vadd.f32 %v910_v45, %v7577_v24 }
 0x13f   : > { %v915_v37 = vrot.slane %v774_v61, 1  ;;  %v5050_v19 = vpop.f32.mrf.mxu0  ;;  %v990_v63 = vadd.f32 %v912_v38, %v7578_v7  ;;  %v7581_v7 = vld [vmem:[#allocation7_spill] sm:$0xff] }
 0x140   : > { %v1298_v1 = vsel %vm1241_vm3, %v1295_v30, %v1297_v31  ;;  %v5008_v52 = vpop.f32.mrf.mxu1  ;;  %v1303_v33 = vrot.slane %v5050_v19, 2  ;;  %v7579_v19 = vld [vmem:[#allocation4_spill] sm:$0xff] }
 0x141   : > { %v916_v36 = vsel %vm851_vm2, %v913_v17, %v915_v37  ;;  %v6166_v21 = vadd.f32 %v1298_v1, %v988_v46  ;;  %v921_v58 = vrot.slane %v5008_v52, 1  ;;  %v1151_v51 = vpop.f32.mrf.mxu0 }
 0x142   : > { %v1304_v43 = vsel %vm1241_vm3, %v1301_v25, %v1303_v33  ;;  %v777_v3 = vpop.f32.mrf.mxu1  ;;  %v1299_v49 = vrot.slane %v1151_v51, 2 }
 0x143   : > { %v922_v30 = vsel %vm851_vm2, %v919_v2, %v921_v58  ;;  %v6172_v32 = vadd.f32 %v1304_v43, %v991_v56  ;;  %v917_v28 = vrot.slane %v777_v3, 1  ;;  %v5053_v17 = vpop.f32.mrf.mxu0  ;;  %5244 = vmatmul.mubr.msk.bf16.gmra.mxu0 %vm335_vm1, %v5641_v27  ;;  %v5458_v27 = vld [vmem:[%s5535_s23 + $0x10] sm:$0xff]  }
 0x144   : > { %v1300_v39 = vsel %vm1241_vm3, %v1297_v31, %v1299_v49  ;;  %v1302_v4 = vsel %vm1241_vm3, %v1299_v49, %v1301_v25  ;;  %v5011_v0 = vpop.f32.mrf.mxu1  ;;  %5250 = vmatmul.mubr.msk.bf16.vlgmr.msra.gmra.mxu1 %vm335_vm1, %v5457_v41  ;;  %5295 = vmatprep.mubr.msk.bf16.mxu0 %vm335_vm1, %v5456_v18  ;;  %v992_v25 = vadd.f32 %v7579_v19, %v916_v36  ;;  %v1309_v47 = vrot.slane %v5053_v17, 2  ;;  %v7583_v19 = vld [vmem:[#allocation8_spill] sm:$0xff] }
 0x145   : > { %v918_v12 = vsel %vm851_vm2, %v915_v37, %v917_v28  ;;  %v920_v45 = vsel %vm851_vm2, %v917_v28, %v919_v2  ;;  %v6183_v38 = vadd.f32 %v1300_v39, %v989_v13  ;;  %v6185_v23 = vadd.f32 %v1302_v4, %v990_v63  ;;  %v1164_v61 = vpop.f32.mrf.mxu0  ;;  %5253 = vmatprep.mubr.msk.bf16.mxu1 %vm335_vm1, %v5458_v27  ;;  %v7580_v2 = vld [vmem:[#allocation6_spill] sm:$0xff]  ;;  %v7582_v28 = vld [vmem:[#allocation9_spill] sm:$0xff] }
 0x146   : > { %v790_v31 = vpop.f32.mrf.mxu1  ;;  %v1305_v46 = vrot.slane %v1164_v61, 2  ;;  %v995_v51 = vadd.f32 %v7580_v2, %v922_v30  ;;  %v993_v63 = vadd.f32 %v918_v12, %v7581_v7  ;;  %v994_v17 = vadd.f32 %v920_v45, %v7582_v28  ;;  %v5459_v0 = vld [vmem:[%s5535_s23 + $0x18] sm:$0xff]  }
 0x147   : > { %v923_v1 = vrot.slane %v790_v31, 1  ;;  %v5054_v52 = vpop.f32.mrf.mxu0  ;;  %v5460_v31 = vld [vmem:[%s5535_s23 + $0x20] sm:$0xff]  }
 0x148   : > { %v1306_v18 = vsel %vm1241_vm3, %v1303_v33, %v1305_v46  ;;  %v5012_v37 = vpop.f32.mrf.mxu1  ;;  %v1311_v56 = vrot.slane %v5054_v52, 2 }
 0x149   : > { %v924_v24 = vsel %vm851_vm2, %v921_v58, %v923_v1  ;;  %v6193_v13 = vadd.f32 %v1306_v18, %v992_v25  ;;  %v1167_v43 = vpop.f32.mrf.mxu0 }
 0x14a   : > { %v1312_v3 = vsel %vm1241_vm3, %v1309_v47, %v1311_v56  ;;  %v793_v49 = vpop.f32.mrf.mxu1  ;;  %v1307_v36 = vrot.slane %v1167_v43, 2  ;;  %v996_v25 = vadd.f32 %v7583_v19, %v924_v24  ;;  %v5461_v43 = vld [vmem:[%s5535_s23 + $0x28] sm:$0xff]   ;;  %v5462_v24 = vld [vmem:[%s5535_s23 + $0x30] sm:$0xff]  }
 0x14b   : > { %v6198_v33 = vadd.f32 %v1312_v3, %v995_v51  ;;  %v5057_v39 = vpop.f32.mrf.mxu0  ;;  %5296 = vmatmul.mubr.msk.bf16.vlgmr.msra.gmra.mxu0 %vm335_vm1, %v5457_v41 }
 0x14c   : > { %v1308_v30 = vsel %vm1241_vm3, %v1305_v46, %v1307_v36  ;;  %v1310_v58 = vsel %vm1241_vm3, %v1307_v36, %v1309_v47  ;;  %v5015_v4 = vpop.f32.mrf.mxu1  ;;  %5254 = vmatmul.mubr.msk.bf16.gmra.mxu1 %vm335_vm1, %v5459_v0  ;;  %5299 = vmatprep.mubr.msk.bf16.mxu0 %vm335_vm1, %v5458_v27 }
 0x14d   : > { %v6206_v61 = vadd.f32 %v1308_v30, %v993_v63  ;;  %v6208_v12 = vadd.f32 %v1310_v58, %v994_v17  ;;  %v1180_v45 = vpop.f32.mrf.mxu0  ;;  %5257 = vmatprep.mubr.msk.bf16.mxu1 %vm335_vm1, %v5460_v31 }
 0x14e   : > { %v803_v41 = vpop.f32.mrf.mxu1  ;;  %v1313_v46 = vrot.slane %v1180_v45, 2 }
 0x14f   : > { %v5058_v1 = vpop.f32.mrf.mxu0 }
 0x150   : > { %v1314_v52 = vsel %vm1241_vm3, %v1311_v56, %v1313_v46  ;;  %v5016_v47 = vpop.f32.mrf.mxu1 }
 0x151   : > { %v6214_v18 = vadd.f32 %v1314_v52, %v996_v25  ;;  %v1183_v27 = vpop.f32.mrf.mxu0 }
 0x152   : > { %v805_v37 = vpop.f32.mrf.mxu1 }
 0x153   : > { %v5061_v2 = vpop.f32.mrf.mxu0  ;;  %5300 = vmatmul.mubr.msk.bf16.gmra.mxu0 %vm335_vm1, %v5459_v0  ;;  %v5463_v0 = vld [vmem:[%s5535_s23 + $0x38] sm:$0xff]  }
 0x154   : > { %v5067_v51 = vpop.f32.mrf.mxu1  ;;  %5258 = vmatmul.mubr.msk.bf16.gmra.mxu1 %vm335_vm1, %v5461_v43  ;;  %5303 = vmatprep.mubr.msk.bf16.mxu0 %vm335_vm1, %v5460_v31  ;;  %v5464_v31 = vld [vmem:[%s5535_s23 + $0x40] sm:$0xff]  }
 0x155   : > { %v1193_v3 = vpop.f32.mrf.mxu0  ;;  %5261 = vmatprep.mubr.msk.bf16.mxu1 %vm335_vm1, %v5462_v24  ;;  %v1631_v49 = vrot.slane %v5067_v51, 2 }
 0x156   : > { %v1426_v56 = vpop.f32.mrf.mxu1 }
 0x157   : > { %v5062_v36 = vpop.f32.mrf.mxu0 }
 0x158   : > { %v5068_v7 = vpop.f32.mrf.mxu1 }
 0x159   : > { %v1632_v63 = vrot.slane %v5068_v7, 2  ;;  %v1195_v28 = vpop.f32.mrf.mxu0 }
 0x15a   : > { %v1428_v17 = vpop.f32.mrf.mxu1 }
 0x15b   : > { %v1633_v39 = vsel %vm1241_vm3, %v1631_v49, %v1632_v63  ;;  %v5113_v30 = vpop.f32.mrf.mxu0  ;;  %5304 = vmatmul.mubr.msk.bf16.gmra.mxu0 %vm335_vm1, %v5461_v43 }
 0x15c   : > { %v1740_v58 = vadd.f32 %v1633_v39, %v5990_v6  ;;  %v5071_v4 = vpop.f32.mrf.mxu1  ;;  %5262 = vmatmul.mubr.msk.bf16.gmra.mxu1 %vm335_vm1, %v5463_v0  ;;  %5307 = vmatprep.mubr.msk.bf16.mxu0 %vm335_vm1, %v5462_v24  ;;  %v2021_v1 = vrot.slane %v5113_v30, 3  ;;  %v5466_v39 = vld [vmem:[%s5535_s23 + $0x50] sm:$0xff]  }
 0x15d   : > { %v1815_v45 = vpop.f32.mrf.mxu0  ;;  %5265 = vmatprep.mubr.msk.bf16.mxu1 %vm335_vm1, %v5464_v31  ;;  %v1638_v46 = vrot.slane %v5071_v4, 2 }
 0x15e   : > { %v1440_v41 = vpop.f32.mrf.mxu1 }
 0x15f   : > { %v1634_v19 = vrot.slane %v1440_v41, 2  ;;  %v5114_v25 = vpop.f32.mrf.mxu0 }
 0x160   : > { %v5072_v52 = vpop.f32.mrf.mxu1  ;;  %v2022_v47 = vrot.slane %v5114_v25, 3 }
 0x161   : > { %v1635_v6 = vsel %vm1241_vm3, %v1632_v63, %v1634_v19  ;;  %v1640_v27 = vrot.slane %v5072_v52, 2  ;;  %v1817_v37 = vpop.f32.mrf.mxu0  ;;  %v5465_v63 = vld [vmem:[%s5535_s23 + $0x48] sm:$0xff]  }
 0x162   : > { %v1741_v2 = vadd.f32 %v1635_v6, %v5992_v22  ;;  %v2023_v51 = vsel %vm2020_vm4, %v2021_v1, %v2022_v47  ;;  %v1443_v43 = vpop.f32.mrf.mxu1 }
 0x163   : > { %v1641_v3 = vsel %vm1241_vm3, %v1638_v46, %v1640_v27  ;;  %v6234_v24 = vadd.f32 %v2023_v51, %v1740_v58  ;;  %v1636_v56 = vrot.slane %v1443_v43, 2  ;;  %v5117_v49 = vpop.f32.mrf.mxu0  ;;  %5308 = vmatmul.mubr.msk.bf16.gmra.mxu0 %vm335_vm1, %v5463_v0 }
 0x164   : > { %v1744_v36 = vadd.f32 %v1641_v3, %v6018_v40  ;;  %v5075_v7 = vpop.f32.mrf.mxu1  ;;  %5266 = vmatmul.mubr.msk.bf16.gmra.mxu1 %vm335_vm1, %v5465_v63  ;;  %5311 = vmatprep.mubr.msk.bf16.mxu0 %vm335_vm1, %v5464_v31  ;;  %v2028_v25 = vrot.slane %v5117_v49, 3 }
 0x165   : > { %v1637_v22 = vsel %vm1241_vm3, %v1634_v19, %v1636_v56  ;;  %v1639_v28 = vsel %vm1241_vm3, %v1636_v56, %v1638_v46  ;;  %v1829_v17 = vpop.f32.mrf.mxu0  ;;  %5269 = vmatprep.mubr.msk.bf16.mxu1 %vm335_vm1, %v5466_v39  ;;  %v1646_v0 = vrot.slane %v5075_v7, 2 }
 0x166   : > { %v1742_v30 = vadd.f32 %v1637_v22, %v5977_v59  ;;  %v1743_v58 = vadd.f32 %v1639_v28, %v6000_v44  ;;  %v1456_v4 = vpop.f32.mrf.mxu1  ;;  %v2024_v40 = vrot.slane %v1829_v17, 3  ;;  %v5467_v22 = vld [vmem:[%s5535_s23 + $0x58] sm:$0xff]  }
 0x167   : > { %v1642_v45 = vrot.slane %v1456_v4, 2  ;;  %v5118_v41 = vpop.f32.mrf.mxu0 }
 0x168   : > { %v2025_v31 = vsel %vm2020_vm4, %v2022_v47, %v2024_v40  ;;  %v5076_v1 = vpop.f32.mrf.mxu1  ;;  %v2030_v19 = vrot.slane %v5118_v41, 3 }
 0x169   : > { %v1643_v46 = vsel %vm1241_vm3, %v1640_v27, %v1642_v45  ;;  %v6249_v52 = vadd.f32 %v2025_v31, %v1741_v2  ;;  %v1648_v6 = vrot.slane %v5076_v1, 2  ;;  %v1832_v37 = vpop.f32.mrf.mxu0 }
 0x16a   : > { %v1745_v59 = vadd.f32 %v1643_v46, %v6020_v26  ;;  %v2031_v44 = vsel %vm2020_vm4, %v2028_v25, %v2030_v19  ;;  %v1459_v51 = vpop.f32.mrf.mxu1  ;;  %v2026_v43 = vrot.slane %v1832_v37, 3 }
 0x16b   : > { %v1649_v3 = vsel %vm1241_vm3, %v1646_v0, %v1648_v6  ;;  %v6254_v56 = vadd.f32 %v2031_v44, %v1744_v36  ;;  %v1644_v47 = vrot.slane %v1459_v51, 2  ;;  %v5121_v49 = vpop.f32.mrf.mxu0  ;;  %5312 = vmatmul.mubr.msk.bf16.gmra.mxu0 %vm335_vm1, %v5465_v63 }
 0x16c   : > { %v1748_v27 = vadd.f32 %v1649_v3, %v6046_v54  ;;  %v2027_v2 = vsel %vm2020_vm4, %v2024_v40, %v2026_v43  ;;  %v2029_v7 = vsel %vm2020_vm4, %v2026_v43, %v2028_v25  ;;  %v5079_v26 = vpop.f32.mrf.mxu1  ;;  %5270 = vmatmul.mubr.msk.bf16.gmra.mxu1 %vm335_vm1, %v5467_v22  ;;  %5315 = vmatprep.mubr.msk.bf16.mxu0 %vm335_vm1, %v5466_v39  ;;  %v5468_v54 = vld [vmem:[%s5535_s23 + $0x60] sm:$0xff]  }
 0x16d   : > { %v1645_v36 = vsel %vm1241_vm3, %v1642_v45, %v1644_v47  ;;  %v1647_v28 = vsel %vm1241_vm3, %v1644_v47, %v1646_v0  ;;  %v6265_v17 = vadd.f32 %v2027_v2, %v1742_v30  ;;  %v6267_v4 = vadd.f32 %v2029_v7, %v1743_v58  ;;  %v1845_v63 = vpop.f32.mrf.mxu0  ;;  %5273 = vmatprep.mubr.msk.bf16.mxu1 %vm335_vm1, %v5468_v54 }
 0x16e   : > { %v1746_v40 = vadd.f32 %v1645_v36, %v6005_v16  ;;  %v1747_v41 = vadd.f32 %v1647_v28, %v6028_v42  ;;  %v1472_v25 = vpop.f32.mrf.mxu1  ;;  %v2032_v31 = vrot.slane %v1845_v63, 3  ;;  %v1654_v1 = vrot.slane %v5079_v26, 2  ;;  %v5469_v36 = vld [vmem:[%s5535_s23 + $0x68] sm:$0xff]  }
 0x16f   : > { %v1650_v39 = vrot.slane %v1472_v25, 2  ;;  %v5122_v46 = vpop.f32.mrf.mxu0  ;;  %v2036_v45 = vrot.slane %v5121_v49, 3 }
 0x170   : > { %v2033_v0 = vsel %vm2020_vm4, %v2030_v19, %v2032_v31  ;;  %v5080_v30 = vpop.f32.mrf.mxu1  ;;  %v2038_v37 = vrot.slane %v5122_v46, 3 }
 0x171   : > { %v1651_v58 = vsel %vm1241_vm3, %v1648_v6, %v1650_v39  ;;  %v6275_v44 = vadd.f32 %v2033_v0, %v1745_v59  ;;  %v1656_v51 = vrot.slane %v5080_v30, 2  ;;  %v1848_v43 = vpop.f32.mrf.mxu0 }
 0x172   : > { %v1749_v16 = vadd.f32 %v1651_v58, %v6048_v29  ;;  %v2039_v42 = vsel %vm2020_vm4, %v2036_v45, %v2038_v37  ;;  %v1475_v3 = vpop.f32.mrf.mxu1  ;;  %v2034_v47 = vrot.slane %v1848_v43, 3 }
 0x173   : > { %v1657_v2 = vsel %vm1241_vm3, %v1654_v1, %v1656_v51  ;;  %v6280_v49 = vadd.f32 %v2039_v42, %v1748_v27  ;;  %v1652_v19 = vrot.slane %v1475_v3, 2  ;;  %v5125_v7 = vpop.f32.mrf.mxu0  ;;  %5316 = vmatmul.mubr.msk.bf16.gmra.mxu0 %vm335_vm1, %v5467_v22 }
 0x174   : > { %v1752_v6 = vadd.f32 %v1657_v2, %v6074_v53  ;;  %v2035_v59 = vsel %vm2020_vm4, %v2032_v31, %v2034_v47  ;;  %v2037_v26 = vsel %vm2020_vm4, %v2034_v47, %v2036_v45  ;;  %v5083_v29 = vpop.f32.mrf.mxu1  ;;  %5274 = vmatmul.mubr.msk.bf16.gmra.mxu1 %vm335_vm1, %v5469_v36  ;;  %5319 = vmatprep.mubr.msk.bf16.mxu0 %vm335_vm1, %v5468_v54  ;;  %v5470_v53 = vld [vmem:[%s5535_s23 + $0x70] sm:$0xff]  }
 0x175   : > { %v1653_v27 = vsel %vm1241_vm3, %v1650_v39, %v1652_v19  ;;  %v1655_v28 = vsel %vm1241_vm3, %v1652_v19, %v1654_v1  ;;  %v6291_v63 = vadd.f32 %v2035_v59, %v1746_v40  ;;  %v6293_v25 = vadd.f32 %v2037_v26, %v1747_v41  ;;  %v1861_v22 = vpop.f32.mrf.mxu0  ;;  %5277 = vmatprep.mubr.msk.bf16.mxu1 %vm335_vm1, %v5470_v53 }
 0x176   : > { %v1750_v31 = vadd.f32 %v1653_v27, %v6033_v50  ;;  %v1751_v46 = vadd.f32 %v1655_v28, %v6056_v14  ;;  %v1488_v45 = vpop.f32.mrf.mxu1  ;;  %v2040_v0 = vrot.slane %v1861_v22, 3  ;;  %v1662_v30 = vrot.slane %v5083_v29, 2  ;;  %v5471_v27 = vld [vmem:[%s5535_s23 + $0x78] sm:$0xff]  }
 0x177   : > { %v1658_v54 = vrot.slane %v1488_v45, 2  ;;  %v5126_v58 = vpop.f32.mrf.mxu0  ;;  %v2044_v39 = vrot.slane %v5125_v7, 3 }
 0x178   : > { %v2041_v1 = vsel %vm2020_vm4, %v2038_v37, %v2040_v0  ;;  %v5084_v40 = vpop.f32.mrf.mxu1  ;;  %v2046_v43 = vrot.slane %v5126_v58, 3 }
 0x179   : > { %v1659_v41 = vsel %vm1241_vm3, %v1656_v51, %v1658_v54  ;;  %v6301_v42 = vadd.f32 %v2041_v1, %v1749_v16  ;;  %v1664_v3 = vrot.slane %v5084_v40, 2  ;;  %v1864_v47 = vpop.f32.mrf.mxu0 }
 0x17a   : > { %v1753_v50 = vadd.f32 %v1659_v41, %v6076_v9  ;;  %v2047_v14 = vsel %vm2020_vm4, %v2044_v39, %v2046_v43  ;;  %v1491_v2 = vpop.f32.mrf.mxu1  ;;  %v2042_v19 = vrot.slane %v1864_v47, 3 }
 0x17b   : > { %v1665_v59 = vsel %vm1241_vm3, %v1662_v30, %v1664_v3  ;;  %v6306_v7 = vadd.f32 %v2047_v14, %v1752_v6  ;;  %v1660_v37 = vrot.slane %v1491_v2, 2  ;;  %v5129_v26 = vpop.f32.mrf.mxu0  ;;  %5320 = vmatmul.mubr.msk.bf16.gmra.mxu0 %vm335_vm1, %v5469_v36 }
 0x17c   : > { %v1756_v51 = vadd.f32 %v1665_v59, %v6102_v57  ;;  %v2043_v16 = vsel %vm2020_vm4, %v2040_v0, %v2042_v19  ;;  %v2045_v29 = vsel %vm2020_vm4, %v2042_v19, %v2044_v39  ;;  %v5087_v9 = vpop.f32.mrf.mxu1  ;;  %5278 = vmatmul.mubr.msk.bf16.gmra.mxu1 %vm335_vm1, %v5471_v27  ;;  %5323 = vmatprep.mubr.msk.bf16.mxu0 %vm335_vm1, %v5470_v53  ;;  %v5472_v57 = vld [vmem:[%s5535_s23 + $0x80] sm:$0xff]  }
 0x17d   : > { %v1661_v6 = vsel %vm1241_vm3, %v1658_v54, %v1660_v37  ;;  %v1663_v28 = vsel %vm1241_vm3, %v1660_v37, %v1662_v30  ;;  %v6317_v22 = vadd.f32 %v2043_v16, %v1750_v31  ;;  %v6319_v45 = vadd.f32 %v2045_v29, %v1751_v46  ;;  %v1877_v36 = vpop.f32.mrf.mxu0  ;;  %5281 = vmatprep.mubr.msk.bf16.mxu1 %vm335_vm1, %v5472_v57 }
 0x17e   : > { %v1754_v0 = vadd.f32 %v1661_v6, %v6061_v48  ;;  %v1755_v58 = vadd.f32 %v1663_v28, %v6084_v10  ;;  %v1504_v39 = vpop.f32.mrf.mxu1  ;;  %v2048_v1 = vrot.slane %v1877_v36, 3  ;;  %v1670_v40 = vrot.slane %v5087_v9, 2  ;;  %v5473_v6 = vld [vmem:[%s5535_s23 + $0x88] sm:$0xff]  }
 0x17f   : > { %v1666_v53 = vrot.slane %v1504_v39, 2  ;;  %v5130_v41 = vpop.f32.mrf.mxu0  ;;  %v2052_v54 = vrot.slane %v5129_v26, 3 }
 0x180   : > { %v2049_v30 = vsel %vm2020_vm4, %v2046_v43, %v2048_v1  ;;  %v5088_v31 = vpop.f32.mrf.mxu1  ;;  %v2054_v47 = vrot.slane %v5130_v41, 3 }
 0x181   : > { %v1667_v46 = vsel %vm1241_vm3, %v1664_v3, %v1666_v53  ;;  %v6327_v14 = vadd.f32 %v2049_v30, %v1753_v50  ;;  %v1672_v2 = vrot.slane %v5088_v31, 2  ;;  %v1880_v19 = vpop.f32.mrf.mxu0 }
 0x182   : > { %v1757_v48 = vadd.f32 %v1667_v46, %v6104_v15  ;;  %v2055_v10 = vsel %vm2020_vm4, %v2052_v54, %v2054_v47  ;;  %v1507_v59 = vpop.f32.mrf.mxu1  ;;  %v2050_v37 = vrot.slane %v1880_v19, 3 }
 0x183   : > { %v1673_v16 = vsel %vm1241_vm3, %v1670_v40, %v1672_v2  ;;  %v6332_v26 = vadd.f32 %v2055_v10, %v1756_v51  ;;  %v1668_v43 = vrot.slane %v1507_v59, 2  ;;  %v5133_v29 = vpop.f32.mrf.mxu0  ;;  %5324 = vmatmul.mubr.msk.bf16.gmra.mxu0 %vm335_vm1, %v5471_v27 }
 0x184   : > { %v1760_v3 = vadd.f32 %v1673_v16, %v6129_v55  ;;  %v2051_v50 = vsel %vm2020_vm4, %v2048_v1, %v2050_v37  ;;  %v2053_v9 = vsel %vm2020_vm4, %v2050_v37, %v2052_v54  ;;  %v5091_v15 = vpop.f32.mrf.mxu1  ;;  %5282 = vmatmul.mubr.msk.bf16.gmra.mxu1 %vm335_vm1, %v5473_v6  ;;  %5327 = vmatprep.mubr.msk.bf16.mxu0 %vm335_vm1, %v5472_v57  ;;  %v5474_v55 = vld [vmem:[%s5535_s23 + $0x90] sm:$0xff]  }
 0x185   : > { %v1669_v51 = vsel %vm1241_vm3, %v1666_v53, %v1668_v43  ;;  %v1671_v28 = vsel %vm1241_vm3, %v1668_v43, %v1670_v40  ;;  %v6343_v36 = vadd.f32 %v2051_v50, %v1754_v0  ;;  %v6345_v39 = vadd.f32 %v2053_v9, %v1755_v58  ;;  %v1893_v27 = vpop.f32.mrf.mxu0  ;;  %5285 = vmatprep.mubr.msk.bf16.mxu1 %vm335_vm1, %v5474_v55 }
 0x186   : > { %v1758_v1 = vadd.f32 %v1669_v51, %v6089_v20  ;;  %v1759_v41 = vadd.f32 %v1671_v28, %v6112_v5  ;;  %v1520_v54 = vpop.f32.mrf.mxu1  ;;  %v2056_v30 = vrot.slane %v1893_v27, 3  ;;  %v1678_v31 = vrot.slane %v5091_v15, 2  ;;  %v5475_v27 = vld [vmem:[%s5535_s23 + $0x98] sm:$0xff]  }
 0x187   : > { %v1674_v57 = vrot.slane %v1520_v54, 2  ;;  %v5134_v46 = vpop.f32.mrf.mxu0  ;;  %v2060_v53 = vrot.slane %v5133_v29, 3  ;;  %v3768_v58 = vlaneseq }
 0x188   : > { %v2057_v40 = vsel %vm2020_vm4, %v2054_v47, %v2056_v30  ;;  %v5092_v0 = vpop.f32.mrf.mxu1  ;;  %v2062_v19 = vrot.slane %v5134_v46, 3 }
 0x189   : > { %v1675_v10 = vsel %vm1241_vm3, %v1672_v2, %v1674_v57  ;;  %v6353_v59 = vadd.f32 %v2057_v40, %v1757_v48  ;;  %v1680_v37 = vrot.slane %v5092_v0, 2  ;;  %v1896_v20 = vpop.f32.mrf.mxu0  ;;  %v6361_v2 = vshrl.u32 %v3768_v58, 7 }
 0x18a   : > { %v1761_v5 = vadd.f32 %v1675_v10, %v6131_v60  ;;  %v2063_v16 = vsel %vm2020_vm4, %v2060_v53, %v2062_v19  ;;  %v1523_v43 = vpop.f32.mrf.mxu1  ;;  %v2058_v50 = vrot.slane %v1896_v20, 3 }
 0x18b   : > { %v1681_v29 = vsel %vm1241_vm3, %v1678_v31, %v1680_v37  ;;  %v6358_v9 = vadd.f32 %v2063_v16, %v1760_v3  ;;  %v1676_v47 = vrot.slane %v1523_v43, 2  ;;  %v5137_v15 = vpop.f32.mrf.mxu0  ;;  %5328 = vmatmul.mubr.msk.bf16.gmra.mxu0 %vm335_vm1, %v5473_v6  ;;  %7584 = vst [vmem:[#allocation2_spill] sm:$0xff] %v6361_v2  ;;  %v6384_v43 = vadd.s32 8, %v6361_v2 }
 0x18c   : > { %v1764_v48 = vadd.f32 %v1681_v29, %v6156_v35  ;;  %v2059_v51 = vsel %vm2020_vm4, %v2056_v30, %v2058_v50  ;;  %v2061_v60 = vsel %vm2020_vm4, %v2058_v50, %v2060_v53  ;;  %v5095_v28 = vpop.f32.mrf.mxu1  ;;  %5286 = vmatmul.mubr.msk.bf16.gmra.mxu1 %vm335_vm1, %v5475_v27  ;;  %5331 = vmatprep.mubr.msk.bf16.mxu0 %vm335_vm1, %v5474_v55  ;;  %v5476_v35 = vld [vmem:[%s5535_s23 + $0xa0] sm:$0xff]  }
 0x18d   : > { %v1677_v3 = vsel %vm1241_vm3, %v1674_v57, %v1676_v47  ;;  %v1679_v54 = vsel %vm1241_vm3, %v1676_v47, %v1678_v31  ;;  %v6371_v46 = vadd.f32 %v2059_v51, %v1758_v1  ;;  %v6373_v6 = vadd.f32 %v2061_v60, %v1759_v41  ;;  %v1909_v40 = vpop.f32.mrf.mxu0  ;;  %5289 = vmatprep.mubr.msk.bf16.mxu1 %vm335_vm1, %v5476_v35 }
 0x18e   : > { %v1762_v30 = vadd.f32 %v1677_v3, %v6117_v8  ;;  %v1763_v53 = vadd.f32 %v1679_v54, %v6138_v62  ;;  %v1536_v0 = vpop.f32.mrf.mxu1  ;;  %v2064_v58 = vrot.slane %v1909_v40, 3  ;;  %v1686_v10 = vrot.slane %v5095_v28, 2 }
 0x18f   : > { %7585 = vst [vmem:[#allocation3_spill] sm:$0xff] %v6373_v6  ;;  %v1682_v55 = vrot.slane %v1536_v0, 2  ;;  %v5138_v20 = vpop.f32.mrf.mxu0  ;;  %v6380_v57 = vadd.s32 16, %v6361_v2  ;;  %v2068_v1 = vrot.slane %v5137_v15, 3  ;;  %v3805_v28 = vcvt.s32.f32 %v6361_v2 }
 0x190   : > { %v2065_v41 = vsel %vm2020_vm4, %v2062_v19, %v2064_v58  ;;  %v5096_v31 = vpop.f32.mrf.mxu1  ;;  %v2070_v16 = vrot.slane %v5138_v20, 3 }
 0x191   : > { %v1683_v8 = vsel %vm1241_vm3, %v1680_v37, %v1682_v55  ;;  %v6387_v50 = vadd.f32 %v2065_v41, %v1761_v5  ;;  %v1688_v62 = vrot.slane %v5096_v31, 2  ;;  %v1912_v29 = vpop.f32.mrf.mxu0  ;;  %v3807_v47 = vcvt.s32.f32 %v6380_v57  ;;  %v5477_v31 = vld [vmem:[%s5535_s23 + $0xa8] ss:$0 sps:$4 sm:$0x77]  }
 0x192   : > { %v1765_v51 = vadd.f32 %v1683_v8, %v6158_v34  ;;  %v2071_v15 = vsel %vm2020_vm4, %v2068_v1, %v2070_v16  ;;  %v1539_v60 = vpop.f32.mrf.mxu1  ;;  %v2066_v19 = vrot.slane %v1912_v29, 3  ;;  %v3841_v6 = vadd.f32 0.5, %v3805_v28 }
 0x193   : > { %7586 = vst [vmem:[#allocation5_spill] sm:$0xff] %v6387_v50  ;;  %v1689_v3 = vsel %vm1241_vm3, %v1686_v10, %v1688_v62  ;;  %v6394_v54 = vadd.f32 %v2071_v15, %v1764_v48  ;;  %v1684_v37 = vrot.slane %v1539_v60, 2  ;;  %v5141_v5 = vpop.f32.mrf.mxu0  ;;  %5332 = vmatmul.mubr.msk.bf16.gmra.mxu0 %vm335_vm1, %v5475_v27  ;;  %v3843_v40 = vadd.f32 0.5, %v3807_v47 }
 0x194   : > { %v1768_v0 = vadd.f32 %v1689_v3, %v6183_v38  ;;  %v2067_v20 = vsel %vm2020_vm4, %v2064_v58, %v2066_v19  ;;  %v2069_v34 = vsel %vm2020_vm4, %v2066_v19, %v2068_v1  ;;  %v5099_v41 = vpop.f32.mrf.mxu1  ;;  %5290 = vmatmul.mubr.msk.bf16.gmra.mxu1 %vm335_vm1, %v5477_v31  ;;  %5335 = vmatprep.mubr.msk.bf16.mxu0 %vm335_vm1, %v5476_v35  ;;  %v3806_v48 = vcvt.s32.f32 %v6384_v43 }
 0x195   : > { %7587 = vst [vmem:[#allocation4_spill] sm:$0xff] %v6394_v54  ;;  %v1685_v8 = vsel %vm1241_vm3, %v1682_v55, %v1684_v37  ;;  %v1687_v29 = vsel %vm1241_vm3, %v1684_v37, %v1686_v10  ;;  %v6406_v27 = vadd.f32 %v2067_v20, %v1762_v30  ;;  %v6408_v47 = vadd.f32 %v2069_v34, %v1763_v53  ;;  %v1925_v38 = vpop.f32.mrf.mxu0 }
 0x196   : > { %v1766_v58 = vadd.f32 %v1685_v8, %v6144_v11  ;;  %v1767_v1 = vadd.f32 %v1687_v29, %v6166_v21  ;;  %v2076_v15 = vrot.slane %v5141_v5, 3  ;;  %v1552_v60 = vpop.f32.mrf.mxu1  ;;  %v2072_v19 = vrot.slane %v1925_v38, 3 }
 0x197   : > { %v1694_v3 = vrot.slane %v5099_v41, 2  ;;  %v1690_v35 = vrot.slane %v1552_v60, 2  ;;  %v5142_v54 = vpop.f32.mrf.mxu0  ;;  %v3879_v50 = vmul.f32 0.055555556, %v3843_v40  ;;  %v3842_v37 = vadd.f32 0.5, %v3806_v48 }
 0x198   : > { %v2073_v55 = vsel %vm2020_vm4, %v2070_v16, %v2072_v19  ;;  %v5100_v10 = vpop.f32.mrf.mxu1  ;;  %v2078_v30 = vrot.slane %v5142_v54, 3  ;;  %v6414_v53 = vadd.s32 24, %v6361_v2  ;;  %v6422_v54 = vadd.s32 48, %v6361_v2 }
 0x199   : > { %v1691_v11 = vsel %vm1241_vm3, %v1688_v62, %v1690_v35  ;;  %v6417_v21 = vadd.f32 %v2073_v55, %v1765_v51  ;;  %v1696_v5 = vrot.slane %v5100_v10, 2  ;;  %v1928_v20 = vpop.f32.mrf.mxu0  ;;  %v5357_v34 = vtrunc.f32 %v3879_v50 }
 0x19a   : > { %v1769_v41 = vadd.f32 %v1691_v11, %v6185_v23  ;;  %v2079_v28 = vsel %vm2020_vm4, %v2076_v15, %v2078_v30  ;;  %v1555_v40 = vpop.f32.mrf.mxu1  ;;  %v2074_v16 = vrot.slane %v1928_v20, 3  ;;  %v3877_v55 = vmul.f32 0.055555556, %v3841_v6 }
 0x19b   : > { %v1697_v48 = vsel %vm1241_vm3, %v1694_v3, %v1696_v5  ;;  %v6425_v8 = vadd.f32 %v2079_v28, %v1768_v0  ;;  %v1692_v29 = vrot.slane %v1555_v40, 2  ;;  %v5145_v62 = vpop.f32.mrf.mxu0  ;;  %5336 = vmatmul.mubr.msk.bf16.gmra.mxu0 %vm335_vm1, %v5477_v31  ;;  %v5358_v51 = vcvt.f32.s32 %v5357_v34 }
 0x19c   : > { %v1772_v50 = vadd.f32 %v1697_v48, %v6206_v61  ;;  %v2075_v23 = vsel %vm2020_vm4, %v2072_v19, %v2074_v16  ;;  %v2077_v38 = vsel %vm2020_vm4, %v2074_v16, %v2076_v15  ;;  %v5103_v60 = vpop.f32.mrf.mxu1  ;;  %v2084_v61 = vrot.slane %v5145_v62, 3 }
 0x19d   : > { %v1693_v10 = vsel %vm1241_vm3, %v1690_v35, %v1692_v29  ;;  %v1695_v11 = vsel %vm1241_vm3, %v1692_v29, %v1694_v3  ;;  %v6434_v0 = vadd.f32 %v2075_v23, %v1766_v58  ;;  %v6436_v20 = vadd.f32 %v2077_v38, %v1767_v1  ;;  %v1941_v28 = vpop.f32.mrf.mxu0 }
 0x19e   : > { %v1770_v31 = vadd.f32 %v1693_v10, %v6172_v32  ;;  %v1771_v34 = vadd.f32 %v1695_v11, %v6193_v13  ;;  %v1568_v40 = vpop.f32.mrf.mxu1  ;;  %v2080_v19 = vrot.slane %v1941_v28, 3  ;;  %v3951_v6 = vmul.u32 18, %v5358_v51 }
 0x19f   : > { %v1698_v48 = vrot.slane %v1568_v40, 2  ;;  %v5146_v15 = vpop.f32.mrf.mxu0  ;;  %v7554_v1 = vmov 0.0   ;;  %v3878_v3 = vmul.f32 0.055555556, %v3842_v37  ;;  %v5353_v35 = vtrunc.f32 %v3877_v55 }
 0x1a0   : > { %v2081_v32 = vsel %vm2020_vm4, %v2078_v30, %v2080_v19  ;;  %v5104_v13 = vpop.f32.mrf.mxu1  ;;  %v2086_v58 = vrot.slane %v5146_v15, 3  ;;  %3725 = vst.msk [vmem:[%s6443_s14] sm:$0xff] %vm3724_vm5, %v7554_v1  ;;  %3726 = vst.msk [vmem:[%s6443_s14 + $0x8] sm:$0xff] %vm3724_vm5, %v7554_v1  ;;  %v1702_v30 = vrot.slane %v5103_v60, 2  ;;  %v3987_v51 = vsub.s32 %v6380_v57, %v3951_v6 }
 0x1a1   : > { %3727 = vst.msk [vmem:[%s6443_s14 + $0x10] sm:$0xff] %vm3724_vm5, %v7554_v1  ;;  %3764 = vst.msk [vmem:[%s6443_s14 + $0x138] sm:$0xff] %vm3724_vm5, %v7554_v1  ;;  %v1699_v16 = vsel %vm1241_vm3, %v1696_v5, %v1698_v48  ;;  %v6462_v29 = vadd.f32 %v2081_v32, %v1769_v41  ;;  %v1944_v62 = vpop.f32.mrf.mxu0  ;;  %v3808_v28 = vcvt.s32.f32 %v6414_v53  ;;  %v5354_v60 = vcvt.f32.s32 %v5353_v35 }
 0x1a2   : > { %3765 = vst.msk [vmem:[%s6443_s14 + $0x140] sm:$0xff] %vm3724_vm5, %v7554_v1  ;;  %v1773_v23 = vadd.f32 %v1699_v16, %v6208_v12  ;;  %v2087_v38 = vsel %vm2020_vm4, %v2084_v61, %v2086_v58  ;;  %v1571_v10 = vpop.f32.mrf.mxu1  ;;  %v2082_v11 = vrot.slane %v1944_v62, 3  ;;  %v5355_v15 = vtrunc.f32 %v3878_v3 }
 0x1a3   : > { %v6468_v40 = vadd.f32 %v2087_v38, %v1772_v50  ;;  %v1700_v37 = vrot.slane %v1571_v10, 2  ;;  %v5149_v55 = vpop.f32.mrf.mxu0  ;;  %vm4023_vm6 = vcmp.lt.s32.totalorder %v3987_v51, 16  ;;  %v3949_v10 = vmul.u32 18, %v5354_v60 }
 0x1a4   : > { %v2083_v5 = vsel %vm2020_vm4, %v2080_v19, %v2082_v11  ;;  %v2085_v41 = vsel %vm2020_vm4, %v2082_v11, %v2084_v61  ;;  %v5107_v32 = vpop.f32.mrf.mxu1  ;;  %v2092_v57 = vrot.slane %v5149_v55, 3  ;;  %v5356_v38 = vcvt.f32.s32 %v5355_v15 }
 0x1a5   : > { %v1701_v12 = vsel %vm1241_vm3, %v1698_v48, %v1700_v37  ;;  %v1703_v6 = vsel %vm1241_vm3, %v1700_v37, %v1702_v30  ;;  %v6474_v13 = vadd.f32 %v2083_v5, %v1770_v31  ;;  %v6476_v16 = vadd.f32 %v2085_v41, %v1771_v34  ;;  %v1957_v50 = vpop.f32.mrf.mxu0 }
 0x1a6   : > { %v1774_v62 = vadd.f32 %v1701_v12, %v6198_v33  ;;  %v1775_v3 = vadd.f32 %v1703_v6, %v6214_v18  ;;  %v1583_v35 = vpop.f32.mrf.mxu1  ;;  %v2088_v19 = vrot.slane %v1957_v50, 3  ;;  %v3844_v11 = vadd.f32 0.5, %v3808_v28 }
 0x1a7   : > { %v5150_v61 = vpop.f32.mrf.mxu0  ;;  %v3811_v55 = vcvt.s32.f32 %v6422_v54  ;;  %v6482_v48 = vadd.s32 32, %v6361_v2  ;;  %v3950_v30 = vmul.u32 18, %v5356_v38  ;;  %v6486_v33 = vadd.s32 40, %v6361_v2 }
 0x1a8   : > { %v2089_v31 = vsel %vm2020_vm4, %v2086_v58, %v2088_v19  ;;  %v5108_v34 = vpop.f32.mrf.mxu1  ;;  %v6489_v18 = vadd.s32 56, %v6361_v2  ;;  %v3985_v28 = vsub.s32 %v6361_v2, %v3949_v10  ;;  %v3880_v15 = vmul.f32 0.055555556, %v3844_v11 }
 0x1a9   : > { %v6491_v37 = vadd.f32 %v2089_v31, %v1773_v23  ;;  %v1960_v60 = vpop.f32.mrf.mxu0  ;;  %v3847_v5 = vadd.f32 0.5, %v3811_v55  ;;  %v3986_v58 = vsub.s32 %v6384_v43, %v3950_v30  ;;  %v3809_v12 = vcvt.s32.f32 %v6482_v48 }
 0x1aa   : > { %v1585_v41 = vpop.f32.mrf.mxu1  ;;  %v2090_v32 = vrot.slane %v1960_v60, 3  ;;  %v3810_v6 = vcvt.s32.f32 %v6486_v33  ;;  %vm4021_vm8 = vcmp.lt.s32.totalorder %v3985_v28, 16  ;;  %v5359_v35 = vtrunc.f32 %v3880_v15 }
 0x1ab   : > { %v5153_v50 = vpop.f32.mrf.mxu0  ;;  %v3883_v38 = vmul.f32 0.055555556, %v3847_v5  ;;  %v3812_v23 = vcvt.s32.f32 %v6489_v18  ;;  %v6502_v55 = vsel %vm4023_vm6, 1.0, %v7554_v1  ;;  %vm4022_vm9 = vcmp.lt.s32.totalorder %v3986_v58, 16 }
 0x1ac   : > { %v2091_v61 = vsel %vm2020_vm4, %v2088_v19, %v2090_v32  ;;  %v2093_v10 = vsel %vm2020_vm4, %v2090_v32, %v2092_v57  ;;  %v5159_v11 = vpop.f32.mrf.mxu1  ;;  %7588 = vst [vmem:[#allocation6_spill] sm:$0xff] %v6502_v55  ;;  %v6509_v60 = vsel %vm4021_vm8, 1.0, %v7554_v1  ;;  %v5360_v15 = vcvt.f32.s32 %v5359_v35 }
 0x1ad   : > { %v6504_v43 = vadd.f32 %v2091_v61, %v1774_v62  ;;  %v6506_v31 = vadd.f32 %v2093_v10, %v1775_v3  ;;  %v2411_v34 = vrot.slane %v5159_v11, 4  ;;  %v1972_v30 = vpop.f32.mrf.mxu0  ;;  %7591 = vst [vmem:[#allocation8_spill] sm:$0xff] %v6509_v60  ;;  %v5365_v19 = vtrunc.f32 %v3883_v38 }
 0x1ae   : > { %v2205_v28 = vpop.f32.mrf.mxu1  ;;  %v3845_v5 = vadd.f32 0.5, %v3809_v12  ;;  %v3846_v57 = vadd.f32 0.5, %v3810_v6  ;;  %v3848_v32 = vadd.f32 0.5, %v3812_v23  ;;  %v6512_v51 = vadd.s32 80, %v6361_v2 }
 0x1af   : > { %7589 = vst [vmem:[#allocation7_spill] sm:$0xff] %v6504_v43  ;;  %7590 = vst [vmem:[#allocation9_spill] sm:$0xff] %v6506_v31  ;;  %v5154_v41 = vpop.f32.mrf.mxu0  ;;  %v6515_v62 = vadd.s32 64, %v6361_v2  ;;  %v6518_v3 = vadd.s32 72, %v6361_v2  ;;  %v3952_v61 = vmul.u32 18, %v5360_v15  ;;  %v5366_v10 = vcvt.f32.s32 %v5365_v19 }
 0x1b0   : > { %v5160_v50 = vpop.f32.mrf.mxu1  ;;  %v3881_v11 = vmul.f32 0.055555556, %v3845_v5  ;;  %v3882_v30 = vmul.f32 0.055555556, %v3846_v57  ;;  %v3884_v12 = vmul.f32 0.055555556, %v3848_v32  ;;  %v3815_v6 = vcvt.s32.f32 %v6512_v51 }
 0x1b1   : > { %v2412_v35 = vrot.slane %v5160_v50, 4  ;;  %v1974_v38 = vpop.f32.mrf.mxu0  ;;  %v3813_v23 = vcvt.s32.f32 %v6515_v62  ;;  %v3988_v41 = vsub.s32 %v6414_v53, %v3952_v61  ;;  %v3955_v1 = vmul.u32 18, %v5366_v10 }
 0x1b2   : > { %v2207_v28 = vpop.f32.mrf.mxu1  ;;  %v5361_v60 = vtrunc.f32 %v3881_v11  ;;  %v5363_v55 = vtrunc.f32 %v3882_v30  ;;  %v5367_v15 = vtrunc.f32 %v3884_v12  ;;  %v3851_v19 = vadd.f32 0.5, %v3815_v6 }
 0x1b3   : > { %v2413_v31 = vsel %vm2410_vm7, %v2411_v34, %v2412_v35  ;;  %v5205_v43 = vpop.f32.mrf.mxu0  ;;  %v3814_v5 = vcvt.s32.f32 %v6518_v3  ;;  %vm4024_vm10 = vcmp.lt.s32.totalorder %v3988_v41, 16  ;;  %v3991_v50 = vsub.s32 %v6422_v54, %v3955_v1 }
 0x1b4   : > { %v6526_v57 = vadd.f32 %v2413_v31, %v6234_v24  ;;  %v5163_v32 = vpop.f32.mrf.mxu1  ;;  %v5362_v38 = vcvt.f32.s32 %v5361_v60  ;;  %v7592_v61 = vmov 0.0   ;;  %v5364_v34 = vcvt.f32.s32 %v5363_v55 }
 0x1b5   : > { %v2418_v28 = vrot.slane %v5163_v32, 4  ;;  %v2595_v53 = vpop.f32.mrf.mxu0  ;;  %v6531_v10 = vsel %vm4022_vm9, 1.0, %v7592_v61  ;;  %v5368_v43 = vcvt.f32.s32 %v5367_v15  ;;  %vm4027_vm11 = vcmp.lt.s32.totalorder %v3991_v50, 16 }
 0x1b6   : > { %v2219_v11 = vpop.f32.mrf.mxu1  ;;  %v3953_v30 = vmul.u32 18, %v5362_v38  ;;  %v3887_v12 = vmul.f32 0.055555556, %v3851_v19  ;;  %v3849_v6 = vadd.f32 0.5, %v3813_v23  ;;  %v6534_v41 = vsel %vm4024_vm10, 1.0, %v7592_v61 }
 0x1b7   : > { %v2414_v24 = vrot.slane %v2219_v11, 4  ;;  %v5206_v31 = vpop.f32.mrf.mxu0  ;;  %7593 = vst [vmem:[#allocation10_spill] sm:$0xff] %v6534_v41  ;;  %v3954_v54 = vmul.u32 18, %v5364_v34  ;;  %v3956_v1 = vmul.u32 18, %v5368_v43  ;;  %v6537_v32 = vsel %vm4027_vm11, 1.0, %v7592_v61 }
 0x1b8   : > { %v5164_v60 = vpop.f32.mrf.mxu1  ;;  %7594 = vst [vmem:[#allocation11_spill] sm:$0xff] %v6537_v32  ;;  %v3989_v58 = vsub.s32 %v6482_v48, %v3953_v30  ;;  %v5373_v55 = vtrunc.f32 %v3887_v12  ;;  %v3850_v15 = vadd.f32 0.5, %v3814_v5  ;;  %v3885_v31 = vmul.f32 0.055555556, %v3849_v6 }
 0x1b9   : > { %v2415_v50 = vsel %vm2410_vm7, %v2412_v35, %v2414_v24  ;;  %v2420_v38 = vrot.slane %v5164_v60, 4  ;;  %v2597_v19 = vpop.f32.mrf.mxu0  ;;  %v3990_v23 = vsub.s32 %v6486_v33, %v3954_v54  ;;  %v3992_v53 = vsub.s32 %v6489_v18, %v3956_v1 }
 0x1ba   : > { %v2521_v11 = vadd.f32 %v2415_v50, %v6249_v52  ;;  %v2222_v34 = vpop.f32.mrf.mxu1  ;;  %vm4025_vm12 = vcmp.lt.s32.totalorder %v3989_v58, 16  ;;  %v5374_v43 = vcvt.f32.s32 %v5373_v55  ;;  %v3886_v5 = vmul.f32 0.055555556, %v3850_v15 }
 0x1bb   : > { %v2421_v32 = vsel %vm2410_vm7, %v2418_v28, %v2420_v38  ;;  %v2416_v41 = vrot.slane %v2222_v34, 4  ;;  %v5209_v48 = vpop.f32.mrf.mxu0  ;;  %vm4026_vm13 = vcmp.lt.s32.totalorder %v3990_v23, 16  ;;  %v6549_v33 = vsel %vm4025_vm12, 1.0, %v7592_v61 }
 0x1bc   : > { %v6546_v35 = vadd.f32 %v2421_v32, %v6254_v56  ;;  %v5167_v30 = vpop.f32.mrf.mxu1  ;;  %v2803_v12 = vrot.slane %v5209_v48, 4  ;;  %7595 = vst [vmem:[#allocation12_spill] sm:$0xff] %v6549_v33  ;;  %vm4028_vm14 = vcmp.lt.s32.totalorder %v3992_v53, 16  ;;  %v6554_v1 = vsel %vm4026_vm13, 1.0, %v7592_v61 }
 0x1bd   : > { %v2417_v52 = vsel %vm2410_vm7, %v2414_v24, %v2416_v41  ;;  %v2419_v18 = vsel %vm2410_vm7, %v2416_v41, %v2418_v28  ;;  %v2426_v6 = vrot.slane %v5167_v30, 4  ;;  %v2607_v54 = vpop.f32.mrf.mxu0  ;;  %7596 = vst [vmem:[#allocation13_spill] sm:$0xff] %v6554_v1  ;;  %v6559_v58 = vsel %vm4028_vm14, 1.0, %v7592_v61 }
 0x1be   : > { %v2522_v60 = vadd.f32 %v2417_v52, %v6265_v17  ;;  %v2523_v56 = vadd.f32 %v2419_v18, %v6267_v4  ;;  %v2235_v32 = vpop.f32.mrf.mxu1  ;;  %7597 = vst [vmem:[#allocation14_spill] sm:$0xff] %v6559_v58  ;;  %v3959_v55 = vmul.u32 18, %v5374_v43  ;;  %v2800_v50 = vrot.slane %v2607_v54, 4 }
 0x1bf   : > { %v2422_v15 = vrot.slane %v2235_v32, 4  ;;  %v5210_v19 = vpop.f32.mrf.mxu0  ;;  %v5369_v24 = vtrunc.f32 %v3885_v31  ;;  %v5371_v23 = vtrunc.f32 %v3886_v5  ;;  %v6563_v34 = vadd.s32 88, %v6361_v2 }
 0x1c0   : > { %v5168_v28 = vpop.f32.mrf.mxu1  ;;  %v2805_v41 = vrot.slane %v5210_v19, 4  ;;  %v3995_v53 = vsub.s32 %v6512_v51, %v3959_v55  ;;  %v6566_v17 = vadd.s32 112, %v6361_v2  ;;  %v6570_v52 = vadd.s32 96, %v6361_v2 }
 0x1c1   : > { %v2423_v4 = vsel %vm2410_vm7, %v2420_v38, %v2422_v15  ;;  %v2428_v48 = vrot.slane %v5168_v28, 4  ;;  %v2610_v30 = vpop.f32.mrf.mxu0  ;;  %v5370_v43 = vcvt.f32.s32 %v5369_v24  ;;  %v5372_v38 = vcvt.f32.s32 %v5371_v23 }
 0x1c2   : > { %v2525_v31 = vadd.f32 %v2423_v4, %v6275_v44  ;;  %v2806_v5 = vsel %vm2410_vm7, %v2803_v12, %v2805_v41  ;;  %v2238_v18 = vpop.f32.mrf.mxu1  ;;  %v2801_v51 = vrot.slane %v2610_v30, 4  ;;  %vm4031_vm15 = vcmp.lt.s32.totalorder %v3995_v53, 16 }
 0x1c3   : > { %v2429_v54 = vsel %vm2410_vm7, %v2426_v6, %v2428_v48  ;;  %v6575_v32 = vadd.f32 %v2806_v5, %v2522_v60  ;;  %v2424_v55 = vrot.slane %v2238_v18, 4  ;;  %v5213_v19 = vpop.f32.mrf.mxu0  ;;  %v6583_v4 = vsel %vm4031_vm15, 1.0, %v7592_v61 }
 0x1c4   : > { %v6578_v28 = vadd.f32 %v2429_v54, %v6280_v49  ;;  %v2802_v24 = vsel %vm2410_vm7, %v2800_v50, %v2801_v51  ;;  %v2804_v58 = vsel %vm2410_vm7, %v2801_v51, %v2803_v12  ;;  %v5171_v44 = vpop.f32.mrf.mxu1  ;;  %7598 = vst [vmem:[#allocation15_spill] sm:$0xff] %v6583_v4  ;;  %v2811_v18 = vrot.slane %v5213_v19, 4 }
 0x1c5   : > { %v2425_v53 = vsel %vm2410_vm7, %v2422_v15, %v2424_v55  ;;  %v2427_v30 = vsel %vm2410_vm7, %v2424_v55, %v2426_v6  ;;  %v6588_v60 = vadd.f32 %v2802_v24, %v6526_v57  ;;  %v6590_v5 = vadd.f32 %v2804_v58, %v2521_v11  ;;  %v2623_v23 = vpop.f32.mrf.mxu0 }
 0x1c6   : > { %v2526_v49 = vadd.f32 %v2425_v53, %v6291_v63  ;;  %v2527_v50 = vadd.f32 %v2427_v30, %v6293_v25  ;;  %v2251_v12 = vpop.f32.mrf.mxu1  ;;  %v2807_v51 = vrot.slane %v2623_v23, 4  ;;  %v2434_v54 = vrot.slane %v5171_v44, 4 }
 0x1c7   : > { %v2430_v1 = vrot.slane %v2251_v12, 4  ;;  %v5214_v4 = vpop.f32.mrf.mxu0  ;;  %v3957_v33 = vmul.u32 18, %v5370_v43  ;;  %v3958_v15 = vmul.u32 18, %v5372_v38  ;;  %v3816_v11 = vcvt.s32.f32 %v6563_v34 }
 0x1c8   : > { %v2808_v6 = vsel %vm2410_vm7, %v2805_v41, %v2807_v51  ;;  %v5172_v55 = vpop.f32.mrf.mxu1  ;;  %v2813_v57 = vrot.slane %v5214_v4, 4  ;;  %v3819_v58 = vcvt.s32.f32 %v6566_v17  ;;  %v6604_v4 = vadd.s32 104, %v6361_v2 }
 0x1c9   : > { %v2431_v63 = vsel %vm2410_vm7, %v2428_v48, %v2430_v1  ;;  %v6598_v24 = vadd.f32 %v2808_v6, %v2523_v56  ;;  %v2436_v25 = vrot.slane %v5172_v55, 4  ;;  %v2626_v19 = vpop.f32.mrf.mxu0  ;;  %v3993_v44 = vsub.s32 %v6515_v62, %v3957_v33 }
 0x1ca   : > { %v2529_v53 = vadd.f32 %v2431_v63, %v6301_v42  ;;  %v2814_v43 = vsel %vm2410_vm7, %v2811_v18, %v2813_v57  ;;  %v2254_v38 = vpop.f32.mrf.mxu1  ;;  %v2809_v41 = vrot.slane %v2626_v19, 4  ;;  %v3994_v12 = vsub.s32 %v6518_v3, %v3958_v15 }
 0x1cb   : > { %v2437_v30 = vsel %vm2410_vm7, %v2434_v54, %v2436_v25  ;;  %v6607_v23 = vadd.f32 %v2814_v43, %v2526_v49  ;;  %v2432_v48 = vrot.slane %v2254_v38, 4  ;;  %v5217_v56 = vpop.f32.mrf.mxu0  ;;  %vm4029_vm1 = vcmp.lt.s32.totalorder %v3993_v44, 16 }
 0x1cc   : > { %v6611_v6 = vadd.f32 %v2437_v30, %v6306_v7  ;;  %v2810_v42 = vsel %vm2410_vm7, %v2807_v51, %v2809_v41  ;;  %v2812_v62 = vsel %vm2410_vm7, %v2809_v41, %v2811_v18  ;;  %v5175_v33 = vpop.f32.mrf.mxu1  ;;  %v2819_v15 = vrot.slane %v5217_v56, 4 }
 0x1cd   : > { %v2433_v55 = vsel %vm2410_vm7, %v2430_v1, %v2432_v48  ;;  %v2435_v63 = vsel %vm2410_vm7, %v2432_v48, %v2434_v54  ;;  %v6618_v49 = vadd.f32 %v2810_v42, %v6546_v35  ;;  %v6620_v19 = vadd.f32 %v2812_v62, %v2525_v31  ;;  %v2639_v43 = vpop.f32.mrf.mxu0 }
 0x1ce   : > { %v2530_v3 = vadd.f32 %v2433_v55, %v6317_v22  ;;  %v2531_v7 = vadd.f32 %v2435_v63, %v6319_v45  ;;  %v2267_v51 = vpop.f32.mrf.mxu1  ;;  %v2815_v38 = vrot.slane %v2639_v43, 4  ;;  %v2442_v18 = vrot.slane %v5175_v33, 4 }
 0x1cf   : > { %v2438_v41 = vrot.slane %v2267_v51, 4  ;;  %v5218_v30 = vpop.f32.mrf.mxu0  ;;  %vm4030_vm2 = vcmp.lt.s32.totalorder %v3994_v12, 16  ;;  %v3852_v1 = vadd.f32 0.5, %v3816_v11  ;;  %v6627_v31 = vsel %vm4029_vm1, 1.0, %v7592_v61 }
 0x1d0   : > { %v2816_v54 = vsel %vm2410_vm7, %v2813_v57, %v2815_v38  ;;  %v5176_v48 = vpop.f32.mrf.mxu1  ;;  %v2821_v35 = vrot.slane %v5218_v30, 4  ;;  %7599 = vst [vmem:[#allocation16_spill] sm:$0xff] %v6627_v31  ;;  %v3855_v42 = vadd.f32 0.5, %v3819_v58  ;;  %vm3189_vm11 = vcmask 1042432  }
 0x1d1   : > { %v2439_v22 = vsel %vm2410_vm7, %v2436_v25, %v2438_v41  ;;  %v6630_v45 = vadd.f32 %v2816_v54, %v2527_v50  ;;  %v2444_v56 = vrot.slane %v5176_v48, 4  ;;  %v2642_v62 = vpop.f32.mrf.mxu0  ;;  %v3888_v33 = vmul.f32 0.055555556, %v3852_v1 }
 0x1d2   : > { %v2533_v55 = vadd.f32 %v2439_v22, %v6327_v14  ;;  %v2822_v11 = vsel %vm2410_vm7, %v2819_v15, %v2821_v35  ;;  %v2270_v63 = vpop.f32.mrf.mxu1  ;;  %v2817_v57 = vrot.slane %v2642_v62, 4  ;;  %v3891_v43 = vmul.f32 0.055555556, %v3855_v42 }
 0x1d3   : > { %v2445_v51 = vsel %vm2410_vm7, %v2442_v18, %v2444_v56  ;;  %v6635_v44 = vadd.f32 %v2822_v11, %v2530_v3  ;;  %v2440_v30 = vrot.slane %v2270_v63, 4  ;;  %v5221_v58 = vpop.f32.mrf.mxu0  ;;  %v5375_v31 = vtrunc.f32 %v3888_v33 }
 0x1d4   : > { %v6638_v50 = vadd.f32 %v2445_v51, %v6332_v26  ;;  %v2818_v25 = vsel %vm2410_vm7, %v2815_v38, %v2817_v57  ;;  %v2820_v1 = vsel %vm2410_vm7, %v2817_v57, %v2819_v15  ;;  %v5179_v14 = vpop.f32.mrf.mxu1  ;;  %v6644_v54 = vsel %vm4030_vm2, 1.0, %v7592_v61 }
 0x1d5   : > { %7600 = vst [vmem:[#allocation17_spill] sm:$0xff] %v6644_v54  ;;  %v2441_v48 = vsel %vm2410_vm7, %v2438_v41, %v2440_v30  ;;  %v2443_v3 = vsel %vm2410_vm7, %v2440_v30, %v2442_v18  ;;  %v6649_v42 = vadd.f32 %v2818_v25, %v6578_v28  ;;  %v6651_v22 = vadd.f32 %v2820_v1, %v2529_v53  ;;  %v2655_v26 = vpop.f32.mrf.mxu0 }
 0x1d6   : > { %v2534_v62 = vadd.f32 %v2441_v48, %v6343_v36  ;;  %v2535_v38 = vadd.f32 %v2443_v3, %v6345_v39  ;;  %v2827_v15 = vrot.slane %v5221_v58, 4  ;;  %v2283_v33 = vpop.f32.mrf.mxu1  ;;  %v2823_v11 = vrot.slane %v2655_v26, 4 }
 0x1d7   : > { %v2450_v12 = vrot.slane %v5179_v14, 4  ;;  %v2446_v63 = vrot.slane %v2283_v33, 4  ;;  %v5222_v57 = vpop.f32.mrf.mxu0  ;;  %v5376_v51 = vcvt.f32.s32 %v5375_v31  ;;  %v5381_v41 = vtrunc.f32 %v3891_v43 }
 0x1d8   : > { %v2824_v18 = vsel %vm2410_vm7, %v2821_v35, %v2823_v11  ;;  %v5180_v30 = vpop.f32.mrf.mxu1  ;;  %v2829_v28 = vrot.slane %v5222_v57, 4  ;;  %v3817_v53 = vcvt.s32.f32 %v6570_v52  ;;  %v3818_v25 = vcvt.s32.f32 %v6604_v4 }
 0x1d9   : > { %v2447_v36 = vsel %vm2410_vm7, %v2444_v56, %v2446_v63  ;;  %v6659_v1 = vadd.f32 %v2824_v18, %v2531_v7  ;;  %v2452_v39 = vrot.slane %v5180_v30, 4  ;;  %v2658_v58 = vpop.f32.mrf.mxu0  ;;  %v3960_v48 = vmul.u32 18, %v5376_v51 }
 0x1da   : > { %v2537_v14 = vadd.f32 %v2447_v36, %v6353_v59  ;;  %v2830_v31 = vsel %vm2410_vm7, %v2827_v15, %v2829_v28  ;;  %v2286_v43 = vpop.f32.mrf.mxu1  ;;  %v2825_v3 = vrot.slane %v2658_v58, 4  ;;  %v5382_v35 = vcvt.f32.s32 %v5381_v41 }
 0x1db   : > { %7601 = vst [vmem:[#allocation18_spill] sm:$0xff] %v6659_v1  ;;  %v2453_v26 = vsel %vm2410_vm7, %v2450_v12, %v2452_v39  ;;  %v6664_v33 = vadd.f32 %v2830_v31, %v2534_v62  ;;  %v2448_v57 = vrot.slane %v2286_v43, 4  ;;  %v5225_v54 = vpop.f32.mrf.mxu0  ;;  %v3996_v56 = vsub.s32 %v6563_v34, %v3960_v48  ;;  %v7603_v48 = vld [vmem:[#allocation3_spill] sm:$0xff] }
 0x1dc   : > { %v6668_v7 = vadd.f32 %v2453_v26, %v6358_v9  ;;  %v2826_v51 = vsel %vm2410_vm7, %v2823_v11, %v2825_v3  ;;  %v2828_v59 = vsel %vm2410_vm7, %v2825_v3, %v2827_v15  ;;  %v5183_v18 = vpop.f32.mrf.mxu1  ;;  %v6673_v30 = vadd.s32 120, %v6361_v2 }
 0x1dd   : > { %7602 = vst [vmem:[#allocation19_spill] sm:$0xff] %v6664_v33  ;;  %v2449_v41 = vsel %vm2410_vm7, %v2446_v63, %v2448_v57  ;;  %v2451_v62 = vsel %vm2410_vm7, %v2448_v57, %v2450_v12  ;;  %v6678_v36 = vadd.f32 %v2826_v51, %v6611_v6  ;;  %v6680_v58 = vadd.f32 %v2828_v59, %v2533_v55  ;;  %v2671_v34 = vpop.f32.mrf.mxu0 }
 0x1de   : > { %v2538_v9 = vadd.f32 %v2449_v41, %v6371_v46  ;;  %v2539_v11 = vadd.f32 %v2451_v62, %v7603_v48  ;;  %v2458_v31 = vrot.slane %v5183_v18, 4  ;;  %v2299_v15 = vpop.f32.mrf.mxu1  ;;  %v2831_v43 = vrot.slane %v2671_v34, 4  ;;  %v7604_v62 = vld [vmem:[#allocation5_spill] sm:$0xff] }
 0x1df   : > { %v2454_v3 = vrot.slane %v2299_v15, 4  ;;  %v5226_v26 = vpop.f32.mrf.mxu0  ;;  %vm4032_vm3 = vcmp.lt.s32.totalorder %v3996_v56, 16  ;;  %v3963_v33 = vmul.u32 18, %v5382_v35  ;;  %v3853_v63 = vadd.f32 0.5, %v3817_v53 }
 0x1e0   : > { %v2835_v1 = vrot.slane %v5225_v54, 4  ;;  %v2832_v12 = vsel %vm2410_vm7, %v2829_v28, %v2831_v43  ;;  %v5184_v6 = vpop.f32.mrf.mxu1  ;;  %v2837_v57 = vrot.slane %v5226_v26, 4  ;;  %v6686_v55 = vsel %vm4032_vm3, 1.0, %v7592_v61 }
 0x1e1   : > { %v2455_v46 = vsel %vm2410_vm7, %v2452_v39, %v2454_v3  ;;  %v6689_v51 = vadd.f32 %v2832_v12, %v2535_v38  ;;  %v2460_v59 = vrot.slane %v5184_v6, 4  ;;  %v2674_v18 = vpop.f32.mrf.mxu0  ;;  %v3999_v41 = vsub.s32 %v6566_v17, %v3963_v33  ;;  %v7606_v38 = vld [vmem:[#allocation4_spill] sm:$0xff] }
 0x1e2   : > { %v2541_v56 = vadd.f32 %v2455_v46, %v7604_v62  ;;  %v2838_v53 = vsel %vm2410_vm7, %v2835_v1, %v2837_v57  ;;  %v2302_v54 = vpop.f32.mrf.mxu1  ;;  %v2833_v35 = vrot.slane %v2674_v18, 4  ;;  %v3854_v28 = vadd.f32 0.5, %v3818_v25 }
 0x1e3   : > { %v2461_v34 = vsel %vm2410_vm7, %v2458_v31, %v2460_v59  ;;  %v6695_v48 = vadd.f32 %v2838_v53, %v2538_v9  ;;  %v2456_v15 = vrot.slane %v2302_v54, 4  ;;  %v5229_v26 = vpop.f32.mrf.mxu0  ;;  %v3889_v39 = vmul.f32 0.055555556, %v3853_v63 }
 0x1e4   : > { %v6698_v12 = vadd.f32 %v2461_v34, %v7606_v38  ;;  %v2834_v6 = vsel %vm2410_vm7, %v2831_v43, %v2833_v35  ;;  %v2836_v17 = vsel %vm2410_vm7, %v2833_v35, %v2835_v1  ;;  %v5187_v33 = vpop.f32.mrf.mxu1  ;;  %vm4035_vm4 = vcmp.lt.s32.totalorder %v3999_v41, 16 }
 0x1e5   : > { %7605 = vst [vmem:[#allocation3_spill] sm:$0xff] %v6695_v48  ;;  %v2457_v46 = vsel %vm2410_vm7, %v2454_v3, %v2456_v15  ;;  %v2459_v25 = vsel %vm2410_vm7, %v2456_v15, %v2458_v31  ;;  %v6705_v18 = vadd.f32 %v2834_v6, %v6638_v50  ;;  %v6707_v9 = vadd.f32 %v2836_v17, %v2537_v14  ;;  %v2687_v62 = vpop.f32.mrf.mxu0 }
 0x1e6   : > { %v2542_v63 = vadd.f32 %v2457_v46, %v6406_v27  ;;  %v2543_v53 = vadd.f32 %v2459_v25, %v6408_v47  ;;  %v2843_v54 = vrot.slane %v5229_v26, 4  ;;  %v2315_v43 = vpop.f32.mrf.mxu1  ;;  %v2839_v34 = vrot.slane %v2687_v62, 4 }
 0x1e7   : > { %7607 = vst [vmem:[#allocation5_spill] sm:$0xff] %v6707_v9  ;;  %v2466_v1 = vrot.slane %v5187_v33, 4  ;;  %v2462_v35 = vrot.slane %v2315_v43, 4  ;;  %v5230_v38 = vpop.f32.mrf.mxu0  ;;  %v3890_v48 = vmul.f32 0.055555556, %v3854_v28  ;;  %v5377_v3 = vtrunc.f32 %v3889_v39 }
 0x1e8   : > { %v2840_v31 = vsel %vm2410_vm7, %v2837_v57, %v2839_v34  ;;  %v5188_v15 = vpop.f32.mrf.mxu1  ;;  %v2845_v50 = vrot.slane %v5230_v38, 4  ;;  %v6714_v14 = vsel %vm4035_vm4, 1.0, %v7592_v61  ;;  %v3820_v27 = vcvt.s32.f32 %v6673_v30 }
 0x1e9   : > { %v2463_v47 = vsel %vm2410_vm7, %v2460_v59, %v2462_v35  ;;  %v6718_v26 = vadd.f32 %v2840_v31, %v2539_v11  ;;  %v2468_v6 = vrot.slane %v5188_v15, 4  ;;  %v2690_v17 = vpop.f32.mrf.mxu0  ;;  %v5378_v33 = vcvt.f32.s32 %v5377_v3 }
 0x1ea   : > { %v2545_v28 = vadd.f32 %v2463_v47, %v6417_v21  ;;  %v2846_v39 = vsel %vm2410_vm7, %v2843_v54, %v2845_v50  ;;  %v2318_v57 = vpop.f32.mrf.mxu1  ;;  %v2841_v46 = vrot.slane %v2690_v17, 4  ;;  %v5379_v25 = vtrunc.f32 %v3890_v48 }
 0x1eb   : > { %v2469_v41 = vsel %vm2410_vm7, %v2466_v1, %v2468_v6  ;;  %v6723_v62 = vadd.f32 %v2846_v39, %v2542_v63  ;;  %v2464_v43 = vrot.slane %v2318_v57, 4  ;;  %v5233_v38 = vpop.f32.mrf.mxu0  ;;  %v3961_v9 = vmul.u32 18, %v5378_v33 }
 0x1ec   : > { %v6726_v11 = vadd.f32 %v2469_v41, %v6425_v8  ;;  %v2842_v59 = vsel %vm2410_vm7, %v2839_v34, %v2841_v46  ;;  %v2844_v3 = vsel %vm2410_vm7, %v2841_v46, %v2843_v54  ;;  %v5191_v21 = vpop.f32.mrf.mxu1  ;;  %v6731_v31 = vadd.s32 144, %v6361_v2 }
 0x1ed   : > { %7608 = vst [vmem:[#allocation4_spill] sm:$0xff] %v6723_v62  ;;  %v2465_v48 = vsel %vm2410_vm7, %v2462_v35, %v2464_v43  ;;  %v2467_v15 = vsel %vm2410_vm7, %v2464_v43, %v2466_v1  ;;  %v6736_v63 = vadd.f32 %v2842_v59, %v6668_v7  ;;  %v6738_v47 = vadd.f32 %v2844_v3, %v2541_v56  ;;  %v2703_v17 = vpop.f32.mrf.mxu0 }
 0x1ee   : > { %v2546_v8 = vadd.f32 %v2465_v48, %v6434_v0  ;;  %v2547_v34 = vadd.f32 %v2467_v15, %v6436_v20  ;;  %v2851_v33 = vrot.slane %v5233_v38, 4  ;;  %v2331_v54 = vpop.f32.mrf.mxu1  ;;  %v2847_v39 = vrot.slane %v2703_v17, 4 }
 0x1ef   : > { %v2474_v57 = vrot.slane %v5191_v21, 4  ;;  %v2470_v46 = vrot.slane %v2331_v54, 4  ;;  %v5234_v41 = vpop.f32.mrf.mxu0  ;;  %v5380_v62 = vcvt.f32.s32 %v5379_v25  ;;  %v3997_v35 = vsub.s32 %v6570_v52, %v3961_v9 }
 0x1f0   : > { %v2848_v1 = vsel %vm2410_vm7, %v2845_v50, %v2847_v39  ;;  %v5192_v7 = vpop.f32.mrf.mxu1  ;;  %v2853_v43 = vrot.slane %v5234_v41, 4  ;;  %v3856_v56 = vadd.f32 0.5, %v3820_v27  ;;  %v3823_v59 = vcvt.s32.f32 %v6731_v31 }
 0x1f1   : > { %v2471_v0 = vsel %vm2410_vm7, %v2468_v6, %v2470_v46  ;;  %v6746_v3 = vadd.f32 %v2848_v1, %v2543_v53  ;;  %v2476_v20 = vrot.slane %v5192_v7, 4  ;;  %v2706_v38 = vpop.f32.mrf.mxu0  ;;  %v3962_v48 = vmul.u32 18, %v5380_v62 }
 0x1f2   : > { %v2549_v21 = vadd.f32 %v2471_v0, %v6462_v29  ;;  %v2854_v25 = vsel %vm2410_vm7, %v2851_v33, %v2853_v43  ;;  %v2334_v15 = vpop.f32.mrf.mxu1  ;;  %v2849_v52 = vrot.slane %v2706_v38, 4  ;;  %v6751_v9 = vadd.s32 128, %v6361_v2 }
 0x1f3   : > { %v2477_v50 = vsel %vm2410_vm7, %v2474_v57, %v2476_v20  ;;  %v6754_v27 = vadd.f32 %v2854_v25, %v2546_v8  ;;  %v2472_v17 = vrot.slane %v2334_v15, 4  ;;  %v5237_v6 = vpop.f32.mrf.mxu0  ;;  %v3998_v53 = vsub.s32 %v6604_v4, %v3962_v48 }
 0x1f4   : > { %v6758_v54 = vadd.f32 %v2477_v50, %v6468_v40  ;;  %v2850_v29 = vsel %vm2410_vm7, %v2847_v39, %v2849_v52  ;;  %v2852_v62 = vsel %vm2410_vm7, %v2849_v52, %v2851_v33  ;;  %v5195_v41 = vpop.f32.mrf.mxu1  ;;  %vm4033_vm6 = vcmp.lt.s32.totalorder %v3997_v35, 16 }
 0x1f5   : > { %v2473_v1 = vsel %vm2410_vm7, %v2470_v46, %v2472_v17  ;;  %v2475_v7 = vsel %vm2410_vm7, %v2472_v17, %v2474_v57  ;;  %v6765_v8 = vadd.f32 %v2850_v29, %v6698_v12  ;;  %v6767_v0 = vadd.f32 %v2852_v62, %v2545_v28  ;;  %v2719_v38 = vpop.f32.mrf.mxu0 }
 0x1f6   : > { %v2550_v4 = vadd.f32 %v2473_v1, %v6474_v13  ;;  %v2551_v40 = vadd.f32 %v2475_v7, %v6476_v16  ;;  %v2859_v48 = vrot.slane %v5237_v6, 4  ;;  %v2347_v39 = vpop.f32.mrf.mxu1  ;;  %v2855_v25 = vrot.slane %v2719_v38, 4 }
 0x1f7   : > { %v2482_v33 = vrot.slane %v5195_v41, 4  ;;  %v2478_v15 = vrot.slane %v2347_v39, 4  ;;  %v5238_v52 = vpop.f32.mrf.mxu0  ;;  %vm4034_vm8 = vcmp.lt.s32.totalorder %v3998_v53, 16  ;;  %v3892_v46 = vmul.f32 0.055555556, %v3856_v56 }
 0x1f8   : > { %v2856_v57 = vsel %vm2410_vm7, %v2853_v43, %v2855_v25  ;;  %v5196_v50 = vpop.f32.mrf.mxu1  ;;  %v2861_v12 = vrot.slane %v5238_v52, 4  ;;  %v6774_v28 = vsel %vm4033_vm6, 1.0, %v7592_v61  ;;  %v3859_v17 = vadd.f32 0.5, %v3823_v59 }
 0x1f9   : > { %v2479_v13 = vsel %vm2410_vm7, %v2476_v20, %v2478_v15  ;;  %v6777_v16 = vadd.f32 %v2856_v57, %v2547_v34  ;;  %v2722_v6 = vpop.f32.mrf.mxu0  ;;  %v5383_v29 = vtrunc.f32 %v3892_v46  ;;  %v6780_v62 = vadd.s32 136, %v6361_v2 }
 0x1fa   : > { %v2553_v56 = vadd.f32 %v2479_v13, %v6491_v37  ;;  %v2862_v43 = vsel %vm2410_vm7, %v2859_v48, %v2861_v12  ;;  %v2350_v41 = vpop.f32.mrf.mxu1  ;;  %v2857_v1 = vrot.slane %v2722_v6, 4  ;;  %v3895_v7 = vmul.f32 0.055555556, %v3859_v17 }
 0x1fb   : > { %7609 = vst [vmem:[#allocation20_spill] sm:$0xff] %v6777_v16  ;;  %v6784_v35 = vadd.f32 %v2862_v43, %v2550_v4  ;;  %v2480_v38 = vrot.slane %v2350_v41, 4  ;;  %v5241_v59 = vpop.f32.mrf.mxu0  ;;  %v5384_v39 = vcvt.f32.s32 %v5383_v29  ;;  %v3821_v34 = vcvt.s32.f32 %v6751_v9  ;;  %v7613_v29 = vld [vmem:[#allocation7_spill] sm:$0xff]  ;;  %v7614_v43 = vld [vmem:[#allocation9_spill] sm:$0xff] }
 0x1fc   : > { %v2858_v20 = vsel %vm2410_vm7, %v2855_v25, %v2857_v1  ;;  %v2860_v52 = vsel %vm2410_vm7, %v2857_v1, %v2859_v48  ;;  %v5199_v46 = vpop.f32.mrf.mxu1  ;;  %v6791_v37 = vsel %vm4034_vm8, 1.0, %v7592_v61  ;;  %v5389_v57 = vtrunc.f32 %v3895_v7 }
 0x1fd   : > { %7610 = vst [vmem:[#allocation21_spill] sm:$0xff] %v6784_v35  ;;  %v2481_v50 = vsel %vm2410_vm7, %v2478_v15, %v2480_v38  ;;  %v2483_v4 = vsel %vm2410_vm7, %v2480_v38, %v2482_v33  ;;  %v6796_v17 = vadd.f32 %v2858_v20, %v6726_v11  ;;  %v6798_v13 = vadd.f32 %v2860_v52, %v2549_v21  ;;  %v2735_v6 = vpop.f32.mrf.mxu0 }
 0x1fe   : > { %v2554_v25 = vadd.f32 %v2481_v50, %v7613_v29  ;;  %v2555_v48 = vadd.f32 %v2483_v4, %v7614_v43  ;;  %v2362_v41 = vpop.f32.mrf.mxu1  ;;  %v2863_v1 = vrot.slane %v2735_v6, 4  ;;  %v3964_v53 = vmul.u32 18, %v5384_v39 }
 0x1ff   : > { %7611 = vst [vmem:[#allocation22_spill] sm:$0xff] %v6796_v17  ;;  %7612 = vst [vmem:[#allocation23_spill] sm:$0xff] %v6798_v13  ;;  %v5242_v46 = vpop.f32.mrf.mxu0  ;;  %v5390_v35 = vcvt.f32.s32 %v5389_v57  ;;  %v3822_v7 = vcvt.s32.f32 %v6780_v62  ;;  %v3857_v15 = vadd.f32 0.5, %v3821_v34  ;;  %v6804_v33 = vadd.s32 152, %v6361_v2 }
 0x200   : > { %v2867_v11 = vrot.slane %v5241_v59, 4  ;;  %v2864_v21 = vsel %vm2410_vm7, %v2861_v12, %v2863_v1  ;;  %v5200_v38 = vpop.f32.mrf.mxu1  ;;  %v2869_v20 = vrot.slane %v5242_v46, 4  ;;  %v4000_v52 = vsub.s32 %v6673_v30, %v3964_v53 }
 0x201   : > { %v6808_v50 = vadd.f32 %v2864_v21, %v2551_v40  ;;  %v2738_v4 = vpop.f32.mrf.mxu0  ;;  %v3967_v6 = vmul.u32 18, %v5390_v35  ;;  %v3858_v39 = vadd.f32 0.5, %v3822_v7  ;;  %v3893_v29 = vmul.f32 0.055555556, %v3857_v15 }
 0x202   : > { %v2870_v57 = vsel %vm2410_vm7, %v2867_v11, %v2869_v20  ;;  %v2364_v43 = vpop.f32.mrf.mxu1  ;;  %v2865_v34 = vrot.slane %v2738_v4, 4  ;;  %vm4036_vm9 = vcmp.lt.s32.totalorder %v4000_v52, 16  ;;  %v3824_v41 = vcvt.s32.f32 %v6804_v33 }
 0x203   : > { %7615 = vst [vmem:[#allocation7_spill] sm:$0xff] %v6808_v50  ;;  %v6812_v59 = vadd.f32 %v2870_v57, %v2554_v25  ;;  %v5245_v12 = vpop.f32.mrf.mxu0  ;;  %v4003_v46 = vsub.s32 %v6731_v31, %v3967_v6  ;;  %v3894_v38 = vmul.f32 0.055555556, %v3858_v39  ;;  %v6816_v30 = vadd.s32 176, %v6361_v2 }
 0x204   : > { %v2866_v40 = vsel %vm2410_vm7, %v2863_v1, %v2865_v34  ;;  %v2868_v35 = vsel %vm2410_vm7, %v2865_v34, %v2867_v11  ;;  %v5251_v53 = vpop.f32.mrf.mxu1  ;;  %v5385_v7 = vtrunc.f32 %v3893_v29  ;;  %v3860_v15 = vadd.f32 0.5, %v3824_v41 }
 0x205   : > { %7616 = vst [vmem:[#allocation9_spill] sm:$0xff] %v6812_v59  ;;  %v6821_v21 = vadd.f32 %v2866_v40, %v6758_v54  ;;  %v6823_v52 = vadd.f32 %v2868_v35, %v2553_v56  ;;  %v2751_v25 = vpop.f32.mrf.mxu0  ;;  %v6826_v4 = vsel %vm4036_vm9, 1.0, %v7592_v61  ;;  %v5387_v31 = vtrunc.f32 %v3894_v38 }
 0x206   : > { %v2871_v6 = vrot.slane %v2751_v25, 4  ;;  %v2984_v39 = vpop.f32.mrf.mxu1  ;;  %vm4039_vm10 = vcmp.lt.s32.totalorder %v4003_v46, 16  ;;  %v5386_v57 = vcvt.f32.s32 %v5385_v7  ;;  %v3896_v1 = vmul.f32 0.055555556, %v3860_v15 }
 0x207   : > { %7617 = vst [vmem:[#allocation24_spill] sm:$0xff] %v6821_v21  ;;  %7618 = vst [vmem:[#allocation25_spill] sm:$0xff] %v6823_v52  ;;  %v5246_v43 = vpop.f32.mrf.mxu0  ;;  %v5388_v11 = vcvt.f32.s32 %v5387_v31  ;;  %v3827_v29 = vcvt.s32.f32 %v6816_v30  ;;  %v6830_v34 = vadd.s32 160, %v6361_v2  ;;  %v6833_v54 = vadd.s32 168, %v6361_v2 }
 0x208   : > { %v2872_v56 = vsel %vm2410_vm7, %v2869_v20, %v2871_v6  ;;  %v5252_v41 = vpop.f32.mrf.mxu1  ;;  %v3965_v12 = vmul.u32 18, %v5386_v57  ;;  %v5391_v38 = vtrunc.f32 %v3896_v1  ;;  %v6837_v40 = vadd.s32 184, %v6361_v2 }
 0x209   : > { %v6839_v35 = vadd.f32 %v2872_v56, %v2555_v48  ;;  %v2754_v53 = vpop.f32.mrf.mxu0  ;;  %v3966_v7 = vmul.u32 18, %v5388_v11  ;;  %v3863_v15 = vadd.f32 0.5, %v3827_v29  ;;  %v3825_v25 = vcvt.s32.f32 %v6830_v34 }
 0x20a   : > { %v2986_v31 = vpop.f32.mrf.mxu1  ;;  %v4001_v39 = vsub.s32 %v6751_v9, %v3965_v12  ;;  %v5392_v43 = vcvt.f32.s32 %v5391_v38  ;;  %v3826_v20 = vcvt.s32.f32 %v6833_v54  ;;  %v3828_v6 = vcvt.s32.f32 %v6837_v40 }
 0x20b   : > { %7619 = vst [vmem:[#allocation26_spill] sm:$0xff] %v6839_v35  ;;  %v5297_v57 = vpop.f32.mrf.mxu0  ;;  %v4002_v1 = vsub.s32 %v6780_v62, %v3966_v7  ;;  %v3899_v41 = vmul.f32 0.055555556, %v3863_v15  ;;  %v3861_v52 = vadd.f32 0.5, %v3825_v25  ;;  %v6847_v48 = vadd.s32 208, %v6361_v2 }
 0x20c   : > { %v5255_v11 = vpop.f32.mrf.mxu1  ;;  %vm4037_vm7 = vcmp.lt.s32.totalorder %v4001_v39, 16  ;;  %v3968_v29 = vmul.u32 18, %v5392_v43  ;;  %v3862_v56 = vadd.f32 0.5, %v3826_v20  ;;  %v3864_v53 = vadd.f32 0.5, %v3828_v6 }
 0x20d   : > { %7620 = vst [vmem:[#allocation27_spill] sm:$0xff] %v6847_v48  ;;  %v3193_v31 = vrot.slane %v5255_v11, 5  ;;  %v3374_v9 = vpop.f32.mrf.mxu0  ;;  %v6851_v12 = vsel %vm4039_vm10, 1.0, %v7592_v61  ;;  %vm4038_vm12 = vcmp.lt.s32.totalorder %v4002_v1, 16  ;;  %v5397_v38 = vtrunc.f32 %v3899_v41 }
 0x20e   : > { %v2996_v57 = vpop.f32.mrf.mxu1  ;;  %v6854_v62 = vsel %vm4037_vm7, 1.0, %v7592_v61  ;;  %v4004_v7 = vsub.s32 %v6804_v33, %v3968_v29  ;;  %v3897_v15 = vmul.f32 0.055555556, %v3861_v52  ;;  %v3898_v25 = vmul.f32 0.055555556, %v3862_v56 }
 0x20f   : > { %v5298_v39 = vpop.f32.mrf.mxu0  ;;  %v6858_v43 = vsel %vm4038_vm12, 1.0, %v7592_v61  ;;  %v5398_v20 = vcvt.f32.s32 %v5397_v38  ;;  %v3900_v6 = vmul.f32 0.055555556, %v3864_v53  ;;  %v3831_v46 = vcvt.s32.f32 %v6847_v48 }
 0x210   : > { %v3190_v11 = vrot.slane %v2996_v57, 5  ;;  %v5256_v9 = vpop.f32.mrf.mxu1  ;;  %vm4040_vm13 = vcmp.lt.s32.totalorder %v4004_v7, 16  ;;  %v5393_v1 = vtrunc.f32 %v3897_v15  ;;  %v5395_v41 = vtrunc.f32 %v3898_v25 }
 0x211   : > { %v3195_v35 = vrot.slane %v5256_v9, 5  ;;  %v3376_v21 = vpop.f32.mrf.mxu0  ;;  %v3971_v59 = vmul.u32 18, %v5398_v20  ;;  %v5399_v50 = vtrunc.f32 %v3900_v6  ;;  %v6862_v33 = vadd.s32 192, %v6361_v2 }
 0x212   : > { %v2999_v52 = vpop.f32.mrf.mxu1  ;;  %v6865_v29 = vsel %vm4040_vm13, 1.0, %v7592_v61  ;;  %v5394_v56 = vcvt.f32.s32 %v5393_v1  ;;  %v5396_v53 = vcvt.f32.s32 %v5395_v41  ;;  %v3867_v38 = vadd.f32 0.5, %v3831_v46 }
 0x213   : > { %7621 = vst [vmem:[#allocation28_spill] sm:$0xff] %v6862_v33  ;;  %v3196_v57 = vsel %vm3189_vm11, %v3193_v31, %v3195_v35  ;;  %v3191_v39 = vrot.slane %v2999_v52, 5  ;;  %v5301_v7 = vpop.f32.mrf.mxu0  ;;  %v4007_v15 = vsub.s32 %v6816_v30, %v3971_v59  ;;  %v6870_v21 = vadd.s32 200, %v6361_v2 }
 0x214   : > { %v3301_v25 = vadd.f32 %v3196_v57, %v6575_v32  ;;  %v5259_v20 = vpop.f32.mrf.mxu1  ;;  %v3969_v6 = vmul.u32 18, %v5394_v56  ;;  %v3970_v9 = vmul.u32 18, %v5396_v53  ;;  %v6873_v13 = vcvt.f32.s32 %v5399_v50 }
 0x215   : > { %7622 = vst [vmem:[#allocation29_spill] sm:$0xff] %v6870_v21  ;;  %v3192_v1 = vsel %vm3189_vm11, %v3190_v11, %v3191_v39  ;;  %v3194_v46 = vsel %vm3189_vm11, %v3191_v39, %v3193_v31  ;;  %v3582_v41 = vrot.slane %v5301_v7, 6  ;;  %v3386_v48 = vpop.f32.mrf.mxu0  ;;  %vm4043_vm14 = vcmp.lt.s32.totalorder %v4007_v15, 16 }
 0x216   : > { %v3299_v52 = vadd.f32 %v3192_v1, %v6588_v60  ;;  %v3300_v59 = vadd.f32 %v3194_v46, %v6590_v5  ;;  %v3201_v30 = vrot.slane %v5259_v20, 5  ;;  %v3012_v2 = vpop.f32.mrf.mxu1  ;;  %v3579_v17 = vrot.slane %v3386_v48, 6 }
 0x217   : > { %v3197_v32 = vrot.slane %v3012_v2, 5  ;;  %v5302_v57 = vpop.f32.mrf.mxu0  ;;  %v6880_v56 = vsel %vm4043_vm14, 1.0, %v7592_v61  ;;  %v4005_v50 = vsub.s32 %v6830_v34, %v3969_v6  ;;  %v4006_v11 = vsub.s32 %v6833_v54, %v3970_v9 }
 0x218   : > { %v5260_v31 = vpop.f32.mrf.mxu1  ;;  %v3584_v53 = vrot.slane %v5302_v57, 6  ;;  %v3972_v39 = vmul.u32 18, %v6873_v13  ;;  %v6885_v7 = vmul.f32 0.055555556, %v3867_v38  ;;  %vm3766_vm7 = vcmask 59392  }
 0x219   : > { %v3198_v5 = vsel %vm3189_vm11, %v3195_v35, %v3197_v32  ;;  %v3203_v48 = vrot.slane %v5260_v31, 5  ;;  %v3389_v2 = vpop.f32.mrf.mxu0  ;;  %vm4041_vm15 = vcmp.lt.s32.totalorder %v4005_v50, 16  ;;  %vm4042_vm1 = vcmp.lt.s32.totalorder %v4006_v11, 16 }
 0x21a   : > { %7623 = vst [vmem:[#allocation30_spill] sm:$0xff] %v6885_v7  ;;  %v3302_v15 = vadd.f32 %v3198_v5, %v6598_v24  ;;  %v3585_v34 = vsel %vm402_vm0, %v3582_v41, %v3584_v53  ;;  %v3015_v54 = vpop.f32.mrf.mxu1  ;;  %v3580_v20 = vrot.slane %v3389_v2, 6  ;;  %v6896_v35 = vsel %vm4041_vm15, 1.0, %v7592_v61 }
 0x21b   : > { %v3204_v13 = vsel %vm3189_vm11, %v3201_v30, %v3203_v48  ;;  %v3690_v38 = vadd.f32 %v3585_v34, %v3301_v25  ;;  %v3199_v9 = vrot.slane %v3015_v54, 5  ;;  %v6893_v1 = vpop.f32.mrf.mxu0  ;;  %v6902_v11 = vsel %vm4042_vm1, 1.0, %v7592_v61  ;;  %v7625_v25 = vld [vmem:[#allocation6_spill] sm:$0xff] }
 0x21c   : > { %v3305_v46 = vadd.f32 %v3204_v13, %v6607_v23  ;;  %v3581_v57 = vsel %vm402_vm0, %v3579_v17, %v3580_v20  ;;  %v3583_v24 = vsel %vm402_vm0, %v3580_v20, %v3582_v41  ;;  %v5263_v50 = vpop.f32.mrf.mxu1  ;;  %7624 = vst [vmem:[#allocation31_spill] sm:$0xff] %v6902_v11  ;;  %v3590_v20 = vrot.slane %v6893_v1, 6 }
 0x21d   : > { %3730 = vst.msk [vmem:[%s6443_s14 + $0x28] sm:$0xff] %vm3724_vm5, %v3690_v38  ;;  %v4131_v31 = vmul.f32 %v7625_v25, %v3690_v38  ;;  %v3200_v5 = vsel %vm3189_vm11, %v3197_v32, %v3199_v9  ;;  %v3202_v2 = vsel %vm3189_vm11, %v3199_v9, %v3201_v30  ;;  %v3688_v34 = vadd.f32 %v3581_v57, %v3299_v52  ;;  %v3402_v23 = vpop.f32.mrf.mxu0  ;;  %v7626_v38 = vld [vmem:[#allocation8_spill] sm:$0xff] }
 0x21e   : > { %v6910_v17 = vadd.f32 %v3200_v5, %v6618_v49  ;;  %v6913_v41 = vadd.f32 %v3202_v2, %v6620_v19  ;;  %v3689_v54 = vadd.f32 %v3583_v24, %v3300_v59  ;;  %v3028_v13 = vpop.f32.mrf.mxu1  ;;  %v3209_v25 = vrot.slane %v5263_v50, 5 }
 0x21f   : > { %v4246_v6 = vmul.f32 %v4131_v31, %v4131_v31  ;;  %3728 = vst.msk [vmem:[%s6443_s14 + $0x18] sm:$0xff] %vm3724_vm5, %v3688_v34  ;;  %v4129_v32 = vmul.f32 %v7626_v38, %v3688_v34  ;;  %v3205_v60 = vrot.slane %v3028_v13, 5  ;;  %v6919_v30 = vpop.f32.mrf.mxu0  ;;  %v4168_v52 = vsel %vm3724_vm5, %v4131_v31, 0.0 }
 0x220   : > { %3729 = vst.msk [vmem:[%s6443_s14 + $0x20] sm:$0xff] %vm3724_vm5, %v3689_v54  ;;  %v4130_v49 = vmul.f32 %v6531_v10, %v3689_v54  ;;  %v3586_v19 = vrot.slane %v3402_v23, 6  ;;  %v6925_v59 = vpop.f32.mrf.mxu1  ;;  %v7561_v9 = vrot.slane %v6919_v30, 6  ;;  %v6931_v5 = vsub.s32 %v6837_v40, %v3972_v39 }
 0x221   : > { %v4283_v1 = vsel %vm3724_vm5, %v4246_v6, 0.0  ;;  %v4165_v57 = vsel %vm3724_vm5, %v4129_v32, 0.0  ;;  %v4244_v24 = vmul.f32 %v4129_v32, %v4129_v32  ;;  %v3405_v50 = vpop.f32.mrf.mxu0  ;;  %v3206_v10 = vsel %vm3189_vm11, %v3203_v48, %v3205_v60 }
 0x222   : > { %v4166_v31 = vsel %vm3724_vm5, %v4130_v49, 0.0  ;;  %v4245_v2 = vmul.f32 %v4130_v49, %v4130_v49  ;;  %v3587_v34 = vsel %vm402_vm0, %v3584_v53, %v3586_v19  ;;  %v3031_v23 = vpop.f32.mrf.mxu1  ;;  %v3211_v38 = vrot.slane %v6925_v59, 5 }
 0x223   : > { %v4167_v54 = vadd.f32 %v4166_v31, %v4165_v57  ;;  %v4280_v13 = vsel %vm3724_vm5, %v4244_v24, 0.0  ;;  %v3691_v6 = vadd.f32 %v3587_v34, %v3302_v15  ;;  %v6938_v32 = vpop.f32.mrf.mxu0  ;;  %v3593_v39 = vsel %vm402_vm0, %v3590_v20, %v7561_v9  ;;  %v7627_v57 = vld [vmem:[#allocation10_spill] sm:$0xff] }
 0x224   : > { %v4281_v40 = vsel %vm3724_vm5, %v4245_v2, 0.0  ;;  %v3207_v49 = vrot.slane %v3031_v23, 5  ;;  %v3588_v21 = vrot.slane %v3405_v50, 6  ;;  %v6944_v48 = vpop.f32.mrf.mxu1  ;;  %v3212_v59 = vsel %vm3189_vm11, %v3209_v25, %v3211_v38 }
 0x225   : > { %v4282_v53 = vadd.f32 %v4281_v40, %v4280_v13  ;;  %3731 = vst.msk [vmem:[%s6443_s14 + $0x30] sm:$0xff] %vm3724_vm5, %v3691_v6  ;;  %v4132_v15 = vmul.f32 %v7627_v57, %v3691_v6  ;;  %v4169_v24 = vadd.f32 %v4168_v52, %v4167_v54  ;;  %v6950_v31 = vpop.f32.mrf.mxu0  ;;  %v3306_v2 = vadd.f32 %v3206_v10, %v6630_v45  ;;  %v7628_v57 = vld [vmem:[#allocation11_spill] sm:$0xff] }
 0x226   : > { %v3694_v34 = vadd.f32 %v3593_v39, %v3305_v46  ;;  %v3208_v9 = vsel %vm3189_vm11, %v3205_v60, %v3207_v49  ;;  %v3210_v50 = vsel %vm3189_vm11, %v3207_v49, %v3209_v25  ;;  %v6955_v23 = vpop.f32.mrf.mxu1  ;;  %v3309_v6 = vadd.f32 %v3212_v59, %v6635_v44  ;;  %v7629_v59 = vld [vmem:[#allocation12_spill] sm:$0xff] }
 0x227   : > { %v4170_v13 = vsel %vm3724_vm5, %v4132_v15, 0.0  ;;  %v4247_v40 = vmul.f32 %v4132_v15, %v4132_v15  ;;  %v4284_v33 = vadd.f32 %v4283_v1, %v4282_v53  ;;  %v6959_v52 = vpop.f32.mrf.mxu0  ;;  %v6965_v60 = vadd.f32 %v3208_v9, %v6649_v42 }
 0x228   : > { %v4171_v54 = vadd.f32 %v4170_v13, %v4169_v24  ;;  %3734 = vst.msk [vmem:[%s6443_s14 + $0x48] sm:$0xff] %vm3724_vm5, %v3694_v34  ;;  %v4135_v45 = vmul.f32 %v7628_v57, %v3694_v34  ;;  %v3589_v46 = vsel %vm402_vm0, %v3586_v19, %v3588_v21  ;;  %v6968_v25 = vpop.f32.mrf.mxu1  ;;  %v6972_v44 = vadd.f32 %v3210_v50, %v6651_v22 }
 0x229   : > { %v4285_v10 = vsel %vm3724_vm5, %v4247_v40, 0.0  ;;  %v3591_v1 = vsel %vm402_vm0, %v3588_v21, %v3590_v20  ;;  %v3692_v39 = vadd.f32 %v3589_v46, %v6910_v17  ;;  %v6976_v49 = vpop.f32.mrf.mxu0  ;;  %v3217_v19 = vrot.slane %v6944_v48, 5 }
 0x22a   : > { %v4286_v53 = vadd.f32 %v4285_v10, %v4284_v33  ;;  %v4250_v15 = vmul.f32 %v4135_v45, %v4135_v45  ;;  %v3693_v42 = vadd.f32 %v3591_v1, %v6913_v41  ;;  %v3047_v9 = vpop.f32.mrf.mxu1  ;;  %v4176_v24 = vsel %vm3724_vm5, %v4135_v45, 0.0  ;;  %v7630_v33 = vld [vmem:[#allocation13_spill] sm:$0xff] }
 0x22b   : > { %3732 = vst.msk [vmem:[%s6443_s14 + $0x38] sm:$0xff] %vm3724_vm5, %v3692_v39  ;;  %v4133_v22 = vmul.f32 %v7629_v59, %v3692_v39  ;;  %v3213_v34 = vrot.slane %v6955_v23, 5  ;;  %v3594_v21 = vrot.slane %v6950_v31, 6  ;;  %v6986_v17 = vpop.f32.mrf.mxu0  ;;  %v3598_v41 = vrot.slane %v6938_v32, 6 }
 0x22c   : > { %3733 = vst.msk [vmem:[%s6443_s14 + $0x40] sm:$0xff] %vm3724_vm5, %v3693_v42  ;;  %v4134_v20 = vmul.f32 %v7630_v33, %v3693_v42  ;;  %v3219_v48 = vrot.slane %v6968_v25, 5  ;;  %v7565_v50 = vrot.slane %v6959_v52, 6  ;;  %v6994_v13 = vpop.f32.mrf.mxu1  ;;  %v7631_v31 = vrot.slane %v6919_v30, 6 }
 0x22d   : > { %v4172_v40 = vsel %vm3724_vm5, %v4133_v22, 0.0  ;;  %v4248_v57 = vmul.f32 %v4133_v22, %v4133_v22  ;;  %v3214_v23 = vsel %vm3189_vm11, %v3211_v38, %v3213_v34  ;;  %v7001_v46 = vpop.f32.mrf.mxu0  ;;  %v4291_v32 = vsel %vm3724_vm5, %v4250_v15, 0.0  ;;  %v7632_v15 = vld [vmem:[#allocation18_spill] sm:$0xff] }
 0x22e   : > { %v3595_v45 = vsel %vm402_vm0, %v7631_v31, %v3594_v21  ;;  %v4173_v10 = vadd.f32 %v4172_v40, %v4171_v54  ;;  %v4174_v25 = vsel %vm3724_vm5, %v4134_v20, 0.0  ;;  %v4249_v1 = vmul.f32 %v4134_v20, %v4134_v20  ;;  %v7005_v39 = vpop.f32.mrf.mxu1 }
 0x22f   : > { %v4287_v42 = vsel %vm3724_vm5, %v4248_v57, 0.0  ;;  %v3695_v59 = vadd.f32 %v3595_v45, %v3306_v2  ;;  %v3220_v38 = vsel %vm3189_vm11, %v3217_v19, %v3219_v48  ;;  %v3601_v30 = vsel %vm402_vm0, %v3598_v41, %v7565_v50  ;;  %v7012_v22 = vpop.f32.mrf.mxu0  ;;  %v7633_v2 = vld [vmem:[#allocation14_spill] sm:$0xff]  ;;  %v7634_v45 = vld [vmem:[#allocation19_spill] sm:$0xff] }
 0x230   : > { %v4175_v33 = vadd.f32 %v4174_v25, %v4173_v10  ;;  %v4288_v31 = vadd.f32 %v4287_v42, %v4286_v53  ;;  %v4289_v54 = vsel %vm3724_vm5, %v4249_v1, 0.0  ;;  %v3310_v20 = vadd.f32 %v3214_v23, %v7632_v15  ;;  %v7016_v40 = vpop.f32.mrf.mxu1  ;;  %v7635_v15 = vld [vmem:[#allocation15_spill] sm:$0xff] }
 0x231   : > { %3735 = vst.msk [vmem:[%s6443_s14 + $0x50] sm:$0xff] %vm3724_vm5, %v3695_v59  ;;  %v4136_v57 = vmul.f32 %v7633_v2, %v3695_v59  ;;  %v3313_v7 = vadd.f32 %v3220_v38, %v7634_v45  ;;  %v3698_v16 = vadd.f32 %v3601_v30, %v3309_v6  ;;  %v3215_v61 = vrot.slane %v3047_v9, 5  ;;  %v7022_v50 = vpop.f32.mrf.mxu0 }
 0x232   : > { %v4290_v11 = vadd.f32 %v4289_v54, %v4288_v31  ;;  %v4177_v10 = vadd.f32 %v4176_v24, %v4175_v33  ;;  %v3596_v53 = vrot.slane %v6976_v49, 6  ;;  %v3225_v25 = vrot.slane %v6994_v13, 5  ;;  %v3063_v1 = vpop.f32.mrf.mxu1 }
 0x233   : > { %v4178_v23 = vsel %vm3724_vm5, %v4136_v57, 0.0  ;;  %v4251_v42 = vmul.f32 %v4136_v57, %v4136_v57  ;;  %3738 = vst.msk [vmem:[%s6443_s14 + $0x68] sm:$0xff] %vm3724_vm5, %v3698_v16  ;;  %v4139_v59 = vmul.f32 %v7635_v15, %v3698_v16  ;;  %v3216_v38 = vsel %vm3189_vm11, %v3213_v34, %v3215_v61  ;;  %v7031_v6 = vpop.f32.mrf.mxu0 }
 0x234   : > { %v4179_v9 = vadd.f32 %v4178_v23, %v4177_v10  ;;  %v4292_v30 = vadd.f32 %v4291_v32, %v4290_v11  ;;  %v3218_v24 = vsel %vm3189_vm11, %v3215_v61, %v3217_v19  ;;  %v3606_v49 = vrot.slane %v6986_v17, 6  ;;  %v7035_v33 = vpop.f32.mrf.mxu1 }
 0x235   : > { %v4293_v13 = vsel %vm3724_vm5, %v4251_v42, 0.0  ;;  %v4184_v31 = vsel %vm3724_vm5, %v4139_v59, 0.0  ;;  %v4254_v54 = vmul.f32 %v4139_v59, %v4139_v59  ;;  %v7040_v2 = vadd.f32 %v3216_v38, %v6678_v36  ;;  %v7042_v16 = vpop.f32.mrf.mxu0 }
 0x236   : > { %v4294_v34 = vadd.f32 %v4293_v13, %v4292_v30  ;;  %v3597_v11 = vsel %vm402_vm0, %v3594_v21, %v3596_v53  ;;  %v3599_v61 = vsel %vm402_vm0, %v3596_v53, %v3598_v41  ;;  %v3221_v19 = vrot.slane %v7005_v39, 5  ;;  %v7047_v32 = vpop.f32.mrf.mxu1 }
 0x237   : > { %v3312_v57 = vadd.f32 %v3218_v24, %v6680_v58  ;;  %v3696_v45 = vadd.f32 %v3597_v11, %v6965_v60  ;;  %v3697_v36 = vadd.f32 %v3599_v61, %v6972_v44  ;;  %v3602_v10 = vrot.slane %v7001_v46, 6  ;;  %v7053_v23 = vpop.f32.mrf.mxu0  ;;  %v7636_v58 = vld [vmem:[#allocation16_spill] sm:$0xff]  ;;  %v7637_v44 = vld [vmem:[#allocation17_spill] sm:$0xff] }
 0x238   : > { %v3222_v42 = vsel %vm3189_vm11, %v3219_v48, %v3221_v19  ;;  %v7567_v21 = vrot.slane %v7016_v40, 5  ;;  %v7566_v41 = vrot.slane %v7012_v22, 6  ;;  %v3223_v53 = vrot.slane %v3063_v1, 5  ;;  %v7058_v39 = vpop.f32.mrf.mxu1 }
 0x239   : > { %v4299_v15 = vsel %vm3724_vm5, %v4254_v54, 0.0  ;;  %3736 = vst.msk [vmem:[%s6443_s14 + $0x58] sm:$0xff] %vm3724_vm5, %v3696_v45  ;;  %3737 = vst.msk [vmem:[%s6443_s14 + $0x60] sm:$0xff] %vm3724_vm5, %v3697_v36  ;;  %v4137_v60 = vmul.f32 %v7636_v58, %v3696_v45  ;;  %v4138_v46 = vmul.f32 %v7637_v44, %v3697_v36  ;;  %v7638_v48 = vrot.slane %v6959_v52, 6  ;;  %v7070_v38 = vpop.f32.mrf.mxu0 }
 0x23a   : > { %v7073_v1 = vadd.f32 %v3222_v42, %v6689_v51  ;;  %v3228_v24 = vsel %vm3189_vm11, %v3225_v25, %v7567_v21  ;;  %v3609_v13 = vsel %vm402_vm0, %v3606_v49, %v7566_v41  ;;  %v7083_v54 = vpop.f32.mrf.mxu1  ;;  %v3224_v51 = vsel %vm3189_vm11, %v3221_v19, %v3223_v53 }
 0x23b   : > { %v3603_v59 = vsel %vm402_vm0, %v7638_v48, %v3602_v10  ;;  %v4180_v52 = vsel %vm3724_vm5, %v4137_v60, 0.0  ;;  %v4252_v11 = vmul.f32 %v4137_v60, %v4137_v60  ;;  %v4253_v61 = vmul.f32 %v4138_v46, %v4138_v46 }
 0x23c   : > { %v3699_v30 = vadd.f32 %v3603_v59, %v3310_v20  ;;  %v7087_v20 = vpop.f32.mrf.mxu0  ;;  %v4181_v45 = vadd.f32 %v4180_v52, %v4179_v9  ;;  %v4182_v36 = vsel %vm3724_vm5, %v4138_v46, 0.0  ;;  %v3702_v58 = vadd.f32 %v3609_v13, %v3313_v7  ;;  %v7093_v44 = vpop.f32.mrf.mxu1  ;;  %v7639_v59 = vld [vmem:[#allocation3_spill] sm:$0xff] }
 0x23d   : > { %v4295_v48 = vsel %vm3724_vm5, %v4252_v11, 0.0  ;;  %v4297_v60 = vsel %vm3724_vm5, %v4253_v61, 0.0  ;;  %v7098_v41 = vadd.f32 %v3228_v24, %v7639_v59  ;;  %v3226_v19 = vsel %vm3189_vm11, %v3223_v53, %v3225_v25  ;;  %v7640_v24 = vld [vmem:[#allocation5_spill] sm:$0xff] }
 0x23e   : > { %3739 = vst.msk [vmem:[%s6443_s14 + $0x70] sm:$0xff] %vm3724_vm5, %v3699_v30  ;;  %v4140_v42 = vmul.f32 %v6686_v55, %v3699_v30  ;;  %v7101_v21 = vpop.f32.mrf.mxu0  ;;  %v4183_v9 = vadd.f32 %v4182_v36, %v4181_v45  ;;  %v4296_v46 = vadd.f32 %v4295_v48, %v4294_v34  ;;  %3742 = vst.msk [vmem:[%s6443_s14 + $0x88] sm:$0xff] %vm3724_vm5, %v3702_v58  ;;  %v7108_v7 = vpop.f32.mrf.mxu1  ;;  %v3604_v25 = vrot.slane %v7022_v50, 6 }
 0x23f   : > { %v7106_v55 = vadd.f32 %v3224_v51, %v6705_v18  ;;  %v4143_v13 = vmul.f32 %v6714_v14, %v3702_v58  ;;  %v7113_v11 = vadd.f32 %v3226_v19, %v7640_v24  ;;  %v3233_v18 = vrot.slane %v7035_v33, 5 }
 0x240   : > { %v4255_v52 = vmul.f32 %v4140_v42, %v4140_v42  ;;  %v4186_v30 = vsel %vm3724_vm5, %v4140_v42, 0.0  ;;  %v7116_v53 = vpop.f32.mrf.mxu0  ;;  %v4298_v34 = vadd.f32 %v4297_v60, %v4296_v46  ;;  %v4185_v61 = vadd.f32 %v4184_v31, %v4183_v9  ;;  %v7120_v51 = vpop.f32.mrf.mxu1 }
 0x241   : > { %v4258_v36 = vmul.f32 %v4143_v13, %v4143_v13  ;;  %v3605_v42 = vsel %vm402_vm0, %v3602_v10, %v3604_v25  ;;  %v3607_v14 = vsel %vm402_vm0, %v3604_v25, %v3606_v49  ;;  %v3614_v50 = vrot.slane %v7031_v6, 6 }
 0x242   : > { %v4301_v45 = vsel %vm3724_vm5, %v4255_v52, 0.0  ;;  %v7127_v58 = vpop.f32.mrf.mxu0  ;;  %v4187_v31 = vadd.f32 %v4186_v30, %v4185_v61  ;;  %v4300_v48 = vadd.f32 %v4299_v15, %v4298_v34  ;;  %v3700_v60 = vadd.f32 %v3605_v42, %v7040_v2  ;;  %v7130_v59 = vpop.f32.mrf.mxu1 }
 0x243   : > { %v3701_v33 = vadd.f32 %v3607_v14, %v3312_v57  ;;  %v4192_v19 = vsel %vm3724_vm5, %v4143_v13, 0.0  ;;  %v3229_v10 = vrot.slane %v7047_v32, 5  ;;  %v3610_v17 = vrot.slane %v7042_v16, 6 }
 0x244   : > { %v3235_v9 = vrot.slane %v7058_v39, 5  ;;  %v7136_v49 = vpop.f32.mrf.mxu0  ;;  %v4302_v6 = vadd.f32 %v4301_v45, %v4300_v48  ;;  %3740 = vst.msk [vmem:[%s6443_s14 + $0x78] sm:$0xff] %vm3724_vm5, %v3700_v60  ;;  %v4141_v2 = vmul.f32 %v6774_v28, %v3700_v60  ;;  %v3616_v15 = vrot.slane %v7053_v23, 6  ;;  %v7145_v46 = vpop.f32.mrf.mxu1 }
 0x245   : > { %3741 = vst.msk [vmem:[%s6443_s14 + $0x80] sm:$0xff] %vm3724_vm5, %v3701_v33  ;;  %v4142_v57 = vmul.f32 %v6791_v37, %v3701_v33  ;;  %v7641_v32 = vrot.slane %v7016_v40, 5  ;;  %v7642_v52 = vrot.slane %v7012_v22, 6  ;;  %v3231_v28 = vrot.slane %v7083_v54, 5 }
 0x246   : > { %v3236_v13 = vsel %vm3189_vm11, %v3233_v18, %v3235_v9  ;;  %v7157_v24 = vpop.f32.mrf.mxu0  ;;  %v4307_v37 = vsel %vm3724_vm5, %v4258_v36, 0.0  ;;  %v4188_v25 = vsel %vm3724_vm5, %v4141_v2, 0.0  ;;  %v4256_v40 = vmul.f32 %v4141_v2, %v4141_v2  ;;  %v7161_v61 = vpop.f32.mrf.mxu1  ;;  %v7643_v36 = vld [vmem:[#allocation4_spill] sm:$0xff] }
 0x247   : > { %v3230_v16 = vsel %vm3189_vm11, %v7641_v32, %v3229_v10  ;;  %v3611_v30 = vsel %vm402_vm0, %v7642_v52, %v3610_v17  ;;  %v4257_v34 = vmul.f32 %v4142_v57, %v4142_v57  ;;  %v4189_v22 = vadd.f32 %v4188_v25, %v4187_v31 }
 0x248   : > { %v4190_v45 = vsel %vm3724_vm5, %v4142_v57, 0.0  ;;  %v7165_v42 = vadd.f32 %v3230_v16, %v6718_v26  ;;  %v3703_v14 = vadd.f32 %v3611_v30, %v7073_v1  ;;  %v7168_v54 = vpop.f32.mrf.mxu0  ;;  %v4303_v48 = vsel %vm3724_vm5, %v4256_v40, 0.0  ;;  %v7178_v2 = vpop.f32.mrf.mxu1 }
 0x249   : > { %v7172_v60 = vadd.f32 %v3236_v13, %v7643_v36  ;;  %v3617_v33 = vsel %vm402_vm0, %v3614_v50, %v3616_v15  ;;  %v3232_v31 = vsel %vm3189_vm11, %v3229_v10, %v3231_v28  ;;  %v4191_v26 = vadd.f32 %v4190_v45, %v4189_v22 }
 0x24a   : > { %v4304_v57 = vadd.f32 %v4303_v48, %v4302_v6  ;;  %3743 = vst.msk [vmem:[%s6443_s14 + $0x90] sm:$0xff] %vm3724_vm5, %v3703_v14  ;;  %v4144_v1 = vmul.f32 %v6826_v4, %v3703_v14  ;;  %v3706_v32 = vadd.f32 %v3617_v33, %v7098_v41  ;;  %v7184_v16 = vpop.f32.mrf.mxu0  ;;  %v4305_v52 = vsel %vm3724_vm5, %v4257_v34, 0.0  ;;  %v7192_v25 = vpop.f32.mrf.mxu1 }
 0x24b   : > { %v3234_v30 = vsel %vm3189_vm11, %v3231_v28, %v3233_v18  ;;  %v7189_v13 = vadd.f32 %v3232_v31, %v6736_v63  ;;  %v3612_v10 = vrot.slane %v7070_v38, 6  ;;  %v4193_v40 = vadd.f32 %v4192_v19, %v4191_v26 }
 0x24c   : > { %v4306_v6 = vadd.f32 %v4305_v52, %v4304_v57  ;;  %v4259_v22 = vmul.f32 %v4144_v1, %v4144_v1  ;;  %3746 = vst.msk [vmem:[%s6443_s14 + $0xa8] sm:$0xff] %vm3724_vm5, %v3706_v32  ;;  %v3241_v4 = vrot.slane %v7093_v44, 5  ;;  %v7197_v41 = vpop.f32.mrf.mxu0  ;;  %v4194_v34 = vsel %vm3724_vm5, %v4144_v1, 0.0  ;;  %v7203_v28 = vpop.f32.mrf.mxu1 }
 0x24d   : > { %v4147_v18 = vmul.f32 %v6851_v12, %v3706_v32  ;;  %v3613_v63 = vsel %vm402_vm0, %v3610_v17, %v3612_v10  ;;  %v3615_v38 = vsel %vm402_vm0, %v3612_v10, %v3614_v50  ;;  %v4195_v45 = vadd.f32 %v4194_v34, %v4193_v40 }
 0x24e   : > { %v4308_v19 = vadd.f32 %v4307_v37, %v4306_v6  ;;  %v7206_v14 = vadd.f32 %v3234_v30, %v6738_v47  ;;  %v3704_v48 = vadd.f32 %v3613_v63, %v7106_v55  ;;  %v7209_v36 = vpop.f32.mrf.mxu0  ;;  %v4309_v33 = vsel %vm3724_vm5, %v4259_v22, 0.0  ;;  %v7214_v50 = vpop.f32.mrf.mxu1 }
 0x24f   : > { %v4200_v12 = vsel %vm3724_vm5, %v4147_v18, 0.0  ;;  %v4262_v31 = vmul.f32 %v4147_v18, %v4147_v18  ;;  %v3705_v17 = vadd.f32 %v3615_v38, %v7113_v11  ;;  %v3237_v47 = vrot.slane %v7108_v7, 5 }
 0x250   : > { %v4310_v26 = vadd.f32 %v4309_v33, %v4308_v19  ;;  %3744 = vst.msk [vmem:[%s6443_s14 + $0x98] sm:$0xff] %vm3724_vm5, %v3704_v48  ;;  %v4145_v37 = vmul.f32 %v6854_v62, %v3704_v48  ;;  %v3618_v55 = vrot.slane %v7101_v21, 6  ;;  %v7221_v57 = vpop.f32.mrf.mxu0  ;;  %v3622_v32 = vrot.slane %v7087_v20, 6  ;;  %v7229_v30 = vpop.f32.mrf.mxu1 }
 0x251   : > { %3745 = vst.msk [vmem:[%s6443_s14 + $0xa0] sm:$0xff] %vm3724_vm5, %v3705_v17  ;;  %v4146_v1 = vmul.f32 %v6858_v43, %v3705_v17  ;;  %v3243_v11 = vrot.slane %v7120_v51, 5  ;;  %v3624_v52 = vrot.slane %v7116_v53, 6  ;;  %v3238_v21 = vsel %vm3189_vm11, %v3235_v9, %v3237_v47 }
 0x252   : > { %v4196_v62 = vsel %vm3724_vm5, %v4145_v37, 0.0  ;;  %v4260_v10 = vmul.f32 %v4145_v37, %v4145_v37  ;;  %v3619_v7 = vsel %vm402_vm0, %v3616_v15, %v3618_v55  ;;  %v7238_v43 = vpop.f32.mrf.mxu0  ;;  %v4315_v20 = vsel %vm3724_vm5, %v4262_v31, 0.0  ;;  %v7242_v22 = vpop.f32.mrf.mxu1 }
 0x253   : > { %v4197_v51 = vadd.f32 %v4196_v62, %v4195_v45  ;;  %v4198_v6 = vsel %vm3724_vm5, %v4146_v1, 0.0  ;;  %v4261_v40 = vmul.f32 %v4146_v1, %v4146_v1  ;;  %v3707_v39 = vadd.f32 %v3619_v7, %v7165_v42 }
 0x254   : > { %v4311_v34 = vsel %vm3724_vm5, %v4260_v10, 0.0  ;;  %v3244_v23 = vsel %vm3189_vm11, %v3241_v4, %v3243_v11  ;;  %v3625_v9 = vsel %vm402_vm0, %v3622_v32, %v3624_v52  ;;  %v7252_v15 = vpop.f32.mrf.mxu0  ;;  %v3322_v45 = vadd.f32 %v3238_v21, %v6746_v3  ;;  %v5291_v19 = vpop.f32.mrf.mxu1 }
 0x255   : > { %v4199_v18 = vadd.f32 %v4198_v6, %v4197_v51  ;;  %v4312_v63 = vadd.f32 %v4311_v34, %v4310_v26  ;;  %v4313_v38 = vsel %vm3724_vm5, %v4261_v40, 0.0  ;;  %3747 = vst.msk [vmem:[%s6443_s14 + $0xb0] sm:$0xff] %vm3724_vm5, %v3707_v39  ;;  %v4148_v42 = vmul.f32 %v6865_v29, %v3707_v39 }
 0x256   : > { %v3325_v48 = vadd.f32 %v3244_v23, %v6754_v27  ;;  %v3710_v33 = vadd.f32 %v3625_v9, %v7172_v60  ;;  %v3239_v31 = vrot.slane %v7130_v59, 5  ;;  %v7262_v17 = vpop.f32.mrf.mxu0  ;;  %v3620_v1 = vrot.slane %v7127_v58, 6  ;;  %v7266_v3 = vpop.f32.mrf.mxu1 }
 0x257   : > { %v4314_v37 = vadd.f32 %v4313_v38, %v4312_v63  ;;  %v4201_v26 = vadd.f32 %v4200_v12, %v4199_v18  ;;  %v3249_v62 = vrot.slane %v7145_v46, 5  ;;  %v4202_v10 = vsel %vm3724_vm5, %v4148_v42, 0.0 }
 0x258   : > { %v4263_v21 = vmul.f32 %v4148_v42, %v4148_v42  ;;  %3750 = vst.msk [vmem:[%s6443_s14 + $0xc8] sm:$0xff] %vm3724_vm5, %v3710_v33  ;;  %v4151_v27 = vmul.f32 %v6880_v56, %v3710_v33  ;;  %v3240_v29 = vsel %vm3189_vm11, %v3237_v47, %v3239_v31  ;;  %v7273_v59 = vpop.f32.mrf.mxu0  ;;  %v3242_v58 = vsel %vm3189_vm11, %v3239_v31, %v3241_v4  ;;  %v5292_v51 = vpop.f32.mrf.mxu1 }
 0x259   : > { %v4203_v60 = vadd.f32 %v4202_v10, %v4201_v26  ;;  %v4316_v7 = vadd.f32 %v4315_v20, %v4314_v37  ;;  %v3630_v12 = vrot.slane %v7136_v49, 6  ;;  %v3323_v56 = vadd.f32 %v3240_v29, %v6765_v8  ;;  %v7646_v26 = vld [vmem:[#allocation20_spill] sm:$0xff] }
 0x25a   : > { %v4317_v6 = vsel %vm3724_vm5, %v4263_v21, 0.0  ;;  %v4208_v40 = vsel %vm3724_vm5, %v4151_v27, 0.0  ;;  %v4266_v34 = vmul.f32 %v4151_v27, %v4151_v27  ;;  %v7282_v39 = vpop.f32.mrf.mxu0  ;;  %v3621_v20 = vsel %vm402_vm0, %v3618_v55, %v3620_v1  ;;  %v3143_v23 = vpop.f32.mrf.mxu1 }
 0x25b   : > { %v4318_v47 = vadd.f32 %v4317_v6, %v4316_v7  ;;  %v3623_v44 = vsel %vm402_vm0, %v3620_v1, %v3622_v32  ;;  %v3245_v4 = vrot.slane %v7161_v61, 5  ;;  %v3324_v9 = vadd.f32 %v3242_v58, %v6767_v0  ;;  %v7647_v58 = vld [vmem:[#allocation21_spill] sm:$0xff]  ;;  %v7648_v6 = vld [vmem:[#allocation30_spill] sm:$0xff] }
 0x25c   : > { %v3708_v18 = vadd.f32 %v3621_v20, %v7189_v13  ;;  %v3709_v63 = vadd.f32 %v3623_v44, %v7206_v14  ;;  %v3626_v8 = vrot.slane %v7157_v24, 6  ;;  %v5337_v38 = vpop.f32.mrf.mxu0  ;;  %vm4044_vm2 = vcmp.lt.s32.totalorder %v6931_v5, 16  ;;  %v7644_v13 = vld [vmem:[#allocation31_spill] sm:$0xff] }
 0x25d   : > { %v3246_v19 = vsel %vm3189_vm11, %v3243_v11, %v3245_v4  ;;  %v3251_v55 = vrot.slane %v7178_v2, 5  ;;  %v3632_v32 = vrot.slane %v7168_v54, 6  ;;  %v4323_v61 = vsel %vm3724_vm5, %v4266_v34, 0.0 }
 0x25e   : > { %3748 = vst.msk [vmem:[%s6443_s14 + $0xb8] sm:$0xff] %vm3724_vm5, %v3708_v18  ;;  %3749 = vst.msk [vmem:[%s6443_s14 + $0xc0] sm:$0xff] %vm3724_vm5, %v3709_v63  ;;  %v4149_v0 = vmul.f32 %v6896_v35, %v3708_v18  ;;  %v4150_v24 = vmul.f32 %v7644_v13, %v3709_v63  ;;  %v3627_v14 = vsel %vm402_vm0, %v3624_v52, %v3626_v8  ;;  %v7305_v5 = vpop.f32.mrf.mxu0  ;;  %v7645_v42 = vmov 0.0  }
 0x25f   : > { %v3711_v11 = vadd.f32 %v3627_v14, %v3322_v45  ;;  %v4703_v33 = vsel %vm4044_vm2, 1.0, %v7645_v42  ;;  %v3252_v31 = vsel %vm3189_vm11, %v3249_v62, %v3251_v55  ;;  %v3633_v35 = vsel %vm402_vm0, %v3630_v12, %v3632_v32  ;;  %3767 = vst.msk [vmem:[%s6443_s14 + $0x148] sm:$0x7] %vm3766_vm7, %v7645_v42 }
 0x260   : > { %v4204_v53 = vsel %vm3724_vm5, %v4149_v0, 0.0  ;;  %v4264_v52 = vmul.f32 %v4149_v0, %v4149_v0  ;;  %v4265_v37 = vmul.f32 %v4150_v24, %v4150_v24  ;;  %v3326_v45 = vadd.f32 %v3246_v19, %v7646_v26  ;;  %v5338_v1 = vpop.f32.mrf.mxu0 }
 0x261   : > { %v4205_v10 = vadd.f32 %v4204_v53, %v4203_v60  ;;  %v4206_v21 = vsel %vm3724_vm5, %v4150_v24, 0.0  ;;  %3751 = vst.msk [vmem:[%s6443_s14 + $0xd0] sm:$0xff] %vm3724_vm5, %v3711_v11  ;;  %v4152_v27 = vmul.f32 %v4703_v33, %v3711_v11  ;;  %v3714_v29 = vadd.f32 %v3633_v35, %v3325_v48  ;;  %v7649_v11 = vld [vmem:[#allocation22_spill] sm:$0xff] }
 0x262   : > { %v4319_v7 = vsel %vm3724_vm5, %v4264_v52, 0.0  ;;  %v7325_v51 = vadd.f32 %v3252_v31, %v7647_v58  ;;  %v5405_v34 = vtrunc.f32 %v7648_v6  ;;  %v3247_v20 = vrot.slane %v7192_v25, 5  ;;  %v3533_v44 = vpop.f32.mrf.mxu0  ;;  %v7650_v52 = vld [vmem:[#allocation27_spill] sm:$0xff]  ;;  %v7656_v58 = vld [vmem:[#allocation2_spill] sm:$0xff] }
 0x263   : > { %v4207_v23 = vadd.f32 %v4206_v21, %v4205_v10  ;;  %v4320_v18 = vadd.f32 %v4319_v7, %v4318_v47  ;;  %v4321_v60 = vsel %vm3724_vm5, %v4265_v37, 0.0  ;;  %v4267_v63 = vmul.f32 %v4152_v27, %v4152_v27  ;;  %3754 = vst.msk [vmem:[%s6443_s14 + $0xe8] sm:$0xff] %vm3724_vm5, %v3714_v29  ;;  %v7651_v37 = vld [vmem:[#allocation23_spill] sm:$0xff]  ;;  %v7654_v21 = vld [vmem:[#allocation29_spill] sm:$0xff] }
 0x264   : > { %v4210_v38 = vsel %vm3724_vm5, %v4152_v27, 0.0  ;;  %v5406_v48 = vcvt.f32.s32 %v5405_v34  ;;  %v3248_v19 = vsel %vm3189_vm11, %v3245_v4, %v3247_v20  ;;  %v3628_v0 = vrot.slane %v7184_v16, 6 }
 0x265   : > { %v4322_v13 = vadd.f32 %v4321_v60, %v4320_v18  ;;  %v4209_v24 = vadd.f32 %v4208_v40, %v4207_v23  ;;  %v4325_v25 = vsel %vm3724_vm5, %v4267_v63, 0.0  ;;  %v3250_v47 = vsel %vm3189_vm11, %v3247_v20, %v3249_v62  ;;  %v7652_v62 = vld [vmem:[#allocation28_spill] sm:$0xff] }
 0x266   : > { %v3975_v14 = vmul.u32 18, %v5406_v48  ;;  %v7340_v33 = vadd.f32 %v3248_v19, %v7649_v11  ;;  %v3629_v31 = vsel %vm402_vm0, %v3626_v8, %v3628_v0  ;;  %v3631_v16 = vsel %vm402_vm0, %v3628_v0, %v3630_v12 }
 0x267   : > { %v7346_v4 = vadd.f32 %v4210_v38, %v4209_v24  ;;  %v4324_v40 = vadd.f32 %v4323_v61, %v4322_v13  ;;  %v3712_v35 = vadd.f32 %v3629_v31, %v3323_v56  ;;  %v3713_v53 = vadd.f32 %v3631_v16, %v3324_v9 }
 0x268   : > { %v4011_v46 = vsub.s32 %v7650_v52, %v3975_v14  ;;  %v7350_v26 = vadd.f32 %v3250_v47, %v7651_v37  ;;  %v7653_v1 = vcvt.s32.f32 %v7652_v62  ;;  %v7655_v27 = vcvt.s32.f32 %v7654_v21 }
 0x269   : > { %v7356_v7 = vadd.f32 %v4325_v25, %v4324_v40  ;;  %3752 = vst.msk [vmem:[%s6443_s14 + $0xd8] sm:$0xff] %vm3724_vm5, %v3712_v35  ;;  %3753 = vst.msk [vmem:[%s6443_s14 + $0xe0] sm:$0xff] %vm3724_vm5, %v3713_v53  ;;  %v3257_v49 = vrot.slane %v7203_v28, 5  ;;  %v3253_v12 = vrot.slane %v7214_v50, 5  ;;  %v3634_v56 = vrot.slane %v7209_v36, 6  ;;  %v7658_v25 = vld [vmem:[#allocation9_spill] sm:$0xff] }
 0x26a   : > { %v3865_v10 = vadd.f32 0.5, %v7653_v1  ;;  %v3866_v8 = vadd.f32 0.5, %v7655_v27  ;;  %vm4047_vm3 = vcmp.lt.s32.totalorder %v4011_v46, 16  ;;  %v3796_v6 = vadd.s32 216, %v7656_v58 }
 0x26b   : > { %v4706_v34 = vsel %vm4047_vm3, 1.0, %v7645_v42  ;;  %v3254_v20 = vsel %vm3189_vm11, %v3251_v55, %v3253_v12  ;;  %v3635_v28 = vsel %vm402_vm0, %v3632_v32, %v3634_v56  ;;  %v3259_v50 = vrot.slane %v7229_v30, 5  ;;  %v7657_v32 = vld [vmem:[#allocation7_spill] sm:$0xff] }
 0x26c   : > { %v3901_v9 = vmul.f32 0.055555556, %v3865_v10  ;;  %v3902_v61 = vmul.f32 0.055555556, %v3866_v8  ;;  %v4155_v44 = vmul.f32 %v4706_v34, %v3714_v29  ;;  %v3638_v18 = vrot.slane %v7197_v41, 6 }
 0x26d   : > { %v7375_v60 = vadd.f32 %v3635_v28, %v3326_v45  ;;  %v3832_v63 = vcvt.s32.f32 %v3796_v6  ;;  %v3260_v2 = vsel %vm3189_vm11, %v3257_v49, %v3259_v50  ;;  %v3640_v55 = vrot.slane %v7221_v57, 6 }
 0x26e   : > { %v5401_v36 = vtrunc.f32 %v3901_v9  ;;  %v5403_v23 = vtrunc.f32 %v3902_v61  ;;  %v4270_v54 = vmul.f32 %v4155_v44, %v4155_v44  ;;  %v7382_v19 = vadd.f32 %v3254_v20, %v7657_v32 }
 0x26f   : > { %v4216_v29 = vsel %vm3724_vm5, %v4155_v44, 0.0  ;;  %3755 = vst.msk [vmem:[%s6443_s14 + $0xf0] sm:$0xff] %vm3724_vm5, %v7375_v60  ;;  %v3868_v41 = vadd.f32 0.5, %v3832_v63  ;;  %v3641_v45 = vsel %vm402_vm0, %v3638_v18, %v3640_v55  ;;  %v3799_v0 = vadd.s32 240, %v7656_v58 }
 0x270   : > { %v5402_v38 = vcvt.f32.s32 %v5401_v36  ;;  %v5404_v48 = vcvt.f32.s32 %v5403_v23  ;;  %v7393_v47 = vadd.f32 %v3260_v2, %v7658_v25  ;;  %v7396_v14 = vadd.f32 %v3641_v45, %v7325_v51 }
 0x271   : > { %v4331_v11 = vsel %vm3724_vm5, %v4270_v54, 0.0  ;;  %v3904_v31 = vmul.f32 0.055555556, %v3868_v41  ;;  %v3835_v16 = vcvt.s32.f32 %v3799_v0  ;;  %v3255_v40 = vrot.slane %v7242_v22, 5 }
 0x272   : > { %v3973_v13 = vmul.u32 18, %v5402_v38  ;;  %v3974_v24 = vmul.u32 18, %v5404_v48  ;;  %3758 = vst.msk [vmem:[%s6443_s14 + $0x108] sm:$0xff] %vm3724_vm5, %v7396_v14  ;;  %v3636_v37 = vrot.slane %v7238_v43, 6  ;;  %v7407_v1 = vadd.s32 224, %v7656_v58  ;;  %v7660_v48 = vld [vmem:[#allocation25_spill] sm:$0xff] }
 0x273   : > { %v5407_v51 = vtrunc.f32 %v3904_v31  ;;  %v3871_v10 = vadd.f32 0.5, %v3835_v16  ;;  %v3256_v27 = vsel %vm3189_vm11, %v3253_v12, %v3255_v40  ;;  %v7411_v8 = vadd.s32 232, %v7656_v58 }
 0x274   : > { %v4009_v52 = vsub.s32 %v7652_v62, %v3973_v13  ;;  %v4010_v46 = vsub.s32 %v7654_v21, %v3974_v24  ;;  %v3258_v22 = vsel %vm3189_vm11, %v3255_v40, %v3257_v49  ;;  %v7659_v62 = vld [vmem:[#allocation24_spill] sm:$0xff]  ;;  %v3637_v28 = vsel %vm402_vm0, %v3634_v56, %v3636_v37 }
 0x275   : > { %v7415_v21 = vadd.f32 %v3256_v27, %v7659_v62  ;;  %v5408_v61 = vcvt.f32.s32 %v5407_v51  ;;  %v3907_v34 = vmul.f32 0.055555556, %v3871_v10  ;;  %v3639_v44 = vsel %vm402_vm0, %v3636_v37, %v3638_v18 }
 0x276   : > { %vm4045_vm4 = vcmp.lt.s32.totalorder %v4009_v52, 16  ;;  %vm4046_vm6 = vcmp.lt.s32.totalorder %v4010_v46, 16  ;;  %v7422_v49 = vadd.f32 %v3637_v28, %v7340_v33  ;;  %v7425_v63 = vadd.f32 %v3639_v44, %v7350_v26  ;;  %v7661_v28 = vld [vmem:[#allocation26_spill] sm:$0xff] }
 0x277   : > { %v4704_v9 = vsel %vm4045_vm4, 1.0, %v7645_v42  ;;  %v4705_v43 = vsel %vm4046_vm6, 1.0, %v7645_v42  ;;  %v3976_v36 = vmul.u32 18, %v5408_v61  ;;  %v5413_v23 = vtrunc.f32 %v3907_v34 }
 0x278   : > { %v4153_v20 = vmul.f32 %v4704_v9, %v3712_v35  ;;  %v4154_v12 = vmul.f32 %v4705_v43, %v3713_v53  ;;  %v7429_v35 = vadd.f32 %v3258_v22, %v7660_v48  ;;  %3756 = vst.msk [vmem:[%s6443_s14 + $0xf8] sm:$0xff] %vm3724_vm5, %v7422_v49  ;;  %3757 = vst.msk [vmem:[%s6443_s14 + $0x100] sm:$0xff] %vm3724_vm5, %v7425_v63  ;;  %v3833_v33 = vcvt.s32.f32 %v7407_v1 }
 0x279   : > { %v4012_v56 = vsub.s32 %v3796_v6, %v3976_v36  ;;  %v5414_v32 = vcvt.f32.s32 %v5413_v23  ;;  %v3834_v45 = vcvt.s32.f32 %v7411_v8  ;;  %v3261_v16 = vrot.slane %v7266_v3, 5 }
 0x27a   : > { %v4212_v2 = vsel %vm3724_vm5, %v4153_v20, 0.0  ;;  %v4268_v54 = vmul.f32 %v4153_v20, %v4153_v20  ;;  %v4269_v38 = vmul.f32 %v4154_v12, %v4154_v12  ;;  %v4214_v26 = vsel %vm3724_vm5, %v4154_v12, 0.0 }
 0x27b   : > { %v4213_v53 = vadd.f32 %v4212_v2, %v7346_v4  ;;  %vm4048_vm8 = vcmp.lt.s32.totalorder %v4012_v56, 16  ;;  %v3979_v6 = vmul.u32 18, %v5414_v32  ;;  %v3869_v25 = vadd.f32 0.5, %v3833_v33 }
 0x27c   : > { %v4327_v18 = vsel %vm3724_vm5, %v4268_v54, 0.0  ;;  %v4329_v41 = vsel %vm3724_vm5, %v4269_v38, 0.0  ;;  %v4707_v24 = vsel %vm4048_vm8, 1.0, %v7645_v42  ;;  %v3870_v31 = vadd.f32 0.5, %v3834_v45 }
 0x27d   : > { %v4215_v13 = vadd.f32 %v4214_v26, %v4213_v53  ;;  %v4328_v4 = vadd.f32 %v4327_v18, %v7356_v7  ;;  %v4156_v52 = vmul.f32 %v4707_v24, %v7375_v60  ;;  %v4015_v37 = vsub.s32 %v3799_v0, %v3979_v6 }
 0x27e   : > { %v3905_v51 = vmul.f32 0.055555556, %v3869_v25  ;;  %v3906_v10 = vmul.f32 0.055555556, %v3870_v31  ;;  %v3262_v27 = vsel %vm3189_vm11, %v3259_v50, %v3261_v16  ;;  %v3642_v7 = vrot.slane %v7262_v17, 6 }
 0x27f   : > { %v4330_v40 = vadd.f32 %v4329_v41, %v4328_v4  ;;  %v4217_v46 = vadd.f32 %v4216_v29, %v4215_v13  ;;  %v4218_v22 = vsel %vm3724_vm5, %v4156_v52, 0.0  ;;  %v4271_v62 = vmul.f32 %v4156_v52, %v4156_v52 }
 0x280   : > { %vm4051_vm9 = vcmp.lt.s32.totalorder %v4015_v37, 16  ;;  %v5409_v61 = vtrunc.f32 %v3905_v51  ;;  %v5411_v60 = vtrunc.f32 %v3906_v10  ;;  %v3646_v30 = vrot.slane %v7252_v15, 6 }
 0x281   : > { %v4332_v9 = vadd.f32 %v4331_v11, %v4330_v40  ;;  %v4219_v43 = vadd.f32 %v4218_v22, %v4217_v46  ;;  %v4710_v3 = vsel %vm4051_vm9, 1.0, %v7645_v42  ;;  %v4333_v29 = vsel %vm3724_vm5, %v4271_v62, 0.0 }
 0x282   : > { %v4159_v0 = vmul.f32 %v4710_v3, %v7396_v14  ;;  %v3643_v17 = vsel %vm402_vm0, %v3640_v55, %v3642_v7  ;;  %v5410_v34 = vcvt.f32.s32 %v5409_v61  ;;  %v5412_v11 = vcvt.f32.s32 %v5411_v60 }
 0x283   : > { %v4334_v50 = vadd.f32 %v4333_v29, %v4332_v9  ;;  %v7460_v20 = vadd.f32 %v3643_v17, %v7382_v19  ;;  %v3334_v44 = vadd.f32 %v3262_v27, %v7661_v28  ;;  %v3800_v36 = vadd.s32 248, %v7656_v58 }
 0x284   : > { %v4224_v12 = vsel %vm3724_vm5, %v4159_v0, 0.0  ;;  %v3648_v14 = vrot.slane %v7273_v59, 6  ;;  %v3977_v23 = vmul.u32 18, %v5410_v34  ;;  %v3978_v15 = vmul.u32 18, %v5412_v11 }
 0x285   : > { %3759 = vst.msk [vmem:[%s6443_s14 + $0x110] sm:$0xff] %vm3724_vm5, %v7460_v20  ;;  %v7470_v57 = vadd.s32 272, %v7656_v58  ;;  %v3644_v55 = vrot.slane %v7282_v39, 6  ;;  %v4274_v19 = vmul.f32 %v4159_v0, %v4159_v0  ;;  %v3836_v2 = vcvt.s32.f32 %v3800_v36 }
 0x286   : > { %v3649_v54 = vsel %vm402_vm0, %v3646_v30, %v3648_v14  ;;  %v7475_v38 = vadd.s32 256, %v7656_v58  ;;  %v4013_v59 = vsub.s32 %v7407_v1, %v3977_v23  ;;  %v4014_v48 = vsub.s32 %v7411_v8, %v3978_v15 }
 0x287   : > { %v7480_v53 = vadd.f32 %v3649_v54, %v7393_v47  ;;  %v3839_v56 = vcvt.s32.f32 %v7470_v57  ;;  %v3872_v32 = vadd.f32 0.5, %v3836_v2  ;;  %v3645_v39 = vsel %vm402_vm0, %v3642_v7, %v3644_v55 }
 0x288   : > { %v3647_v33 = vsel %vm402_vm0, %v3644_v55, %v3646_v30  ;;  %v7486_v26 = vadd.s32 264, %v7656_v58  ;;  %vm4049_vm10 = vcmp.lt.s32.totalorder %v4013_v59, 16  ;;  %vm4050_vm11 = vcmp.lt.s32.totalorder %v4014_v48, 16 }
 0x289   : > { %3762 = vst.msk [vmem:[%s6443_s14 + $0x128] sm:$0xff] %vm3724_vm5, %v7480_v53  ;;  %v3875_v1 = vadd.f32 0.5, %v3839_v56  ;;  %v7492_v47 = vadd.f32 %v3645_v39, %v7415_v21  ;;  %v4708_v8 = vsel %vm4049_vm10, 1.0, %v7645_v42  ;;  %v4709_v18 = vsel %vm4050_vm11, 1.0, %v7645_v42 }
 0x28a   : > { %v3908_v41 = vmul.f32 0.055555556, %v3872_v32  ;;  %v7497_v45 = vadd.f32 %v3647_v33, %v7429_v35  ;;  %v4157_v13 = vmul.f32 %v4708_v8, %v7422_v49  ;;  %v4158_v4 = vmul.f32 %v4709_v18, %v7425_v63 }
 0x28b   : > { %v3911_v6 = vmul.f32 0.055555556, %v3875_v1  ;;  %3760 = vst.msk [vmem:[%s6443_s14 + $0x118] sm:$0xff] %vm3724_vm5, %v7492_v47  ;;  %v3837_v24 = vcvt.s32.f32 %v7475_v38  ;;  %v3838_v25 = vcvt.s32.f32 %v7486_v26  ;;  %v3650_v31 = vrot.slane %v7305_v5, 6 }
 0x28c   : > { %v5415_v21 = vtrunc.f32 %v3908_v41  ;;  %3761 = vst.msk [vmem:[%s6443_s14 + $0x120] sm:$0xff] %vm3724_vm5, %v7497_v45  ;;  %v3804_v35 = vadd.s32 280, %v7656_v58  ;;  %v4220_v49 = vsel %vm3724_vm5, %v4157_v13, 0.0  ;;  %v4222_v63 = vsel %vm3724_vm5, %v4158_v4, 0.0 }
 0x28d   : > { %v4272_v16 = vmul.f32 %v4157_v13, %v4157_v13  ;;  %v4273_v40 = vmul.f32 %v4158_v4, %v4158_v4  ;;  %v4221_v52 = vadd.f32 %v4220_v49, %v4219_v43  ;;  %v5421_v37 = vtrunc.f32 %v3911_v6 }
 0x28e   : > { %v5416_v46 = vcvt.f32.s32 %v5415_v21  ;;  %v3873_v51 = vadd.f32 0.5, %v3837_v24  ;;  %v3874_v7 = vadd.f32 0.5, %v3838_v25  ;;  %v3651_v22 = vsel %vm402_vm0, %v3648_v14, %v3650_v31 }
 0x28f   : > { %v4335_v10 = vsel %vm3724_vm5, %v4272_v16, 0.0  ;;  %v4337_v27 = vsel %vm3724_vm5, %v4273_v40, 0.0  ;;  %v4223_v5 = vadd.f32 %v4222_v63, %v4221_v52  ;;  %v5422_v9 = vcvt.f32.s32 %v5421_v37 }
 0x290   : > { %v4336_v58 = vadd.f32 %v4335_v10, %v4334_v50  ;;  %v3980_v62 = vmul.u32 18, %v5416_v46  ;;  %v3909_v3 = vmul.f32 0.055555556, %v3873_v51  ;;  %v3910_v61 = vmul.f32 0.055555556, %v3874_v7 }
 0x291   : > { %v3723_v60 = vadd.f32 %v3651_v22, %v3334_v44  ;;  %v3840_v29 = vcvt.s32.f32 %v3804_v35  ;;  %v4225_v30 = vadd.f32 %v4224_v12, %v4223_v5  ;;  %v3983_v17 = vmul.u32 18, %v5422_v9 }
 0x292   : > { %v4338_v43 = vadd.f32 %v4337_v27, %v4336_v58  ;;  %v4016_v0 = vsub.s32 %v3800_v36, %v3980_v62  ;;  %v4339_v34 = vsel %vm3724_vm5, %v4274_v19, 0.0  ;;  %v5417_v11 = vtrunc.f32 %v3909_v3 }
 0x293   : > { %v5419_v28 = vtrunc.f32 %v3910_v61  ;;  %3763 = vst.msk [vmem:[%s6443_s14 + $0x130] sm:$0xff] %vm3724_vm5, %v3723_v60  ;;  %v3876_v14 = vadd.f32 0.5, %v3840_v29  ;;  %v4019_v23 = vsub.s32 %v7470_v57, %v3983_v17  ;;  %vm4242_vm1 = vcmask 57344  }
 0x294   : > { %vm4052_vm0 = vcmp.lt.s32.totalorder %v4016_v0, 16  ;;  %v4340_v50 = vadd.f32 %v4339_v34, %v4338_v43  ;;  %v5418_v15 = vcvt.f32.s32 %v5417_v11 }
 0x295   : > { %v4711_v44 = vsel %vm4052_vm0, 1.0, %v7645_v42  ;;  %v5420_v55 = vcvt.f32.s32 %v5419_v28  ;;  %v3912_v36 = vmul.f32 0.055555556, %v3876_v14  ;;  %vm4055_vm12 = vcmp.lt.s32.totalorder %v4019_v23, 16 }
 0x296   : > { %v4160_v12 = vmul.f32 %v4711_v44, %v7460_v20  ;;  %v3981_v19 = vmul.u32 18, %v5418_v15  ;;  %v4714_v1 = vsel %vm4055_vm12, 1.0, %v7645_v42 }
 0x297   : > { %v3982_v2 = vmul.u32 18, %v5420_v55  ;;  %v5423_v54 = vtrunc.f32 %v3912_v36  ;;  %v4163_v13 = vmul.f32 %v4714_v1, %v7480_v53 }
 0x298   : > { %v4226_v59 = vsel %vm3724_vm5, %v4160_v12, 0.0  ;;  %v4275_v48 = vmul.f32 %v4160_v12, %v4160_v12  ;;  %v4017_v57 = vsub.s32 %v7475_v38, %v3981_v19 }
 0x299   : > { %v4227_v56 = vadd.f32 %v4226_v59, %v4225_v30  ;;  %v4018_v32 = vsub.s32 %v7486_v26, %v3982_v2  ;;  %v5424_v39 = vcvt.f32.s32 %v5423_v54  ;;  %v4278_v31 = vmul.f32 %v4163_v13, %v4163_v13 }
 0x29a   : > { %v4341_v33 = vsel %vm3724_vm5, %v4275_v48, 0.0  ;;  %vm4053_vm13 = vcmp.lt.s32.totalorder %v4017_v57, 16 }
 0x29b   : > { %v4342_v8 = vadd.f32 %v4341_v33, %v4340_v50  ;;  %vm4054_vm14 = vcmp.lt.s32.totalorder %v4018_v32, 16  ;;  %v3984_v20 = vmul.u32 18, %v5424_v39  ;;  %v4712_v18 = vsel %vm4053_vm13, 1.0, %v7645_v42 }
 0x29c   : > { %v4713_v41 = vsel %vm4054_vm14, 1.0, %v7645_v42  ;;  %v4161_v4 = vmul.f32 %v4712_v18, %v7492_v47  ;;  %v4232_v47 = vsel %vm3724_vm5, %v4163_v13, 0.0  ;;  %v4347_v51 = vsel %vm3724_vm5, %v4278_v31, 0.0 }
 0x29d   : > { %v4162_v38 = vmul.f32 %v4713_v41, %v7497_v45  ;;  %v4020_v26 = vsub.s32 %v3804_v35, %v3984_v20 }
 0x29e   : > { %v4228_v6 = vsel %vm3724_vm5, %v4161_v4, 0.0  ;;  %v4276_v24 = vmul.f32 %v4161_v4, %v4161_v4 }
 0x29f   : > { %v4277_v21 = vmul.f32 %v4162_v38, %v4162_v38  ;;  %v4229_v25 = vadd.f32 %v4228_v6, %v4227_v56  ;;  %vm4056_vm15 = vcmp.lt.s32.totalorder %v4020_v26, 16  ;;  %v4230_v49 = vsel %vm3724_vm5, %v4162_v38, 0.0 }
 0x2a0   : > { %v4343_v63 = vsel %vm3724_vm5, %v4276_v24, 0.0  ;;  %v4715_v16 = vsel %vm4056_vm15, 1.0, %v7645_v42 }
 0x2a1   : > { %v4231_v40 = vadd.f32 %v4230_v49, %v4229_v25  ;;  %v4344_v53 = vadd.f32 %v4343_v63, %v4342_v8  ;;  %v4164_v52 = vmul.f32 %v4715_v16, %v3723_v60  ;;  %v4345_v45 = vsel %vm3724_vm5, %v4277_v21, 0.0 }
 0x2a3   : > { %v4346_v35 = vadd.f32 %v4345_v45, %v4344_v53  ;;  %v4233_v46 = vadd.f32 %v4232_v47, %v4231_v40  ;;  %v4279_v37 = vmul.f32 %v4164_v52, %v4164_v52  ;;  %v4234_v10 = vsel %vm3724_vm5, %v4164_v52, 0.0 }
 0x2a5   : > { %v4235_v27 = vadd.f32 %v4234_v10, %v4233_v46  ;;  %v4348_v7 = vadd.f32 %v4347_v51, %v4346_v35  ;;  %v4349_v22 = vsel %vm3724_vm5, %v4279_v37, 0.0 }
 0x2a7   : > { %v4236_v42 = vrot.slane %v4235_v27, 4  ;;  %v4350_v5 = vadd.f32 %v4349_v22, %v4348_v7 }
 0x2a9   : > { %v4237_v58 = vadd.f32 %v4236_v42, %v4235_v27  ;;  %v4351_v62 = vrot.slane %v4350_v5, 4 }
 0x2ab   : > { %v4238_v9 = vrot.slane %v4237_v58, 2  ;;  %v4352_v3 = vadd.f32 %v4351_v62, %v4350_v5 }
 0x2ad   : > { %v4239_v61 = vadd.f32 %v4238_v9, %v4237_v58  ;;  %v4353_v60 = vrot.slane %v4352_v3, 2 }
 0x2af   : > { %v4240_v29 = vrot.slane %v4239_v61, 1  ;;  %v4354_v43 = vadd.f32 %v4353_v60, %v4352_v3 }
 0x2b1   : > { %v4241_v0 = vadd.f32 %v4240_v29, %v4239_v61  ;;  %v4355_v30 = vrot.slane %v4354_v43, 1 }
 0x2b3   : > { %4243 = vst.msk [vmem:[%s181_s18] sm:$0x1] %vm4242_vm1, %v4241_v0  ;;  %v4356_v17 = vadd.f32 %v4355_v30, %v4354_v43 }
 0x2b5   : > { %4357 = vst.msk [vmem:[%s181_s18 + $0x1] sm:$0x1] %vm4242_vm1, %v4356_v17 }
 0x2b6 PF: > { %s14_s12 = sadd.s32 1, %s5484_s12  }
 0x2b7   : > { %p11_p4 = scmp.ge.s32.totalorder %s14_s12, 4  }
 0x2b9   :  { %13 = sbr.rel (!%p11_p4) target bundleno = 1 (0x1), region = 78 }

// kernel: double_conv_forward.3
= control target key start
LH: loop header
LB: loop body
LE: loop exit
PB: predicated region body
PF: predicated region fallthrough
CT: control target
= control target key end

     0   :  { %s7007_s18 = smov 0   ;;  %s9507_s0 = inlined_call_operand.vmem [shape: f32[2,331,8], index: 0, kind: input, shape index: {}]   ;;  %s9508_s1 = inlined_call_operand.vmem [shape: f32[1,8], index: 1, kind: input, shape index: {}]   ;;  %s9509_s2 = inlined_call_operand.vmem [shape: f32[1,8], index: 2, kind: input, shape index: {}]   ;;  %s9510_s3 = inlined_call_operand.vmem [shape: bf16[9,8,8], index: 3, kind: input, shape index: {}]   ;;  %s9511_s4 = inlined_call_operand.vmem [shape: f32[2,288,8], index: 4, kind: output, shape index: {0}]   ;;  %s9512_s5 = inlined_call_operand.vmem [shape: f32[2,2,8], index: 5, kind: output, shape index: {1}]  }
   0x1 LB: > { %s5567_s19 = sadd.s32 4294967295, %s6972_s18   ;;  %p5571_p0 = scmp.ge.s32.totalorder %s6972_s18, 1  ;;  %s6972_s18 = sphi %s7007_s18, %s16_s18  }
   0x2   : > { %p190_p1 = scmp.lt.s32.totalorder %s6972_s18, 3 }
   0x4   : > { %p191_p2 = pnand %p5571_p0, %p190_p1 }
   0x6   : > { %194 = sbr.rel (%p191_p2) target bundleno = 1061 (0x425), region = 36 }
   0xb   : > { %v1111_v0 = vld [vmem:[%s9510_s3] sm:$0xf]  ;;  %vm1176_vm0 = vcmask 1043456   ;;  %v9515_v1 = vmov 0.0   ;;  %vm6975_vm1 = vmmov 0   ;;  %p222_p3 = scmp.lt.s32.totalorder %s5567_s19, 1  ;;  %v237_v4 = vlaneseq }
   0xc   : > { %6033 = vmatprep.subr.bf16.mxu0 %v9515_v1  ;;  %v1178_v2 = vsel %vm1176_vm0, %v1111_v0, 0  ;;  %6035 = vmatprep.mubr.msk.bf16.mxu0 %vm6975_vm1, %v9515_v1  ;;  %v5657_v3 = vld [vmem:[%s9510_s3 + $0x8] sm:$0xf]  ;;  %v5637_v5 = vld [vmem:[%s9510_s3 + $0x4] sm:$0xf]  ;;  %v9513_v9 = vmov 0.0|0.0  }
   0xd   : > { %6034 = vmatpush3.bf16.msra.mxu0 %v1178_v2  ;;  %6807 = vmatprep.subr.bf16.mxu1 %v9515_v1  ;;  %v1765_v6 = vsel %vm1176_vm0, %v5657_v3, 0  ;;  %s9825_s19 = smov (!%p222_p3, %s5567_s19), 1  ;;  %v7033_v7 = vshrl.u32 %v237_v4, 7  ;;  %v7039_v8 = vsel %vm1176_vm0, %v5637_v5, 0  ;;  %v7058_v14 = vld [vmem:[%s9508_s1] ss:$0 sm:$0xff] }
   0xe   : > { %6205 = vmatprep.subr.bf16.mxu0 %v9515_v1  ;;  %6808 = vmatpush3.bf16.msra.mxu1 %v1178_v2  ;;  %s6809_s26 = smul.u32 336, %s9825_s19  ;;  %v7080_v20 = vld [vmem:[%s9509_s2] ss:$0 sm:$0xff]  ;;  %vm1112_vm2 = vcmask 64512  }
   0xf   : > { %9606 = vst [vmem:[#allocation2_spill] sm:$0xff] %v7033_v7  ;;  %6079 = vmatprep.mubr.msk.bf16.mxu1 %vm6975_vm1, %v9515_v1  ;;  %6119 = vmatprep.subr.bf16.mxu1 %v9515_v1  ;;  %v323_v10 = vcvt.s32.f32 %v7033_v7  ;;  %v7045_v11 = vadd.s32 176, %v7033_v7  ;;  %v7048_v12 = vadd.s32 184, %v7033_v7  ;;  %v7051_v13 = vadd.s32 32, %v7033_v7  ;;  %s6810_s27 = smul.u32 288, %s9825_s19 }
  0x10   : > { %6036 = vmatmul.mubr.bf16.vlgmr.msra.gmra.mxu0 %v9513_v9  ;;  %v7061_v15 = vadd.s32 40, %v7033_v7  ;;  %v7064_v16 = vadd.s32 192, %v7033_v7  ;;  %v7067_v17 = vadd.s32 200, %v7033_v7  ;;  %v7070_v18 = vadd.s32 48, %v7033_v7  ;;  %s7075_s6 = scalar_lea.vmem %s9507_s0, %s6809_s26 }
  0x11   : > { %9607 = vst [vmem:[#allocation3_spill] sm:$0xff] %v7045_v11  ;;  %9608 = vst [vmem:[#allocation4_spill] sm:$0xff] %v7048_v12  ;;  %6206 = vmatpush3.bf16.msra.mxu0 %v1765_v6  ;;  %6039 = vmatprep.mubr.msk.bf16.mxu0 %vm6975_vm1, %v9515_v1  ;;  %v365_v19 = vadd.f32 0.5, %v323_v10  ;;  %v7083_v21 = vadd.s32 4294967272, %v7045_v11  ;;  %v7086_v22 = vadd.s32 4294967272, %v7048_v12  ;;  %v7089_v23 = vadd.s32 4294967272, %v7051_v13  ;;  %s9096_s30 = scalar_lea.vmem %s9511_s4, %s6810_s27 }
  0x12   : > { %9609 = vst [vmem:[#allocation5_spill] sm:$0xff] %v7051_v13  ;;  %9610 = vst [vmem:[#allocation6_spill] sm:$0xff] %v7061_v15  ;;  %6377 = vmatprep.subr.bf16.mxu0 %v9515_v1  ;;  %v785_v24 = vld [vmem:[%s7075_s6 + $0x18] sm:$0xff]  ;;  %v804_v25 = vld [vmem:[%s7075_s6 + $0xb0] sm:$0xff]  ;;  %v5579_v27 = vadd.s32 4294967272, %v7061_v15  ;;  %v7097_v28 = vadd.s32 4294967272, %v7064_v16 }
  0x13   : > { %9611 = vst [vmem:[#allocation7_spill] sm:$0xff] %v7064_v16  ;;  %9612 = vst [vmem:[#allocation8_spill] sm:$0xff] %v7067_v17  ;;  %v805_v26 = vld [vmem:[%s7075_s6 + $0xb8] sm:$0xff]  ;;  %v7100_v29 = vadd.s32 4294967272, %v7067_v17  ;;  %v407_v30 = vmul.f32 0.055555556, %v365_v19  ;;  %v834_v31 = vmul.f32 %v7058_v14, %v785_v24  ;;  %v342_v32 = vcvt.s32.f32 %v7083_v21 }
  0x14   : > { %9613 = vst [vmem:[#allocation9_spill] sm:$0xff] %v7070_v18  ;;  %v343_v33 = vcvt.s32.f32 %v7086_v22  ;;  %v853_v34 = vmul.f32 %v7058_v14, %v804_v25  ;;  %v854_v35 = vmul.f32 %v7058_v14, %v805_v26  ;;  %v324_v36 = vcvt.s32.f32 %v7089_v23  ;;  %v786_v46 = vld [vmem:[%s7075_s6 + $0x20] sm:$0xff]  ;;  %v787_v51 = vld [vmem:[%s7075_s6 + $0x28] sm:$0xff] }
  0x15   : > { %v325_v37 = vcvt.s32.f32 %v5579_v27  ;;  %v6811_v38 = vtrunc.f32 %v407_v30  ;;  %v883_v39 = vadd.f32 %v7080_v20, %v834_v31  ;;  %v384_v40 = vadd.f32 0.5, %v342_v32  ;;  %v806_v30 = vld [vmem:[%s7075_s6 + $0xc0] sm:$0xff]  ;;  %v803_v11 = vld [vmem:[%s7075_s6 + $0xa8] sm:$0xff] }
  0x16   : > { %v385_v41 = vadd.f32 0.5, %v343_v33  ;;  %v902_v42 = vadd.f32 %v7080_v20, %v853_v34  ;;  %v903_v43 = vadd.f32 %v7080_v20, %v854_v35  ;;  %v366_v44 = vadd.f32 0.5, %v324_v36  ;;  %v807_v35 = vld [vmem:[%s7075_s6 + $0xc8] sm:$0xff] }
  0x17   : > { %v367_v45 = vadd.f32 0.5, %v325_v37  ;;  %v6812_v47 = vcvt.f32.s32 %v6811_v38  ;;  %v925_v48 = vmax.f32 %v883_v39, 0.0  ;;  %v426_v49 = vmul.f32 0.055555556, %v384_v40 }
  0x18   : > { %v427_v50 = vmul.f32 0.055555556, %v385_v41  ;;  %v944_v52 = vmax.f32 %v902_v42, 0.0  ;;  %v945_v53 = vmax.f32 %v903_v43, 0.0  ;;  %v408_v54 = vmul.f32 0.055555556, %v366_v44 }
  0x19   : > { %v409_v55 = vmul.f32 0.055555556, %v367_v45  ;;  %v491_v56 = vmul.u32 18, %v6812_v47  ;;  %v6849_v57 = vtrunc.f32 %v426_v49  ;;  %v835_v59 = vmul.f32 %v7058_v14, %v786_v46 }
  0x1a   : > { %v6851_v58 = vtrunc.f32 %v427_v50  ;;  %v6813_v60 = vtrunc.f32 %v408_v54  ;;  %v836_v62 = vmul.f32 %v7058_v14, %v787_v51  ;;  %v344_v63 = vcvt.s32.f32 %v7097_v28  ;;  %v789_v54 = vld [vmem:[%s7075_s6 + $0x38] sm:$0xff] }
  0x1b   : > { %v6815_v61 = vtrunc.f32 %v409_v55  ;;  %v7117_v0 = vsub.s32 %v7033_v7, %v491_v56  ;;  %v6850_v2 = vcvt.f32.s32 %v6849_v57  ;;  %v884_v4 = vadd.f32 %v7080_v20, %v835_v59 }
  0x1c   : > { %v6852_v3 = vcvt.f32.s32 %v6851_v58  ;;  %v6814_v5 = vcvt.f32.s32 %v6813_v60  ;;  %v885_v10 = vadd.f32 %v7080_v20, %v836_v62  ;;  %v345_v19 = vcvt.s32.f32 %v7100_v29 }
  0x1d   : > { %9614 = vst [vmem:[#allocation10_spill] sm:$0xff] %v7117_v0  ;;  %v6816_v6 = vcvt.f32.s32 %v6815_v61  ;;  %vm701_vm3 = vcmp.lt.s32.totalorder %v7117_v0, 16  ;;  %v510_v24 = vmul.u32 18, %v6850_v2  ;;  %v926_v26 = vmax.f32 %v884_v4, 0.0 }
  0x1e   : > { %v511_v25 = vmul.u32 18, %v6852_v3  ;;  %v1051_v31 = vsel %vm701_vm3, %v925_v48, 0.0  ;;  %v492_v32 = vmul.u32 18, %v6814_v5  ;;  %v927_v34 = vmax.f32 %v885_v10, 0.0  ;;  %v788_v48 = vld [vmem:[%s7075_s6 + $0x30] sm:$0xff] }
  0x1f   : > { %v493_v33 = vmul.u32 18, %v6816_v6  ;;  %v7128_v36 = vpack.c.bf16 %v1051_v31, %v9515_v1  ;;  %v552_v37 = vsub.s32 %v7083_v21, %v510_v24  ;;  %v386_v39 = vadd.f32 0.5, %v344_v63 }
  0x20   : > { %v553_v38 = vsub.s32 %v7086_v22, %v511_v25  ;;  %v534_v40 = vsub.s32 %v7089_v23, %v492_v32  ;;  %v387_v42 = vadd.f32 0.5, %v345_v19  ;;  %v855_v43 = vmul.f32 %v7058_v14, %v806_v30  ;;  %v808_v19 = vld [vmem:[%s7075_s6 + $0xd0] sm:$0xff] }
  0x21   : > { %9615 = vst [vmem:[#allocation11_spill] sm:$0xff] %v7128_v36  ;;  %v535_v41 = vsub.s32 %v5579_v27, %v493_v33  ;;  %6040 = vmatmul.mubr.msk.bf16.gmra.mxu0 %vm1112_vm2, %v7128_v36  ;;  %vm720_vm4 = vcmp.lt.s32.totalorder %v552_v37, 16  ;;  %v428_v44 = vmul.f32 0.055555556, %v386_v39  ;;  %v856_v45 = vmul.f32 %v7058_v14, %v807_v35  ;;  %v809_v35 = vld [vmem:[%s7075_s6 + $0xd8] sm:$0xff] }
  0x22   : > { %vm721_vm5 = vcmp.lt.s32.totalorder %v553_v38, 16  ;;  %v1070_v21 = vsel %vm720_vm4, %v944_v52, 0.0  ;;  %6043 = vmatprep.mubr.msk.bf16.mxu0 %vm6975_vm1, %v9515_v1  ;;  %vm702_vm6 = vcmp.lt.s32.totalorder %v534_v40, 16  ;;  %v429_v47 = vmul.f32 0.055555556, %v387_v42 }
  0x23   : > { %v1071_v46 = vsel %vm721_vm5, %v945_v53, 0.0  ;;  %vm703_vm7 = vcmp.lt.s32.totalorder %v535_v41, 16  ;;  %v1052_v23 = vsel %vm702_vm6, %v926_v26, 0.0  ;;  %v6853_v50 = vtrunc.f32 %v428_v44 }
  0x24   : > { %v7139_v22 = vpack.c.bf16 %v1071_v46, %v1070_v21  ;;  %v1053_v27 = vsel %vm703_vm7, %v927_v34, 0.0  ;;  %v904_v51 = vadd.f32 %v7080_v20, %v855_v43  ;;  %v6855_v52 = vtrunc.f32 %v429_v47 }
  0x25   : > { %v7142_v49 = vpack.c.bf16 %v1053_v27, %v1052_v23  ;;  %v905_v53 = vadd.f32 %v7080_v20, %v856_v45  ;;  %v7150_v55 = vadd.s32 56, %v7033_v7  ;;  %v7153_v56 = vadd.s32 4294967272, %v7070_v18 }
  0x26   : > { %6080 = vmatmul.mubr.msk.bf16.vlgmr.msra.gmra.mxu1 %vm1112_vm2, %v7139_v22  ;;  %v6854_v57 = vcvt.f32.s32 %v6853_v50  ;;  %v837_v58 = vmul.f32 %v7058_v14, %v788_v48  ;;  %v6856_v59 = vcvt.f32.s32 %v6855_v52  ;;  %v838_v62 = vmul.f32 %v7058_v14, %v789_v54 }
  0x27   : > { %9616 = vst [vmem:[#allocation12_spill] sm:$0xff] %v7142_v49  ;;  %9617 = vst [vmem:[#allocation13_spill] sm:$0xff] %v7150_v55  ;;  %6120 = vmatpush3.bf16.msra.mxu1 %v7039_v8  ;;  %6083 = vmatprep.mubr.msk.bf16.mxu1 %vm6975_vm1, %v9515_v1  ;;  %v7160_v60 = vadd.s32 4294967272, %v7150_v55  ;;  %v326_v61 = vcvt.s32.f32 %v7153_v56  ;;  %v946_v2 = vmax.f32 %v904_v51, 0.0  ;;  %v7166_v8 = vadd.s32 208, %v7033_v7  ;;  %v790_v51 = vld [vmem:[%s7075_s6 + $0x40] sm:$0xff] }
  0x28   : > { %6291 = vmatprep.subr.bf16.mxu1 %v9515_v1  ;;  %v512_v63 = vmul.u32 18, %v6854_v57  ;;  %v7169_v3 = vadd.s32 216, %v7033_v7  ;;  %v513_v4 = vmul.u32 18, %v6856_v59  ;;  %v947_v5 = vmax.f32 %v905_v53, 0.0 }
  0x29   : > { %9618 = vst [vmem:[#allocation14_spill] sm:$0xff] %v7166_v8  ;;  %6044 = vmatmul.mubr.msk.bf16.gmra.mxu0 %vm1112_vm2, %v7142_v49  ;;  %v327_v6 = vcvt.s32.f32 %v7160_v60  ;;  %v368_v10 = vadd.f32 0.5, %v326_v61  ;;  %v886_v25 = vadd.f32 %v7080_v20, %v837_v58  ;;  %v5600_v26 = vadd.s32 4294967272, %v7166_v8 }
  0x2a   : > { %9619 = vst [vmem:[#allocation15_spill] sm:$0xff] %v7169_v3  ;;  %v554_v24 = vsub.s32 %v7097_v28, %v512_v63  ;;  %6047 = vmatprep.mubr.msk.bf16.mxu0 %vm6975_vm1, %v9515_v1  ;;  %v5601_v30 = vadd.s32 4294967272, %v7169_v3  ;;  %v555_v31 = vsub.s32 %v7100_v29, %v513_v4  ;;  %v887_v34 = vadd.f32 %v7080_v20, %v838_v62  ;;  %v791_v63 = vld [vmem:[%s7075_s6 + $0x48] sm:$0xff] }
  0x2b   : > { %v369_v32 = vadd.f32 0.5, %v327_v6  ;;  %v410_v33 = vmul.f32 0.055555556, %v368_v10  ;;  %v346_v37 = vcvt.s32.f32 %v5600_v26  ;;  %v857_v28 = vmul.f32 %v7058_v14, %v808_v19 }
  0x2c   : > { %vm722_vm8 = vcmp.lt.s32.totalorder %v554_v24, 16  ;;  %v347_v38 = vcvt.s32.f32 %v5601_v30  ;;  %vm723_vm9 = vcmp.lt.s32.totalorder %v555_v31, 16  ;;  %v858_v29 = vmul.f32 %v7058_v14, %v809_v35 }
  0x2d   : > { %v1072_v39 = vsel %vm722_vm8, %v946_v2, 0.0  ;;  %v411_v40 = vmul.f32 0.055555556, %v369_v32  ;;  %v6817_v41 = vtrunc.f32 %v410_v33  ;;  %v1073_v42 = vsel %vm723_vm9, %v947_v5, 0.0 }
  0x2e   : > { %v388_v43 = vadd.f32 0.5, %v346_v37  ;;  %v389_v44 = vadd.f32 0.5, %v347_v38  ;;  %v7186_v45 = vpack.c.bf16 %v1073_v42, %v1072_v39  ;;  %v928_v23 = vmax.f32 %v886_v25, 0.0 }
  0x2f   : > { %v6818_v21 = vcvt.f32.s32 %v6817_v41  ;;  %v6819_v46 = vtrunc.f32 %v411_v40  ;;  %v906_v48 = vadd.f32 %v7080_v20, %v857_v28  ;;  %v7190_v50 = vadd.s32 64, %v7033_v7 }
  0x30   : > { %v430_v27 = vmul.f32 0.055555556, %v388_v43  ;;  %v431_v47 = vmul.f32 0.055555556, %v389_v44  ;;  %6084 = vmatmul.mubr.msk.bf16.gmra.mxu1 %vm1112_vm2, %v7186_v45  ;;  %v929_v53 = vmax.f32 %v887_v34, 0.0  ;;  %v7196_v57 = vadd.s32 72, %v7033_v7 }
  0x31   : > { %9620 = vst [vmem:[#allocation16_spill] sm:$0xff] %v7190_v50  ;;  %v6820_v54 = vcvt.f32.s32 %v6819_v46  ;;  %v494_v52 = vmul.u32 18, %v6818_v21  ;;  %6087 = vmatprep.mubr.msk.bf16.mxu1 %vm6975_vm1, %v9515_v1  ;;  %v907_v61 = vadd.f32 %v7080_v20, %v858_v29  ;;  %v5582_v62 = vadd.s32 4294967272, %v7190_v50  ;;  %v810_v46 = vld [vmem:[%s7075_s6 + $0xe0] sm:$0xff] }
  0x32   : > { %9621 = vst [vmem:[#allocation17_spill] sm:$0xff] %v7196_v57  ;;  %v6857_v58 = vtrunc.f32 %v430_v27  ;;  %v6859_v59 = vtrunc.f32 %v431_v47  ;;  %v5583_v5 = vadd.s32 4294967272, %v7196_v57  ;;  %v839_v6 = vmul.f32 %v7058_v14, %v790_v51  ;;  %v811_v51 = vld [vmem:[%s7075_s6 + $0xe8] sm:$0xff] }
  0x33   : > { %v495_v2 = vmul.u32 18, %v6820_v54  ;;  %v536_v4 = vsub.s32 %v7153_v56, %v494_v52  ;;  %v948_v24 = vmax.f32 %v906_v48, 0.0  ;;  %v328_v25 = vcvt.s32.f32 %v5582_v62 }
  0x34   : > { %v6858_v10 = vcvt.f32.s32 %v6857_v58  ;;  %v6860_v19 = vcvt.f32.s32 %v6859_v59  ;;  %v329_v32 = vcvt.s32.f32 %v5583_v5  ;;  %v840_v33 = vmul.f32 %v7058_v14, %v791_v63 }
  0x35   : > { %v537_v31 = vsub.s32 %v7160_v60, %v495_v2  ;;  %vm704_vm10 = vcmp.lt.s32.totalorder %v536_v4, 16  ;;  %v370_v38 = vadd.f32 0.5, %v328_v25  ;;  %v949_v56 = vmax.f32 %v907_v61, 0.0 }
  0x36   : > { %v1054_v34 = vsel %vm704_vm10, %v928_v23, 0.0  ;;  %v514_v35 = vmul.u32 18, %v6858_v10  ;;  %v515_v37 = vmul.u32 18, %v6860_v19  ;;  %v371_v28 = vadd.f32 0.5, %v329_v32 }
  0x37   : > { %vm705_vm11 = vcmp.lt.s32.totalorder %v537_v31, 16  ;;  %v888_v39 = vadd.f32 %v7080_v20, %v839_v6  ;;  %v412_v43 = vmul.f32 0.055555556, %v370_v38  ;;  %v7212_v29 = vadd.s32 224, %v7033_v7 }
  0x38   : > { %v1055_v40 = vsel %vm705_vm11, %v929_v53, 0.0  ;;  %v556_v41 = vsub.s32 %v5600_v26, %v514_v35  ;;  %v557_v42 = vsub.s32 %v5601_v30, %v515_v37  ;;  %v413_v44 = vmul.f32 0.055555556, %v371_v28 }
  0x39   : > { %v7209_v60 = vpack.c.bf16 %v1055_v40, %v1054_v34  ;;  %9623 = vst [vmem:[#allocation19_spill] sm:$0xff] %v7212_v29  ;;  %v7215_v21 = vadd.s32 232, %v7033_v7  ;;  %v6821_v23 = vtrunc.f32 %v412_v43  ;;  %v889_v27 = vadd.f32 %v7080_v20, %v840_v33  ;;  %v793_v40 = vld [vmem:[%s7075_s6 + $0x58] sm:$0xff] }
  0x3a   : > { %vm724_vm12 = vcmp.lt.s32.totalorder %v556_v41, 16  ;;  %vm725_vm13 = vcmp.lt.s32.totalorder %v557_v42, 16  ;;  %v6823_v47 = vtrunc.f32 %v413_v44  ;;  %v7222_v48 = vadd.s32 4294967272, %v7212_v29 }
  0x3b   : > { %9622 = vst [vmem:[#allocation18_spill] sm:$0xff] %v7209_v60  ;;  %9624 = vst [vmem:[#allocation20_spill] sm:$0xff] %v7215_v21  ;;  %6048 = vmatmul.mubr.msk.bf16.gmra.mxu0 %vm1112_vm2, %v7209_v60  ;;  %v1074_v26 = vsel %vm724_vm12, %v948_v24, 0.0  ;;  %v1075_v30 = vsel %vm725_vm13, %v949_v56, 0.0  ;;  %v6822_v52 = vcvt.f32.s32 %v6821_v23  ;;  %v5603_v53 = vadd.s32 4294967272, %v7215_v21  ;;  %v792_v24 = vld [vmem:[%s7075_s6 + $0x50] sm:$0xff] }
  0x3c   : > { %v7225_v54 = vpack.c.bf16 %v1075_v30, %v1074_v26  ;;  %6051 = vmatprep.mubr.msk.bf16.mxu0 %vm6975_vm1, %v9515_v1  ;;  %v859_v58 = vmul.f32 %v7058_v14, %v810_v46  ;;  %v6824_v59 = vcvt.f32.s32 %v6823_v47  ;;  %v930_v61 = vmax.f32 %v888_v39, 0.0 }
  0x3d   : > { %v348_v63 = vcvt.s32.f32 %v7222_v48  ;;  %v7233_v2 = vadd.s32 80, %v7033_v7  ;;  %v496_v4 = vmul.u32 18, %v6822_v52  ;;  %v349_v6 = vcvt.s32.f32 %v5603_v53 }
  0x3e   : > { %6088 = vmatmul.mubr.msk.bf16.gmra.mxu1 %vm1112_vm2, %v7225_v54  ;;  %v860_v10 = vmul.f32 %v7058_v14, %v811_v51  ;;  %v7239_v19 = vadd.s32 88, %v7033_v7  ;;  %v497_v25 = vmul.u32 18, %v6824_v59  ;;  %v931_v31 = vmax.f32 %v889_v27, 0.0 }
  0x3f   : > { %9625 = vst [vmem:[#allocation21_spill] sm:$0xff] %v7233_v2  ;;  %6091 = vmatprep.mubr.msk.bf16.mxu1 %vm6975_vm1, %v9515_v1  ;;  %v390_v32 = vadd.f32 0.5, %v348_v63  ;;  %v5584_v33 = vadd.s32 4294967272, %v7233_v2  ;;  %v538_v34 = vsub.s32 %v5582_v62, %v496_v4  ;;  %v391_v35 = vadd.f32 0.5, %v349_v6 }
  0x40   : > { %9626 = vst [vmem:[#allocation22_spill] sm:$0xff] %v7239_v19  ;;  %v908_v37 = vadd.f32 %v7080_v20, %v859_v58  ;;  %v5585_v38 = vadd.s32 4294967272, %v7239_v19  ;;  %v539_v56 = vsub.s32 %v5583_v5, %v497_v25  ;;  %v841_v41 = vmul.f32 %v7058_v14, %v792_v24 }
  0x41   : > { %v432_v28 = vmul.f32 0.055555556, %v390_v32  ;;  %v330_v39 = vcvt.s32.f32 %v5584_v33  ;;  %vm706_vm14 = vcmp.lt.s32.totalorder %v538_v34, 16  ;;  %v433_v42 = vmul.f32 0.055555556, %v391_v35 }
  0x42   : > { %v909_v43 = vadd.f32 %v7080_v20, %v860_v10  ;;  %v331_v44 = vcvt.s32.f32 %v5585_v38  ;;  %vm707_vm15 = vcmp.lt.s32.totalorder %v539_v56, 16  ;;  %v1056_v46 = vsel %vm706_vm14, %v930_v61, 0.0  ;;  %v813_v56 = vld [vmem:[%s7075_s6 + $0xf8] sm:$0xff] }
  0x43   : > { %v6861_v23 = vtrunc.f32 %v432_v28  ;;  %v372_v62 = vadd.f32 0.5, %v330_v39  ;;  %v1057_v27 = vsel %vm707_vm15, %v931_v31, 0.0  ;;  %v6863_v26 = vtrunc.f32 %v433_v42  ;;  %v812_v31 = vld [vmem:[%s7075_s6 + $0xf0] sm:$0xff] }
  0x44   : > { %v373_v30 = vadd.f32 0.5, %v331_v44  ;;  %v842_v5 = vmul.f32 %v7058_v14, %v793_v40  ;;  %v7251_v47 = vpack.c.bf16 %v1057_v27, %v1056_v46  ;;  %v890_v58 = vadd.f32 %v7080_v20, %v841_v41 }
  0x45   : > { %v6862_v51 = vcvt.f32.s32 %v6861_v23  ;;  %v414_v52 = vmul.f32 0.055555556, %v372_v62  ;;  %v6864_v59 = vcvt.f32.s32 %v6863_v26  ;;  %v950_v63 = vmax.f32 %v908_v37, 0.0 }
  0x46   : > { %9627 = vst [vmem:[#allocation23_spill] sm:$0xff] %v7251_v47  ;;  %v415_v4 = vmul.f32 0.055555556, %v373_v30  ;;  %v7255_v61 = vadd.s32 240, %v7033_v7  ;;  %6052 = vmatmul.mubr.msk.bf16.gmra.mxu0 %vm1112_vm2, %v7251_v47  ;;  %v951_v10 = vmax.f32 %v909_v43, 0.0  ;;  %v7260_v25 = vadd.s32 248, %v7033_v7 }
  0x47   : > { %v516_v6 = vmul.u32 18, %v6862_v51  ;;  %v6825_v24 = vtrunc.f32 %v414_v52  ;;  %v517_v32 = vmul.u32 18, %v6864_v59  ;;  %6055 = vmatprep.mubr.msk.bf16.mxu0 %vm6975_vm1, %v9515_v1  ;;  %v891_v35 = vadd.f32 %v7080_v20, %v842_v5 }
  0x48   : > { %9628 = vst [vmem:[#allocation24_spill] sm:$0xff] %v7255_v61  ;;  %9629 = vst [vmem:[#allocation25_spill] sm:$0xff] %v7260_v25  ;;  %v6827_v34 = vtrunc.f32 %v415_v4  ;;  %v5604_v37 = vadd.s32 4294967272, %v7255_v61  ;;  %v932_v40 = vmax.f32 %v890_v58, 0.0  ;;  %v5605_v41 = vadd.s32 4294967272, %v7260_v25 }
  0x49   : > { %v558_v28 = vsub.s32 %v7222_v48, %v516_v6  ;;  %v6826_v39 = vcvt.f32.s32 %v6825_v24  ;;  %v559_v42 = vsub.s32 %v5603_v53, %v517_v32  ;;  %v861_v46 = vmul.f32 %v7058_v14, %v812_v31  ;;  %v794_v32 = vld [vmem:[%s7075_s6 + $0x60] sm:$0xff] }
  0x4a   : > { %v6828_v43 = vcvt.f32.s32 %v6827_v34  ;;  %v350_v44 = vcvt.s32.f32 %v5604_v37  ;;  %v351_v62 = vcvt.s32.f32 %v5605_v41  ;;  %v862_v27 = vmul.f32 %v7058_v14, %v813_v56 }
  0x4b   : > { %vm726_vm4 = vcmp.lt.s32.totalorder %v558_v28, 16  ;;  %v498_v23 = vmul.u32 18, %v6826_v39  ;;  %vm727_vm5 = vcmp.lt.s32.totalorder %v559_v42, 16  ;;  %v933_v52 = vmax.f32 %v891_v35, 0.0  ;;  %v795_v39 = vld [vmem:[%s7075_s6 + $0x68] sm:$0xff] }
  0x4c   : > { %v1076_v26 = vsel %vm726_vm4, %v950_v63, 0.0  ;;  %v499_v30 = vmul.u32 18, %v6828_v43  ;;  %v392_v5 = vadd.f32 0.5, %v350_v44  ;;  %v1077_v48 = vsel %vm727_vm5, %v951_v10, 0.0 }
  0x4d   : > { %v540_v51 = vsub.s32 %v5584_v33, %v498_v23  ;;  %v393_v58 = vadd.f32 0.5, %v351_v62  ;;  %v7272_v59 = vpack.c.bf16 %v1077_v48, %v1076_v26  ;;  %v910_v6 = vadd.f32 %v7080_v20, %v861_v46  ;;  %v814_v26 = vld [vmem:[%s7075_s6 + $0x100] sm:$0xff] }
  0x4e   : > { %v541_v53 = vsub.s32 %v5585_v38, %v499_v30  ;;  %v434_v4 = vmul.f32 0.055555556, %v392_v5  ;;  %v7276_v31 = vadd.s32 96, %v7033_v7  ;;  %v7279_v63 = vadd.s32 104, %v7033_v7 }
  0x4f   : > { %vm708_vm6 = vcmp.lt.s32.totalorder %v540_v51, 16  ;;  %v435_v24 = vmul.f32 0.055555556, %v393_v58  ;;  %6092 = vmatmul.mubr.msk.bf16.gmra.mxu1 %vm1112_vm2, %v7272_v59  ;;  %v911_v38 = vadd.f32 %v7080_v20, %v862_v27  ;;  %v843_v44 = vmul.f32 %v7058_v14, %v794_v32 }
  0x50   : > { %9630 = vst [vmem:[#allocation26_spill] sm:$0xff] %v7276_v31  ;;  %9631 = vst [vmem:[#allocation27_spill] sm:$0xff] %v7279_v63  ;;  %vm709_vm7 = vcmp.lt.s32.totalorder %v541_v53, 16  ;;  %v1058_v33 = vsel %vm708_vm6, %v932_v40, 0.0  ;;  %v6865_v10 = vtrunc.f32 %v434_v4  ;;  %6095 = vmatprep.mubr.msk.bf16.mxu1 %vm6975_vm1, %v9515_v1  ;;  %v7288_v56 = vadd.s32 4294967272, %v7276_v31 }
  0x51   : > { %v1059_v34 = vsel %vm709_vm7, %v933_v52, 0.0  ;;  %v6867_v35 = vtrunc.f32 %v435_v24  ;;  %v7291_v28 = vadd.s32 4294967272, %v7279_v63  ;;  %v952_v40 = vmax.f32 %v910_v6, 0.0  ;;  %v815_v6 = vld [vmem:[%s7075_s6 + $0x108] sm:$0xff] }
  0x52   : > { %v7294_v42 = vpack.c.bf16 %v1059_v34, %v1058_v33  ;;  %v6866_v43 = vcvt.f32.s32 %v6865_v10  ;;  %v332_v23 = vcvt.s32.f32 %v7288_v56  ;;  %v7300_v27 = vadd.s32 256, %v7033_v7 }
  0x53   : > { %v6868_v46 = vcvt.f32.s32 %v6867_v35  ;;  %v333_v62 = vcvt.s32.f32 %v7291_v28  ;;  %v953_v5 = vmax.f32 %v911_v38, 0.0  ;;  %v844_v48 = vmul.f32 %v7058_v14, %v795_v39 }
  0x54   : > { %9632 = vst [vmem:[#allocation28_spill] sm:$0xff] %v7294_v42  ;;  %9633 = vst [vmem:[#allocation29_spill] sm:$0xff] %v7300_v27  ;;  %6056 = vmatmul.mubr.msk.bf16.gmra.mxu0 %vm1112_vm2, %v7294_v42  ;;  %v518_v30 = vmul.u32 18, %v6866_v43  ;;  %v7307_v51 = vadd.s32 264, %v7033_v7  ;;  %v374_v58 = vadd.f32 0.5, %v332_v23  ;;  %v7312_v4 = vadd.s32 4294967272, %v7300_v27 }
  0x55   : > { %v519_v52 = vmul.u32 18, %v6868_v46  ;;  %6059 = vmatprep.mubr.msk.bf16.mxu0 %vm6975_vm1, %v9515_v1  ;;  %v375_v53 = vadd.f32 0.5, %v333_v62  ;;  %v892_v32 = vadd.f32 %v7080_v20, %v843_v44  ;;  %v863_v10 = vmul.f32 %v7058_v14, %v814_v26 }
  0x56   : > { %9634 = vst [vmem:[#allocation30_spill] sm:$0xff] %v7307_v51  ;;  %v560_v24 = vsub.s32 %v5604_v37, %v518_v30  ;;  %v5607_v33 = vadd.s32 4294967272, %v7307_v51  ;;  %v416_v34 = vmul.f32 0.055555556, %v374_v58  ;;  %v352_v39 = vcvt.s32.f32 %v7312_v4 }
  0x57   : > { %v561_v38 = vsub.s32 %v5605_v41, %v519_v52  ;;  %v417_v35 = vmul.f32 0.055555556, %v375_v53  ;;  %v893_v43 = vadd.f32 %v7080_v20, %v844_v48  ;;  %v864_v23 = vmul.f32 %v7058_v14, %v815_v6 }
  0x58   : > { %vm728_vm8 = vcmp.lt.s32.totalorder %v560_v24, 16  ;;  %v353_v46 = vcvt.s32.f32 %v5607_v33  ;;  %v6829_v62 = vtrunc.f32 %v416_v34  ;;  %v394_v9 = vadd.f32 0.5, %v352_v39 }
  0x59   : > { %vm729_vm9 = vcmp.lt.s32.totalorder %v561_v38, 16  ;;  %v1078_v37 = vsel %vm728_vm8, %v952_v40, 0.0  ;;  %v6831_v44 = vtrunc.f32 %v417_v35  ;;  %v912_v41 = vadd.f32 %v7080_v20, %v863_v10  ;;  %v796_v40 = vld [vmem:[%s7075_s6 + $0x70] sm:$0xff] }
  0x5a   : > { %v1079_v30 = vsel %vm729_vm9, %v953_v5, 0.0  ;;  %v395_v1 = vadd.f32 0.5, %v353_v46  ;;  %v6830_v52 = vcvt.f32.s32 %v6829_v62  ;;  %v934_v53 = vmax.f32 %v892_v32, 0.0 }
  0x5b   : > { %v7322_v26 = vpack.c.bf16 %v1079_v30, %v1078_v37  ;;  %v6832_v58 = vcvt.f32.s32 %v6831_v44  ;;  %v436_v48 = vmul.f32 0.055555556, %v394_v9  ;;  %v913_v6 = vadd.f32 %v7080_v20, %v864_v23  ;;  %v797_v23 = vld [vmem:[%s7075_s6 + $0x78] sm:$0xff] }
  0x5c   : > { %v437_v24 = vmul.f32 0.055555556, %v395_v1  ;;  %v7326_v38 = vadd.s32 112, %v7033_v7  ;;  %v500_v5 = vmul.u32 18, %v6830_v52  ;;  %v935_v10 = vmax.f32 %v893_v43, 0.0 }
  0x5d   : > { %6096 = vmatmul.mubr.msk.bf16.gmra.mxu1 %vm1112_vm2, %v7322_v26  ;;  %v501_v34 = vmul.u32 18, %v6832_v58  ;;  %v7332_v35 = vadd.s32 120, %v7033_v7  ;;  %v9637_v39 = vmov 0.0   ;;  %v6869_v9 = vtrunc.f32 %v436_v48 }
  0x5e   : > { %9635 = vst [vmem:[#allocation31_spill] sm:$0xff] %v7326_v38  ;;  %6099 = vmatprep.mubr.msk.bf16.mxu1 %vm6975_vm1, %v9637_v39  ;;  %v6871_v1 = vtrunc.f32 %v437_v24  ;;  %v954_v32 = vmax.f32 %v912_v41, 0.0  ;;  %v7337_v46 = vadd.s32 4294967272, %v7326_v38  ;;  %v542_v37 = vsub.s32 %v7288_v56, %v500_v5 }
  0x5f   : > { %9636 = vst [vmem:[#allocation32_spill] sm:$0xff] %v7332_v35  ;;  %v543_v62 = vsub.s32 %v7291_v28, %v501_v34  ;;  %v7343_v43 = vadd.s32 4294967272, %v7332_v35  ;;  %v845_v44 = vmul.f32 %v7058_v14, %v796_v40  ;;  %v6870_v30 = vcvt.f32.s32 %v6869_v9  ;;  %v816_v34 = vld [vmem:[%s7075_s6 + $0x110] sm:$0xff] }
  0x60   : > { %v6872_v52 = vcvt.f32.s32 %v6871_v1  ;;  %v955_v58 = vmax.f32 %v913_v6, 0.0  ;;  %v334_v48 = vcvt.s32.f32 %v7337_v46  ;;  %vm710_vm10 = vcmp.lt.s32.totalorder %v542_v37, 16 }
  0x61   : > { %vm711_vm11 = vcmp.lt.s32.totalorder %v543_v62, 16  ;;  %v335_v41 = vcvt.s32.f32 %v7343_v43  ;;  %v846_v24 = vmul.f32 %v7058_v14, %v797_v23  ;;  %v1060_v56 = vsel %vm710_vm10, %v934_v53, 0.0 }
  0x62   : > { %v1061_v5 = vsel %vm711_vm11, %v935_v10, 0.0  ;;  %v520_v51 = vmul.u32 18, %v6870_v30  ;;  %v521_v28 = vmul.u32 18, %v6872_v52  ;;  %v376_v25 = vadd.f32 0.5, %v334_v48 }
  0x63   : > { %v7350_v27 = vpack.c.bf16 %v1061_v5, %v1060_v56  ;;  %v377_v40 = vadd.f32 0.5, %v335_v41  ;;  %v894_v6 = vadd.f32 %v7080_v20, %v845_v44  ;;  %v7355_v37 = vadd.s32 272, %v7033_v7 }
  0x64   : > { %v562_v9 = vsub.s32 %v7312_v4, %v520_v51  ;;  %v563_v1 = vsub.s32 %v5607_v33, %v521_v28  ;;  %v7358_v23 = vadd.s32 280, %v7033_v7  ;;  %v418_v53 = vmul.f32 0.055555556, %v376_v25  ;;  %v817_v33 = vld [vmem:[%s7075_s6 + $0x118] sm:$0xff] }
  0x65   : > { %9638 = vst [vmem:[#allocation33_spill] sm:$0xff] %v7355_v37  ;;  %6060 = vmatmul.mubr.msk.bf16.gmra.mxu0 %vm1112_vm2, %v7350_v27  ;;  %v419_v10 = vmul.f32 0.055555556, %v377_v40  ;;  %v895_v62 = vadd.f32 %v7080_v20, %v846_v24  ;;  %v865_v30 = vmul.f32 %v7058_v14, %v816_v34  ;;  %v5608_v51 = vadd.s32 4294967272, %v7355_v37 }
  0x66   : > { %9639 = vst [vmem:[#allocation34_spill] sm:$0xff] %v7358_v23  ;;  %vm730_vm12 = vcmp.lt.s32.totalorder %v562_v9, 16  ;;  %vm731_vm13 = vcmp.lt.s32.totalorder %v563_v1, 16  ;;  %6063 = vmatprep.mubr.msk.bf16.mxu0 %vm6975_vm1, %v9637_v39  ;;  %v5609_v4 = vadd.s32 4294967272, %v7358_v23  ;;  %v6833_v48 = vtrunc.f32 %v418_v53  ;;  %v798_v1 = vld [vmem:[%s7075_s6 + $0x80] sm:$0xff] }
  0x67   : > { %v1080_v44 = vsel %vm730_vm12, %v954_v32, 0.0  ;;  %v1081_v52 = vsel %vm731_vm13, %v955_v58, 0.0  ;;  %v6835_v25 = vtrunc.f32 %v419_v10  ;;  %v936_v24 = vmax.f32 %v894_v6, 0.0 }
  0x68   : > { %v7369_v41 = vpack.c.bf16 %v1081_v52, %v1080_v44  ;;  %v354_v56 = vcvt.s32.f32 %v5608_v51  ;;  %v355_v5 = vcvt.s32.f32 %v5609_v4  ;;  %v6834_v28 = vcvt.f32.s32 %v6833_v48  ;;  %v799_v48 = vld [vmem:[%s7075_s6 + $0x88] sm:$0xff] }
  0x69   : > { %v6836_v34 = vcvt.f32.s32 %v6835_v25  ;;  %v866_v40 = vmul.f32 %v7058_v14, %v817_v33  ;;  %v7373_v9 = vadd.s32 128, %v7033_v7  ;;  %v937_v32 = vmax.f32 %v895_v62, 0.0 }
  0x6a   : > { %6100 = vmatmul.mubr.msk.bf16.gmra.mxu1 %vm1112_vm2, %v7369_v41  ;;  %v396_v58 = vadd.f32 0.5, %v354_v56  ;;  %v397_v53 = vadd.f32 0.5, %v355_v5  ;;  %v7379_v10 = vadd.s32 136, %v7033_v7  ;;  %v502_v6 = vmul.u32 18, %v6834_v28 }
  0x6b   : > { %9640 = vst [vmem:[#allocation35_spill] sm:$0xff] %v7373_v9  ;;  %v503_v44 = vmul.u32 18, %v6836_v34  ;;  %6103 = vmatprep.mubr.msk.bf16.mxu1 %vm6975_vm1, %v9637_v39  ;;  %v914_v33 = vadd.f32 %v7080_v20, %v865_v30  ;;  %v5590_v52 = vadd.s32 4294967272, %v7373_v9  ;;  %v847_v62 = vmul.f32 %v7058_v14, %v798_v1 }
  0x6c   : > { %9641 = vst [vmem:[#allocation36_spill] sm:$0xff] %v7379_v10  ;;  %v438_v25 = vmul.f32 0.055555556, %v396_v58  ;;  %v439_v23 = vmul.f32 0.055555556, %v397_v53  ;;  %v7387_v37 = vadd.s32 4294967272, %v7379_v10  ;;  %v544_v56 = vsub.s32 %v7337_v46, %v502_v6 }
  0x6d   : > { %v545_v5 = vsub.s32 %v7343_v43, %v503_v44  ;;  %v915_v28 = vadd.f32 %v7080_v20, %v866_v40  ;;  %v336_v34 = vcvt.s32.f32 %v5590_v52  ;;  %v848_v29 = vmul.f32 %v7058_v14, %v799_v48 }
  0x6e   : > { %v6873_v61 = vtrunc.f32 %v438_v25  ;;  %v6875_v21 = vtrunc.f32 %v439_v23  ;;  %v337_v30 = vcvt.s32.f32 %v7387_v37  ;;  %vm712_vm14 = vcmp.lt.s32.totalorder %v544_v56, 16  ;;  %v818_v56 = vld [vmem:[%s7075_s6 + $0x120] sm:$0xff] }
  0x6f   : > { %vm713_vm15 = vcmp.lt.s32.totalorder %v545_v5, 16  ;;  %v378_v58 = vadd.f32 0.5, %v336_v34  ;;  %v896_v53 = vadd.f32 %v7080_v20, %v847_v62  ;;  %v1062_v1 = vsel %vm712_vm14, %v936_v24, 0.0 }
  0x70   : > { %v1063_v3 = vsel %vm713_vm15, %v937_v32, 0.0  ;;  %v6874_v46 = vcvt.f32.s32 %v6873_v61  ;;  %v6876_v43 = vcvt.f32.s32 %v6875_v21  ;;  %v956_v40 = vmax.f32 %v914_v33, 0.0 }
  0x71   : > { %v7396_v6 = vpack.c.bf16 %v1063_v3, %v1062_v1  ;;  %v379_v44 = vadd.f32 0.5, %v337_v30  ;;  %v420_v23 = vmul.f32 0.055555556, %v378_v58  ;;  %v957_v17 = vmax.f32 %v915_v28, 0.0  ;;  %v819_v3 = vld [vmem:[%s7075_s6 + $0x128] sm:$0xff] }
  0x72   : > { %v522_v25 = vmul.u32 18, %v6874_v46  ;;  %v523_v8 = vmul.u32 18, %v6876_v43  ;;  %v273_v48 = vadd.s32 288, %v7033_v7  ;;  %v897_v61 = vadd.f32 %v7080_v20, %v848_v29 }
  0x73   : > { %6064 = vmatmul.mubr.msk.bf16.gmra.mxu0 %vm1112_vm2, %v7396_v6  ;;  %v421_v62 = vmul.f32 0.055555556, %v379_v44  ;;  %v6837_v24 = vtrunc.f32 %v420_v23  ;;  %v274_v21 = vadd.s32 296, %v7033_v7  ;;  %v938_v5 = vmax.f32 %v896_v53, 0.0 }
  0x74   : > { %v564_v32 = vsub.s32 %v5608_v51, %v522_v25  ;;  %v565_v33 = vsub.s32 %v5609_v4, %v523_v8  ;;  %6067 = vmatprep.mubr.msk.bf16.mxu0 %vm6975_vm1, %v9637_v39  ;;  %v5610_v28 = vadd.s32 4294967272, %v273_v48  ;;  %v867_v1 = vmul.f32 %v7058_v14, %v818_v56  ;;  %v800_v48 = vld [vmem:[%s7075_s6 + $0x90] sm:$0xff] }
  0x75   : > { %v6838_v34 = vcvt.f32.s32 %v6837_v24  ;;  %v6839_v30 = vtrunc.f32 %v421_v62  ;;  %v7407_v58 = vadd.s32 4294967272, %v274_v21  ;;  %v868_v46 = vmul.f32 %v7058_v14, %v819_v3 }
  0x76   : > { %vm732_vm4 = vcmp.lt.s32.totalorder %v564_v32, 16  ;;  %vm733_vm5 = vcmp.lt.s32.totalorder %v565_v33, 16  ;;  %v356_v29 = vcvt.s32.f32 %v5610_v28  ;;  %v939_v53 = vmax.f32 %v897_v61, 0.0  ;;  %v801_v32 = vld [vmem:[%s7075_s6 + $0x98] sm:$0xff] }
  0x77   : > { %v1082_v43 = vsel %vm732_vm4, %v956_v40, 0.0  ;;  %v1083_v51 = vsel %vm733_vm5, %v957_v17, 0.0  ;;  %v6840_v8 = vcvt.f32.s32 %v6839_v30  ;;  %v504_v4 = vmul.u32 18, %v6838_v34 }
  0x78   : > { %v7411_v44 = vpack.c.bf16 %v1083_v51, %v1082_v43  ;;  %v357_v23 = vcvt.s32.f32 %v7407_v58  ;;  %v398_v25 = vadd.f32 0.5, %v356_v29  ;;  %v916_v56 = vadd.f32 %v7080_v20, %v867_v1 }
  0x79   : > { %v505_v62 = vmul.u32 18, %v6840_v8  ;;  %v546_v24 = vsub.s32 %v5590_v52, %v504_v4  ;;  %v7417_v21 = vadd.s32 144, %v7033_v7  ;;  %v917_v3 = vadd.f32 %v7080_v20, %v868_v46 }
  0x7a   : > { %6104 = vmatmul.mubr.msk.bf16.gmra.mxu1 %vm1112_vm2, %v7411_v44  ;;  %v399_v17 = vadd.f32 0.5, %v357_v23  ;;  %v440_v40 = vmul.f32 0.055555556, %v398_v25  ;;  %v7423_v61 = vadd.s32 152, %v7033_v7  ;;  %v849_v34 = vmul.f32 %v7058_v14, %v800_v48 }
  0x7b   : > { %9642 = vst [vmem:[#allocation37_spill] sm:$0xff] %v7417_v21  ;;  %v547_v33 = vsub.s32 %v7387_v37, %v505_v62  ;;  %vm714_vm6 = vcmp.lt.s32.totalorder %v546_v24, 16  ;;  %6107 = vmatprep.mubr.msk.bf16.mxu1 %vm6975_vm1, %v9637_v39  ;;  %v5592_v52 = vadd.s32 4294967272, %v7417_v21  ;;  %v958_v46 = vmax.f32 %v916_v56, 0.0 }
  0x7c   : > { %9643 = vst [vmem:[#allocation38_spill] sm:$0xff] %v7423_v61  ;;  %v1064_v30 = vsel %vm714_vm6, %v938_v5, 0.0  ;;  %v441_v1 = vmul.f32 0.055555556, %v399_v17  ;;  %v6877_v29 = vtrunc.f32 %v440_v40  ;;  %v5593_v43 = vadd.s32 4294967272, %v7423_v61 }
  0x7d   : > { %vm715_vm7 = vcmp.lt.s32.totalorder %v547_v33, 16  ;;  %v338_v51 = vcvt.s32.f32 %v5592_v52  ;;  %v850_v8 = vmul.f32 %v7058_v14, %v801_v32  ;;  %v959_v24 = vmax.f32 %v917_v3, 0.0 }
  0x7e   : > { %v1065_v4 = vsel %vm715_vm7, %v939_v53, 0.0  ;;  %v6878_v37 = vcvt.f32.s32 %v6877_v29  ;;  %v6879_v23 = vtrunc.f32 %v441_v1  ;;  %v339_v25 = vcvt.s32.f32 %v5593_v43  ;;  %v820_v29 = vld [vmem:[%s7075_s6 + $0x130] sm:$0xff] }
  0x7f   : > { %v7433_v62 = vpack.c.bf16 %v1065_v4, %v1064_v30  ;;  %v380_v16 = vadd.f32 0.5, %v338_v51  ;;  %v898_v5 = vadd.f32 %v7080_v20, %v849_v34  ;;  %v275_v33 = vadd.s32 304, %v7033_v7 }
  0x80   : > { %v6880_v48 = vcvt.f32.s32 %v6879_v23  ;;  %v524_v17 = vmul.u32 18, %v6878_v37  ;;  %v381_v40 = vadd.f32 0.5, %v339_v25  ;;  %v899_v53 = vadd.f32 %v7080_v20, %v850_v8  ;;  %v802_v25 = vld [vmem:[%s7075_s6 + $0xa0] sm:$0xff]  ;;  %s5574_s6 = sshll.u32 %s9825_s19, 1 }
  0x81   : > { %6068 = vmatmul.mubr.msk.bf16.gmra.mxu0 %vm1112_vm2, %v7433_v62  ;;  %v422_v14 = vmul.f32 0.055555556, %v380_v16  ;;  %v7441_v56 = vadd.s32 160, %v7033_v7  ;;  %v7444_v3 = vadd.s32 168, %v7033_v7  ;;  %v5612_v1 = vadd.s32 4294967272, %v275_v33  ;;  %s235_s9 = scalar_lea.vmem %s9512_s5, %s5574_s6 }
  0x82   : > { %v525_v32 = vmul.u32 18, %v6880_v48  ;;  %v566_v34 = vsub.s32 %v5610_v28, %v524_v17  ;;  %6071 = vmatprep.mubr.msk.bf16.mxu0 %vm6975_vm1, %v9637_v39  ;;  %v423_v30 = vmul.f32 0.055555556, %v381_v40  ;;  %v940_v4 = vmax.f32 %v898_v5, 0.0  ;;  %v6964_v17 = vld [vmem:[%s9508_s1] ss:$0 sm:$0xff] }
  0x83   : > { %9644 = vst [vmem:[#allocation39_spill] sm:$0xff] %v7441_v56  ;;  %9645 = vst [vmem:[#allocation40_spill] sm:$0xff] %v7444_v3  ;;  %v6841_v51 = vtrunc.f32 %v422_v14  ;;  %v5594_v16 = vadd.s32 4294967272, %v7441_v56  ;;  %v5595_v20 = vadd.s32 4294967272, %v7444_v3  ;;  %v358_v23 = vcvt.s32.f32 %v5612_v1 }
  0x84   : > { %v567_v8 = vsub.s32 %v7407_v58, %v525_v32  ;;  %vm734_vm8 = vcmp.lt.s32.totalorder %v566_v34, 16  ;;  %v6843_v37 = vtrunc.f32 %v423_v30  ;;  %v869_v40 = vmul.f32 %v6964_v17, %v820_v29 }
  0x85   : > { %v1084_v28 = vsel %vm734_vm8, %v958_v46, 0.0  ;;  %v6842_v48 = vcvt.f32.s32 %v6841_v51  ;;  %v340_v33 = vcvt.s32.f32 %v5594_v16  ;;  %v400_v14 = vadd.f32 0.5, %v358_v23 }
  0x86   : > { %vm735_vm9 = vcmp.lt.s32.totalorder %v567_v8, 16  ;;  %v6844_v5 = vcvt.f32.s32 %v6843_v37  ;;  %v341_v12 = vcvt.s32.f32 %v5595_v20  ;;  %v851_v32 = vmul.f32 %v6964_v17, %v802_v25 }
  0x87   : > { %v1085_v3 = vsel %vm735_vm9, %v959_v24, 0.0  ;;  %v506_v56 = vmul.u32 18, %v6842_v48  ;;  %v382_v58 = vadd.f32 0.5, %v340_v33  ;;  %v442_v46 = vmul.f32 0.055555556, %v400_v14 }
  0x88   : > { %v7457_v34 = vpack.c.bf16 %v1085_v3, %v1084_v28  ;;  %v507_v30 = vmul.u32 18, %v6844_v5  ;;  %v383_v51 = vadd.f32 0.5, %v341_v12  ;;  %v941_v21 = vmax.f32 %v899_v53, 0.0  ;;  %v6965_v24 = vld [vmem:[%s9509_s2] ss:$0 sm:$0xff] }
  0x89   : > { %v548_v61 = vsub.s32 %v5592_v52, %v506_v56  ;;  %v424_v10 = vmul.f32 0.055555556, %v382_v58  ;;  %v852_v9 = vmul.f32 %v6964_v17, %v803_v11  ;;  %v6881_v8 = vtrunc.f32 %v442_v46 }
  0x8a   : > { %9646 = vst [vmem:[#allocation41_spill] sm:$0xff] %v7457_v34  ;;  %6108 = vmatmul.mubr.msk.bf16.gmra.mxu1 %vm1112_vm2, %v7457_v34  ;;  %v549_v29 = vsub.s32 %v5593_v43, %v507_v30  ;;  %v425_v37 = vmul.f32 0.055555556, %v383_v51  ;;  %v918_v3 = vadd.f32 %v6965_v24, %v869_v40  ;;  %v900_v52 = vadd.f32 %v6965_v24, %v851_v32  ;;  %v5677_v51 = vld [vmem:[%s9510_s3 + $0xc] sm:$0xf] }
  0x8b   : > { %vm716_vm10 = vcmp.lt.s32.totalorder %v548_v61, 16  ;;  %6111 = vmatprep.mubr.msk.bf16.mxu1 %vm6975_vm1, %v9637_v39  ;;  %v6845_v12 = vtrunc.f32 %v424_v10  ;;  %v6882_v11 = vcvt.f32.s32 %v6881_v8  ;;  %v901_v43 = vadd.f32 %v6965_v24, %v852_v9 }
  0x8c   : > { %vm717_vm11 = vcmp.lt.s32.totalorder %v549_v29, 16  ;;  %v1066_v53 = vsel %vm716_vm10, %v940_v4, 0.0  ;;  %v6847_v56 = vtrunc.f32 %v425_v37  ;;  %v960_v17 = vmax.f32 %v918_v3, 0.0 }
  0x8d   : > { %v1067_v23 = vsel %vm717_vm11, %v941_v21, 0.0  ;;  %v6846_v25 = vcvt.f32.s32 %v6845_v12  ;;  %v526_v61 = vmul.u32 18, %v6882_v11  ;;  %v942_v10 = vmax.f32 %v900_v52, 0.0 }
  0x8e   : > { %v7466_v28 = vpack.c.bf16 %v1067_v23, %v1066_v53  ;;  %v6848_v48 = vcvt.f32.s32 %v6847_v56  ;;  %v943_v14 = vmax.f32 %v901_v43, 0.0  ;;  %v2151_v29 = vsel %vm1176_vm0, %v5677_v51, 0 }
  0x8f   : > { %v508_v33 = vmul.u32 18, %v6846_v25  ;;  %v568_v5 = vsub.s32 %v5612_v1, %v526_v61  ;;  %vm2000_vm15 = vcmask 1045504   ;;  %vm1614_vm4 = vcmask 1046528  }
  0x90   : > { %6072 = vmatmul.mubr.msk.bf16.gmra.mxu0 %vm1112_vm2, %v7466_v28  ;;  %v509_v40 = vmul.u32 18, %v6848_v48  ;;  %vm2769_vm5 = vcmask 1044480  }
  0x91   : > { %6075 = vmatprep.mubr.msk.bf16.mxu0 %vm6975_vm1, %v9637_v39  ;;  %v550_v4 = vsub.s32 %v5594_v16, %v508_v33  ;;  %vm736_vm12 = vcmp.lt.s32.totalorder %v568_v5, 16  ;;  %v5697_v16 = vld [vmem:[%s9510_s3 + $0x10] sm:$0xf] }
  0x92   : > { %v551_v21 = vsub.s32 %v5595_v20, %v509_v40  ;;  %v1086_v9 = vsel %vm736_vm12, %v960_v17, 0.0  ;;  %v9648_v20 = vmov 0.0|0.0   ;;  %v2536_v46 = vsel %vm1176_vm0, %v5697_v16, 0 }
  0x93   : > { %vm718_vm13 = vcmp.lt.s32.totalorder %v550_v4, 16  ;;  %v7473_v58 = vpack.c.bf16 %v9637_v39, %v1086_v9 }
  0x94   : > { %vm719_vm14 = vcmp.lt.s32.totalorder %v551_v21, 16  ;;  %v1068_v32 = vsel %vm718_vm13, %v942_v10, 0.0 }
  0x95   : > { %9647 = vst [vmem:[#allocation42_spill] sm:$0xff] %v7473_v58  ;;  %v1069_v30 = vsel %vm719_vm14, %v943_v14, 0.0  ;;  %6112 = vmatmul.mubr.msk.bf16.gmra.mxu1 %vm1112_vm2, %v7473_v58 }
  0x96   : > { %v7477_v1 = vpack.c.bf16 %v1069_v30, %v1068_v32  ;;  %6115 = vmatprep.mubr.msk.bf16.mxu1 %vm6975_vm1, %v9637_v39 }
  0x98   : > { %6076 = vmatmul.mubr.msk.bf16.gmra.mxu0 %vm1112_vm2, %v7477_v1 }
  0x99   : > { %6207 = vmatprep.mubr.msk.bf16.mxu0 %vm6975_vm1, %v9637_v39 }
  0x9d   : > { %6116 = vmatmul.mubr.bf16.gmra.mxu1 %v9648_v20 }
  0x9e   : > { %6121 = vmatprep.mubr.msk.bf16.mxu1 %vm6975_vm1, %v9637_v39 }
  0xa0   : > { %6208 = vmatmul.mubr.bf16.vlgmr.msra.gmra.mxu0 %v9648_v20 }
  0xa1   : > { %6378 = vmatpush3.bf16.msra.mxu0 %v2536_v46  ;;  %6211 = vmatprep.mubr.msk.bf16.mxu0 %vm6975_vm1, %v9637_v39 }
  0xa2   : > { %6549 = vmatprep.subr.bf16.mxu0 %v9637_v39 }
  0xa5   : > { %6122 = vmatmul.mubr.bf16.vlgmr.msra.gmra.mxu1 %v9648_v20 }
  0xa6   : > { %6292 = vmatpush3.bf16.msra.mxu1 %v2151_v29  ;;  %6125 = vmatprep.mubr.msk.bf16.mxu1 %vm6975_vm1, %v9637_v39 }
  0xa7   : > { %6463 = vmatprep.subr.bf16.mxu1 %v9637_v39 }
  0xa8   : > { %6212 = vmatmul.mubr.msk.bf16.gmra.mxu0 %vm1112_vm2, %v7128_v36 }
  0xa9   : > { %6215 = vmatprep.mubr.msk.bf16.mxu0 %vm6975_vm1, %v9637_v39 }
  0xad   : > { %6126 = vmatmul.mubr.msk.bf16.gmra.mxu1 %vm1112_vm2, %v7128_v36 }
  0xae   : > { %6129 = vmatprep.mubr.msk.bf16.mxu1 %vm6975_vm1, %v9637_v39 }
  0xb0   : > { %6216 = vmatmul.mubr.msk.bf16.gmra.mxu0 %vm1112_vm2, %v7142_v49 }
  0xb1   : > { %6219 = vmatprep.mubr.msk.bf16.mxu0 %vm6975_vm1, %v9637_v39 }
  0xb5   : > { %6130 = vmatmul.mubr.msk.bf16.gmra.mxu1 %vm1112_vm2, %v7142_v49 }
  0xb6   : > { %6133 = vmatprep.mubr.msk.bf16.mxu1 %vm6975_vm1, %v9637_v39 }
  0xb8   : > { %6220 = vmatmul.mubr.msk.bf16.gmra.mxu0 %vm1112_vm2, %v7209_v60 }
  0xb9   : > { %6223 = vmatprep.mubr.msk.bf16.mxu0 %vm6975_vm1, %v9637_v39 }
  0xbd   : > { %6134 = vmatmul.mubr.msk.bf16.gmra.mxu1 %vm1112_vm2, %v7209_v60 }
  0xbe   : > { %6137 = vmatprep.mubr.msk.bf16.mxu1 %vm6975_vm1, %v9637_v39 }
  0xc0   : > { %6224 = vmatmul.mubr.msk.bf16.gmra.mxu0 %vm1112_vm2, %v7251_v47 }
  0xc1   : > { %6227 = vmatprep.mubr.msk.bf16.mxu0 %vm6975_vm1, %v9637_v39 }
  0xc5   : > { %6138 = vmatmul.mubr.msk.bf16.gmra.mxu1 %vm1112_vm2, %v7251_v47 }
  0xc6   : > { %6141 = vmatprep.mubr.msk.bf16.mxu1 %vm6975_vm1, %v9637_v39 }
  0xc8   : > { %6228 = vmatmul.mubr.msk.bf16.gmra.mxu0 %vm1112_vm2, %v7294_v42 }
  0xc9   : > { %6231 = vmatprep.mubr.msk.bf16.mxu0 %vm6975_vm1, %v9637_v39 }
  0xcd   : > { %6142 = vmatmul.mubr.msk.bf16.gmra.mxu1 %vm1112_vm2, %v7294_v42 }
  0xce   : > { %6145 = vmatprep.mubr.msk.bf16.mxu1 %vm6975_vm1, %v9637_v39 }
  0xd0   : > { %v7544_v8 = vpop.f32.mrf.mxu0  ;;  %6232 = vmatmul.mubr.msk.bf16.gmra.mxu0 %vm1112_vm2, %v7350_v27 }
  0xd1   : > { %6235 = vmatprep.mubr.msk.bf16.mxu0 %vm6975_vm1, %v9637_v39 }
  0xd2   : > { %v6037_v37 = vpop.f32.mrf.mxu0 }
  0xd4   : > { %v7550_v24 = vpop.f32.mrf.mxu0 }
  0xd5   : > { %6146 = vmatmul.mubr.msk.bf16.gmra.mxu1 %vm1112_vm2, %v7350_v27 }
  0xd6   : > { %v6038_v3 = vpop.f32.mrf.mxu0  ;;  %6149 = vmatprep.mubr.msk.bf16.mxu1 %vm6975_vm1, %v9637_v39 }
  0xd8   : > { %6236 = vmatmul.mubr.msk.bf16.gmra.mxu0 %vm1112_vm2, %v7396_v6 }
  0xd9   : > { %6239 = vmatprep.mubr.msk.bf16.mxu0 %vm6975_vm1, %v9637_v39 }
  0xdd   : > { %6150 = vmatmul.mubr.msk.bf16.gmra.mxu1 %vm1112_vm2, %v7396_v6 }
  0xde   : > { %6153 = vmatprep.mubr.msk.bf16.mxu1 %vm6975_vm1, %v9637_v39 }
  0xe0   : > { %6240 = vmatmul.mubr.msk.bf16.gmra.mxu0 %vm1112_vm2, %v7433_v62 }
  0xe1   : > { %6243 = vmatprep.mubr.msk.bf16.mxu0 %vm6975_vm1, %v9637_v39  ;;  %v7568_v12 = vpop.f32.mrf.mxu0 }
  0xe3   : > { %v6041_v52 = vpop.f32.mrf.mxu0 }
  0xe5   : > { %v7570_v53 = vpop.f32.mrf.mxu0  ;;  %6154 = vmatmul.mubr.msk.bf16.gmra.mxu1 %vm1112_vm2, %v7433_v62 }
  0xe6   : > { %v7572_v11 = vpop.f32.mrf.mxu1  ;;  %6157 = vmatprep.mubr.msk.bf16.mxu1 %vm6975_vm1, %v9637_v39 }
  0xe7   : > { %v6042_v56 = vpop.f32.mrf.mxu0 }
  0xe8   : > { %v6081_v23 = vpop.f32.mrf.mxu1  ;;  %6244 = vmatmul.mubr.msk.bf16.gmra.mxu0 %vm1112_vm2, %v7466_v28 }
  0xe9   : > { %6247 = vmatprep.mubr.msk.bf16.mxu0 %vm6975_vm1, %v9637_v39  ;;  %v7582_v25 = vpop.f32.mrf.mxu0 }
  0xea   : > { %v7584_v43 = vpop.f32.mrf.mxu1 }
  0xeb   : > { %v6045_v61 = vpop.f32.mrf.mxu0 }
  0xec   : > { %v6082_v48 = vpop.f32.mrf.mxu1 }
  0xed   : > { %v7586_v17 = vpop.f32.mrf.mxu0  ;;  %6158 = vmatmul.mubr.msk.bf16.gmra.mxu1 %vm1112_vm2, %v7466_v28 }
  0xee   : > { %6161 = vmatprep.mubr.msk.bf16.mxu1 %vm6975_vm1, %v9637_v39 }
  0xef   : > { %v6046_v33 = vpop.f32.mrf.mxu0 }
  0xf0   : > { %6248 = vmatmul.mubr.msk.bf16.gmra.mxu0 %vm1112_vm2, %v7477_v1  ;;  %v7596_v5 = vpop.f32.mrf.mxu1 }
  0xf1   : > { %6251 = vmatprep.mubr.msk.bf16.mxu0 %vm6975_vm1, %v9637_v39 }
  0xf2   : > { %v6085_v40 = vpop.f32.mrf.mxu1 }
  0xf4   : > { %v7598_v10 = vpop.f32.mrf.mxu1 }
  0xf5   : > { %6162 = vmatmul.mubr.msk.bf16.gmra.mxu1 %vm1112_vm2, %v7477_v1 }
  0xf6   : > { %6165 = vmatprep.mubr.msk.bf16.mxu1 %vm6975_vm1, %v9637_v39  ;;  %v6086_v4 = vpop.f32.mrf.mxu1 }
  0xf8   : > { %6252 = vmatmul.mubr.msk.bf16.gmra.mxu0 %vm1112_vm2, %v7139_v22 }
  0xf9   : > { %6255 = vmatprep.mubr.msk.bf16.mxu0 %vm6975_vm1, %v9637_v39 }
  0xfb   : > { %v7608_v14 = vpop.f32.mrf.mxu0 }
  0xfd   : > { %v6049_v21 = vpop.f32.mrf.mxu0  ;;  %6166 = vmatmul.mubr.msk.bf16.gmra.mxu1 %vm1112_vm2, %v7139_v22 }
  0xfe   : > { %v7612_v9 = vpop.f32.mrf.mxu1  ;;  %6169 = vmatprep.mubr.msk.bf16.mxu1 %vm6975_vm1, %v9637_v39 }
  0xff   : > { %v7616_v32 = vpop.f32.mrf.mxu0 }
 0x100   : > { %6256 = vmatmul.mubr.msk.bf16.gmra.mxu0 %vm1112_vm2, %v7186_v45  ;;  %v6089_v30 = vpop.f32.mrf.mxu1 }
 0x101   : > { %6259 = vmatprep.mubr.msk.bf16.mxu0 %vm6975_vm1, %v9637_v39  ;;  %v6050_v16 = vpop.f32.mrf.mxu0 }
 0x102   : > { %v7622_v46 = vpop.f32.mrf.mxu1 }
 0x104   : > { %v6090_v51 = vpop.f32.mrf.mxu1 }
 0x105   : > { %6170 = vmatmul.mubr.msk.bf16.gmra.mxu1 %vm1112_vm2, %v7186_v45 }
 0x106   : > { %6173 = vmatprep.mubr.msk.bf16.mxu1 %vm6975_vm1, %v9637_v39  ;;  %v7628_v29 = vpop.f32.mrf.mxu0 }
 0x108   : > { %6260 = vmatmul.mubr.msk.bf16.gmra.mxu0 %vm1112_vm2, %v7225_v54  ;;  %v6053_v37 = vpop.f32.mrf.mxu0 }
 0x109   : > { %6263 = vmatprep.mubr.msk.bf16.mxu0 %vm6975_vm1, %v9637_v39 }
 0x10a   : > { %v7634_v3 = vpop.f32.mrf.mxu0 }
 0x10c   : > { %v6054_v52 = vpop.f32.mrf.mxu0 }
 0x10d   : > { %6174 = vmatmul.mubr.msk.bf16.gmra.mxu1 %vm1112_vm2, %v7225_v54 }
 0x10e   : > { %6177 = vmatprep.mubr.msk.bf16.mxu1 %vm6975_vm1, %v9637_v39 }
 0x10f   : > { %v7642_v56 = vpop.f32.mrf.mxu1 }
 0x110   : > { %6264 = vmatmul.mubr.msk.bf16.gmra.mxu0 %vm1112_vm2, %v7272_v59 }
 0x111   : > { %6267 = vmatprep.mubr.msk.bf16.mxu0 %vm6975_vm1, %v9637_v39  ;;  %v6093_v23 = vpop.f32.mrf.mxu1 }
 0x113   : > { %v7648_v48 = vpop.f32.mrf.mxu1 }
 0x114   : > { %v7646_v61 = vpop.f32.mrf.mxu0  ;;  %9649 = vst [vmem:[#allocation43_spill] sm:$0xff] %v7648_v48 }
 0x115   : > { %6178 = vmatmul.mubr.msk.bf16.gmra.mxu1 %vm1112_vm2, %v7272_v59  ;;  %v6094_v40 = vpop.f32.mrf.mxu1 }
 0x116   : > { %v6057_v33 = vpop.f32.mrf.mxu0  ;;  %6181 = vmatprep.mubr.msk.bf16.mxu1 %vm6975_vm1, %v9637_v39 }
 0x118   : > { %6268 = vmatmul.mubr.msk.bf16.gmra.mxu0 %vm1112_vm2, %v7322_v26  ;;  %v7656_v4 = vpop.f32.mrf.mxu0 }
 0x119   : > { %6271 = vmatprep.mubr.msk.bf16.mxu0 %vm6975_vm1, %v9637_v39 }
 0x11a   : > { %v6058_v21 = vpop.f32.mrf.mxu0 }
 0x11d   : > { %v7660_v30 = vpop.f32.mrf.mxu1  ;;  %6182 = vmatmul.mubr.msk.bf16.gmra.mxu1 %vm1112_vm2, %v7322_v26 }
 0x11e   : > { %9650 = vst [vmem:[#allocation44_spill] sm:$0xff] %v7660_v30  ;;  %6185 = vmatprep.mubr.msk.bf16.mxu1 %vm6975_vm1, %v9637_v39 }
 0x11f   : > { %v6097_v16 = vpop.f32.mrf.mxu1 }
 0x120   : > { %6272 = vmatmul.mubr.msk.bf16.gmra.mxu0 %vm1112_vm2, %v7369_v41 }
 0x121   : > { %6275 = vmatprep.mubr.msk.bf16.mxu0 %vm6975_vm1, %v9637_v39  ;;  %v7670_v51 = vpop.f32.mrf.mxu1 }
 0x122   : > { %9651 = vst [vmem:[#allocation45_spill] sm:$0xff] %v7670_v51 }
 0x123   : > { %v6098_v37 = vpop.f32.mrf.mxu1 }
 0x125   : > { %v7672_v52 = vpop.f32.mrf.mxu0  ;;  %6186 = vmatmul.mubr.msk.bf16.gmra.mxu1 %vm1112_vm2, %v7369_v41 }
 0x126   : > { %6189 = vmatprep.mubr.msk.bf16.mxu1 %vm6975_vm1, %v9637_v39 }
 0x127   : > { %v6061_v23 = vpop.f32.mrf.mxu0 }
 0x128   : > { %6276 = vmatmul.mubr.msk.bf16.gmra.mxu0 %vm1112_vm2, %v7411_v44 }
 0x129   : > { %6279 = vmatprep.mubr.msk.bf16.mxu0 %vm6975_vm1, %v9637_v39  ;;  %v7682_v33 = vpop.f32.mrf.mxu0 }
 0x12a   : > { %v7684_v40 = vpop.f32.mrf.mxu1 }
 0x12b   : > { %9652 = vst [vmem:[#allocation46_spill] sm:$0xff] %v7684_v40  ;;  %v6062_v21 = vpop.f32.mrf.mxu0 }
 0x12c   : > { %v6101_v16 = vpop.f32.mrf.mxu1 }
 0x12d   : > { %6190 = vmatmul.mubr.msk.bf16.gmra.mxu1 %vm1112_vm2, %v7411_v44 }
 0x12e   : > { %v7688_v37 = vpop.f32.mrf.mxu1  ;;  %6193 = vmatprep.mubr.msk.bf16.mxu1 %vm6975_vm1, %v9637_v39 }
 0x12f   : > { %9653 = vst [vmem:[#allocation47_spill] sm:$0xff] %v7688_v37 }
 0x130   : > { %6280 = vmatmul.mubr.msk.bf16.gmra.mxu0 %vm1112_vm2, %v7457_v34  ;;  %v6102_v23 = vpop.f32.mrf.mxu1 }
 0x131   : > { %6283 = vmatprep.mubr.msk.bf16.mxu0 %vm6975_vm1, %v9637_v39 }
 0x133   : > { %v7696_v35 = vpop.f32.mrf.mxu0 }
 0x135   : > { %v6065_v38 = vpop.f32.mrf.mxu0  ;;  %6194 = vmatmul.mubr.msk.bf16.gmra.mxu1 %vm1112_vm2, %v7457_v34 }
 0x136   : > { %6197 = vmatprep.mubr.msk.bf16.mxu1 %vm6975_vm1, %v9637_v39 }
 0x137   : > { %v7702_v21 = vpop.f32.mrf.mxu0 }
 0x138   : > { %6284 = vmatmul.mubr.msk.bf16.gmra.mxu0 %vm1112_vm2, %v7473_v58 }
 0x139   : > { %6287 = vmatprep.mubr.msk.bf16.mxu0 %vm6975_vm1, %v9637_v39  ;;  %v6066_v16 = vpop.f32.mrf.mxu0 }
 0x13a   : > { %v7708_v23 = vpop.f32.mrf.mxu1 }
 0x13b   : > { %9654 = vst [vmem:[#allocation48_spill] sm:$0xff] %v7708_v23 }
 0x13c   : > { %v6105_v63 = vpop.f32.mrf.mxu1 }
 0x13d   : > { %6198 = vmatmul.mubr.msk.bf16.gmra.mxu1 %vm1112_vm2, %v7473_v58  ;;  %v5737_v63 = vld [vmem:[%s9510_s3 + $0x18] sm:$0xf] }
 0x13e   : > { %v7712_v38 = vpop.f32.mrf.mxu1  ;;  %6201 = vmatprep.mubr.msk.bf16.mxu1 %vm6975_vm1, %v9637_v39  ;;  %v3303_v57 = vsel %vm1176_vm0, %v5737_v63, 0 }
 0x13f   : > { %9655 = vst [vmem:[#allocation49_spill] sm:$0xff] %v7712_v38 }
 0x140   : > { %6288 = vmatmul.mubr.bf16.gmra.mxu0 %v9648_v20  ;;  %v6106_v31 = vpop.f32.mrf.mxu1 }
 0x141   : > { %6379 = vmatprep.mubr.msk.bf16.mxu0 %vm6975_vm1, %v9637_v39  ;;  %v7719_v19 = vpop.f32.mrf.mxu0 }
 0x143   : > { %v6069_v16 = vpop.f32.mrf.mxu0 }
 0x144   : > { %v5717_v16 = vld [vmem:[%s9510_s3 + $0x14] sm:$0xf] }
 0x145   : > { %v7724_v2 = vpop.f32.mrf.mxu0  ;;  %6202 = vmatmul.mubr.bf16.gmra.mxu1 %v9648_v20  ;;  %v2918_v63 = vsel %vm1176_vm0, %v5717_v16, 0 }
 0x146   : > { %6293 = vmatprep.mubr.msk.bf16.mxu1 %vm6975_vm1, %v9637_v39 }
 0x147   : > { %v6070_v31 = vpop.f32.mrf.mxu0 }
 0x148   : > { %6380 = vmatmul.mubr.bf16.vlgmr.msra.gmra.mxu0 %v9648_v20 }
 0x149   : > { %6550 = vmatpush3.bf16.msra.mxu0 %v3303_v57  ;;  %6383 = vmatprep.mubr.msk.bf16.mxu0 %vm6975_vm1, %v9637_v39 }
 0x14a   : > { %v7736_v50 = vpop.f32.mrf.mxu1  ;;  %6721 = vmatprep.subr.bf16.mxu0 %v9637_v39 }
 0x14b   : > { %9656 = vst [vmem:[#allocation50_spill] sm:$0xff] %v7736_v50 }
 0x14c   : > { %v6109_v55 = vpop.f32.mrf.mxu1 }
 0x14d   : > { %6294 = vmatmul.mubr.bf16.vlgmr.msra.gmra.mxu1 %v9648_v20 }
 0x14e   : > { %v1361_v31 = vpop.f32.mrf.mxu1  ;;  %6464 = vmatpush3.bf16.msra.mxu1 %v2918_v63  ;;  %6297 = vmatprep.mubr.msk.bf16.mxu1 %vm6975_vm1, %v9637_v39 }
 0x14f   : > { %6635 = vmatprep.subr.bf16.mxu1 %v9637_v39 }
 0x150   : > { %v7743_v0 = vpop.f32.mrf.mxu0  ;;  %6384 = vmatmul.mubr.msk.bf16.gmra.mxu0 %vm1112_vm2, %v7128_v36  ;;  %v6110_v57 = vpop.f32.mrf.mxu1 }
 0x151   : > { %6387 = vmatprep.mubr.msk.bf16.mxu0 %vm6975_vm1, %v9637_v39 }
 0x152   : > { %v6073_v16 = vpop.f32.mrf.mxu0 }
 0x154   : > { %v7750_v55 = vpop.f32.mrf.mxu0 }
 0x155   : > { %v1365_v18 = vpop.f32.mrf.mxu1  ;;  %6298 = vmatmul.mubr.msk.bf16.gmra.mxu1 %vm1112_vm2, %v7128_v36 }
 0x156   : > { %v6074_v63 = vpop.f32.mrf.mxu0  ;;  %6301 = vmatprep.mubr.msk.bf16.mxu1 %vm6975_vm1, %v9637_v39 }
 0x157   : > { %v6113_v31 = vpop.f32.mrf.mxu1 }
 0x158   : > { %v7756_v15 = vpop.f32.mrf.mxu0  ;;  %6388 = vmatmul.mubr.msk.bf16.gmra.mxu0 %vm1112_vm2, %v7142_v49 }
 0x159   : > { %6391 = vmatprep.mubr.msk.bf16.mxu0 %vm6975_vm1, %v9637_v39  ;;  %v1367_v57 = vpop.f32.mrf.mxu1 }
 0x15a   : > { %v6077_v16 = vpop.f32.mrf.mxu0 }
 0x15b   : > { %v6114_v13 = vpop.f32.mrf.mxu1 }
 0x15c   : > { %v7762_v18 = vpop.f32.mrf.mxu0 }
 0x15d   : > { %v1371_v7 = vpop.f32.mrf.mxu1  ;;  %6302 = vmatmul.mubr.msk.bf16.gmra.mxu1 %vm1112_vm2, %v7142_v49 }
 0x15e   : > { %v6078_v63 = vpop.f32.mrf.mxu0  ;;  %6305 = vmatprep.mubr.msk.bf16.mxu1 %vm6975_vm1, %v9637_v39 }
 0x15f   : > { %v6117_v31 = vpop.f32.mrf.mxu1 }
 0x160   : > { %v1801_v38 = vpop.f32.mrf.mxu0  ;;  %6392 = vmatmul.mubr.msk.bf16.gmra.mxu0 %vm1112_vm2, %v7209_v60 }
 0x161   : > { %6395 = vmatprep.mubr.msk.bf16.mxu0 %vm6975_vm1, %v9637_v39  ;;  %v1373_v57 = vpop.f32.mrf.mxu1  ;;  %v2001_v16 = vrot.slane %v1801_v38, 2 }
 0x162   : > { %v6209_v13 = vpop.f32.mrf.mxu0 }
 0x163   : > { %v6118_v50 = vpop.f32.mrf.mxu1 }
 0x164   : > { %v1804_v7 = vpop.f32.mrf.mxu0 }
 0x165   : > { %v2002_v36 = vrot.slane %v1804_v7, 2  ;;  %v1415_v49 = vpop.f32.mrf.mxu1  ;;  %6306 = vmatmul.mubr.msk.bf16.gmra.mxu1 %vm1112_vm2, %v7209_v60 }
 0x166   : > { %v6210_v63 = vpop.f32.mrf.mxu0  ;;  %6309 = vmatprep.mubr.msk.bf16.mxu1 %vm6975_vm1, %v9637_v39  ;;  %v1615_v13 = vrot.slane %v1415_v49, 1 }
 0x167   : > { %v2003_v31 = vsel %vm2000_vm15, %v2001_v16, %v2002_v36  ;;  %v6123_v23 = vpop.f32.mrf.mxu1 }
 0x168   : > { %v1809_v37 = vpop.f32.mrf.mxu0  ;;  %6396 = vmatmul.mubr.msk.bf16.gmra.mxu0 %vm1112_vm2, %v7251_v47 }
 0x169   : > { %v2004_v38 = vrot.slane %v1809_v37, 2  ;;  %6399 = vmatprep.mubr.msk.bf16.mxu0 %vm6975_vm1, %v9637_v39  ;;  %v1418_v50 = vpop.f32.mrf.mxu1 }
 0x16a   : > { %v6213_v57 = vpop.f32.mrf.mxu0  ;;  %v1616_v7 = vrot.slane %v1418_v50, 1 }
 0x16b   : > { %v2005_v63 = vsel %vm2000_vm15, %v2002_v36, %v2004_v38  ;;  %v6124_v16 = vpop.f32.mrf.mxu1 }
 0x16c   : > { %v1812_v60 = vpop.f32.mrf.mxu0  ;;  %v1617_v40 = vsel %vm1614_vm4, %v1615_v13, %v1616_v7 }
 0x16d   : > { %v2006_v23 = vrot.slane %v1812_v60, 2  ;;  %v1725_v51 = vadd.f32 %v1617_v40, %v7544_v8  ;;  %v1423_v20 = vpop.f32.mrf.mxu1  ;;  %6310 = vmatmul.mubr.msk.bf16.gmra.mxu1 %vm1112_vm2, %v7251_v47 }
 0x16e   : > { %v6214_v37 = vpop.f32.mrf.mxu0  ;;  %v1618_v30 = vrot.slane %v1423_v20, 1  ;;  %6313 = vmatprep.mubr.msk.bf16.mxu1 %vm6975_vm1, %v9637_v39 }
 0x16f   : > { %v2007_v48 = vsel %vm2000_vm15, %v2004_v38, %v2006_v23  ;;  %v6127_v49 = vpop.f32.mrf.mxu1  ;;  %v7791_v50 = vadd.f32 %v2003_v31, %v1725_v51 }
 0x170   : > { %v1817_v36 = vpop.f32.mrf.mxu0  ;;  %6400 = vmatmul.mubr.msk.bf16.gmra.mxu0 %vm1112_vm2, %v7294_v42  ;;  %v1619_v60 = vsel %vm1614_vm4, %v1616_v7, %v1618_v30 }
 0x171   : > { %9657 = vst [vmem:[#allocation51_spill] sm:$0xff] %v7791_v50  ;;  %v2008_v8 = vrot.slane %v1817_v36, 2  ;;  %6403 = vmatprep.mubr.msk.bf16.mxu0 %vm6975_vm1, %v9637_v39  ;;  %v1726_v20 = vadd.f32 %v1619_v60, %v7550_v24  ;;  %v1426_v40 = vpop.f32.mrf.mxu1 }
 0x172   : > { %v6217_v38 = vpop.f32.mrf.mxu0  ;;  %v1620_v57 = vrot.slane %v1426_v40, 1 }
 0x173   : > { %v2009_v13 = vsel %vm2000_vm15, %v2006_v23, %v2008_v8  ;;  %v6128_v16 = vpop.f32.mrf.mxu1  ;;  %v7798_v49 = vadd.f32 %v2005_v63, %v1726_v20 }
 0x174   : > { %v1820_v37 = vpop.f32.mrf.mxu0  ;;  %v1621_v51 = vsel %vm1614_vm4, %v1618_v30, %v1620_v57 }
 0x175   : > { %v2010_v31 = vrot.slane %v1820_v37, 2  ;;  %v1727_v7 = vadd.f32 %v1621_v51, %v7568_v12  ;;  %v1431_v36 = vpop.f32.mrf.mxu1  ;;  %6314 = vmatmul.mubr.msk.bf16.gmra.mxu1 %vm1112_vm2, %v7294_v42 }
 0x176   : > { %v6218_v50 = vpop.f32.mrf.mxu0  ;;  %v1622_v24 = vrot.slane %v1431_v36, 1  ;;  %6317 = vmatprep.mubr.msk.bf16.mxu1 %vm6975_vm1, %v9637_v39 }
 0x177   : > { %v2011_v60 = vsel %vm2000_vm15, %v2008_v8, %v2010_v31  ;;  %v6131_v23 = vpop.f32.mrf.mxu1  ;;  %v7809_v30 = vadd.f32 %v2007_v48, %v1727_v7 }
 0x178   : > { %v1825_v40 = vpop.f32.mrf.mxu0  ;;  %6404 = vmatmul.mubr.msk.bf16.gmra.mxu0 %vm1112_vm2, %v7350_v27  ;;  %v1623_v12 = vsel %vm1614_vm4, %v1620_v57, %v1622_v24 }
 0x179   : > { %v2012_v63 = vrot.slane %v1825_v40, 2  ;;  %6407 = vmatprep.mubr.msk.bf16.mxu0 %vm6975_vm1, %v9637_v39  ;;  %v1728_v50 = vadd.f32 %v1623_v12, %v7570_v53  ;;  %v1434_v20 = vpop.f32.mrf.mxu1 }
 0x17a   : > { %v6221_v8 = vpop.f32.mrf.mxu0  ;;  %v1624_v38 = vrot.slane %v1434_v20, 1 }
 0x17b   : > { %v2013_v16 = vsel %vm2000_vm15, %v2010_v31, %v2012_v63  ;;  %v6132_v37 = vpop.f32.mrf.mxu1  ;;  %v7816_v36 = vadd.f32 %v2009_v13, %v1728_v50 }
 0x17c   : > { %v1828_v51 = vpop.f32.mrf.mxu0  ;;  %v1625_v48 = vsel %vm1614_vm4, %v1622_v24, %v1624_v38 }
 0x17d   : > { %v2014_v7 = vrot.slane %v1828_v51, 2  ;;  %v1729_v57 = vadd.f32 %v1625_v48, %v7582_v25  ;;  %v1439_v23 = vpop.f32.mrf.mxu1  ;;  %6318 = vmatmul.mubr.msk.bf16.gmra.mxu1 %vm1112_vm2, %v7350_v27 }
 0x17e   : > { %v6222_v40 = vpop.f32.mrf.mxu0  ;;  %v1626_v53 = vrot.slane %v1439_v23, 1  ;;  %6321 = vmatprep.mubr.msk.bf16.mxu1 %vm6975_vm1, %v9637_v39 }
 0x17f   : > { %v2015_v12 = vsel %vm2000_vm15, %v2012_v63, %v2014_v7  ;;  %v6135_v31 = vpop.f32.mrf.mxu1  ;;  %v7827_v13 = vadd.f32 %v2011_v60, %v1729_v57 }
 0x180   : > { %v1833_v20 = vpop.f32.mrf.mxu0  ;;  %6408 = vmatmul.mubr.msk.bf16.gmra.mxu0 %vm1112_vm2, %v7396_v6  ;;  %v1627_v25 = vsel %vm1614_vm4, %v1624_v38, %v1626_v53 }
 0x181   : > { %v2016_v24 = vrot.slane %v1833_v20, 2  ;;  %6411 = vmatprep.mubr.msk.bf16.mxu0 %vm6975_vm1, %v9637_v39  ;;  %v1730_v50 = vadd.f32 %v1627_v25, %v7586_v17  ;;  %v1442_v8 = vpop.f32.mrf.mxu1 }
 0x182   : > { %v6225_v63 = vpop.f32.mrf.mxu0  ;;  %v1628_v37 = vrot.slane %v1442_v8, 1 }
 0x183   : > { %v2017_v51 = vsel %vm2000_vm15, %v2014_v7, %v2016_v24  ;;  %v6136_v48 = vpop.f32.mrf.mxu1  ;;  %v7834_v40 = vadd.f32 %v2013_v16, %v1730_v50 }
 0x184   : > { %v1836_v23 = vpop.f32.mrf.mxu0  ;;  %v1629_v60 = vsel %vm1614_vm4, %v1626_v53, %v1628_v37 }
 0x185   : > { %v2018_v57 = vrot.slane %v1836_v23, 2  ;;  %v1731_v38 = vadd.f32 %v1629_v60, %v7608_v14  ;;  %v1447_v31 = vpop.f32.mrf.mxu1  ;;  %6322 = vmatmul.mubr.msk.bf16.gmra.mxu1 %vm1112_vm2, %v7396_v6 }
 0x186   : > { %v6226_v20 = vpop.f32.mrf.mxu0  ;;  %v1630_v17 = vrot.slane %v1447_v31, 1  ;;  %6325 = vmatprep.mubr.msk.bf16.mxu1 %vm6975_vm1, %v9637_v39 }
 0x187   : > { %v2019_v25 = vsel %vm2000_vm15, %v2016_v24, %v2018_v57  ;;  %v6139_v7 = vpop.f32.mrf.mxu1  ;;  %v7845_v16 = vadd.f32 %v2015_v12, %v1731_v38 }
 0x188   : > { %v1841_v8 = vpop.f32.mrf.mxu0  ;;  %6412 = vmatmul.mubr.msk.bf16.gmra.mxu0 %vm1112_vm2, %v7433_v62  ;;  %v1631_v14 = vsel %vm1614_vm4, %v1628_v37, %v1630_v17 }
 0x189   : > { %v2020_v53 = vrot.slane %v1841_v8, 2  ;;  %6415 = vmatprep.mubr.msk.bf16.mxu0 %vm6975_vm1, %v9637_v39  ;;  %v1732_v50 = vadd.f32 %v1631_v14, %v7616_v32  ;;  %v1450_v63 = vpop.f32.mrf.mxu1 }
 0x18a   : > { %v6229_v24 = vpop.f32.mrf.mxu0  ;;  %v1632_v48 = vrot.slane %v1450_v63, 1 }
 0x18b   : > { %v2021_v23 = vsel %vm2000_vm15, %v2018_v57, %v2020_v53  ;;  %v6140_v60 = vpop.f32.mrf.mxu1  ;;  %v7852_v20 = vadd.f32 %v2017_v51, %v1732_v50 }
 0x18c   : > { %v1844_v31 = vpop.f32.mrf.mxu0  ;;  %v1633_v12 = vsel %vm1614_vm4, %v1630_v17, %v1632_v48 }
 0x18d   : > { %v2022_v38 = vrot.slane %v1844_v31, 2  ;;  %v1733_v37 = vadd.f32 %v1633_v12, %v7628_v29  ;;  %v1455_v7 = vpop.f32.mrf.mxu1  ;;  %6326 = vmatmul.mubr.msk.bf16.gmra.mxu1 %vm1112_vm2, %v7433_v62 }
 0x18e   : > { %v6230_v8 = vpop.f32.mrf.mxu0  ;;  %v1634_v32 = vrot.slane %v1455_v7, 1  ;;  %6329 = vmatprep.mubr.msk.bf16.mxu1 %vm6975_vm1, %v9637_v39 }
 0x18f   : > { %v2023_v14 = vsel %vm2000_vm15, %v2020_v53, %v2022_v38  ;;  %v6143_v57 = vpop.f32.mrf.mxu1  ;;  %v7863_v51 = vadd.f32 %v2019_v25, %v1733_v37 }
 0x190   : > { %v1849_v63 = vpop.f32.mrf.mxu0  ;;  %6416 = vmatmul.mubr.msk.bf16.gmra.mxu0 %vm1112_vm2, %v7466_v28  ;;  %v1635_v29 = vsel %vm1614_vm4, %v1632_v48, %v1634_v32 }
 0x191   : > { %v2024_v17 = vrot.slane %v1849_v63, 2  ;;  %6419 = vmatprep.mubr.msk.bf16.mxu0 %vm6975_vm1, %v9637_v39  ;;  %v1734_v50 = vadd.f32 %v1635_v29, %v7634_v3  ;;  %v1458_v24 = vpop.f32.mrf.mxu1 }
 0x192   : > { %v6233_v53 = vpop.f32.mrf.mxu0  ;;  %v1636_v60 = vrot.slane %v1458_v24, 1 }
 0x193   : > { %v2025_v31 = vsel %vm2000_vm15, %v2022_v38, %v2024_v17  ;;  %v6144_v12 = vpop.f32.mrf.mxu1  ;;  %v7870_v8 = vadd.f32 %v2021_v23, %v1734_v50 }
 0x194   : > { %v1852_v7 = vpop.f32.mrf.mxu0  ;;  %v1637_v25 = vsel %vm1614_vm4, %v1634_v32, %v1636_v60 }
 0x195   : > { %v2026_v37 = vrot.slane %v1852_v7, 2  ;;  %v1735_v48 = vadd.f32 %v1637_v25, %v7646_v61  ;;  %v1463_v57 = vpop.f32.mrf.mxu1  ;;  %6330 = vmatmul.mubr.msk.bf16.gmra.mxu1 %vm1112_vm2, %v7466_v28 }
 0x196   : > { %v6234_v63 = vpop.f32.mrf.mxu0  ;;  %v1638_v3 = vrot.slane %v1463_v57, 1  ;;  %6333 = vmatprep.mubr.msk.bf16.mxu1 %vm6975_vm1, %v9637_v39 }
 0x197   : > { %v2027_v29 = vsel %vm2000_vm15, %v2024_v17, %v2026_v37  ;;  %v6147_v38 = vpop.f32.mrf.mxu1  ;;  %v7881_v23 = vadd.f32 %v2023_v14, %v1735_v48 }
 0x198   : > { %v1857_v24 = vpop.f32.mrf.mxu0  ;;  %6420 = vmatmul.mubr.msk.bf16.gmra.mxu0 %vm1112_vm2, %v7477_v1  ;;  %v1639_v61 = vsel %vm1614_vm4, %v1636_v60, %v1638_v3 }
 0x199   : > { %v2028_v32 = vrot.slane %v1857_v24, 2  ;;  %6423 = vmatprep.mubr.msk.bf16.mxu0 %vm6975_vm1, %v9637_v39  ;;  %v1736_v50 = vadd.f32 %v1639_v61, %v7656_v4  ;;  %v1466_v53 = vpop.f32.mrf.mxu1 }
 0x19a   : > { %v6237_v17 = vpop.f32.mrf.mxu0  ;;  %v1640_v12 = vrot.slane %v1466_v53, 1 }
 0x19b   : > { %v2029_v7 = vsel %vm2000_vm15, %v2026_v37, %v2028_v32  ;;  %v6148_v25 = vpop.f32.mrf.mxu1  ;;  %v7888_v63 = vadd.f32 %v2025_v31, %v1736_v50 }
 0x19c   : > { %v1860_v57 = vpop.f32.mrf.mxu0  ;;  %v1641_v14 = vsel %vm1614_vm4, %v1638_v3, %v1640_v12 }
 0x19d   : > { %v2030_v48 = vrot.slane %v1860_v57, 2  ;;  %v1737_v60 = vadd.f32 %v1641_v14, %v7672_v52  ;;  %v1471_v38 = vpop.f32.mrf.mxu1  ;;  %6334 = vmatmul.mubr.msk.bf16.gmra.mxu1 %vm1112_vm2, %v7477_v1 }
 0x19e   : > { %v6238_v24 = vpop.f32.mrf.mxu0  ;;  %v1642_v4 = vrot.slane %v1471_v38, 1  ;;  %6337 = vmatprep.mubr.msk.bf16.mxu1 %vm6975_vm1, %v9637_v39 }
 0x19f   : > { %v2031_v61 = vsel %vm2000_vm15, %v2028_v32, %v2030_v48  ;;  %v6151_v37 = vpop.f32.mrf.mxu1  ;;  %v7899_v31 = vadd.f32 %v2027_v29, %v1737_v60 }
 0x1a0   : > { %v1865_v53 = vpop.f32.mrf.mxu0  ;;  %6424 = vmatmul.mubr.msk.bf16.gmra.mxu0 %vm1112_vm2, %v7139_v22  ;;  %v1643_v52 = vsel %vm1614_vm4, %v1640_v12, %v1642_v4 }
 0x1a1   : > { %v2032_v3 = vrot.slane %v1865_v53, 2  ;;  %6427 = vmatprep.mubr.msk.bf16.mxu0 %vm6975_vm1, %v9637_v39  ;;  %v1738_v50 = vadd.f32 %v1643_v52, %v7682_v33  ;;  %v1474_v17 = vpop.f32.mrf.mxu1 }
 0x1a2   : > { %v6241_v32 = vpop.f32.mrf.mxu0  ;;  %v1644_v25 = vrot.slane %v1474_v17, 1 }
 0x1a3   : > { %v2033_v57 = vsel %vm2000_vm15, %v2030_v48, %v2032_v3  ;;  %v6152_v14 = vpop.f32.mrf.mxu1  ;;  %v7906_v24 = vadd.f32 %v2029_v7, %v1738_v50 }
 0x1a4   : > { %v1868_v38 = vpop.f32.mrf.mxu0  ;;  %v1645_v29 = vsel %vm1614_vm4, %v1642_v4, %v1644_v25 }
 0x1a5   : > { %v2034_v60 = vrot.slane %v1868_v38, 2  ;;  %v1739_v12 = vadd.f32 %v1645_v29, %v7696_v35  ;;  %v1479_v37 = vpop.f32.mrf.mxu1  ;;  %6338 = vmatmul.mubr.msk.bf16.gmra.mxu1 %vm1112_vm2, %v7139_v22 }
 0x1a6   : > { %v6242_v53 = vpop.f32.mrf.mxu0  ;;  %v1646_v33 = vrot.slane %v1479_v37, 1  ;;  %6341 = vmatprep.mubr.msk.bf16.mxu1 %vm6975_vm1, %v9637_v39 }
 0x1a7   : > { %v2035_v52 = vsel %vm2000_vm15, %v2032_v3, %v2034_v60  ;;  %v6155_v48 = vpop.f32.mrf.mxu1  ;;  %v7917_v7 = vadd.f32 %v2031_v61, %v1739_v12 }
 0x1a8   : > { %v1873_v17 = vpop.f32.mrf.mxu0  ;;  %6428 = vmatmul.mubr.msk.bf16.gmra.mxu0 %vm1112_vm2, %v7186_v45  ;;  %v1647_v35 = vsel %vm1614_vm4, %v1644_v25, %v1646_v33 }
 0x1a9   : > { %v2036_v4 = vrot.slane %v1873_v17, 2  ;;  %6431 = vmatprep.mubr.msk.bf16.mxu0 %vm6975_vm1, %v9637_v39  ;;  %v1740_v50 = vadd.f32 %v1647_v35, %v7702_v21  ;;  %v1482_v32 = vpop.f32.mrf.mxu1 }
 0x1aa   : > { %v6245_v3 = vpop.f32.mrf.mxu0  ;;  %v1648_v14 = vrot.slane %v1482_v32, 1 }
 0x1ab   : > { %v2037_v38 = vsel %vm2000_vm15, %v2034_v60, %v2036_v4  ;;  %v6156_v29 = vpop.f32.mrf.mxu1  ;;  %v7924_v53 = vadd.f32 %v2033_v57, %v1740_v50 }
 0x1ac   : > { %v1876_v37 = vpop.f32.mrf.mxu0  ;;  %v1649_v61 = vsel %vm1614_vm4, %v1646_v33, %v1648_v14 }
 0x1ad   : > { %v2038_v12 = vrot.slane %v1876_v37, 2  ;;  %v1741_v25 = vadd.f32 %v1649_v61, %v7719_v19  ;;  %v1487_v48 = vpop.f32.mrf.mxu1  ;;  %6342 = vmatmul.mubr.msk.bf16.gmra.mxu1 %vm1112_vm2, %v7186_v45 }
 0x1ae   : > { %v6246_v17 = vpop.f32.mrf.mxu0  ;;  %v1650_v21 = vrot.slane %v1487_v48, 1  ;;  %6345 = vmatprep.mubr.msk.bf16.mxu1 %vm6975_vm1, %v9637_v39 }
 0x1af   : > { %v2039_v35 = vsel %vm2000_vm15, %v2036_v4, %v2038_v12  ;;  %v6159_v60 = vpop.f32.mrf.mxu1  ;;  %v7935_v57 = vadd.f32 %v2035_v52, %v1741_v25 }
 0x1b0   : > { %v1881_v32 = vpop.f32.mrf.mxu0  ;;  %6432 = vmatmul.mubr.msk.bf16.gmra.mxu0 %vm1112_vm2, %v7225_v54  ;;  %v1651_v19 = vsel %vm1614_vm4, %v1648_v14, %v1650_v21 }
 0x1b1   : > { %v2040_v33 = vrot.slane %v1881_v32, 2  ;;  %6435 = vmatprep.mubr.msk.bf16.mxu0 %vm6975_vm1, %v9637_v39  ;;  %v1742_v50 = vadd.f32 %v1651_v19, %v7724_v2  ;;  %v1490_v3 = vpop.f32.mrf.mxu1 }
 0x1b2   : > { %v6249_v4 = vpop.f32.mrf.mxu0  ;;  %v1652_v29 = vrot.slane %v1490_v3, 1 }
 0x1b3   : > { %v2041_v37 = vsel %vm2000_vm15, %v2038_v12, %v2040_v33  ;;  %v6160_v61 = vpop.f32.mrf.mxu1  ;;  %v7942_v17 = vadd.f32 %v2037_v38, %v1742_v50 }
 0x1b4   : > { %v1884_v48 = vpop.f32.mrf.mxu0  ;;  %v1653_v52 = vsel %vm1614_vm4, %v1650_v21, %v1652_v29 }
 0x1b5   : > { %v2042_v25 = vrot.slane %v1884_v48, 2  ;;  %v1743_v14 = vadd.f32 %v1653_v52, %v7743_v0  ;;  %v1495_v60 = vpop.f32.mrf.mxu1  ;;  %6346 = vmatmul.mubr.msk.bf16.gmra.mxu1 %vm1112_vm2, %v7225_v54 }
 0x1b6   : > { %v6250_v32 = vpop.f32.mrf.mxu0  ;;  %v1654_v2 = vrot.slane %v1495_v60, 1  ;;  %6349 = vmatprep.mubr.msk.bf16.mxu1 %vm6975_vm1, %v9637_v39 }
 0x1b7   : > { %v2043_v19 = vsel %vm2000_vm15, %v2040_v33, %v2042_v25  ;;  %v6163_v12 = vpop.f32.mrf.mxu1  ;;  %v7953_v38 = vadd.f32 %v2039_v35, %v1743_v14 }
 0x1b8   : > { %v1889_v3 = vpop.f32.mrf.mxu0  ;;  %6436 = vmatmul.mubr.msk.bf16.gmra.mxu0 %vm1112_vm2, %v7272_v59  ;;  %v1655_v0 = vsel %vm1614_vm4, %v1652_v29, %v1654_v2 }
 0x1b9   : > { %v2044_v21 = vrot.slane %v1889_v3, 2  ;;  %6439 = vmatprep.mubr.msk.bf16.mxu0 %vm6975_vm1, %v9637_v39  ;;  %v1744_v50 = vadd.f32 %v1655_v0, %v7750_v55  ;;  %v1498_v4 = vpop.f32.mrf.mxu1 }
 0x1ba   : > { %v6253_v33 = vpop.f32.mrf.mxu0  ;;  %v1656_v61 = vrot.slane %v1498_v4, 1 }
 0x1bb   : > { %v2045_v48 = vsel %vm2000_vm15, %v2042_v25, %v2044_v21  ;;  %v6164_v52 = vpop.f32.mrf.mxu1  ;;  %v7960_v32 = vadd.f32 %v2041_v37, %v1744_v50 }
 0x1bc   : > { %v1892_v60 = vpop.f32.mrf.mxu0  ;;  %v1657_v35 = vsel %vm1614_vm4, %v1654_v2, %v1656_v61 }
 0x1bd   : > { %v2046_v14 = vrot.slane %v1892_v60, 2  ;;  %v1745_v29 = vadd.f32 %v1657_v35, %v7756_v15  ;;  %v1503_v12 = vpop.f32.mrf.mxu1  ;;  %6350 = vmatmul.mubr.msk.bf16.gmra.mxu1 %vm1112_vm2, %v7272_v59 }
 0x1be   : > { %v6254_v3 = vpop.f32.mrf.mxu0  ;;  %v1658_v55 = vrot.slane %v1503_v12, 1  ;;  %6353 = vmatprep.mubr.msk.bf16.mxu1 %vm6975_vm1, %v9637_v39 }
 0x1bf   : > { %v2047_v0 = vsel %vm2000_vm15, %v2044_v21, %v2046_v14  ;;  %v6167_v25 = vpop.f32.mrf.mxu1  ;;  %v7971_v37 = vadd.f32 %v2043_v19, %v1745_v29 }
 0x1c0   : > { %v1897_v4 = vpop.f32.mrf.mxu0  ;;  %6440 = vmatmul.mubr.msk.bf16.gmra.mxu0 %vm1112_vm2, %v7322_v26  ;;  %v1659_v15 = vsel %vm1614_vm4, %v1656_v61, %v1658_v55 }
 0x1c1   : > { %v2048_v2 = vrot.slane %v1897_v4, 2  ;;  %6443 = vmatprep.mubr.msk.bf16.mxu0 %vm6975_vm1, %v9637_v39  ;;  %v1746_v50 = vadd.f32 %v1659_v15, %v7762_v18  ;;  %v1506_v33 = vpop.f32.mrf.mxu1 }
 0x1c2   : > { %v6257_v21 = vpop.f32.mrf.mxu0  ;;  %v1660_v52 = vrot.slane %v1506_v33, 1 }
 0x1c3   : > { %v2049_v60 = vsel %vm2000_vm15, %v2046_v14, %v2048_v2  ;;  %v6168_v35 = vpop.f32.mrf.mxu1  ;;  %v7978_v3 = vadd.f32 %v2045_v48, %v1746_v50 }
 0x1c4   : > { %v1900_v12 = vpop.f32.mrf.mxu0  ;;  %v1661_v19 = vsel %vm1614_vm4, %v1658_v55, %v1660_v52 }
 0x1c5   : > { %v2050_v29 = vrot.slane %v1900_v12, 2  ;;  %v1747_v61 = vadd.f32 %v1661_v19, %v7572_v11  ;;  %v1511_v25 = vpop.f32.mrf.mxu1  ;;  %6354 = vmatmul.mubr.msk.bf16.gmra.mxu1 %vm1112_vm2, %v7322_v26 }
 0x1c6   : > { %v6258_v4 = vpop.f32.mrf.mxu0  ;;  %v1662_v18 = vrot.slane %v1511_v25, 1  ;;  %6357 = vmatprep.mubr.msk.bf16.mxu1 %vm6975_vm1, %v9637_v39 }
 0x1c7   : > { %v2051_v15 = vsel %vm2000_vm15, %v2048_v2, %v2050_v29  ;;  %v6171_v14 = vpop.f32.mrf.mxu1  ;;  %v7989_v48 = vadd.f32 %v2047_v0, %v1747_v61 }
 0x1c8   : > { %v1905_v33 = vpop.f32.mrf.mxu0  ;;  %6444 = vmatmul.mubr.msk.bf16.gmra.mxu0 %vm1112_vm2, %v7369_v41  ;;  %v1663_v11 = vsel %vm1614_vm4, %v1660_v52, %v1662_v18 }
 0x1c9   : > { %v2052_v55 = vrot.slane %v1905_v33, 2  ;;  %6447 = vmatprep.mubr.msk.bf16.mxu0 %vm6975_vm1, %v9637_v39  ;;  %v1748_v50 = vadd.f32 %v1663_v11, %v7584_v43  ;;  %v1514_v21 = vpop.f32.mrf.mxu1 }
 0x1ca   : > { %v6261_v2 = vpop.f32.mrf.mxu0  ;;  %v1664_v35 = vrot.slane %v1514_v21, 1 }
 0x1cb   : > { %v2053_v12 = vsel %vm2000_vm15, %v2050_v29, %v2052_v55  ;;  %v6172_v19 = vpop.f32.mrf.mxu1  ;;  %v7996_v4 = vadd.f32 %v2049_v60, %v1748_v50 }
 0x1cc   : > { %v1908_v25 = vpop.f32.mrf.mxu0  ;;  %v1665_v0 = vsel %vm1614_vm4, %v1662_v18, %v1664_v35 }
 0x1cd   : > { %v2054_v61 = vrot.slane %v1908_v25, 2  ;;  %v1749_v52 = vadd.f32 %v1665_v0, %v7596_v5  ;;  %v1519_v14 = vpop.f32.mrf.mxu1  ;;  %6358 = vmatmul.mubr.msk.bf16.gmra.mxu1 %vm1112_vm2, %v7369_v41 }
 0x1ce   : > { %v6262_v33 = vpop.f32.mrf.mxu0  ;;  %v1666_v43 = vrot.slane %v1519_v14, 1  ;;  %6361 = vmatprep.mubr.msk.bf16.mxu1 %vm6975_vm1, %v9637_v39 }
 0x1cf   : > { %v2055_v11 = vsel %vm2000_vm15, %v2052_v55, %v2054_v61  ;;  %v6175_v29 = vpop.f32.mrf.mxu1  ;;  %v8007_v60 = vadd.f32 %v2051_v15, %v1749_v52 }
 0x1d0   : > { %v1913_v21 = vpop.f32.mrf.mxu0  ;;  %6448 = vmatmul.mubr.msk.bf16.gmra.mxu0 %vm1112_vm2, %v7411_v44  ;;  %v1667_v5 = vsel %vm1614_vm4, %v1664_v35, %v1666_v43 }
 0x1d1   : > { %v2056_v18 = vrot.slane %v1913_v21, 2  ;;  %6451 = vmatprep.mubr.msk.bf16.mxu0 %vm6975_vm1, %v9637_v39  ;;  %v1750_v50 = vadd.f32 %v1667_v5, %v7598_v10  ;;  %v1522_v2 = vpop.f32.mrf.mxu1 }
 0x1d2   : > { %v6265_v55 = vpop.f32.mrf.mxu0  ;;  %v1668_v19 = vrot.slane %v1522_v2, 1 }
 0x1d3   : > { %v2057_v25 = vsel %vm2000_vm15, %v2054_v61, %v2056_v18  ;;  %v6176_v0 = vpop.f32.mrf.mxu1  ;;  %v8014_v33 = vadd.f32 %v2053_v12, %v1750_v50 }
 0x1d4   : > { %v1916_v14 = vpop.f32.mrf.mxu0  ;;  %v1669_v15 = vsel %vm1614_vm4, %v1666_v43, %v1668_v19 }
 0x1d5   : > { %v2058_v52 = vrot.slane %v1916_v14, 2  ;;  %v1751_v35 = vadd.f32 %v1669_v15, %v7612_v9  ;;  %v1527_v29 = vpop.f32.mrf.mxu1  ;;  %6362 = vmatmul.mubr.msk.bf16.gmra.mxu1 %vm1112_vm2, %v7411_v44 }
 0x1d6   : > { %v6266_v21 = vpop.f32.mrf.mxu0  ;;  %v1670_v10 = vrot.slane %v1527_v29, 1  ;;  %6365 = vmatprep.mubr.msk.bf16.mxu1 %vm6975_vm1, %v9637_v39 }
 0x1d7   : > { %v2059_v5 = vsel %vm2000_vm15, %v2056_v18, %v2058_v52  ;;  %v6179_v61 = vpop.f32.mrf.mxu1  ;;  %v8025_v12 = vadd.f32 %v2055_v11, %v1751_v35 }
 0x1d8   : > { %v1921_v2 = vpop.f32.mrf.mxu0  ;;  %6452 = vmatmul.mubr.msk.bf16.gmra.mxu0 %vm1112_vm2, %v7457_v34  ;;  %v1671_v9 = vsel %vm1614_vm4, %v1668_v19, %v1670_v10 }
 0x1d9   : > { %9658 = vst [vmem:[#allocation52_spill] sm:$0xff] %v8025_v12  ;;  %v2060_v43 = vrot.slane %v1921_v2, 2  ;;  %6455 = vmatprep.mubr.msk.bf16.mxu0 %vm6975_vm1, %v9637_v39  ;;  %v1752_v50 = vadd.f32 %v1671_v9, %v7622_v46  ;;  %v1530_v55 = vpop.f32.mrf.mxu1 }
 0x1da   : > { %v6269_v18 = vpop.f32.mrf.mxu0  ;;  %v1672_v0 = vrot.slane %v1530_v55, 1 }
 0x1db   : > { %v2061_v14 = vsel %vm2000_vm15, %v2058_v52, %v2060_v43  ;;  %v6180_v15 = vpop.f32.mrf.mxu1  ;;  %v8032_v21 = vadd.f32 %v2057_v25, %v1752_v50  ;;  %v9661_v50 = vld [vmem:[#allocation43_spill] sm:$0xff] }
 0x1dc   : > { %v1924_v29 = vpop.f32.mrf.mxu0  ;;  %v1673_v11 = vsel %vm1614_vm4, %v1670_v10, %v1672_v0 }
 0x1dd   : > { %9659 = vst [vmem:[#allocation53_spill] sm:$0xff] %v8032_v21  ;;  %v2062_v35 = vrot.slane %v1924_v29, 2  ;;  %v1753_v19 = vadd.f32 %v1673_v11, %v7642_v56  ;;  %v1535_v61 = vpop.f32.mrf.mxu1  ;;  %6366 = vmatmul.mubr.msk.bf16.gmra.mxu1 %vm1112_vm2, %v7457_v34 }
 0x1de   : > { %v6270_v2 = vpop.f32.mrf.mxu0  ;;  %v1674_v46 = vrot.slane %v1535_v61, 1  ;;  %6369 = vmatprep.mubr.msk.bf16.mxu1 %vm6975_vm1, %v9637_v39 }
 0x1df   : > { %v2063_v9 = vsel %vm2000_vm15, %v2060_v43, %v2062_v35  ;;  %v6183_v52 = vpop.f32.mrf.mxu1  ;;  %v8043_v25 = vadd.f32 %v2059_v5, %v1753_v19 }
 0x1e0   : > { %v1929_v55 = vpop.f32.mrf.mxu0  ;;  %6456 = vmatmul.mubr.msk.bf16.gmra.mxu0 %vm1112_vm2, %v7473_v58  ;;  %v1675_v56 = vsel %vm1614_vm4, %v1672_v0, %v1674_v46 }
 0x1e1   : > { %9660 = vst [vmem:[#allocation54_spill] sm:$0xff] %v8043_v25  ;;  %v2064_v10 = vrot.slane %v1929_v55, 2  ;;  %6459 = vmatprep.mubr.msk.bf16.mxu0 %vm6975_vm1, %v9637_v39  ;;  %v1754_v18 = vadd.f32 %v1675_v56, %v9661_v50  ;;  %v1538_v15 = vpop.f32.mrf.mxu1  ;;  %v9663_v25 = vld [vmem:[#allocation44_spill] sm:$0xff] }
 0x1e2   : > { %v6273_v43 = vpop.f32.mrf.mxu0  ;;  %v1676_v29 = vrot.slane %v1538_v15, 1 }
 0x1e3   : > { %v2065_v11 = vsel %vm2000_vm15, %v2062_v35, %v2064_v10  ;;  %v6184_v61 = vpop.f32.mrf.mxu1  ;;  %v8050_v52 = vadd.f32 %v2061_v14, %v1754_v18  ;;  %v9664_v14 = vmov 0.0|0.0   ;;  %v9666_v43 = vld [vmem:[#allocation45_spill] sm:$0xff] }
 0x1e4   : > { %v1932_v2 = vpop.f32.mrf.mxu0  ;;  %v1677_v5 = vsel %vm1614_vm4, %v1674_v46, %v1676_v29 }
 0x1e5   : > { %9662 = vst [vmem:[#allocation43_spill] sm:$0xff] %v8050_v52  ;;  %v2066_v19 = vrot.slane %v1932_v2, 2  ;;  %v1755_v0 = vadd.f32 %v1677_v5, %v9663_v25  ;;  %v1543_v55 = vpop.f32.mrf.mxu1  ;;  %6370 = vmatmul.mubr.msk.bf16.gmra.mxu1 %vm1112_vm2, %v7473_v58 }
 0x1e6   : > { %v6274_v21 = vpop.f32.mrf.mxu0  ;;  %v1678_v56 = vrot.slane %v1543_v55, 1  ;;  %6373 = vmatprep.mubr.msk.bf16.mxu1 %vm6975_vm1, %v9637_v39  ;;  %v5777_v55 = vld [vmem:[%s9510_s3 + $0x20] sm:$0xf] }
 0x1e7   : > { %v2067_v50 = vsel %vm2000_vm15, %v2064_v10, %v2066_v19  ;;  %v6187_v35 = vpop.f32.mrf.mxu1  ;;  %v8060_v18 = vadd.f32 %v2063_v9, %v1755_v0 }
 0x1e8   : > { %v1937_v15 = vpop.f32.mrf.mxu0  ;;  %6460 = vmatmul.mubr.bf16.gmra.mxu0 %v9664_v14  ;;  %v1679_v46 = vsel %vm1614_vm4, %v1676_v29, %v1678_v56 }
 0x1e9   : > { %9665 = vst [vmem:[#allocation44_spill] sm:$0xff] %v8060_v18  ;;  %v2068_v25 = vrot.slane %v1937_v15, 2  ;;  %6551 = vmatprep.mubr.msk.bf16.mxu0 %vm6975_vm1, %v9637_v39  ;;  %v1756_v21 = vadd.f32 %v1679_v46, %v9666_v43  ;;  %v1546_v61 = vpop.f32.mrf.mxu1  ;;  %v9668_v18 = vld [vmem:[#allocation46_spill] sm:$0xff]  ;;  %v4074_v43 = vsel %vm1176_vm0, %v5777_v55, 0 }
 0x1ea   : > { %v6277_v2 = vpop.f32.mrf.mxu0  ;;  %v1680_v10 = vrot.slane %v1546_v61, 1 }
 0x1eb   : > { %v2069_v5 = vsel %vm2000_vm15, %v2066_v19, %v2068_v25  ;;  %v6188_v35 = vpop.f32.mrf.mxu1  ;;  %v8070_v0 = vadd.f32 %v2065_v11, %v1756_v21 }
 0x1ec   : > { %v1940_v9 = vpop.f32.mrf.mxu0  ;;  %v1681_v29 = vsel %vm1614_vm4, %v1678_v56, %v1680_v10  ;;  %v5757_v35 = vld [vmem:[%s9510_s3 + $0x1c] sm:$0xf] }
 0x1ed   : > { %9667 = vst [vmem:[#allocation45_spill] sm:$0xff] %v8070_v0  ;;  %v2070_v15 = vrot.slane %v1940_v9, 2  ;;  %v1757_v52 = vadd.f32 %v1681_v29, %v9668_v18  ;;  %v1551_v58 = vpop.f32.mrf.mxu1  ;;  %6374 = vmatmul.mubr.bf16.gmra.mxu1 %v9664_v14 }
 0x1ee   : > { %v6278_v46 = vpop.f32.mrf.mxu0  ;;  %v1682_v19 = vrot.slane %v1551_v58, 1  ;;  %6465 = vmatprep.mubr.msk.bf16.mxu1 %vm6975_vm1, %v9637_v39  ;;  %v9670_v58 = vld [vmem:[#allocation47_spill] sm:$0xff] }
 0x1ef   : > { %v2071_v61 = vsel %vm2000_vm15, %v2068_v25, %v2070_v15  ;;  %v6191_v2 = vpop.f32.mrf.mxu1  ;;  %v8080_v56 = vadd.f32 %v2067_v50, %v1757_v52 }
 0x1f0   : > { %v1945_v11 = vpop.f32.mrf.mxu0  ;;  %6552 = vmatmul.mubr.bf16.vlgmr.msra.gmra.mxu0 %v9664_v14  ;;  %v1683_v18 = vsel %vm1614_vm4, %v1680_v10, %v1682_v19  ;;  %v3688_v10 = vsel %vm1176_vm0, %v5757_v35, 0  ;;  %v9673_v35 = vld [vmem:[#allocation50_spill] sm:$0xff] }
 0x1f1   : > { %9669 = vst [vmem:[#allocation46_spill] sm:$0xff] %v8080_v56  ;;  %v2072_v21 = vrot.slane %v1945_v11, 2  ;;  %6722 = vmatpush3.bf16.msra.mxu0 %v4074_v43  ;;  %6555 = vmatprep.mubr.msk.bf16.mxu0 %vm6975_vm1, %v9637_v39  ;;  %v1758_v25 = vadd.f32 %v1683_v18, %v9670_v58  ;;  %v1554_v55 = vpop.f32.mrf.mxu1  ;;  %v9671_v56 = vld [vmem:[#allocation48_spill] sm:$0xff] }
 0x1f2   : > { %v6281_v9 = vpop.f32.mrf.mxu0  ;;  %v1684_v29 = vrot.slane %v1554_v55, 1  ;;  %v9672_v55 = vld [vmem:[#allocation11_spill] sm:$0xff] }
 0x1f3   : > { %v2073_v46 = vsel %vm2000_vm15, %v2070_v15, %v2072_v21  ;;  %v6192_v52 = vpop.f32.mrf.mxu1  ;;  %v8091_v2 = vadd.f32 %v2069_v5, %v1758_v25 }
 0x1f4   : > { %v1948_v50 = vpop.f32.mrf.mxu0  ;;  %v1685_v11 = vsel %vm1614_vm4, %v1682_v19, %v1684_v29 }
 0x1f5   : > { %v1759_v43 = vadd.f32 %v1685_v11, %v9671_v56  ;;  %v1559_v0 = vpop.f32.mrf.mxu1  ;;  %6466 = vmatmul.mubr.bf16.vlgmr.msra.gmra.mxu1 %v9664_v14 }
 0x1f6   : > { %v6282_v12 = vpop.f32.mrf.mxu0  ;;  %v1686_v18 = vrot.slane %v1559_v0, 1  ;;  %6636 = vmatpush3.bf16.msra.mxu1 %v3688_v10  ;;  %6469 = vmatprep.mubr.msk.bf16.mxu1 %vm6975_vm1, %v9637_v39 }
 0x1f7   : > { %v6195_v15 = vpop.f32.mrf.mxu1  ;;  %v8100_v5 = vadd.f32 %v2071_v61, %v1759_v43  ;;  %v9674_v12 = vld [vmem:[#allocation49_spill] sm:$0xff] }
 0x1f8   : > { %v1952_v58 = vpop.f32.mrf.mxu0  ;;  %6556 = vmatmul.mubr.msk.bf16.gmra.mxu0 %vm1112_vm2, %v9672_v55  ;;  %v1687_v19 = vsel %vm1614_vm4, %v1684_v29, %v1686_v18  ;;  %v1761_v56 = vadd.f32 %v1686_v18, %v9673_v35  ;;  %v9676_v18 = vld [vmem:[#allocation12_spill] sm:$0xff] }
 0x1f9   : > { %6559 = vmatprep.mubr.msk.bf16.mxu0 %vm6975_vm1, %v9637_v39  ;;  %v1760_v0 = vadd.f32 %v1687_v19, %v9674_v12  ;;  %v1562_v25 = vpop.f32.mrf.mxu1 }
 0x1fa   : > { %v6285_v9 = vpop.f32.mrf.mxu0  ;;  %v8107_v52 = vadd.f32 %v2072_v21, %v1761_v56  ;;  %v9677_v25 = vld [vmem:[#allocation18_spill] sm:$0xff] }
 0x1fb   : > { %v6196_v50 = vpop.f32.mrf.mxu1  ;;  %v8109_v11 = vadd.f32 %v2073_v46, %v1760_v0 }
 0x1fc   : > { %v1954_v10 = vpop.f32.mrf.mxu0 }
 0x1fd   : > { %9675 = vst [vmem:[#allocation47_spill] sm:$0xff] %v8109_v11  ;;  %v1566_v15 = vpop.f32.mrf.mxu1  ;;  %6470 = vmatmul.mubr.msk.bf16.gmra.mxu1 %vm1112_vm2, %v9672_v55 }
 0x1fe   : > { %v6286_v61 = vpop.f32.mrf.mxu0  ;;  %6473 = vmatprep.mubr.msk.bf16.mxu1 %vm6975_vm1, %v9637_v39 }
 0x1ff   : > { %v6199_v29 = vpop.f32.mrf.mxu1 }
 0x200   : > { %v1958_v43 = vpop.f32.mrf.mxu0  ;;  %6560 = vmatmul.mubr.msk.bf16.gmra.mxu0 %vm1112_vm2, %v9676_v18 }
 0x201   : > { %6563 = vmatprep.mubr.msk.bf16.mxu0 %vm6975_vm1, %v9637_v39  ;;  %v1568_v21 = vpop.f32.mrf.mxu1 }
 0x202   : > { %v6289_v58 = vpop.f32.mrf.mxu0 }
 0x203   : > { %v6200_v46 = vpop.f32.mrf.mxu1 }
 0x204   : > { %v1960_v19 = vpop.f32.mrf.mxu0 }
 0x205   : > { %v1572_v35 = vpop.f32.mrf.mxu1  ;;  %6474 = vmatmul.mubr.msk.bf16.gmra.mxu1 %vm1112_vm2, %v9676_v18 }
 0x206   : > { %v6290_v56 = vpop.f32.mrf.mxu0  ;;  %6477 = vmatprep.mubr.msk.bf16.mxu1 %vm6975_vm1, %v9637_v39 }
 0x207   : > { %v6203_v12 = vpop.f32.mrf.mxu1 }
 0x208   : > { %v2572_v0 = vpop.f32.mrf.mxu0  ;;  %6564 = vmatmul.mubr.msk.bf16.gmra.mxu0 %vm1112_vm2, %v9677_v25 }
 0x209   : > { %6567 = vmatprep.mubr.msk.bf16.mxu0 %vm6975_vm1, %v9637_v39  ;;  %v1574_v9 = vpop.f32.mrf.mxu1 }
 0x20a   : > { %v6381_v50 = vpop.f32.mrf.mxu0 }
 0x20b   : > { %v6204_v10 = vpop.f32.mrf.mxu1 }
 0x20c   : > { %v2574_v15 = vpop.f32.mrf.mxu0 }
 0x20d   : > { %v2187_v61 = vpop.f32.mrf.mxu1  ;;  %6478 = vmatmul.mubr.msk.bf16.gmra.mxu1 %vm1112_vm2, %v9677_v25 }
 0x20e   : > { %v6382_v29 = vpop.f32.mrf.mxu0  ;;  %6481 = vmatprep.mubr.msk.bf16.mxu1 %vm6975_vm1, %v9637_v39 }
 0x20f   : > { %v6295_v43 = vpop.f32.mrf.mxu1 }
 0x210   : > { %v2578_v21 = vpop.f32.mrf.mxu0  ;;  %6568 = vmatmul.mubr.msk.bf16.gmra.mxu0 %vm1112_vm2, %v7251_v47 }
 0x211   : > { %6571 = vmatprep.mubr.msk.bf16.mxu0 %vm6975_vm1, %v9637_v39  ;;  %v2189_v58 = vpop.f32.mrf.mxu1 }
 0x212   : > { %v6385_v46 = vpop.f32.mrf.mxu0 }
 0x213   : > { %v6296_v19 = vpop.f32.mrf.mxu1 }
 0x214   : > { %v2580_v35 = vpop.f32.mrf.mxu0 }
 0x215   : > { %v2193_v56 = vpop.f32.mrf.mxu1  ;;  %6482 = vmatmul.mubr.msk.bf16.gmra.mxu1 %vm1112_vm2, %v7251_v47  ;;  %v2770_v50 = vrot.slane %v2580_v35, 3 }
 0x216   : > { %v6386_v12 = vpop.f32.mrf.mxu0  ;;  %6485 = vmatprep.mubr.msk.bf16.mxu1 %vm6975_vm1, %v9637_v39  ;;  %v2386_v29 = vrot.slane %v2193_v56, 2 }
 0x217   : > { %v6299_v0 = vpop.f32.mrf.mxu1 }
 0x218   : > { %v2585_v9 = vpop.f32.mrf.mxu0  ;;  %6572 = vmatmul.mubr.msk.bf16.gmra.mxu0 %vm1112_vm2, %v7294_v42  ;;  %v9678_v0 = vld [vmem:[#allocation51_spill] sm:$0xff] }
 0x219   : > { %v2771_v10 = vrot.slane %v2585_v9, 3  ;;  %6575 = vmatprep.mubr.msk.bf16.mxu0 %vm6975_vm1, %v9637_v39  ;;  %v2196_v15 = vpop.f32.mrf.mxu1 }
 0x21a   : > { %v6389_v61 = vpop.f32.mrf.mxu0  ;;  %v2387_v43 = vrot.slane %v2196_v15, 2 }
 0x21b   : > { %v2772_v21 = vsel %vm2769_vm5, %v2770_v50, %v2771_v10  ;;  %v6300_v58 = vpop.f32.mrf.mxu1 }
 0x21c   : > { %v2588_v46 = vpop.f32.mrf.mxu0  ;;  %v2388_v19 = vsel %vm2000_vm15, %v2386_v29, %v2387_v43 }
 0x21d   : > { %v2773_v12 = vrot.slane %v2588_v46, 3  ;;  %v2496_v47 = vadd.f32 %v2388_v19, %v9678_v0  ;;  %v2201_v25 = vpop.f32.mrf.mxu1  ;;  %6486 = vmatmul.mubr.msk.bf16.gmra.mxu1 %vm1112_vm2, %v7294_v42 }
 0x21e   : > { %v6390_v35 = vpop.f32.mrf.mxu0  ;;  %v2389_v9 = vrot.slane %v2201_v25, 2  ;;  %6489 = vmatprep.mubr.msk.bf16.mxu1 %vm6975_vm1, %v9637_v39 }
 0x21f   : > { %v2774_v11 = vsel %vm2769_vm5, %v2771_v10, %v2773_v12  ;;  %v6303_v56 = vpop.f32.mrf.mxu1  ;;  %v8153_v61 = vadd.f32 %v2770_v50, %v2496_v47 }
 0x220   : > { %v2593_v15 = vpop.f32.mrf.mxu0  ;;  %6576 = vmatmul.mubr.msk.bf16.gmra.mxu0 %vm1112_vm2, %v7350_v27  ;;  %v2390_v29 = vsel %vm2000_vm15, %v2387_v43, %v2389_v9 }
 0x221   : > { %9679 = vst [vmem:[#allocation48_spill] sm:$0xff] %v8153_v61  ;;  %v2775_v58 = vrot.slane %v2593_v15, 3  ;;  %6579 = vmatprep.mubr.msk.bf16.mxu0 %vm6975_vm1, %v9637_v39  ;;  %v2497_v25 = vadd.f32 %v2390_v29, %v7798_v49  ;;  %v2204_v46 = vpop.f32.mrf.mxu1 }
 0x222   : > { %v6393_v10 = vpop.f32.mrf.mxu0  ;;  %v2391_v19 = vrot.slane %v2204_v46, 2 }
 0x223   : > { %v2776_v0 = vsel %vm2769_vm5, %v2773_v12, %v2775_v58  ;;  %v6304_v35 = vpop.f32.mrf.mxu1  ;;  %v8160_v42 = vadd.f32 %v2772_v21, %v2497_v25 }
 0x224   : > { %v2596_v56 = vpop.f32.mrf.mxu0  ;;  %v2392_v47 = vsel %vm2000_vm15, %v2389_v9, %v2391_v19 }
 0x225   : > { %v2777_v50 = vrot.slane %v2596_v56, 3  ;;  %v2498_v43 = vadd.f32 %v2392_v47, %v7809_v30  ;;  %v2209_v15 = vpop.f32.mrf.mxu1  ;;  %6490 = vmatmul.mubr.msk.bf16.gmra.mxu1 %vm1112_vm2, %v7350_v27 }
 0x226   : > { %v6394_v61 = vpop.f32.mrf.mxu0  ;;  %v2393_v49 = vrot.slane %v2209_v15, 2  ;;  %6493 = vmatprep.mubr.msk.bf16.mxu1 %vm6975_vm1, %v9637_v39 }
 0x227   : > { %v2778_v29 = vsel %vm2769_vm5, %v2775_v58, %v2777_v50  ;;  %v6307_v12 = vpop.f32.mrf.mxu1  ;;  %v8171_v21 = vadd.f32 %v2774_v11, %v2498_v43 }
 0x228   : > { %v2601_v46 = vpop.f32.mrf.mxu0  ;;  %6580 = vmatmul.mubr.msk.bf16.gmra.mxu0 %vm1112_vm2, %v7396_v6  ;;  %v2394_v30 = vsel %vm2000_vm15, %v2391_v19, %v2393_v49 }
 0x229   : > { %v2779_v9 = vrot.slane %v2601_v46, 3  ;;  %6583 = vmatprep.mubr.msk.bf16.mxu0 %vm6975_vm1, %v9637_v39  ;;  %v2499_v61 = vadd.f32 %v2394_v30, %v7816_v36  ;;  %v2212_v25 = vpop.f32.mrf.mxu1 }
 0x22a   : > { %v6397_v58 = vpop.f32.mrf.mxu0  ;;  %v2395_v10 = vrot.slane %v2212_v25, 2 }
 0x22b   : > { %v2780_v35 = vsel %vm2769_vm5, %v2777_v50, %v2779_v9  ;;  %v6308_v56 = vpop.f32.mrf.mxu1  ;;  %v8178_v15 = vadd.f32 %v2776_v0, %v2499_v61 }
 0x22c   : > { %v2604_v47 = vpop.f32.mrf.mxu0  ;;  %v2396_v11 = vsel %vm2000_vm15, %v2393_v49, %v2395_v10 }
 0x22d   : > { %v2781_v43 = vrot.slane %v2604_v47, 3  ;;  %v2500_v19 = vadd.f32 %v2396_v11, %v7827_v13  ;;  %v2217_v12 = vpop.f32.mrf.mxu1  ;;  %6494 = vmatmul.mubr.msk.bf16.gmra.mxu1 %vm1112_vm2, %v7396_v6 }
 0x22e   : > { %v6398_v46 = vpop.f32.mrf.mxu0  ;;  %v2397_v36 = vrot.slane %v2217_v12, 2  ;;  %6497 = vmatprep.mubr.msk.bf16.mxu1 %vm6975_vm1, %v9637_v39 }
 0x22f   : > { %v2782_v30 = vsel %vm2769_vm5, %v2779_v9, %v2781_v43  ;;  %v6311_v50 = vpop.f32.mrf.mxu1  ;;  %v8189_v0 = vadd.f32 %v2778_v29, %v2500_v19 }
 0x230   : > { %v2609_v25 = vpop.f32.mrf.mxu0  ;;  %6584 = vmatmul.mubr.msk.bf16.gmra.mxu0 %vm1112_vm2, %v7433_v62  ;;  %v2398_v13 = vsel %vm2000_vm15, %v2395_v10, %v2397_v36 }
 0x231   : > { %v2783_v49 = vrot.slane %v2609_v25, 3  ;;  %6587 = vmatprep.mubr.msk.bf16.mxu0 %vm6975_vm1, %v9637_v39  ;;  %v2501_v61 = vadd.f32 %v2398_v13, %v7834_v40  ;;  %v2220_v58 = vpop.f32.mrf.mxu1 }
 0x232   : > { %v6401_v9 = vpop.f32.mrf.mxu0  ;;  %v2399_v56 = vrot.slane %v2220_v58, 2 }
 0x233   : > { %v2784_v47 = vsel %vm2769_vm5, %v2781_v43, %v2783_v49  ;;  %v6312_v11 = vpop.f32.mrf.mxu1  ;;  %v8196_v46 = vadd.f32 %v2780_v35, %v2501_v61 }
 0x234   : > { %v2612_v12 = vpop.f32.mrf.mxu0  ;;  %v2400_v29 = vsel %vm2000_vm15, %v2397_v36, %v2399_v56 }
 0x235   : > { %v2785_v19 = vrot.slane %v2612_v12, 3  ;;  %v2502_v10 = vadd.f32 %v2400_v29, %v7845_v16  ;;  %v2225_v50 = vpop.f32.mrf.mxu1  ;;  %6498 = vmatmul.mubr.msk.bf16.gmra.mxu1 %vm1112_vm2, %v7433_v62 }
 0x236   : > { %v6402_v25 = vpop.f32.mrf.mxu0  ;;  %v2401_v40 = vrot.slane %v2225_v50, 2  ;;  %6501 = vmatprep.mubr.msk.bf16.mxu1 %vm6975_vm1, %v9637_v39 }
 0x237   : > { %v2786_v13 = vsel %vm2769_vm5, %v2783_v49, %v2785_v19  ;;  %v6315_v43 = vpop.f32.mrf.mxu1  ;;  %v8207_v35 = vadd.f32 %v2782_v30, %v2502_v10 }
 0x238   : > { %v2617_v58 = vpop.f32.mrf.mxu0  ;;  %6588 = vmatmul.mubr.msk.bf16.gmra.mxu0 %vm1112_vm2, %v7466_v28  ;;  %v2402_v16 = vsel %vm2000_vm15, %v2399_v56, %v2401_v40 }
 0x239   : > { %v2787_v36 = vrot.slane %v2617_v58, 3  ;;  %6591 = vmatprep.mubr.msk.bf16.mxu0 %vm6975_vm1, %v9637_v39  ;;  %v2503_v61 = vadd.f32 %v2402_v16, %v7852_v20  ;;  %v2228_v9 = vpop.f32.mrf.mxu1 }
 0x23a   : > { %v6405_v49 = vpop.f32.mrf.mxu0  ;;  %v2403_v11 = vrot.slane %v2228_v9, 2 }
 0x23b   : > { %v2788_v12 = vsel %vm2769_vm5, %v2785_v19, %v2787_v36  ;;  %v6316_v29 = vpop.f32.mrf.mxu1  ;;  %v8214_v25 = vadd.f32 %v2784_v47, %v2503_v61 }
 0x23c   : > { %v2620_v50 = vpop.f32.mrf.mxu0  ;;  %v2404_v30 = vsel %vm2000_vm15, %v2401_v40, %v2403_v11 }
 0x23d   : > { %v2789_v10 = vrot.slane %v2620_v50, 3  ;;  %v2504_v56 = vadd.f32 %v2404_v30, %v7863_v51  ;;  %v2233_v43 = vpop.f32.mrf.mxu1  ;;  %6502 = vmatmul.mubr.msk.bf16.gmra.mxu1 %vm1112_vm2, %v7466_v28 }
 0x23e   : > { %v6406_v58 = vpop.f32.mrf.mxu0  ;;  %v2405_v20 = vrot.slane %v2233_v43, 2  ;;  %6505 = vmatprep.mubr.msk.bf16.mxu1 %vm6975_vm1, %v9637_v39 }
 0x23f   : > { %v2790_v16 = vsel %vm2769_vm5, %v2787_v36, %v2789_v10  ;;  %v6319_v19 = vpop.f32.mrf.mxu1  ;;  %v8225_v47 = vadd.f32 %v2786_v13, %v2504_v56 }
 0x240   : > { %v2625_v9 = vpop.f32.mrf.mxu0  ;;  %6592 = vmatmul.mubr.msk.bf16.gmra.mxu0 %vm1112_vm2, %v7477_v1  ;;  %v2406_v51 = vsel %vm2000_vm15, %v2403_v11, %v2405_v20 }
 0x241   : > { %v2791_v40 = vrot.slane %v2625_v9, 3  ;;  %6595 = vmatprep.mubr.msk.bf16.mxu0 %vm6975_vm1, %v9637_v39  ;;  %v2505_v61 = vadd.f32 %v2406_v51, %v7870_v8  ;;  %v2236_v49 = vpop.f32.mrf.mxu1 }
 0x242   : > { %v6409_v36 = vpop.f32.mrf.mxu0  ;;  %v2407_v29 = vrot.slane %v2236_v49, 2 }
 0x243   : > { %v2792_v50 = vsel %vm2769_vm5, %v2789_v10, %v2791_v40  ;;  %v6320_v30 = vpop.f32.mrf.mxu1  ;;  %v8232_v58 = vadd.f32 %v2788_v12, %v2505_v61 }
 0x244   : > { %v2628_v43 = vpop.f32.mrf.mxu0  ;;  %v2408_v13 = vsel %vm2000_vm15, %v2405_v20, %v2407_v29 }
 0x245   : > { %v2793_v56 = vrot.slane %v2628_v43, 3  ;;  %v2506_v11 = vadd.f32 %v2408_v13, %v7881_v23  ;;  %v2241_v19 = vpop.f32.mrf.mxu1  ;;  %6506 = vmatmul.mubr.msk.bf16.gmra.mxu1 %vm1112_vm2, %v7477_v1 }
 0x246   : > { %v6410_v9 = vpop.f32.mrf.mxu0  ;;  %v2409_v8 = vrot.slane %v2241_v19, 2  ;;  %6509 = vmatprep.mubr.msk.bf16.mxu1 %vm6975_vm1, %v9637_v39 }
 0x247   : > { %v2794_v51 = vsel %vm2769_vm5, %v2791_v40, %v2793_v56  ;;  %v6323_v10 = vpop.f32.mrf.mxu1  ;;  %v8243_v12 = vadd.f32 %v2790_v16, %v2506_v11 }
 0x248   : > { %v2633_v49 = vpop.f32.mrf.mxu0  ;;  %6596 = vmatmul.mubr.msk.bf16.gmra.mxu0 %vm1112_vm2, %v7139_v22  ;;  %v2410_v23 = vsel %vm2000_vm15, %v2407_v29, %v2409_v8 }
 0x249   : > { %v2795_v20 = vrot.slane %v2633_v49, 3  ;;  %6599 = vmatprep.mubr.msk.bf16.mxu0 %vm6975_vm1, %v9637_v39  ;;  %v2507_v61 = vadd.f32 %v2410_v23, %v7888_v63  ;;  %v2244_v36 = vpop.f32.mrf.mxu1 }
 0x24a   : > { %v6413_v40 = vpop.f32.mrf.mxu0  ;;  %v2411_v30 = vrot.slane %v2244_v36, 2 }
 0x24b   : > { %v2796_v43 = vsel %vm2769_vm5, %v2793_v56, %v2795_v20  ;;  %v6324_v13 = vpop.f32.mrf.mxu1  ;;  %v8250_v9 = vadd.f32 %v2792_v50, %v2507_v61 }
 0x24c   : > { %v2636_v19 = vpop.f32.mrf.mxu0  ;;  %v2412_v16 = vsel %vm2000_vm15, %v2409_v8, %v2411_v30 }
 0x24d   : > { %v2797_v11 = vrot.slane %v2636_v19, 3  ;;  %v2508_v29 = vadd.f32 %v2412_v16, %v7899_v31  ;;  %v2249_v10 = vpop.f32.mrf.mxu1  ;;  %6510 = vmatmul.mubr.msk.bf16.gmra.mxu1 %vm1112_vm2, %v7139_v22 }
 0x24e   : > { %v6414_v49 = vpop.f32.mrf.mxu0  ;;  %v2413_v63 = vrot.slane %v2249_v10, 2  ;;  %6513 = vmatprep.mubr.msk.bf16.mxu1 %vm6975_vm1, %v9637_v39 }
 0x24f   : > { %v2798_v23 = vsel %vm2769_vm5, %v2795_v20, %v2797_v11  ;;  %v6327_v56 = vpop.f32.mrf.mxu1  ;;  %v8261_v50 = vadd.f32 %v2794_v51, %v2508_v29 }
 0x250   : > { %v2641_v36 = vpop.f32.mrf.mxu0  ;;  %6600 = vmatmul.mubr.msk.bf16.gmra.mxu0 %vm1112_vm2, %v7186_v45  ;;  %v2414_v31 = vsel %vm2000_vm15, %v2411_v30, %v2413_v63 }
 0x251   : > { %v2799_v8 = vrot.slane %v2641_v36, 3  ;;  %6603 = vmatprep.mubr.msk.bf16.mxu0 %vm6975_vm1, %v9637_v39  ;;  %v2509_v61 = vadd.f32 %v2414_v31, %v7906_v24  ;;  %v2252_v40 = vpop.f32.mrf.mxu1 }
 0x252   : > { %v6417_v20 = vpop.f32.mrf.mxu0  ;;  %v2415_v13 = vrot.slane %v2252_v40, 2 }
 0x253   : > { %v2800_v19 = vsel %vm2769_vm5, %v2797_v11, %v2799_v8  ;;  %v6328_v16 = vpop.f32.mrf.mxu1  ;;  %v8268_v49 = vadd.f32 %v2796_v43, %v2509_v61 }
 0x254   : > { %v2644_v10 = vpop.f32.mrf.mxu0  ;;  %v2416_v51 = vsel %vm2000_vm15, %v2413_v63, %v2415_v13 }
 0x255   : > { %v2801_v29 = vrot.slane %v2644_v10, 3  ;;  %v2510_v30 = vadd.f32 %v2416_v51, %v7917_v7  ;;  %v2257_v56 = vpop.f32.mrf.mxu1  ;;  %6514 = vmatmul.mubr.msk.bf16.gmra.mxu1 %vm1112_vm2, %v7186_v45 }
 0x256   : > { %v6418_v36 = vpop.f32.mrf.mxu0  ;;  %v2417_v24 = vrot.slane %v2257_v56, 2  ;;  %6517 = vmatprep.mubr.msk.bf16.mxu1 %vm6975_vm1, %v9637_v39 }
 0x257   : > { %v2802_v31 = vsel %vm2769_vm5, %v2799_v8, %v2801_v29  ;;  %v6331_v11 = vpop.f32.mrf.mxu1  ;;  %v8279_v43 = vadd.f32 %v2798_v23, %v2510_v30 }
 0x258   : > { %v2649_v40 = vpop.f32.mrf.mxu0  ;;  %6604 = vmatmul.mubr.msk.bf16.gmra.mxu0 %vm1112_vm2, %v7225_v54  ;;  %v2418_v7 = vsel %vm2000_vm15, %v2415_v13, %v2417_v24 }
 0x259   : > { %v2803_v63 = vrot.slane %v2649_v40, 3  ;;  %6607 = vmatprep.mubr.msk.bf16.mxu0 %vm6975_vm1, %v9637_v39  ;;  %v2511_v61 = vadd.f32 %v2418_v7, %v7924_v53  ;;  %v2260_v20 = vpop.f32.mrf.mxu1 }
 0x25a   : > { %v6421_v8 = vpop.f32.mrf.mxu0  ;;  %v2419_v16 = vrot.slane %v2260_v20, 2 }
 0x25b   : > { %v2804_v10 = vsel %vm2769_vm5, %v2801_v29, %v2803_v63  ;;  %v6332_v51 = vpop.f32.mrf.mxu1  ;;  %v8286_v36 = vadd.f32 %v2800_v19, %v2511_v61 }
 0x25c   : > { %v2652_v56 = vpop.f32.mrf.mxu0  ;;  %v2420_v23 = vsel %vm2000_vm15, %v2417_v24, %v2419_v16 }
 0x25d   : > { %v2805_v30 = vrot.slane %v2652_v56, 3  ;;  %v2512_v13 = vadd.f32 %v2420_v23, %v7935_v57  ;;  %v2265_v11 = vpop.f32.mrf.mxu1  ;;  %6518 = vmatmul.mubr.msk.bf16.gmra.mxu1 %vm1112_vm2, %v7225_v54 }
 0x25e   : > { %v6422_v40 = vpop.f32.mrf.mxu0  ;;  %v2421_v53 = vrot.slane %v2265_v11, 2  ;;  %6521 = vmatprep.mubr.msk.bf16.mxu1 %vm6975_vm1, %v9637_v39 }
 0x25f   : > { %v2806_v7 = vsel %vm2769_vm5, %v2803_v63, %v2805_v30  ;;  %v6335_v29 = vpop.f32.mrf.mxu1  ;;  %v8297_v19 = vadd.f32 %v2802_v31, %v2512_v13 }
 0x260   : > { %v2657_v20 = vpop.f32.mrf.mxu0  ;;  %6608 = vmatmul.mubr.msk.bf16.gmra.mxu0 %vm1112_vm2, %v7272_v59  ;;  %v2422_v57 = vsel %vm2000_vm15, %v2419_v16, %v2421_v53 }
 0x261   : > { %v2807_v24 = vrot.slane %v2657_v20, 3  ;;  %6611 = vmatprep.mubr.msk.bf16.mxu0 %vm6975_vm1, %v9637_v39  ;;  %v2513_v61 = vadd.f32 %v2422_v57, %v7942_v17  ;;  %v2268_v8 = vpop.f32.mrf.mxu1 }
 0x262   : > { %v6425_v63 = vpop.f32.mrf.mxu0  ;;  %v2423_v51 = vrot.slane %v2268_v8, 2 }
 0x263   : > { %v2808_v56 = vsel %vm2769_vm5, %v2805_v30, %v2807_v24  ;;  %v6336_v23 = vpop.f32.mrf.mxu1  ;;  %v8304_v40 = vadd.f32 %v2804_v10, %v2513_v61 }
 0x264   : > { %v2660_v11 = vpop.f32.mrf.mxu0  ;;  %v2424_v31 = vsel %vm2000_vm15, %v2421_v53, %v2423_v51 }
 0x265   : > { %v2809_v13 = vrot.slane %v2660_v11, 3  ;;  %v2514_v16 = vadd.f32 %v2424_v31, %v7953_v38  ;;  %v2273_v29 = vpop.f32.mrf.mxu1  ;;  %6522 = vmatmul.mubr.msk.bf16.gmra.mxu1 %vm1112_vm2, %v7272_v59 }
 0x266   : > { %v6426_v20 = vpop.f32.mrf.mxu0  ;;  %v2425_v17 = vrot.slane %v2273_v29, 2  ;;  %6525 = vmatprep.mubr.msk.bf16.mxu1 %vm6975_vm1, %v9637_v39 }
 0x267   : > { %v2810_v57 = vsel %vm2769_vm5, %v2807_v24, %v2809_v13  ;;  %v6339_v30 = vpop.f32.mrf.mxu1  ;;  %v8315_v10 = vadd.f32 %v2806_v7, %v2514_v16 }
 0x268   : > { %v2665_v8 = vpop.f32.mrf.mxu0  ;;  %6612 = vmatmul.mubr.msk.bf16.gmra.mxu0 %vm1112_vm2, %v7322_v26  ;;  %v2426_v38 = vsel %vm2000_vm15, %v2423_v51, %v2425_v17 }
 0x269   : > { %v2811_v53 = vrot.slane %v2665_v8, 3  ;;  %6615 = vmatprep.mubr.msk.bf16.mxu0 %vm6975_vm1, %v9637_v39  ;;  %v2515_v61 = vadd.f32 %v2426_v38, %v7960_v32  ;;  %v2276_v63 = vpop.f32.mrf.mxu1 }
 0x26a   : > { %v6429_v24 = vpop.f32.mrf.mxu0  ;;  %v2427_v23 = vrot.slane %v2276_v63, 2 }
 0x26b   : > { %v2812_v11 = vsel %vm2769_vm5, %v2809_v13, %v2811_v53  ;;  %v6340_v31 = vpop.f32.mrf.mxu1  ;;  %v8322_v20 = vadd.f32 %v2808_v56, %v2515_v61 }
 0x26c   : > { %v2668_v29 = vpop.f32.mrf.mxu0  ;;  %v2428_v7 = vsel %vm2000_vm15, %v2425_v17, %v2427_v23 }
 0x26d   : > { %v2813_v16 = vrot.slane %v2668_v29, 3  ;;  %v2516_v51 = vadd.f32 %v2428_v7, %v7971_v37  ;;  %v2281_v30 = vpop.f32.mrf.mxu1  ;;  %6526 = vmatmul.mubr.msk.bf16.gmra.mxu1 %vm1112_vm2, %v7322_v26 }
 0x26e   : > { %v6430_v8 = vpop.f32.mrf.mxu0  ;;  %v2429_v32 = vrot.slane %v2281_v30, 2  ;;  %6529 = vmatprep.mubr.msk.bf16.mxu1 %vm6975_vm1, %v9637_v39 }
 0x26f   : > { %v2814_v38 = vsel %vm2769_vm5, %v2811_v53, %v2813_v16  ;;  %v6343_v13 = vpop.f32.mrf.mxu1  ;;  %v8333_v56 = vadd.f32 %v2810_v57, %v2516_v51 }
 0x270   : > { %v2673_v63 = vpop.f32.mrf.mxu0  ;;  %6616 = vmatmul.mubr.msk.bf16.gmra.mxu0 %vm1112_vm2, %v7369_v41  ;;  %v2430_v37 = vsel %vm2000_vm15, %v2427_v23, %v2429_v32 }
 0x271   : > { %v2815_v17 = vrot.slane %v2673_v63, 3  ;;  %6619 = vmatprep.mubr.msk.bf16.mxu0 %vm6975_vm1, %v9637_v39  ;;  %v2517_v61 = vadd.f32 %v2430_v37, %v7978_v3  ;;  %v2284_v24 = vpop.f32.mrf.mxu1 }
 0x272   : > { %v6433_v53 = vpop.f32.mrf.mxu0  ;;  %v2431_v31 = vrot.slane %v2284_v24, 2 }
 0x273   : > { %v2816_v29 = vsel %vm2769_vm5, %v2813_v16, %v2815_v17  ;;  %v6344_v7 = vpop.f32.mrf.mxu1  ;;  %v8340_v8 = vadd.f32 %v2812_v11, %v2517_v61 }
 0x274   : > { %v2676_v30 = vpop.f32.mrf.mxu0  ;;  %v2432_v57 = vsel %vm2000_vm15, %v2429_v32, %v2431_v31 }
 0x275   : > { %v2817_v51 = vrot.slane %v2676_v30, 3  ;;  %v2518_v23 = vadd.f32 %v2432_v57, %v7989_v48  ;;  %v2289_v13 = vpop.f32.mrf.mxu1  ;;  %6530 = vmatmul.mubr.msk.bf16.gmra.mxu1 %vm1112_vm2, %v7369_v41 }
 0x276   : > { %v6434_v63 = vpop.f32.mrf.mxu0  ;;  %v2433_v3 = vrot.slane %v2289_v13, 2  ;;  %6533 = vmatprep.mubr.msk.bf16.mxu1 %vm6975_vm1, %v9637_v39 }
 0x277   : > { %v2818_v37 = vsel %vm2769_vm5, %v2815_v17, %v2817_v51  ;;  %v6347_v16 = vpop.f32.mrf.mxu1  ;;  %v8351_v11 = vadd.f32 %v2814_v38, %v2518_v23 }
 0x278   : > { %v2681_v24 = vpop.f32.mrf.mxu0  ;;  %6620 = vmatmul.mubr.msk.bf16.gmra.mxu0 %vm1112_vm2, %v7411_v44  ;;  %v2434_v48 = vsel %vm2000_vm15, %v2431_v31, %v2433_v3 }
 0x279   : > { %v2819_v32 = vrot.slane %v2681_v24, 3  ;;  %6623 = vmatprep.mubr.msk.bf16.mxu0 %vm6975_vm1, %v9637_v39  ;;  %v2519_v61 = vadd.f32 %v2434_v48, %v7996_v4  ;;  %v2292_v53 = vpop.f32.mrf.mxu1 }
 0x27a   : > { %v6437_v17 = vpop.f32.mrf.mxu0  ;;  %v2435_v7 = vrot.slane %v2292_v53, 2 }
 0x27b   : > { %v2820_v30 = vsel %vm2769_vm5, %v2817_v51, %v2819_v32  ;;  %v6348_v57 = vpop.f32.mrf.mxu1  ;;  %v8358_v63 = vadd.f32 %v2816_v29, %v2519_v61 }
 0x27c   : > { %v2684_v13 = vpop.f32.mrf.mxu0  ;;  %v2436_v38 = vsel %vm2000_vm15, %v2433_v3, %v2435_v7 }
 0x27d   : > { %v2821_v23 = vrot.slane %v2684_v13, 3  ;;  %v2520_v31 = vadd.f32 %v2436_v38, %v8007_v60  ;;  %v2297_v16 = vpop.f32.mrf.mxu1  ;;  %6534 = vmatmul.mubr.msk.bf16.gmra.mxu1 %vm1112_vm2, %v7411_v44 }
 0x27e   : > { %v6438_v24 = vpop.f32.mrf.mxu0  ;;  %v2437_v4 = vrot.slane %v2297_v16, 2  ;;  %6537 = vmatprep.mubr.msk.bf16.mxu1 %vm6975_vm1, %v9637_v39 }
 0x27f   : > { %v2822_v48 = vsel %vm2769_vm5, %v2819_v32, %v2821_v23  ;;  %v6351_v51 = vpop.f32.mrf.mxu1  ;;  %v8369_v29 = vadd.f32 %v2818_v37, %v2520_v31 }
 0x280   : > { %v2689_v53 = vpop.f32.mrf.mxu0  ;;  %6624 = vmatmul.mubr.msk.bf16.gmra.mxu0 %vm1112_vm2, %v7457_v34  ;;  %v2438_v60 = vsel %vm2000_vm15, %v2435_v7, %v2437_v4  ;;  %v9682_v51 = vld [vmem:[#allocation52_spill] sm:$0xff] }
 0x281   : > { %9680 = vst [vmem:[#allocation11_spill] sm:$0xff] %v8369_v29  ;;  %v2823_v3 = vrot.slane %v2689_v53, 3  ;;  %6627 = vmatprep.mubr.msk.bf16.mxu0 %vm6975_vm1, %v9637_v39  ;;  %v2521_v61 = vadd.f32 %v2438_v60, %v8014_v33  ;;  %v2300_v17 = vpop.f32.mrf.mxu1 }
 0x282   : > { %v6441_v32 = vpop.f32.mrf.mxu0  ;;  %v2439_v57 = vrot.slane %v2300_v17, 2 }
 0x283   : > { %v2824_v13 = vsel %vm2769_vm5, %v2821_v23, %v2823_v3  ;;  %v6352_v38 = vpop.f32.mrf.mxu1  ;;  %v8376_v24 = vadd.f32 %v2820_v30, %v2521_v61  ;;  %v9683_v30 = vld [vmem:[#allocation42_spill] sm:$0xff] }
 0x284   : > { %v2692_v16 = vpop.f32.mrf.mxu0  ;;  %v2440_v37 = vsel %vm2000_vm15, %v2437_v4, %v2439_v57 }
 0x285   : > { %9681 = vst [vmem:[#allocation50_spill] sm:$0xff] %v8376_v24  ;;  %v2825_v31 = vrot.slane %v2692_v16, 3  ;;  %v2522_v7 = vadd.f32 %v2440_v37, %v9682_v51  ;;  %v2305_v53 = vpop.f32.mrf.mxu1  ;;  %6538 = vmatmul.mubr.msk.bf16.gmra.mxu1 %vm1112_vm2, %v7457_v34 }
 0x286   : > { %v6442_v29 = vpop.f32.mrf.mxu0  ;;  %v2441_v33 = vrot.slane %v2305_v53, 2  ;;  %6541 = vmatprep.mubr.msk.bf16.mxu1 %vm6975_vm1, %v9637_v39 }
 0x287   : > { %v2826_v60 = vsel %vm2769_vm5, %v2823_v3, %v2825_v31  ;;  %v6355_v23 = vpop.f32.mrf.mxu1  ;;  %v8387_v4 = vadd.f32 %v2822_v48, %v2522_v7  ;;  %v9685_v29 = vld [vmem:[#allocation53_spill] sm:$0xff] }
 0x288   : > { %v2697_v17 = vpop.f32.mrf.mxu0  ;;  %6628 = vmatmul.mubr.msk.bf16.gmra.mxu0 %vm1112_vm2, %v9683_v30  ;;  %v2442_v61 = vsel %vm2000_vm15, %v2439_v57, %v2441_v33 }
 0x289   : > { %9684 = vst [vmem:[#allocation49_spill] sm:$0xff] %v8387_v4  ;;  %v2827_v32 = vrot.slane %v2697_v17, 3  ;;  %6631 = vmatprep.mubr.msk.bf16.mxu0 %vm6975_vm1, %v9637_v39  ;;  %v2523_v38 = vadd.f32 %v2442_v61, %v9685_v29  ;;  %v2308_v16 = vpop.f32.mrf.mxu1  ;;  %v9687_v4 = vld [vmem:[#allocation54_spill] sm:$0xff] }
 0x28a   : > { %v6445_v3 = vpop.f32.mrf.mxu0  ;;  %v2443_v37 = vrot.slane %v2308_v16, 2 }
 0x28b   : > { %v2828_v51 = vsel %vm2769_vm5, %v2825_v31, %v2827_v32  ;;  %v6356_v53 = vpop.f32.mrf.mxu1  ;;  %v8394_v24 = vadd.f32 %v2824_v13, %v2523_v38  ;;  %v9689_v38 = vld [vmem:[#allocation43_spill] sm:$0xff] }
 0x28c   : > { %v2700_v23 = vpop.f32.mrf.mxu0  ;;  %v2444_v48 = vsel %vm2000_vm15, %v2441_v33, %v2443_v37 }
 0x28d   : > { %9686 = vst [vmem:[#allocation12_spill] sm:$0xff] %v8394_v24  ;;  %v2829_v7 = vrot.slane %v2700_v23, 3  ;;  %v2524_v57 = vadd.f32 %v2444_v48, %v9687_v4  ;;  %v2313_v17 = vpop.f32.mrf.mxu1  ;;  %6542 = vmatmul.mubr.msk.bf16.gmra.mxu1 %vm1112_vm2, %v9683_v30 }
 0x28e   : > { %v6446_v34 = vpop.f32.mrf.mxu0  ;;  %v2445_v61 = vrot.slane %v2313_v17, 2  ;;  %6545 = vmatprep.mubr.msk.bf16.mxu1 %vm6975_vm1, %v9637_v39 }
 0x28f   : > { %v2830_v29 = vsel %vm2769_vm5, %v2827_v32, %v2829_v7  ;;  %v6359_v31 = vpop.f32.mrf.mxu1  ;;  %v8404_v13 = vadd.f32 %v2826_v60, %v2524_v57 }
 0x290   : > { %v2705_v16 = vpop.f32.mrf.mxu0  ;;  %6632 = vmatmul.mubr.bf16.gmra.mxu0 %v9664_v14  ;;  %v2446_v33 = vsel %vm2000_vm15, %v2443_v37, %v2445_v61 }
 0x291   : > { %9688 = vst [vmem:[#allocation51_spill] sm:$0xff] %v8404_v13  ;;  %v2831_v4 = vrot.slane %v2705_v16, 3  ;;  %6723 = vmatprep.mubr.msk.bf16.mxu0 %vm6975_vm1, %v9637_v39  ;;  %v2525_v34 = vadd.f32 %v2446_v33, %v9689_v38  ;;  %v2316_v3 = vpop.f32.mrf.mxu1  ;;  %v9691_v13 = vld [vmem:[#allocation44_spill] sm:$0xff] }
 0x292   : > { %v6449_v53 = vpop.f32.mrf.mxu0  ;;  %v2447_v32 = vrot.slane %v2316_v3, 2 }
 0x293   : > { %v2832_v23 = vsel %vm2769_vm5, %v2829_v7, %v2831_v4  ;;  %v6360_v48 = vpop.f32.mrf.mxu1  ;;  %v8411_v31 = vadd.f32 %v2828_v51, %v2525_v34 }
 0x294   : > { %v2708_v17 = vpop.f32.mrf.mxu0  ;;  %v2448_v60 = vsel %vm2000_vm15, %v2445_v61, %v2447_v32 }
 0x295   : > { %9690 = vst [vmem:[#allocation52_spill] sm:$0xff] %v8411_v31  ;;  %v2833_v57 = vrot.slane %v2708_v17, 3  ;;  %v2526_v37 = vadd.f32 %v2448_v60, %v9691_v13  ;;  %v2321_v16 = vpop.f32.mrf.mxu1  ;;  %6546 = vmatmul.mubr.bf16.gmra.mxu1 %v9664_v14  ;;  %v9693_v13 = vld [vmem:[#allocation45_spill] sm:$0xff] }
 0x296   : > { %v6450_v24 = vpop.f32.mrf.mxu0  ;;  %v2449_v30 = vrot.slane %v2321_v16, 2  ;;  %6637 = vmatprep.mubr.msk.bf16.mxu1 %vm6975_vm1, %v9637_v39 }
 0x297   : > { %v2834_v33 = vsel %vm2769_vm5, %v2831_v4, %v2833_v57  ;;  %v6363_v7 = vpop.f32.mrf.mxu1  ;;  %v8420_v51 = vadd.f32 %v2830_v29, %v2526_v37 }
 0x298   : > { %v2713_v38 = vpop.f32.mrf.mxu0  ;;  %6724 = vmatmul.mubr.bf16.vlgmr.msra.gmra.mxu0 %v9664_v14  ;;  %v2450_v61 = vsel %vm2000_vm15, %v2447_v32, %v2449_v30  ;;  %v9694_v7 = vld [vmem:[#allocation46_spill] sm:$0xff] }
 0x299   : > { %9692 = vst [vmem:[#allocation53_spill] sm:$0xff] %v8420_v51  ;;  %v2835_v34 = vrot.slane %v2713_v38, 3  ;;  %6727 = vmatprep.mubr.msk.bf16.mxu0 %vm6975_vm1, %v9637_v39  ;;  %v2527_v24 = vadd.f32 %v2450_v61, %v9693_v13  ;;  %v2324_v3 = vpop.f32.mrf.mxu1 }
 0x29a   : > { %v6453_v53 = vpop.f32.mrf.mxu0  ;;  %v2451_v4 = vrot.slane %v2324_v3, 2 }
 0x29b   : > { %v2836_v48 = vsel %vm2769_vm5, %v2833_v57, %v2835_v34  ;;  %v6364_v17 = vpop.f32.mrf.mxu1  ;;  %v8427_v16 = vadd.f32 %v2832_v23, %v2527_v24 }
 0x29c   : > { %v2716_v60 = vpop.f32.mrf.mxu0  ;;  %v2452_v29 = vsel %vm2000_vm15, %v2449_v30, %v2451_v4 }
 0x29d   : > { %v2837_v37 = vrot.slane %v2716_v60, 3  ;;  %v2528_v32 = vadd.f32 %v2452_v29, %v9694_v7  ;;  %v2329_v38 = vpop.f32.mrf.mxu1  ;;  %6638 = vmatmul.mubr.bf16.vlgmr.msra.gmra.mxu1 %v9664_v14 }
 0x29e   : > { %v6454_v51 = vpop.f32.mrf.mxu0  ;;  %v2453_v31 = vrot.slane %v2329_v38, 2  ;;  %6641 = vmatprep.mubr.msk.bf16.mxu1 %vm6975_vm1, %v9637_v39 }
 0x29f   : > { %v2838_v61 = vsel %vm2769_vm5, %v2835_v34, %v2837_v37  ;;  %v6367_v57 = vpop.f32.mrf.mxu1  ;;  %v8437_v23 = vadd.f32 %v2834_v33, %v2528_v32 }
 0x2a0   : > { %v2721_v13 = vpop.f32.mrf.mxu0  ;;  %6728 = vmatmul.mubr.msk.bf16.gmra.mxu0 %vm1112_vm2, %v9672_v55  ;;  %v2454_v30 = vsel %vm2000_vm15, %v2451_v4, %v2453_v31 }
 0x2a1   : > { %v2839_v24 = vrot.slane %v2721_v13, 3  ;;  %6731 = vmatprep.mubr.msk.bf16.mxu0 %vm6975_vm1, %v9637_v39  ;;  %v2529_v51 = vadd.f32 %v2454_v30, %v8091_v2  ;;  %v2332_v3 = vpop.f32.mrf.mxu1 }
 0x2a2   : > { %v6457_v34 = vpop.f32.mrf.mxu0  ;;  %v2455_v53 = vrot.slane %v2332_v3, 2 }
 0x2a3   : > { %v2840_v17 = vsel %vm2769_vm5, %v2837_v37, %v2839_v24  ;;  %v6368_v60 = vpop.f32.mrf.mxu1  ;;  %v8444_v7 = vadd.f32 %v2836_v48, %v2529_v51 }
 0x2a4   : > { %v2724_v29 = vpop.f32.mrf.mxu0  ;;  %v2456_v33 = vsel %vm2000_vm15, %v2453_v31, %v2455_v53 }
 0x2a5   : > { %v2530_v32 = vadd.f32 %v2456_v33, %v8100_v5  ;;  %v2337_v4 = vpop.f32.mrf.mxu1  ;;  %6642 = vmatmul.mubr.msk.bf16.gmra.mxu1 %vm1112_vm2, %v9672_v55  ;;  %v9695_v55 = vld [vmem:[#allocation47_spill] sm:$0xff] }
 0x2a6   : > { %v6458_v38 = vpop.f32.mrf.mxu0  ;;  %v2457_v57 = vrot.slane %v2337_v4, 2  ;;  %6645 = vmatprep.mubr.msk.bf16.mxu1 %vm6975_vm1, %v9637_v39 }
 0x2a7   : > { %v6371_v2 = vpop.f32.mrf.mxu1  ;;  %v8454_v48 = vadd.f32 %v2838_v61, %v2530_v32  ;;  %v9696_v32 = vld [vmem:[#allocation18_spill] sm:$0xff] }
 0x2a8   : > { %v2728_v13 = vpop.f32.mrf.mxu0  ;;  %6732 = vmatmul.mubr.msk.bf16.gmra.mxu0 %vm1112_vm2, %v9676_v18  ;;  %v2458_v31 = vsel %vm2000_vm15, %v2455_v53, %v2457_v57  ;;  %v2532_v5 = vadd.f32 %v2457_v57, %v8107_v52 }
 0x2a9   : > { %6735 = vmatprep.mubr.msk.bf16.mxu0 %vm6975_vm1, %v9637_v39  ;;  %v2531_v37 = vadd.f32 %v2458_v31, %v9695_v55  ;;  %v2340_v30 = vpop.f32.mrf.mxu1  ;;  %v9697_v31 = vld [vmem:[#allocation23_spill] sm:$0xff] }
 0x2aa   : > { %v6461_v51 = vpop.f32.mrf.mxu0  ;;  %v8461_v3 = vadd.f32 %v2839_v24, %v2532_v5 }
 0x2ab   : > { %v6372_v34 = vpop.f32.mrf.mxu1  ;;  %v8463_v29 = vadd.f32 %v2840_v17, %v2531_v37 }
 0x2ac   : > { %v2730_v60 = vpop.f32.mrf.mxu0 }
 0x2ad   : > { %v2344_v33 = vpop.f32.mrf.mxu1  ;;  %6646 = vmatmul.mubr.msk.bf16.gmra.mxu1 %vm1112_vm2, %v9676_v18 }
 0x2ae   : > { %v6462_v61 = vpop.f32.mrf.mxu0  ;;  %6649 = vmatprep.mubr.msk.bf16.mxu1 %vm6975_vm1, %v9637_v39 }
 0x2af   : > { %v6375_v52 = vpop.f32.mrf.mxu1  ;;  %v9698_v61 = vld [vmem:[#allocation28_spill] sm:$0xff] }
 0x2b0   : > { %v3339_v53 = vpop.f32.mrf.mxu0  ;;  %6736 = vmatmul.mubr.msk.bf16.gmra.mxu0 %vm1112_vm2, %v9696_v32 }
 0x2b1   : > { %6739 = vmatprep.mubr.msk.bf16.mxu0 %vm6975_vm1, %v9637_v39  ;;  %v2346_v24 = vpop.f32.mrf.mxu1 }
 0x2b2   : > { %v6553_v4 = vpop.f32.mrf.mxu0 }
 0x2b3   : > { %v6376_v17 = vpop.f32.mrf.mxu1 }
 0x2b4   : > { %v3341_v38 = vpop.f32.mrf.mxu0  ;;  %v9699_v17 = vld [vmem:[#allocation48_spill] sm:$0xff] }
 0x2b5   : > { %v2954_v57 = vpop.f32.mrf.mxu1  ;;  %6650 = vmatmul.mubr.msk.bf16.gmra.mxu1 %vm1112_vm2, %v9696_v32 }
 0x2b6   : > { %v6554_v18 = vpop.f32.mrf.mxu0  ;;  %6653 = vmatprep.mubr.msk.bf16.mxu1 %vm6975_vm1, %v9637_v39 }
 0x2b7   : > { %v6467_v2 = vpop.f32.mrf.mxu1 }
 0x2b8   : > { %v3345_v13 = vpop.f32.mrf.mxu0  ;;  %6740 = vmatmul.mubr.msk.bf16.gmra.mxu0 %vm1112_vm2, %v9697_v31 }
 0x2b9   : > { %6743 = vmatprep.mubr.msk.bf16.mxu0 %vm6975_vm1, %v9637_v39  ;;  %v2956_v5 = vpop.f32.mrf.mxu1 }
 0x2ba   : > { %v6557_v55 = vpop.f32.mrf.mxu0 }
 0x2bb   : > { %v6468_v37 = vpop.f32.mrf.mxu1 }
 0x2bc   : > { %v3347_v30 = vpop.f32.mrf.mxu0 }
 0x2bd   : > { %v2960_v51 = vpop.f32.mrf.mxu1  ;;  %6654 = vmatmul.mubr.msk.bf16.gmra.mxu1 %vm1112_vm2, %v9697_v31 }
 0x2be   : > { %v6558_v34 = vpop.f32.mrf.mxu0  ;;  %6657 = vmatprep.mubr.msk.bf16.mxu1 %vm6975_vm1, %v9637_v39 }
 0x2bf   : > { %v6471_v60 = vpop.f32.mrf.mxu1 }
 0x2c0   : > { %v3351_v33 = vpop.f32.mrf.mxu0  ;;  %6744 = vmatmul.mubr.msk.bf16.gmra.mxu0 %vm1112_vm2, %v9698_v61 }
 0x2c1   : > { %6747 = vmatprep.mubr.msk.bf16.mxu0 %vm6975_vm1, %v9637_v39  ;;  %v2962_v52 = vpop.f32.mrf.mxu1 }
 0x2c2   : > { %v6561_v53 = vpop.f32.mrf.mxu0  ;;  %v3153_v32 = vrot.slane %v2962_v52, 4 }
 0x2c3   : > { %v6472_v24 = vpop.f32.mrf.mxu1 }
 0x2c4   : > { %v3353_v4 = vpop.f32.mrf.mxu0  ;;  %v3263_v38 = vadd.f32 %v3153_v32, %v9699_v17 }
 0x2c5   : > { %v3538_v57 = vrot.slane %v3353_v4, 4  ;;  %v2967_v18 = vpop.f32.mrf.mxu1  ;;  %6658 = vmatmul.mubr.msk.bf16.gmra.mxu1 %vm1112_vm2, %v9698_v61 }
 0x2c6   : > { %v6562_v2 = vpop.f32.mrf.mxu0  ;;  %v3154_v13 = vrot.slane %v2967_v18, 4  ;;  %6661 = vmatprep.mubr.msk.bf16.mxu1 %vm6975_vm1, %v9637_v39 }
 0x2c7   : > { %v8492_v31 = vadd.f32 %v3538_v57, %v3263_v38  ;;  %v6475_v5 = vpop.f32.mrf.mxu1 }
 0x2c8   : > { %v3358_v55 = vpop.f32.mrf.mxu0  ;;  %6748 = vmatmul.mubr.msk.bf16.gmra.mxu0 %vm1112_vm2, %v7350_v27  ;;  %v3155_v37 = vsel %vm1176_vm0, %v3153_v32, %v3154_v13 }
 0x2c9   : > { %v3539_v30 = vrot.slane %v3358_v55, 4  ;;  %6751 = vmatprep.mubr.msk.bf16.mxu0 %vm6975_vm1, %v9637_v39  ;;  %v3264_v51 = vadd.f32 %v3155_v37, %v8160_v42  ;;  %v2970_v34 = vpop.f32.mrf.mxu1 }
 0x2ca   : > { %v6565_v60 = vpop.f32.mrf.mxu0  ;;  %v3156_v33 = vrot.slane %v2970_v34, 4 }
 0x2cb   : > { %v3540_v61 = vsel %vm1176_vm0, %v3538_v57, %v3539_v30  ;;  %v6476_v53 = vpop.f32.mrf.mxu1 }
 0x2cc   : > { %v8503_v52 = vadd.f32 %v3540_v61, %v3264_v51  ;;  %v3361_v24 = vpop.f32.mrf.mxu0  ;;  %v3157_v4 = vsel %vm1176_vm0, %v3154_v13, %v3156_v33 }
 0x2cd   : > { %v3541_v17 = vrot.slane %v3361_v24, 4  ;;  %v3265_v32 = vadd.f32 %v3157_v4, %v8171_v21  ;;  %v2975_v38 = vpop.f32.mrf.mxu1  ;;  %6662 = vmatmul.mubr.msk.bf16.gmra.mxu1 %vm1112_vm2, %v7350_v27 }
 0x2ce   : > { %v6566_v18 = vpop.f32.mrf.mxu0  ;;  %v3158_v42 = vrot.slane %v2975_v38, 4  ;;  %6665 = vmatprep.mubr.msk.bf16.mxu1 %vm6975_vm1, %v9637_v39 }
 0x2cf   : > { %v3542_v2 = vsel %vm1176_vm0, %v3539_v30, %v3541_v17  ;;  %v6479_v5 = vpop.f32.mrf.mxu1 }
 0x2d0   : > { %v8512_v57 = vadd.f32 %v3542_v2, %v3265_v32  ;;  %v3366_v55 = vpop.f32.mrf.mxu0  ;;  %6752 = vmatmul.mubr.msk.bf16.gmra.mxu0 %vm1112_vm2, %v7396_v6  ;;  %v3159_v21 = vsel %vm1176_vm0, %v3156_v33, %v3158_v42 }
 0x2d1   : > { %v3543_v13 = vrot.slane %v3366_v55, 4  ;;  %6755 = vmatprep.mubr.msk.bf16.mxu0 %vm6975_vm1, %v9637_v39  ;;  %v3266_v27 = vadd.f32 %v3159_v21, %v8178_v15  ;;  %v2978_v37 = vpop.f32.mrf.mxu1 }
 0x2d2   : > { %v6569_v30 = vpop.f32.mrf.mxu0  ;;  %v3160_v51 = vrot.slane %v2978_v37, 4 }
 0x2d3   : > { %v3544_v34 = vsel %vm1176_vm0, %v3541_v17, %v3543_v13  ;;  %v6480_v61 = vpop.f32.mrf.mxu1 }
 0x2d4   : > { %v8521_v60 = vadd.f32 %v3544_v34, %v3266_v27  ;;  %v3369_v53 = vpop.f32.mrf.mxu0  ;;  %v3161_v24 = vsel %vm1176_vm0, %v3158_v42, %v3160_v51 }
 0x2d5   : > { %v3545_v4 = vrot.slane %v3369_v53, 4  ;;  %v3267_v33 = vadd.f32 %v3161_v24, %v8189_v0  ;;  %v2983_v32 = vpop.f32.mrf.mxu1  ;;  %6666 = vmatmul.mubr.msk.bf16.gmra.mxu1 %vm1112_vm2, %v7396_v6 }
 0x2d6   : > { %v6570_v38 = vpop.f32.mrf.mxu0  ;;  %v3162_v15 = vrot.slane %v2983_v32, 4  ;;  %6669 = vmatprep.mubr.msk.bf16.mxu1 %vm6975_vm1, %v9637_v39 }
 0x2d7   : > { %v3546_v18 = vsel %vm1176_vm0, %v3543_v13, %v3545_v4  ;;  %v6483_v2 = vpop.f32.mrf.mxu1 }
 0x2d8   : > { %v8530_v17 = vadd.f32 %v3546_v18, %v3267_v33  ;;  %v3374_v5 = vpop.f32.mrf.mxu0  ;;  %6756 = vmatmul.mubr.msk.bf16.gmra.mxu0 %vm1112_vm2, %v7433_v62  ;;  %v3163_v0 = vsel %vm1176_vm0, %v3160_v51, %v3162_v15 }
 0x2d9   : > { %v3547_v42 = vrot.slane %v3374_v5, 4  ;;  %6759 = vmatprep.mubr.msk.bf16.mxu0 %vm6975_vm1, %v9637_v39  ;;  %v3268_v6 = vadd.f32 %v3163_v0, %v8196_v46  ;;  %v2986_v55 = vpop.f32.mrf.mxu1 }
 0x2da   : > { %v6573_v21 = vpop.f32.mrf.mxu0  ;;  %v3164_v13 = vrot.slane %v2986_v55, 4 }
 0x2db   : > { %v3548_v27 = vsel %vm1176_vm0, %v3545_v4, %v3547_v42  ;;  %v6484_v30 = vpop.f32.mrf.mxu1 }
 0x2dc   : > { %v8539_v37 = vadd.f32 %v3548_v27, %v3268_v6  ;;  %v3377_v34 = vpop.f32.mrf.mxu0  ;;  %v3165_v61 = vsel %vm1176_vm0, %v3162_v15, %v3164_v13 }
 0x2dd   : > { %v3549_v53 = vrot.slane %v3377_v34, 4  ;;  %v3269_v51 = vadd.f32 %v3165_v61, %v8207_v35  ;;  %v2991_v24 = vpop.f32.mrf.mxu1  ;;  %6670 = vmatmul.mubr.msk.bf16.gmra.mxu1 %vm1112_vm2, %v7433_v62 }
 0x2de   : > { %v6574_v33 = vpop.f32.mrf.mxu0  ;;  %v3166_v46 = vrot.slane %v2991_v24, 4  ;;  %6673 = vmatprep.mubr.msk.bf16.mxu1 %vm6975_vm1, %v9637_v39 }
 0x2df   : > { %v3550_v32 = vsel %vm1176_vm0, %v3547_v42, %v3549_v53  ;;  %v6487_v38 = vpop.f32.mrf.mxu1 }
 0x2e0   : > { %v8548_v4 = vadd.f32 %v3550_v32, %v3269_v51  ;;  %v3382_v18 = vpop.f32.mrf.mxu0  ;;  %6760 = vmatmul.mubr.msk.bf16.gmra.mxu0 %vm1112_vm2, %v7466_v28  ;;  %v3167_v35 = vsel %vm1176_vm0, %v3164_v13, %v3166_v46 }
 0x2e1   : > { %v3551_v15 = vrot.slane %v3382_v18, 4  ;;  %6763 = vmatprep.mubr.msk.bf16.mxu0 %vm6975_vm1, %v9637_v39  ;;  %v3270_v62 = vadd.f32 %v3167_v35, %v8214_v25  ;;  %v2994_v2 = vpop.f32.mrf.mxu1 }
 0x2e2   : > { %v6577_v5 = vpop.f32.mrf.mxu0  ;;  %v3168_v0 = vrot.slane %v2994_v2, 4 }
 0x2e3   : > { %v3552_v42 = vsel %vm1176_vm0, %v3549_v53, %v3551_v15  ;;  %v6488_v55 = vpop.f32.mrf.mxu1 }
 0x2e4   : > { %v8557_v6 = vadd.f32 %v3552_v42, %v3270_v62  ;;  %v3385_v21 = vpop.f32.mrf.mxu0  ;;  %v3169_v27 = vsel %vm1176_vm0, %v3166_v46, %v3168_v0 }
 0x2e5   : > { %v3553_v30 = vrot.slane %v3385_v21, 4  ;;  %v3271_v13 = vadd.f32 %v3169_v27, %v8225_v47  ;;  %v2999_v34 = vpop.f32.mrf.mxu1  ;;  %6674 = vmatmul.mubr.msk.bf16.gmra.mxu1 %vm1112_vm2, %v7466_v28  ;;  %v9700_v28 = vld [vmem:[#allocation2_spill] sm:$0xff] }
 0x2e6   : > { %v6578_v61 = vpop.f32.mrf.mxu0  ;;  %v3170_v25 = vrot.slane %v2999_v34, 4  ;;  %6677 = vmatprep.mubr.msk.bf16.mxu1 %vm6975_vm1, %v9637_v39  ;;  %v8574_v32 = vadd.s32 8, %v9700_v28 }
 0x2e7   : > { %v3554_v51 = vsel %vm1176_vm0, %v3551_v15, %v3553_v30  ;;  %v6491_v24 = vpop.f32.mrf.mxu1 }
 0x2e8   : > { %v8566_v53 = vadd.f32 %v3554_v51, %v3271_v13  ;;  %v3390_v33 = vpop.f32.mrf.mxu0  ;;  %6764 = vmatmul.mubr.msk.bf16.gmra.mxu0 %vm1112_vm2, %v7477_v1  ;;  %v3171_v47 = vsel %vm1176_vm0, %v3168_v0, %v3170_v25  ;;  %v4497_v2 = vcvt.s32.f32 %v8574_v32  ;;  %v8583_v13 = vadd.s32 16, %v9700_v28 }
 0x2e9   : > { %v3555_v46 = vrot.slane %v3390_v33, 4  ;;  %6767 = vmatprep.mubr.msk.bf16.mxu0 %vm6975_vm1, %v9637_v39  ;;  %v3272_v38 = vadd.f32 %v3171_v47, %v8232_v58  ;;  %v3002_v18 = vpop.f32.mrf.mxu1 }
 0x2ea   : > { %v6581_v35 = vpop.f32.mrf.mxu0  ;;  %v3172_v15 = vrot.slane %v3002_v18, 4  ;;  %v4532_v27 = vadd.f32 0.5, %v4497_v2  ;;  %v8601_v2 = vadd.s32 24, %v9700_v28 }
 0x2eb   : > { %v3556_v62 = vsel %vm1176_vm0, %v3553_v30, %v3555_v46  ;;  %v6492_v42 = vpop.f32.mrf.mxu1 }
 0x2ec   : > { %v8579_v5 = vadd.f32 %v3556_v62, %v3272_v38  ;;  %v3393_v0 = vpop.f32.mrf.mxu0  ;;  %v3173_v55 = vsel %vm1176_vm0, %v3170_v25, %v3172_v15  ;;  %v4498_v25 = vcvt.s32.f32 %v8583_v13 }
 0x2ed   : > { %v3557_v21 = vrot.slane %v3393_v0, 4  ;;  %v3273_v58 = vadd.f32 %v3173_v55, %v8243_v12  ;;  %v3007_v34 = vpop.f32.mrf.mxu1  ;;  %6678 = vmatmul.mubr.msk.bf16.gmra.mxu1 %vm1112_vm2, %v7477_v1  ;;  %v4567_v12 = vmul.f32 0.055555556, %v4532_v27 }
 0x2ee   : > { %v6582_v30 = vpop.f32.mrf.mxu0  ;;  %v3174_v61 = vrot.slane %v3007_v34, 4  ;;  %6681 = vmatprep.mubr.msk.bf16.mxu1 %vm6975_vm1, %v9637_v39 }
 0x2ef   : > { %v3558_v51 = vsel %vm1176_vm0, %v3555_v46, %v3557_v21  ;;  %v6495_v33 = vpop.f32.mrf.mxu1  ;;  %v4533_v46 = vadd.f32 0.5, %v4498_v25  ;;  %v6883_v34 = vtrunc.f32 %v4567_v12  ;;  %v4499_v30 = vcvt.s32.f32 %v8601_v2 }
 0x2f0   : > { %v8592_v24 = vadd.f32 %v3558_v51, %v3273_v58  ;;  %v3398_v47 = vpop.f32.mrf.mxu0  ;;  %6768 = vmatmul.mubr.msk.bf16.gmra.mxu0 %vm1112_vm2, %v7139_v22  ;;  %v3175_v38 = vsel %vm1176_vm0, %v3172_v15, %v3174_v61 }
 0x2f1   : > { %v3559_v1 = vrot.slane %v3398_v47, 4  ;;  %6771 = vmatprep.mubr.msk.bf16.mxu0 %vm6975_vm1, %v9637_v39  ;;  %v3274_v18 = vadd.f32 %v3175_v38, %v8250_v9  ;;  %v3010_v35 = vpop.f32.mrf.mxu1  ;;  %v4568_v55 = vmul.f32 0.055555556, %v4533_v46 }
 0x2f2   : > { %9701 = vst [vmem:[#allocation54_spill] sm:$0xff] %v8592_v24  ;;  %v6585_v62 = vpop.f32.mrf.mxu0  ;;  %v3176_v42 = vrot.slane %v3010_v35, 4 }
 0x2f3   : > { %v3560_v0 = vsel %vm1176_vm0, %v3557_v21, %v3559_v1  ;;  %v6496_v27 = vpop.f32.mrf.mxu1  ;;  %v6885_v9 = vtrunc.f32 %v4568_v55  ;;  %v4534_v21 = vadd.f32 0.5, %v4499_v30 }
 0x2f4   : > { %v8604_v58 = vadd.f32 %v3560_v0, %v3274_v18  ;;  %v3401_v15 = vpop.f32.mrf.mxu0  ;;  %v3177_v51 = vsel %vm1176_vm0, %v3174_v61, %v3176_v42 }
 0x2f5   : > { %v3561_v25 = vrot.slane %v3401_v15, 4  ;;  %v3275_v33 = vadd.f32 %v3177_v51, %v8261_v50  ;;  %v3015_v47 = vpop.f32.mrf.mxu1  ;;  %6682 = vmatmul.mubr.msk.bf16.gmra.mxu1 %vm1112_vm2, %v7139_v22  ;;  %v6884_v50 = vcvt.f32.s32 %v6883_v34  ;;  %v6886_v35 = vcvt.f32.s32 %v6885_v9 }
 0x2f6   : > { %9702 = vst [vmem:[#allocation43_spill] sm:$0xff] %v8604_v58  ;;  %v6586_v28 = vpop.f32.mrf.mxu0  ;;  %v3178_v38 = vrot.slane %v3015_v47, 4  ;;  %6685 = vmatprep.mubr.msk.bf16.mxu1 %vm6975_vm1, %v9637_v39  ;;  %v4569_v0 = vmul.f32 0.055555556, %v4534_v21 }
 0x2f7   : > { %v3562_v46 = vsel %vm1176_vm0, %v3559_v1, %v3561_v25  ;;  %v6499_v18 = vpop.f32.mrf.mxu1  ;;  %v9704_v1 = vld [vmem:[#allocation5_spill] sm:$0xff]  ;;  %v4637_v28 = vmul.u32 18, %v6884_v50 }
 0x2f8   : > { %v8614_v12 = vadd.f32 %v3562_v46, %v3275_v33  ;;  %v3406_v61 = vpop.f32.mrf.mxu0  ;;  %6772 = vmatmul.mubr.msk.bf16.gmra.mxu0 %vm1112_vm2, %v7186_v45  ;;  %v3179_v62 = vsel %vm1176_vm0, %v3176_v42, %v3178_v38  ;;  %v4500_v55 = vcvt.s32.f32 %v9704_v1  ;;  %v4638_v42 = vmul.u32 18, %v6886_v35 }
 0x2f9   : > { %v3563_v22 = vrot.slane %v3406_v61, 4  ;;  %6775 = vmatprep.mubr.msk.bf16.mxu0 %vm6975_vm1, %v9637_v39  ;;  %v3276_v27 = vadd.f32 %v3179_v62, %v8268_v49  ;;  %v3018_v15 = vpop.f32.mrf.mxu1  ;;  %v6887_v21 = vtrunc.f32 %v4569_v0 }
 0x2fa   : > { %9703 = vst [vmem:[#allocation44_spill] sm:$0xff] %v8614_v12  ;;  %v6589_v30 = vpop.f32.mrf.mxu0  ;;  %v3180_v51 = vrot.slane %v3018_v15, 4  ;;  %v4535_v46 = vadd.f32 0.5, %v4500_v55  ;;  %v9706_v12 = vld [vmem:[#allocation6_spill] sm:$0xff]  ;;  %v4673_v0 = vsub.s32 %v8583_v13, %v4638_v42 }
 0x2fb   : > { %v3564_v33 = vsel %vm1176_vm0, %v3561_v25, %v3563_v22  ;;  %v6500_v34 = vpop.f32.mrf.mxu1  ;;  %v4501_v58 = vcvt.s32.f32 %v9706_v12 }
 0x2fc   : > { %v8624_v47 = vadd.f32 %v3564_v33, %v3276_v27  ;;  %v3409_v9 = vpop.f32.mrf.mxu0  ;;  %v3181_v18 = vsel %vm1176_vm0, %v3178_v38, %v3180_v51  ;;  %v4570_v27 = vmul.f32 0.055555556, %v4535_v46  ;;  %v9708_v34 = vld [vmem:[#allocation9_spill] sm:$0xff]  ;;  %vm4708_vm7 = vcmp.lt.s32.totalorder %v4673_v0, 16 }
 0x2fd   : > { %v3565_v61 = vrot.slane %v3409_v9, 4  ;;  %v3277_v49 = vadd.f32 %v3181_v18, %v8279_v43  ;;  %v3023_v62 = vpop.f32.mrf.mxu1  ;;  %6686 = vmatmul.mubr.msk.bf16.gmra.mxu1 %vm1112_vm2, %v7186_v45  ;;  %v4672_v43 = vsub.s32 %v8574_v32, %v4637_v28  ;;  %v4536_v45 = vadd.f32 0.5, %v4501_v58 }
 0x2fe   : > { %9705 = vst [vmem:[#allocation45_spill] sm:$0xff] %v8624_v47  ;;  %v6590_v25 = vpop.f32.mrf.mxu0  ;;  %v3182_v15 = vrot.slane %v3023_v62, 4  ;;  %6689 = vmatprep.mubr.msk.bf16.mxu1 %vm6975_vm1, %v9637_v39  ;;  %v4502_v9 = vcvt.s32.f32 %v9708_v34  ;;  %v6889_v62 = vtrunc.f32 %v4570_v27 }
 0x2ff   : > { %v3566_v30 = vsel %vm1176_vm0, %v3563_v22, %v3565_v61  ;;  %v6503_v38 = vpop.f32.mrf.mxu1  ;;  %v6888_v22 = vcvt.f32.s32 %v6887_v21  ;;  %v4571_v25 = vmul.f32 0.055555556, %v4536_v45  ;;  %vm4707_vm6 = vcmp.lt.s32.totalorder %v4672_v43, 16 }
 0x300   : > { %v8634_v50 = vadd.f32 %v3566_v30, %v3277_v49  ;;  %v3414_v35 = vpop.f32.mrf.mxu0  ;;  %6776 = vmatmul.mubr.msk.bf16.gmra.mxu0 %vm1112_vm2, %v7225_v54  ;;  %v3183_v55 = vsel %vm1176_vm0, %v3180_v51, %v3182_v15  ;;  %v4537_v13 = vadd.f32 0.5, %v4502_v9  ;;  %v8655_v9 = vsel %vm701_vm3, 1.0, %v9637_v39 }
 0x301   : > { %v3567_v33 = vrot.slane %v3414_v35, 4  ;;  %6779 = vmatprep.mubr.msk.bf16.mxu0 %vm6975_vm1, %v9637_v39  ;;  %v3278_v46 = vadd.f32 %v3183_v55, %v8286_v36  ;;  %v3026_v18 = vpop.f32.mrf.mxu1  ;;  %v6891_v42 = vtrunc.f32 %v4571_v25  ;;  %v4639_v35 = vmul.u32 18, %v6888_v22 }
 0x302   : > { %9707 = vst [vmem:[#allocation46_spill] sm:$0xff] %v8634_v50  ;;  %v6593_v49 = vpop.f32.mrf.mxu0  ;;  %v3184_v30 = vrot.slane %v3026_v18, 4  ;;  %v4572_v36 = vmul.f32 0.055555556, %v4537_v13  ;;  %v9711_v18 = vld [vmem:[#allocation13_spill] sm:$0xff]  ;;  %v9601_v43 = vrot.slane %v8655_v9, 3 }
 0x303   : > { %v3568_v32 = vsel %vm1176_vm0, %v3565_v61, %v3567_v33  ;;  %v6504_v51 = vpop.f32.mrf.mxu1  ;;  %v4503_v49 = vcvt.s32.f32 %v9711_v18 }
 0x304   : > { %v8646_v58 = vadd.f32 %v3568_v32, %v3278_v46  ;;  %v3417_v28 = vpop.f32.mrf.mxu0  ;;  %v3185_v21 = vsel %vm1176_vm0, %v3182_v15, %v3184_v30  ;;  %v6890_v46 = vcvt.f32.s32 %v6889_v62  ;;  %v6893_v22 = vtrunc.f32 %v4572_v36 }
 0x305   : > { %v3569_v38 = vrot.slane %v3417_v28, 4  ;;  %v3279_v55 = vadd.f32 %v3185_v21, %v8297_v19  ;;  %v3031_v27 = vpop.f32.mrf.mxu1  ;;  %6690 = vmatmul.mubr.msk.bf16.gmra.mxu1 %vm1112_vm2, %v7225_v54  ;;  %v6892_v19 = vcvt.f32.s32 %v6891_v42  ;;  %v5798_v62 = vsel %vm4707_vm6, 1.0, %v9637_v39 }
 0x306   : > { %9709 = vst [vmem:[#allocation47_spill] sm:$0xff] %v8646_v58  ;;  %v6594_v61 = vpop.f32.mrf.mxu0  ;;  %v3186_v25 = vrot.slane %v3031_v27, 4  ;;  %6693 = vmatprep.mubr.msk.bf16.mxu1 %vm6975_vm1, %v9637_v39  ;;  %v8669_v51 = vsel %vm4708_vm7, 1.0, %v9637_v39  ;;  %v4674_v42 = vsub.s32 %v8601_v2, %v4639_v35  ;;  %v6894_v36 = vcvt.f32.s32 %v6893_v22 }
 0x307   : > { %v3570_v15 = vsel %vm1176_vm0, %v3567_v33, %v3569_v38  ;;  %v6507_v54 = vpop.f32.mrf.mxu1  ;;  %v4538_v33 = vadd.f32 0.5, %v4503_v49  ;;  %v4640_v45 = vmul.u32 18, %v6890_v46  ;;  %v4851_v2 = vrot.slane %v5798_v62, 3 }
 0x308   : > { %v8661_v32 = vadd.f32 %v3570_v15, %v3279_v55  ;;  %v3422_v13 = vpop.f32.mrf.mxu0  ;;  %6780 = vmatmul.mubr.msk.bf16.gmra.mxu0 %vm1112_vm2, %v7272_v59  ;;  %v3187_v28 = vsel %vm1176_vm0, %v3184_v30, %v3186_v25  ;;  %v4641_v54 = vmul.u32 18, %v6892_v19  ;;  %v9713_v30 = vld [vmem:[#allocation16_spill] sm:$0xff]  ;;  %v9602_v35 = vrot.slane %v8669_v51, 3 }
 0x309   : > { %v3571_v21 = vrot.slane %v3422_v13, 4  ;;  %6783 = vmatprep.mubr.msk.bf16.mxu0 %vm6975_vm1, %v9637_v39  ;;  %v3280_v55 = vadd.f32 %v3187_v28, %v8304_v40  ;;  %v3034_v27 = vpop.f32.mrf.mxu1  ;;  %v4573_v0 = vmul.f32 0.055555556, %v4538_v33  ;;  %v4504_v13 = vcvt.s32.f32 %v9713_v30 }
 0x30a   : > { %9712 = vst [vmem:[#allocation18_spill] sm:$0xff] %v8661_v32  ;;  %v6597_v61 = vpop.f32.mrf.mxu0  ;;  %v3188_v15 = vrot.slane %v3034_v27, 4  ;;  %vm4709_vm3 = vcmp.lt.s32.totalorder %v4674_v42, 16  ;;  %v4642_v46 = vmul.u32 18, %v6894_v36  ;;  %v4675_v19 = vsub.s32 %v9704_v1, %v4640_v45 }
 0x30b   : > { %v3572_v49 = vsel %vm1176_vm0, %v3569_v38, %v3571_v21  ;;  %v6508_v58 = vpop.f32.mrf.mxu1  ;;  %v6895_v40 = vtrunc.f32 %v4573_v0  ;;  %v8704_v1 = vsel %vm2769_vm5, %v4851_v2, %v9602_v35 }
 0x30c   : > { %v8679_v32 = vadd.f32 %v3572_v49, %v3280_v55  ;;  %v3425_v50 = vpop.f32.mrf.mxu0  ;;  %v3189_v22 = vsel %vm1176_vm0, %v3186_v25, %v3188_v15  ;;  %v4539_v55 = vadd.f32 0.5, %v4504_v13  ;;  %v9715_v25 = vld [vmem:[#allocation17_spill] sm:$0xff]  ;;  %vm4710_vm8 = vcmp.lt.s32.totalorder %v4675_v19, 16 }
 0x30d   : > { %v3573_v28 = vrot.slane %v3425_v50, 4  ;;  %v3281_v33 = vadd.f32 %v3189_v22, %v8315_v10  ;;  %v3039_v27 = vpop.f32.mrf.mxu1  ;;  %6694 = vmatmul.mubr.msk.bf16.gmra.mxu1 %vm1112_vm2, %v7272_v59  ;;  %v6896_v58 = vcvt.f32.s32 %v6895_v40  ;;  %v4676_v50 = vsub.s32 %v9706_v12, %v4641_v54 }
 0x30e   : > { %9714 = vst [vmem:[#allocation23_spill] sm:$0xff] %v8679_v32  ;;  %v6598_v38 = vpop.f32.mrf.mxu0  ;;  %v3190_v62 = vrot.slane %v3039_v27, 4  ;;  %6697 = vmatprep.mubr.msk.bf16.mxu1 %vm6975_vm1, %v9637_v39  ;;  %v4505_v36 = vcvt.s32.f32 %v9715_v25  ;;  %v8699_v59 = vsel %vm2769_vm5, %v9601_v43, %v4851_v2  ;;  %v4677_v54 = vsub.s32 %v9708_v34, %v4642_v46 }
 0x30f   : > { %v3574_v61 = vsel %vm1176_vm0, %v3571_v21, %v3573_v28  ;;  %v6511_v0 = vpop.f32.mrf.mxu1  ;;  %v4643_v12 = vmul.u32 18, %v6896_v58  ;;  %v4574_v13 = vmul.f32 0.055555556, %v4539_v55  ;;  %v8713_v27 = vsel %vm4709_vm3, 1.0, %v9637_v39  ;;  %v9717_v38 = vld [vmem:[#allocation21_spill] sm:$0xff] }
 0x310   : > { %v8692_v10 = vadd.f32 %v3574_v61, %v3281_v33  ;;  %v3430_v49 = vpop.f32.mrf.mxu0  ;;  %6784 = vmatmul.mubr.msk.bf16.gmra.mxu0 %vm1112_vm2, %v7322_v26  ;;  %v3191_v21 = vsel %vm1176_vm0, %v3188_v15, %v3190_v62  ;;  %v4540_v2 = vadd.f32 0.5, %v4505_v36  ;;  %v4506_v58 = vcvt.s32.f32 %v9717_v38 }
 0x311   : > { %v3575_v45 = vrot.slane %v3430_v49, 4  ;;  %6787 = vmatprep.mubr.msk.bf16.mxu0 %vm6975_vm1, %v9637_v39  ;;  %v3282_v40 = vadd.f32 %v3191_v21, %v8322_v20  ;;  %v3042_v22 = vpop.f32.mrf.mxu1  ;;  %vm4711_vm9 = vcmp.lt.s32.totalorder %v4676_v50, 16  ;;  %v4678_v20 = vsub.s32 %v9711_v18, %v4643_v12  ;;  %v9719_v12 = vld [vmem:[#allocation22_spill] sm:$0xff] }
 0x312   : > { %9716 = vst [vmem:[#allocation28_spill] sm:$0xff] %v8692_v10  ;;  %v6601_v33 = vpop.f32.mrf.mxu0  ;;  %v3192_v61 = vrot.slane %v3042_v22, 4  ;;  %v4575_v55 = vmul.f32 0.055555556, %v4540_v2  ;;  %v4541_v49 = vadd.f32 0.5, %v4506_v58  ;;  %vm4712_vm10 = vcmp.lt.s32.totalorder %v4677_v54, 16 }
 0x313   : > { %v3576_v15 = vsel %vm1176_vm0, %v3573_v28, %v3575_v45  ;;  %v6512_v34 = vpop.f32.mrf.mxu1  ;;  %v6897_v36 = vtrunc.f32 %v4574_v13  ;;  %vm4713_vm11 = vcmp.lt.s32.totalorder %v4678_v20, 16 }
 0x314   : > { %v8717_v0 = vadd.f32 %v3576_v15, %v3282_v40  ;;  %v3433_v46 = vpop.f32.mrf.mxu0  ;;  %v3193_v42 = vsel %vm1176_vm0, %v3190_v62, %v3192_v61  ;;  %v4855_v40 = vrot.slane %v8713_v27, 3  ;;  %v6899_v15 = vtrunc.f32 %v4575_v55 }
 0x315   : > { %v3577_v21 = vrot.slane %v3433_v46, 4  ;;  %v3283_v33 = vadd.f32 %v3193_v42, %v8333_v56  ;;  %v3047_v22 = vpop.f32.mrf.mxu1  ;;  %6698 = vmatmul.mubr.msk.bf16.gmra.mxu1 %vm1112_vm2, %v7322_v26  ;;  %v4576_v34 = vmul.f32 0.055555556, %v4541_v49  ;;  %v5801_v62 = vsel %vm4710_vm8, 1.0, %v9637_v39 }
 0x316   : > { %9718 = vst [vmem:[#allocation48_spill] sm:$0xff] %v8717_v0  ;;  %v6602_v28 = vpop.f32.mrf.mxu0  ;;  %v3194_v43 = vrot.slane %v3047_v22, 4  ;;  %6701 = vmatprep.mubr.msk.bf16.mxu1 %vm6975_vm1, %v9637_v39  ;;  %v4507_v56 = vcvt.s32.f32 %v9719_v12  ;;  %v5802_v27 = vsel %vm4711_vm9, 1.0, %v9637_v39  ;;  %v6898_v46 = vcvt.f32.s32 %v6897_v36 }
 0x317   : > { %v3578_v18 = vsel %vm1176_vm0, %v3575_v45, %v3577_v21  ;;  %v6515_v2 = vpop.f32.mrf.mxu1  ;;  %v8739_v45 = vsel %vm4712_vm10, 1.0, %v9637_v39  ;;  %v6900_v22 = vcvt.f32.s32 %v6899_v15  ;;  %v6901_v50 = vtrunc.f32 %v4576_v34  ;;  %v9721_v28 = vld [vmem:[#allocation26_spill] sm:$0xff] }
 0x318   : > { %v8731_v13 = vadd.f32 %v3578_v18, %v3283_v33  ;;  %v3438_v26 = vpop.f32.mrf.mxu0  ;;  %6788 = vmatmul.mubr.msk.bf16.gmra.mxu0 %vm1112_vm2, %v7369_v41  ;;  %v3195_v19 = vsel %vm1176_vm0, %v3192_v61, %v3194_v43  ;;  %v4542_v55 = vadd.f32 0.5, %v4507_v56  ;;  %v4508_v18 = vcvt.s32.f32 %v9721_v28 }
 0x319   : > { %v3579_v58 = vrot.slane %v3438_v26, 4  ;;  %6791 = vmatprep.mubr.msk.bf16.mxu0 %vm6975_vm1, %v9637_v39  ;;  %v3284_v49 = vadd.f32 %v3195_v19, %v8340_v8  ;;  %v3050_v42 = vpop.f32.mrf.mxu1  ;;  %v4857_v35 = vrot.slane %v5801_v62, 3  ;;  %v4859_v10 = vrot.slane %v5802_v27, 3 }
 0x31a   : > { %9720 = vst [vmem:[#allocation2_spill] sm:$0xff] %v8731_v13  ;;  %v6605_v33 = vpop.f32.mrf.mxu0  ;;  %v3196_v54 = vrot.slane %v3050_v42, 4  ;;  %v4577_v13 = vmul.f32 0.055555556, %v4542_v55  ;;  %v4861_v36 = vrot.slane %v8739_v45, 3  ;;  %v8752_v8 = vsel %vm4713_vm11, 1.0, %v9637_v39 }
 0x31b   : > { %v3580_v2 = vsel %vm1176_vm0, %v3577_v21, %v3579_v58  ;;  %v6516_v26 = vpop.f32.mrf.mxu1  ;;  %v4644_v56 = vmul.u32 18, %v6898_v46  ;;  %v6902_v27 = vcvt.f32.s32 %v6901_v50  ;;  %v4543_v42 = vadd.f32 0.5, %v4508_v18 }
 0x31c   : > { %v8747_v61 = vadd.f32 %v3580_v2, %v3284_v49  ;;  %v3441_v0 = vpop.f32.mrf.mxu0  ;;  %v3197_v15 = vsel %vm1176_vm0, %v3194_v43, %v3196_v54  ;;  %v6903_v19 = vtrunc.f32 %v4577_v13  ;;  %v4645_v49 = vmul.u32 18, %v6900_v22 }
 0x31d   : > { %v3581_v34 = vrot.slane %v3441_v0, 4  ;;  %v3285_v21 = vadd.f32 %v3197_v15, %v8351_v11  ;;  %v3055_v62 = vpop.f32.mrf.mxu1  ;;  %6702 = vmatmul.mubr.msk.bf16.gmra.mxu1 %vm1112_vm2, %v7369_v41  ;;  %v9723_v43 = vrot.slane %v8669_v51, 3  ;;  %v8767_v11 = vsel %vm2769_vm5, %v4855_v40, %v4857_v35 }
 0x31e   : > { %9722 = vst [vmem:[#allocation5_spill] sm:$0xff] %v8747_v61  ;;  %v6606_v55 = vpop.f32.mrf.mxu0  ;;  %v3198_v45 = vrot.slane %v3055_v62, 4  ;;  %6705 = vmatprep.mubr.msk.bf16.mxu1 %vm6975_vm1, %v9637_v39  ;;  %v9603_v33 = vrot.slane %v8752_v8, 3  ;;  %v6904_v22 = vcvt.f32.s32 %v6903_v19  ;;  %v4578_v18 = vmul.f32 0.055555556, %v4543_v42  ;;  %v9727_v42 = vld [vmem:[#allocation31_spill] sm:$0xff] }
 0x31f   : > { %v3582_v20 = vsel %vm1176_vm0, %v3579_v58, %v3581_v34  ;;  %v8764_v0 = vsel %vm2769_vm5, %v9723_v43, %v4855_v40  ;;  %v6519_v41 = vpop.f32.mrf.mxu1  ;;  %v8774_v58 = vsel %vm2769_vm5, %v4857_v35, %v4859_v10  ;;  %v4679_v40 = vsub.s32 %v9713_v30, %v4644_v56 }
 0x320   : > { %v8769_v13 = vadd.f32 %v3582_v20, %v3285_v21  ;;  %v3446_v46 = vpop.f32.mrf.mxu0  ;;  %6792 = vmatmul.mubr.msk.bf16.gmra.mxu0 %vm1112_vm2, %v7411_v44  ;;  %v3199_v51 = vsel %vm1176_vm0, %v3196_v54, %v3198_v45  ;;  %v8783_v21 = vsel %vm2769_vm5, %v4859_v10, %v4861_v36  ;;  %v4680_v35 = vsub.s32 %v9715_v25, %v4645_v49  ;;  %v9725_v20 = vld [vmem:[#allocation27_spill] sm:$0xff] }
 0x321   : > { %v3583_v50 = vrot.slane %v3446_v46, 4  ;;  %6795 = vmatprep.mubr.msk.bf16.mxu0 %vm6975_vm1, %v9637_v39  ;;  %v3286_v2 = vadd.f32 %v3199_v51, %v8358_v63  ;;  %v3058_v26 = vpop.f32.mrf.mxu1  ;;  %v4646_v62 = vmul.u32 18, %v6902_v27  ;;  %v6905_v55 = vtrunc.f32 %v4578_v18  ;;  %v9728_v27 = vld [vmem:[#allocation11_spill] sm:$0xff] }
 0x322   : > { %9724 = vst [vmem:[#allocation6_spill] sm:$0xff] %v8769_v13  ;;  %v6609_v15 = vpop.f32.mrf.mxu0  ;;  %v3200_v19 = vrot.slane %v3058_v26, 4  ;;  %v4509_v43 = vcvt.s32.f32 %v9725_v20  ;;  %v8793_v63 = vsel %vm2769_vm5, %v4861_v36, %v9603_v33  ;;  %v4647_v10 = vmul.u32 18, %v6904_v22 }
 0x323   : > { %v3584_v54 = vsel %vm1176_vm0, %v3581_v34, %v3583_v50  ;;  %v6520_v30 = vpop.f32.mrf.mxu1  ;;  %v4510_v46 = vcvt.s32.f32 %v9727_v42  ;;  %vm4714_vm12 = vcmp.lt.s32.totalorder %v4679_v40, 16  ;;  %vm4715_vm13 = vcmp.lt.s32.totalorder %v4680_v35, 16  ;;  %v9729_v15 = vld [vmem:[#allocation32_spill] sm:$0xff] }
 0x324   : > { %v8788_v41 = vadd.f32 %v3584_v54, %v3286_v2  ;;  %v3449_v56 = vpop.f32.mrf.mxu0  ;;  %v3201_v25 = vsel %vm1176_vm0, %v3198_v45, %v3200_v19  ;;  %v4544_v34 = vadd.f32 0.5, %v4509_v43  ;;  %v4511_v36 = vcvt.s32.f32 %v9729_v15 }
 0x325   : > { %v3585_v49 = vrot.slane %v3449_v56, 4  ;;  %v3287_v51 = vadd.f32 %v3201_v25, %v9728_v27  ;;  %v3063_v18 = vpop.f32.mrf.mxu1  ;;  %6706 = vmatmul.mubr.msk.bf16.gmra.mxu1 %vm1112_vm2, %v7411_v44  ;;  %v4545_v26 = vadd.f32 0.5, %v4510_v46  ;;  %v4681_v45 = vsub.s32 %v9717_v38, %v4646_v62  ;;  %v9731_v27 = vld [vmem:[#allocation41_spill] sm:$0xff] }
 0x326   : > { %9726 = vst [vmem:[#allocation9_spill] sm:$0xff] %v8788_v41  ;;  %v6610_v2 = vpop.f32.mrf.mxu0  ;;  %v3202_v54 = vrot.slane %v3063_v18, 4  ;;  %6709 = vmatprep.mubr.msk.bf16.mxu1 %vm6975_vm1, %v9637_v39  ;;  %v6906_v43 = vcvt.f32.s32 %v6905_v55  ;;  %v4682_v44 = vsub.s32 %v9719_v12, %v4647_v10  ;;  %v4579_v46 = vmul.f32 0.055555556, %v4544_v34  ;;  %v9732_v55 = vld [vmem:[#allocation50_spill] sm:$0xff] }
 0x327   : > { %v3586_v22 = vsel %vm1176_vm0, %v3583_v50, %v3585_v49  ;;  %v6523_v56 = vpop.f32.mrf.mxu1  ;;  %v4580_v2 = vmul.f32 0.055555556, %v4545_v26  ;;  %v5805_v38 = vsel %vm4714_vm12, 1.0, %v9637_v39  ;;  %v4546_v62 = vadd.f32 0.5, %v4511_v36 }
 0x328   : > { %v8805_v30 = vadd.f32 %v3586_v22, %v3287_v51  ;;  %v3454_v25 = vpop.f32.mrf.mxu0  ;;  %6796 = vmatmul.mubr.msk.bf16.gmra.mxu0 %vm1112_vm2, %v9731_v27  ;;  %v3203_v18 = vsel %vm1176_vm0, %v3200_v19, %v3202_v54  ;;  %v8818_v33 = vsel %vm4715_vm13, 1.0, %v9637_v39  ;;  %v6907_v12 = vtrunc.f32 %v4579_v46  ;;  %v9734_v46 = vld [vmem:[#allocation49_spill] sm:$0xff] }
 0x329   : > { %v3587_v50 = vrot.slane %v3454_v25, 4  ;;  %6799 = vmatprep.mubr.msk.bf16.mxu0 %vm6975_vm1, %v9637_v39  ;;  %v3288_v51 = vadd.f32 %v3203_v18, %v9732_v55  ;;  %v3066_v22 = vpop.f32.mrf.mxu1  ;;  %v6909_v10 = vtrunc.f32 %v4580_v2  ;;  %vm4716_vm14 = vcmp.lt.s32.totalorder %v4681_v45, 16 }
 0x32a   : > { %9730 = vst [vmem:[#allocation10_spill] sm:$0xff] %v8805_v30  ;;  %v6613_v56 = vpop.f32.mrf.mxu0  ;;  %v3204_v34 = vrot.slane %v3066_v22, 4  ;;  %v4648_v26 = vmul.u32 18, %v6906_v43  ;;  %vm4717_vm15 = vcmp.lt.s32.totalorder %v4682_v44, 16  ;;  %v6908_v36 = vcvt.f32.s32 %v6907_v12 }
 0x32b   : > { %v3588_v19 = vsel %vm1176_vm0, %v3585_v49, %v3587_v50  ;;  %v6524_v40 = vpop.f32.mrf.mxu1  ;;  %v4581_v18 = vmul.f32 0.055555556, %v4546_v62  ;;  %v4865_v35 = vrot.slane %v5805_v38, 3  ;;  %v4867_v41 = vrot.slane %v8818_v33, 3 }
 0x32c   : > { %v8821_v25 = vadd.f32 %v3588_v19, %v3288_v51  ;;  %v3457_v30 = vpop.f32.mrf.mxu0  ;;  %v3205_v55 = vsel %vm1176_vm0, %v3202_v54, %v3204_v34  ;;  %v5807_v43 = vsel %vm4716_vm14, 1.0, %v9637_v39  ;;  %v6910_v51 = vcvt.f32.s32 %v6909_v10  ;;  %v9735_v19 = vld [vmem:[#allocation35_spill] sm:$0xff]  ;;  %v9737_v40 = vld [vmem:[#allocation42_spill] sm:$0xff] }
 0x32d   : > { %v3589_v56 = vrot.slane %v3457_v30, 4  ;;  %v3289_v2 = vadd.f32 %v3205_v55, %v9734_v46  ;;  %v3071_v22 = vpop.f32.mrf.mxu1  ;;  %6710 = vmatmul.mubr.msk.bf16.gmra.mxu1 %vm1112_vm2, %v9731_v27  ;;  %v4512_v12 = vcvt.s32.f32 %v9735_v19  ;;  %v8836_v33 = vsel %vm4717_vm15, 1.0, %v9637_v39 }
 0x32e   : > { %9733 = vst [vmem:[#allocation13_spill] sm:$0xff] %v8821_v25  ;;  %v6614_v49 = vpop.f32.mrf.mxu0  ;;  %v3206_v62 = vrot.slane %v3071_v22, 4  ;;  %6713 = vmatprep.mubr.msk.bf16.mxu1 %vm6975_vm1, %v9637_v39  ;;  %v4683_v30 = vsub.s32 %v9721_v28, %v4648_v26  ;;  %v4649_v10 = vmul.u32 18, %v6908_v36  ;;  %v6911_v55 = vtrunc.f32 %v4581_v18  ;;  %v9739_v28 = vld [vmem:[#allocation12_spill] sm:$0xff] }
 0x32f   : > { %v3590_v54 = vsel %vm1176_vm0, %v3587_v50, %v3589_v56  ;;  %v6527_v38 = vpop.f32.mrf.mxu1  ;;  %v4547_v46 = vadd.f32 0.5, %v4512_v12  ;;  %v4869_v44 = vrot.slane %v5807_v43, 3  ;;  %v9738_v49 = vld [vmem:[#allocation36_spill] sm:$0xff]  ;;  %v8856_v43 = vsel %vm2769_vm5, %v4865_v35, %v4867_v41 }
 0x330   : > { %v8839_v27 = vadd.f32 %v3590_v54, %v3289_v2  ;;  %v3462_v45 = vpop.f32.mrf.mxu0  ;;  %6800 = vmatmul.mubr.msk.bf16.gmra.mxu0 %vm1112_vm2, %v9737_v40  ;;  %v3207_v50 = vsel %vm1176_vm0, %v3204_v34, %v3206_v62  ;;  %v4513_v25 = vcvt.s32.f32 %v9738_v49  ;;  %v9740_v34 = vrot.slane %v8752_v8, 3  ;;  %v9742_v8 = vld [vmem:[#allocation51_spill] sm:$0xff] }
 0x331   : > { %v3591_v22 = vrot.slane %v3462_v45, 4  ;;  %6803 = vmatprep.mubr.msk.bf16.mxu0 %vm6975_vm1, %v9637_v39  ;;  %v3290_v26 = vadd.f32 %v3207_v50, %v9739_v28  ;;  %v3074_v2 = vpop.f32.mrf.mxu1  ;;  %v4582_v13 = vmul.f32 0.055555556, %v4547_v46  ;;  %vm4718_vm4 = vcmp.lt.s32.totalorder %v4683_v30, 16  ;;  %v9749_v30 = vld [vmem:[#allocation52_spill] sm:$0xff] }
 0x332   : > { %9736 = vst [vmem:[#allocation16_spill] sm:$0xff] %v8839_v27  ;;  %v6617_v54 = vpop.f32.mrf.mxu0  ;;  %v4650_v27 = vmul.u32 18, %v6910_v51  ;;  %v3208_v36 = vrot.slane %v3074_v2, 4  ;;  %v8853_v12 = vsel %vm2769_vm5, %v9740_v34, %v4865_v35  ;;  %v6912_v51 = vcvt.f32.s32 %v6911_v55 }
 0x333   : > { %v3592_v18 = vsel %vm1176_vm0, %v3589_v56, %v3591_v22  ;;  %v6528_v50 = vpop.f32.mrf.mxu1  ;;  %v4684_v54 = vsub.s32 %v9725_v20, %v4649_v10  ;;  %v6913_v56 = vtrunc.f32 %v4582_v13  ;;  %v4548_v38 = vadd.f32 0.5, %v4513_v25 }
 0x334   : > { %v8858_v45 = vadd.f32 %v3592_v18, %v3290_v26  ;;  %v3465_v28 = vpop.f32.mrf.mxu0  ;;  %v3209_v46 = vsel %vm1176_vm0, %v3206_v62, %v3208_v36  ;;  %v8866_v26 = vsel %vm2769_vm5, %v4867_v41, %v4869_v44  ;;  %v9744_v18 = vrot.slane %v8836_v33, 3 }
 0x335   : > { %v3593_v2 = vrot.slane %v3465_v28, 4  ;;  %v3291_v61 = vadd.f32 %v3209_v46, %v9742_v8  ;;  %v3079_v34 = vpop.f32.mrf.mxu1  ;;  %6714 = vmatmul.mubr.msk.bf16.gmra.mxu1 %vm1112_vm2, %v9737_v40  ;;  %9743 = vst [vmem:[#allocation21_spill] sm:$0xff] %v8866_v26  ;;  %v4685_v62 = vsub.s32 %v9727_v42, %v4650_v27  ;;  %v8879_v25 = vsel %vm4718_vm4, 1.0, %v9637_v39  ;;  %v9747_v42 = vld [vmem:[#allocation37_spill] sm:$0xff]  ;;  %v9748_v8 = vld [vmem:[#allocation38_spill] sm:$0xff] }
 0x336   : > { %9741 = vst [vmem:[#allocation17_spill] sm:$0xff] %v8858_v45  ;;  %v6618_v35 = vpop.f32.mrf.mxu0  ;;  %v8871_v20 = vsel %vm2769_vm5, %v4869_v44, %v9744_v18  ;;  %v3210_v10 = vrot.slane %v3079_v34, 4  ;;  %6717 = vmatprep.mubr.msk.bf16.mxu1 %vm6975_vm1, %v9637_v39  ;;  %v6914_v40 = vcvt.f32.s32 %v6913_v56  ;;  %v4651_v44 = vmul.u32 18, %v6912_v51 }
 0x337   : > { %9745 = vst [vmem:[#allocation22_spill] sm:$0xff] %v8871_v20  ;;  %v3594_v13 = vsel %vm1176_vm0, %v3591_v22, %v3593_v2  ;;  %v6531_v55 = vpop.f32.mrf.mxu1  ;;  %v4583_v28 = vmul.f32 0.055555556, %v4548_v38  ;;  %v4514_v27 = vcvt.s32.f32 %v9747_v42  ;;  %vm4719_vm6 = vcmp.lt.s32.totalorder %v4684_v54, 16  ;;  %v9751_v20 = vld [vmem:[#allocation39_spill] sm:$0xff] }
 0x338   : > { %v8881_v41 = vadd.f32 %v3594_v13, %v3291_v61  ;;  %v3470_v50 = vpop.f32.mrf.mxu0  ;;  %6804 = vmatmul.mubr.bf16.gmra.mxu0 %v9664_v14  ;;  %v3211_v22 = vsel %vm1176_vm0, %v3208_v36, %v3210_v10  ;;  %v4515_v34 = vcvt.s32.f32 %v9748_v8  ;;  %vm4720_vm1 = vcmp.lt.s32.totalorder %v4685_v62, 16 }
 0x339   : > { %v3595_v46 = vrot.slane %v3470_v50, 4  ;;  %v3292_v35 = vadd.f32 %v3211_v22, %v9749_v30  ;;  %v3082_v18 = vpop.f32.mrf.mxu1  ;;  %v6915_v61 = vtrunc.f32 %v4583_v28  ;;  %v4549_v13 = vadd.f32 0.5, %v4514_v27  ;;  %v9752_v27 = vld [vmem:[#allocation53_spill] sm:$0xff] }
 0x33a   : > { %9746 = vst [vmem:[#allocation26_spill] sm:$0xff] %v8881_v41  ;;  %v6621_v56 = vpop.f32.mrf.mxu0  ;;  %v3212_v55 = vrot.slane %v3082_v18, 4  ;;  %v4652_v51 = vmul.u32 18, %v6914_v40  ;;  %v4550_v38 = vadd.f32 0.5, %v4515_v34  ;;  %v4516_v26 = vcvt.s32.f32 %v9751_v20 }
 0x33b   : > { %v3596_v41 = vsel %vm1176_vm0, %v3593_v2, %v3595_v46  ;;  %v6532_v32 = vpop.f32.mrf.mxu1  ;;  %v6916_v50 = vcvt.f32.s32 %v6915_v61  ;;  %v4584_v47 = vmul.f32 0.055555556, %v4549_v13  ;;  %v4686_v56 = vsub.s32 %v9729_v15, %v4651_v44 }
 0x33c   : > { %v8889_v45 = vadd.f32 %v3596_v41, %v3292_v35  ;;  %v3473_v36 = vpop.f32.mrf.mxu0  ;;  %v3213_v22 = vsel %vm1176_vm0, %v3210_v10, %v3212_v55  ;;  %v4585_v28 = vmul.f32 0.055555556, %v4550_v38  ;;  %v5810_v32 = vsel %vm4719_vm6, 1.0, %v9637_v39 }
 0x33d   : > { %v3597_v30 = vrot.slane %v3473_v36, 4  ;;  %v3293_v18 = vadd.f32 %v3213_v22, %v9752_v27  ;;  %v3087_v24 = vpop.f32.mrf.mxu1  ;;  %6718 = vmatmul.mubr.bf16.gmra.mxu1 %v9664_v14  ;;  %v4653_v40 = vmul.u32 18, %v6916_v50  ;;  %v6917_v41 = vtrunc.f32 %v4584_v47 }
 0x33e   : > { %9750 = vst [vmem:[#allocation27_spill] sm:$0xff] %v8889_v45  ;;  %v6622_v2 = vpop.f32.mrf.mxu0  ;;  %v3214_v34 = vrot.slane %v3087_v24, 4  ;;  %v8901_v10 = vsel %vm4720_vm1, 1.0, %v9637_v39  ;;  %v4687_v15 = vsub.s32 %v9735_v19, %v4652_v51  ;;  %v4551_v54 = vadd.f32 0.5, %v4516_v26 }
 0x33f   : > { %v3598_v35 = vsel %vm1176_vm0, %v3595_v46, %v3597_v30  ;;  %v6535_v61 = vpop.f32.mrf.mxu1  ;;  %v4688_v14 = vsub.s32 %v9738_v49, %v4653_v40  ;;  %v6918_v38 = vcvt.f32.s32 %v6917_v41  ;;  %vm4721_vm7 = vcmp.lt.s32.totalorder %v4686_v56, 16  ;;  %v9755_v40 = vld [vmem:[#allocation40_spill] sm:$0xff] }
 0x340   : > { %v8904_v44 = vadd.f32 %v3598_v35, %v3293_v18  ;;  %v3478_v13 = vpop.f32.mrf.mxu0  ;;  %v3215_v36 = vsel %vm1176_vm0, %v3212_v55, %v3214_v34  ;;  %v6919_v24 = vtrunc.f32 %v4585_v28  ;;  %v4873_v22 = vrot.slane %v8879_v25, 3 }
 0x341   : > { %v3599_v47 = vrot.slane %v3478_v13, 4  ;;  %v3294_v46 = vadd.f32 %v3215_v36, %v8427_v16  ;;  %v3090_v62 = vpop.f32.mrf.mxu1  ;;  %v4875_v19 = vrot.slane %v5810_v32, 3  ;;  %v9604_v51 = vrot.slane %v8901_v10, 3 }
 0x342   : > { %9753 = vst [vmem:[#allocation31_spill] sm:$0xff] %v8904_v44  ;;  %v6625_v50 = vpop.f32.mrf.mxu0  ;;  %v3216_v27 = vrot.slane %v3090_v62, 4  ;;  %vm4722_vm3 = vcmp.lt.s32.totalorder %v4687_v15, 16  ;;  %v4654_v49 = vmul.u32 18, %v6918_v38  ;;  %v8915_v56 = vsel %vm4721_vm7, 1.0, %v9637_v39 }
 0x343   : > { %v3600_v18 = vsel %vm1176_vm0, %v3597_v30, %v3599_v47  ;;  %v6536_v55 = vpop.f32.mrf.mxu1  ;;  %vm4723_vm8 = vcmp.lt.s32.totalorder %v4688_v14, 16  ;;  %v4586_v16 = vmul.f32 0.055555556, %v4551_v54  ;;  %v6920_v32 = vcvt.f32.s32 %v6919_v24 }
 0x344   : > { %v8912_v26 = vadd.f32 %v3600_v18, %v3294_v46  ;;  %v3481_v2 = vpop.f32.mrf.mxu0  ;;  %v3217_v28 = vsel %vm1176_vm0, %v3214_v34, %v3216_v27  ;;  %v4517_v41 = vcvt.s32.f32 %v9755_v40  ;;  %v9756_v13 = vrot.slane %v8836_v33, 3 }
 0x345   : > { %v3601_v25 = vrot.slane %v3481_v2, 4  ;;  %v3295_v35 = vadd.f32 %v3217_v28, %v8437_v23  ;;  %v3095_v30 = vpop.f32.mrf.mxu1  ;;  %v8926_v36 = vsel %vm2769_vm5, %v4873_v22, %v4875_v19  ;;  %v8930_v14 = vsel %vm4722_vm3, 1.0, %v9637_v39 }
 0x346   : > { %9754 = vst [vmem:[#allocation11_spill] sm:$0xff] %v8912_v26  ;;  %v6626_v61 = vpop.f32.mrf.mxu0  ;;  %v8923_v38 = vsel %vm2769_vm5, %v9756_v13, %v4873_v22  ;;  %v3218_v34 = vrot.slane %v3095_v30, 4  ;;  %v8934_v24 = vsel %vm4723_vm8, 1.0, %v9637_v39  ;;  %v4689_v23 = vsub.s32 %v9747_v42, %v4654_v49  ;;  %v9763_v26 = vld [vmem:[#allocation8_spill] sm:$0xff] }
 0x347   : > { %v3602_v54 = vsel %vm1176_vm0, %v3599_v47, %v3601_v25  ;;  %v6539_v33 = vpop.f32.mrf.mxu1  ;;  %v8942_v50 = vsel %vm2769_vm5, %v4875_v19, %v9604_v51  ;;  %v6921_v22 = vtrunc.f32 %v4586_v16  ;;  %v4655_v55 = vmul.u32 18, %v6920_v32  ;;  %v9758_v61 = vld [vmem:[#allocation3_spill] sm:$0xff] }
 0x348   : > { %v8937_v46 = vadd.f32 %v3602_v54, %v3295_v35  ;;  %v3486_v62 = vpop.f32.mrf.mxu0  ;;  %v3219_v18 = vsel %vm1176_vm0, %v3216_v27, %v3218_v34  ;;  %v4552_v2 = vadd.f32 0.5, %v4517_v41  ;;  %v4518_v13 = vcvt.s32.f32 %v9758_v61 }
 0x349   : > { %v3603_v47 = vrot.slane %v3486_v62, 4  ;;  %v3296_v28 = vadd.f32 %v3219_v18, %v8444_v7  ;;  %v3098_v42 = vpop.f32.mrf.mxu1  ;;  %vm4724_vm9 = vcmp.lt.s32.totalorder %v4689_v23, 16  ;;  %v6922_v41 = vcvt.f32.s32 %v6921_v22  ;;  %v9760_v7 = vld [vmem:[#allocation4_spill] sm:$0xff] }
 0x34a   : > { %9757 = vst [vmem:[#allocation32_spill] sm:$0xff] %v8937_v46  ;;  %v6629_v49 = vpop.f32.mrf.mxu0  ;;  %v3220_v19 = vrot.slane %v3098_v42, 4  ;;  %v4587_v16 = vmul.f32 0.055555556, %v4552_v2  ;;  %v4553_v62 = vadd.f32 0.5, %v4518_v13  ;;  %v4519_v18 = vcvt.s32.f32 %v9760_v7 }
 0x34b   : > { %v3604_v54 = vsel %vm1176_vm0, %v3601_v25, %v3603_v47  ;;  %v6540_v27 = vpop.f32.mrf.mxu1  ;;  %v4690_v30 = vsub.s32 %v9748_v8, %v4655_v55  ;;  %v8958_v23 = vsel %vm4724_vm9, 1.0, %v9637_v39  ;;  %v4656_v55 = vmul.u32 18, %v6922_v41 }
 0x34c   : > { %v8951_v33 = vadd.f32 %v3604_v54, %v3296_v28  ;;  %v3489_v32 = vpop.f32.mrf.mxu0  ;;  %v3221_v49 = vsel %vm1176_vm0, %v3218_v34, %v3220_v19  ;;  %v6923_v51 = vtrunc.f32 %v4587_v16  ;;  %v4588_v2 = vmul.f32 0.055555556, %v4553_v62  ;;  %v9761_v27 = vld [vmem:[#allocation7_spill] sm:$0xff] }
 0x34d   : > { %v3605_v35 = vrot.slane %v3489_v32, 4  ;;  %v3297_v42 = vadd.f32 %v3221_v49, %v8454_v48  ;;  %v3103_v15 = vpop.f32.mrf.mxu1  ;;  %v4554_v28 = vadd.f32 0.5, %v4519_v18  ;;  %vm4725_vm10 = vcmp.lt.s32.totalorder %v4690_v30, 16 }
 0x34e   : > { %9759 = vst [vmem:[#allocation41_spill] sm:$0xff] %v8951_v33  ;;  %v6630_v25 = vpop.f32.mrf.mxu0  ;;  %v3222_v54 = vrot.slane %v3103_v15, 4  ;;  %v6924_v13 = vcvt.f32.s32 %v6923_v51  ;;  %v4520_v33 = vcvt.s32.f32 %v9761_v27  ;;  %v6925_v16 = vtrunc.f32 %v4588_v2 }
 0x34f   : > { %v3606_v22 = vsel %vm1176_vm0, %v3603_v47, %v3605_v35  ;;  %v6543_v32 = vpop.f32.mrf.mxu1  ;;  %v4589_v48 = vmul.f32 0.055555556, %v4554_v28  ;;  %v4521_v44 = vcvt.s32.f32 %v9763_v26  ;;  %vm4309_vm7 = vcmask 1041408  }
 0x350   : > { %v8962_v34 = vadd.f32 %v3606_v22, %v3297_v42  ;;  %v3494_v8 = vpop.f32.mrf.mxu0  ;;  %v3223_v49 = vsel %vm1176_vm0, %v3220_v19, %v3222_v54  ;;  %v4555_v46 = vadd.f32 0.5, %v4520_v33  ;;  %v6926_v47 = vcvt.f32.s32 %v6925_v16 }
 0x351   : > { %v3607_v25 = vrot.slane %v3494_v8, 4  ;;  %v3298_v62 = vadd.f32 %v3223_v49, %v8463_v29  ;;  %v3106_v15 = vpop.f32.mrf.mxu1  ;;  %v6927_v51 = vtrunc.f32 %v4589_v48  ;;  %v4657_v32 = vmul.u32 18, %v6924_v13 }
 0x352   : > { %9762 = vst [vmem:[#allocation50_spill] sm:$0xff] %v8962_v34  ;;  %v6633_v18 = vpop.f32.mrf.mxu0  ;;  %v3224_v42 = vrot.slane %v3106_v15, 4  ;;  %v4590_v41 = vmul.f32 0.055555556, %v4555_v46  ;;  %v4691_v8 = vsub.s32 %v9751_v20, %v4656_v55  ;;  %v4658_v33 = vmul.u32 18, %v6926_v47 }
 0x353   : > { %v3608_v22 = vsel %vm1176_vm0, %v3605_v35, %v3607_v25  ;;  %v6544_v28 = vpop.f32.mrf.mxu1  ;;  %v4556_v34 = vadd.f32 0.5, %v4521_v44  ;;  %v6928_v16 = vcvt.f32.s32 %v6927_v51  ;;  %v9765_v35 = vrot.slane %v8915_v56, 3 }
 0x354   : > { %v8968_v2 = vadd.f32 %v3608_v22, %v3298_v62  ;;  %v3497_v19 = vpop.f32.mrf.mxu0  ;;  %v3225_v29 = vsel %vm1176_vm0, %v3222_v54, %v3224_v42  ;;  %v6929_v48 = vtrunc.f32 %v4590_v41  ;;  %v9766_v46 = vrot.slane %v8901_v10, 3  ;;  %v9770_v22 = vld [vmem:[#allocation14_spill] sm:$0xff] }
 0x355   : > { %v3609_v49 = vrot.slane %v3497_v19, 4  ;;  %v3299_v18 = vadd.f32 %v3225_v29, %v8461_v3  ;;  %v3111_v15 = vpop.f32.mrf.mxu1  ;;  %v4885_v20 = vrot.slane %v8958_v23, 3  ;;  %v8983_v44 = vsel %vm4725_vm10, 1.0, %v9637_v39 }
 0x356   : > { %9764 = vst [vmem:[#allocation49_spill] sm:$0xff] %v8968_v2  ;;  %v6634_v45 = vpop.f32.mrf.mxu0  ;;  %v8978_v13 = vsel %vm2769_vm5, %v9766_v46, %v9765_v35  ;;  %v4692_v55 = vsub.s32 %v9755_v40, %v4657_v32  ;;  %v6930_v3 = vcvt.f32.s32 %v6929_v48  ;;  %v4591_v62 = vmul.f32 0.055555556, %v4556_v34 }
 0x357   : > { %v3610_v54 = vsel %vm1176_vm0, %v3607_v25, %v3609_v49  ;;  %v6547_v47 = vpop.f32.mrf.mxu1  ;;  %v9768_v10 = vrot.slane %v8930_v14, 3  ;;  %v9769_v42 = vmov %v9765_v35  ;;  %v4693_v30 = vsub.s32 %v9758_v61, %v4658_v33  ;;  %v9775_v35 = vld [vmem:[#allocation19_spill] sm:$0xff] }
 0x358   : > { %v8987_v45 = vadd.f32 %v3610_v54, %v3299_v18  ;;  %v4110_v51 = vpop.f32.mrf.mxu0  ;;  %v4522_v41 = vcvt.s32.f32 %v9770_v22  ;;  %v9771_v25 = vrot.slane %v8934_v24, 3  ;;  %vm4726_vm0 = vcmp.lt.s32.totalorder %v4691_v8, 16  ;;  %v9773_v18 = vld [vmem:[#allocation15_spill] sm:$0xff]  ;;  %v9776_v24 = vld [vmem:[#allocation20_spill] sm:$0xff] }
 0x359   : > { %v8994_v23 = vsel %vm2769_vm5, %v9769_v42, %v9768_v10  ;;  %v9772_v40 = vmov %v9768_v10  ;;  %v4659_v32 = vmul.u32 18, %v6928_v16  ;;  %v6931_v28 = vtrunc.f32 %v4591_v62  ;;  %v3113_v19 = vpop.f32.mrf.mxu1 }
 0x35a   : > { %9767 = vst [vmem:[#allocation35_spill] sm:$0xff] %v8987_v45  ;;  %v9003_v34 = vsel %vm2769_vm5, %v9772_v40, %v9771_v25  ;;  %v6725_v29 = vpop.f32.mrf.mxu0  ;;  %v9605_v56 = vrot.slane %v8983_v44, 3  ;;  %v4660_v49 = vmul.u32 18, %v6930_v3  ;;  %v4557_v48 = vadd.f32 0.5, %v4522_v41 }
 0x35b   : > { %v4523_v61 = vcvt.s32.f32 %v9773_v18  ;;  %v9774_v33 = vmov %v9771_v25  ;;  %vm4727_vm11 = vcmp.lt.s32.totalorder %v4692_v55, 16  ;;  %v6932_v14 = vcvt.f32.s32 %v6931_v28  ;;  %v6548_v8 = vpop.f32.mrf.mxu1 }
 0x35c   : > { %v9010_v15 = vsel %vm2769_vm5, %v9774_v33, %v4885_v20  ;;  %v4524_v46 = vcvt.s32.f32 %v9775_v35  ;;  %v4112_v16 = vpop.f32.mrf.mxu0  ;;  %v9014_v54 = vsel %vm4726_vm0, 1.0, %v9637_v39  ;;  %vm4728_vm12 = vcmp.lt.s32.totalorder %v4693_v30, 16 }
 0x35d   : > { %v4592_v62 = vmul.f32 0.055555556, %v4557_v48  ;;  %v4558_v3 = vadd.f32 0.5, %v4523_v61  ;;  %v4694_v47 = vsub.s32 %v9760_v7, %v4659_v32  ;;  %v4661_v51 = vmul.u32 18, %v6932_v14  ;;  %v3724_v41 = vpop.f32.mrf.mxu1 }
 0x35e   : > { %v4559_v10 = vadd.f32 0.5, %v4524_v46  ;;  %v4525_v42 = vcvt.s32.f32 %v9776_v24  ;;  %v6726_v25 = vpop.f32.mrf.mxu0  ;;  %v9019_v55 = vsel %vm4727_vm11, 1.0, %v9637_v39  ;;  %v4695_v40 = vsub.s32 %v9761_v27, %v4660_v49 }
 0x35f   : > { %v6933_v28 = vtrunc.f32 %v4592_v62  ;;  %v4593_v19 = vmul.f32 0.055555556, %v4558_v3  ;;  %v9025_v29 = vsel %vm2769_vm5, %v4885_v20, %v9605_v56  ;;  %v4696_v7 = vsub.s32 %v9763_v26, %v4661_v51  ;;  %v6639_v61 = vpop.f32.mrf.mxu1 }
 0x360   : > { %v4594_v32 = vmul.f32 0.055555556, %v4559_v10  ;;  %v4560_v48 = vadd.f32 0.5, %v4525_v42  ;;  %v4116_v33 = vpop.f32.mrf.mxu0  ;;  %v9031_v46 = vsel %vm4728_vm12, 1.0, %v9637_v39  ;;  %v4891_v8 = vrot.slane %v9019_v55, 3  ;;  %v9777_v10 = vld [vmem:[#allocation24_spill] sm:$0xff] }
 0x361   : > { %v6934_v27 = vcvt.f32.s32 %v6933_v28  ;;  %v6935_v49 = vtrunc.f32 %v4593_v19  ;;  %vm4729_vm13 = vcmp.lt.s32.totalorder %v4694_v47, 16  ;;  %v3726_v62 = vpop.f32.mrf.mxu1  ;;  %vm4730_vm14 = vcmp.lt.s32.totalorder %v4695_v40, 16 }
 0x362   : > { %v6937_v16 = vtrunc.f32 %v4594_v32  ;;  %v4595_v20 = vmul.f32 0.055555556, %v4560_v48  ;;  %v6729_v3 = vpop.f32.mrf.mxu0  ;;  %v4526_v42 = vcvt.s32.f32 %v9777_v10  ;;  %v4893_v41 = vrot.slane %v9031_v46, 3 }
 0x363   : > { %v4662_v26 = vmul.u32 18, %v6934_v27  ;;  %v6936_v51 = vcvt.f32.s32 %v6935_v49  ;;  %vm4731_vm15 = vcmp.lt.s32.totalorder %v4696_v7, 16  ;;  %v6640_v61 = vpop.f32.mrf.mxu1  ;;  %v5820_v19 = vsel %vm4729_vm13, 1.0, %v9637_v39  ;;  %v9778_v27 = vld [vmem:[#allocation25_spill] sm:$0xff] }
 0x364   : > { %v6938_v30 = vcvt.f32.s32 %v6937_v16  ;;  %v6939_v25 = vtrunc.f32 %v4595_v20  ;;  %v4118_v28 = vpop.f32.mrf.mxu0  ;;  %v4561_v32 = vadd.f32 0.5, %v4526_v42  ;;  %v5821_v48 = vsel %vm4730_vm14, 1.0, %v9637_v39 }
 0x365   : > { %v4697_v47 = vsub.s32 %v9770_v22, %v4662_v26  ;;  %v4663_v55 = vmul.u32 18, %v6936_v51  ;;  %v4527_v49 = vcvt.s32.f32 %v9778_v27  ;;  %v3730_v62 = vpop.f32.mrf.mxu1  ;;  %v5822_v7 = vsel %vm4731_vm15, 1.0, %v9637_v39 }
 0x366   : > { %v4664_v40 = vmul.u32 18, %v6938_v30  ;;  %v6940_v33 = vcvt.f32.s32 %v6939_v25  ;;  %v6730_v3 = vpop.f32.mrf.mxu0  ;;  %v4596_v16 = vmul.f32 0.055555556, %v4561_v32  ;;  %v4895_v30 = vrot.slane %v5820_v19, 3 }
 0x367   : > { %vm4732_vm4 = vcmp.lt.s32.totalorder %v4697_v47, 16  ;;  %v4698_v46 = vsub.s32 %v9773_v18, %v4663_v55  ;;  %v4562_v51 = vadd.f32 0.5, %v4527_v49  ;;  %v6643_v42 = vpop.f32.mrf.mxu1  ;;  %v4897_v25 = vrot.slane %v5821_v48, 3  ;;  %v9779_v48 = vld [vmem:[#allocation29_spill] sm:$0xff] }
 0x368   : > { %v5823_v20 = vsel %vm4732_vm4, 1.0, %v9637_v39  ;;  %v4699_v22 = vsub.s32 %v9775_v35, %v4664_v40  ;;  %v4665_v26 = vmul.u32 18, %v6940_v33  ;;  %v4122_v61 = vpop.f32.mrf.mxu0  ;;  %v6941_v28 = vtrunc.f32 %v4596_v16 }
 0x369   : > { %vm4733_vm6 = vcmp.lt.s32.totalorder %v4698_v46, 16  ;;  %v4597_v3 = vmul.f32 0.055555556, %v4562_v51  ;;  %v3732_v18 = vpop.f32.mrf.mxu1  ;;  %v4899_v32 = vrot.slane %v5822_v7, 3  ;;  %v4901_v56 = vrot.slane %v5823_v20, 3 }
 0x36a   : > { %v5824_v62 = vsel %vm4733_vm6, 1.0, %v9637_v39  ;;  %vm4734_vm1 = vcmp.lt.s32.totalorder %v4699_v22, 16  ;;  %v4700_v47 = vsub.s32 %v9776_v24, %v4665_v26  ;;  %v6733_v55 = vpop.f32.mrf.mxu0  ;;  %v6942_v35 = vcvt.f32.s32 %v6941_v28 }
 0x36b   : > { %v4903_v14 = vrot.slane %v5824_v62, 3  ;;  %v5825_v40 = vsel %vm4734_vm1, 1.0, %v9637_v39  ;;  %v6943_v19 = vtrunc.f32 %v4597_v3  ;;  %v4528_v33 = vcvt.s32.f32 %v9779_v48  ;;  %v6644_v49 = vpop.f32.mrf.mxu1 }
 0x36c   : > { %vm4735_vm3 = vcmp.lt.s32.totalorder %v4700_v47, 16  ;;  %v4124_v46 = vpop.f32.mrf.mxu0  ;;  %v9780_v16 = vrot.slane %v9014_v54, 3  ;;  %v9781_v24 = vrot.slane %v8983_v44, 3  ;;  %v9061_v26 = vsel %vm2769_vm5, %v4891_v8, %v4893_v41 }
 0x36d   : > { %v4666_v51 = vmul.u32 18, %v6942_v35  ;;  %v9064_v42 = vsel %vm2769_vm5, %v4893_v41, %v4895_v30  ;;  %v9067_v61 = vsel %vm2769_vm5, %v4895_v30, %v4897_v25  ;;  %v5826_v44 = vsel %vm4735_vm3, 1.0, %v9637_v39  ;;  %v3736_v62 = vpop.f32.mrf.mxu1 }
 0x36e   : > { %v9053_v22 = vsel %vm2769_vm5, %v9781_v24, %v9780_v16  ;;  %v9782_v7 = vmov %v9780_v16  ;;  %v6944_v28 = vcvt.f32.s32 %v6943_v19  ;;  %v6734_v47 = vpop.f32.mrf.mxu0  ;;  %vm4457_vm8 = vcmask 64517  }
 0x36f   : > { %v9058_v20 = vsel %vm2769_vm5, %v9782_v7, %v4891_v8  ;;  %vm3923_vm9 = vcmask 1042432   ;;  %v4905_v54 = vrot.slane %v5825_v40, 3  ;;  %v4701_v3 = vsub.s32 %v9777_v10, %v4666_v51  ;;  %v9783_v8 = vld [vmem:[#allocation30_spill] sm:$0xff]  ;;  %v6647_v49 = vpop.f32.mrf.mxu1 }
 0x370   : > { %v4563_v18 = vadd.f32 0.5, %v4528_v33  ;;  %v4529_v55 = vcvt.s32.f32 %v9783_v8  ;;  %v9073_v41 = vsel %vm2769_vm5, %v4897_v25, %v4899_v32  ;;  %v9076_v30 = vsel %vm2769_vm5, %v4899_v32, %v4901_v56  ;;  %v4129_v16 = vpop.f32.mrf.mxu0  ;;  %v9786_v25 = vld [vmem:[#allocation33_spill] sm:$0xff] }
 0x371   : > { %9784 = vst [vmem:[#allocation42_spill] sm:$0xff] %v9076_v30  ;;  %v9079_v35 = vsel %vm2769_vm5, %v4901_v56, %v4903_v14  ;;  %v4667_v19 = vmul.u32 18, %v6944_v28  ;;  %v4907_v24 = vrot.slane %v5826_v44, 3  ;;  %vm4736_vm10 = vcmp.lt.s32.totalorder %v4701_v3, 16  ;;  %v3738_v32 = vpop.f32.mrf.mxu1 }
 0x372   : > { %9785 = vst [vmem:[#allocation36_spill] sm:$0xff] %v9079_v35  ;;  %v4598_v40 = vmul.f32 0.055555556, %v4563_v18  ;;  %v4564_v10 = vadd.f32 0.5, %v4529_v55  ;;  %v4310_v33 = vrot.slane %v4124_v46, 6  ;;  %v5827_v7 = vsel %vm4736_vm10, 1.0, %v9637_v39  ;;  %v6737_v45 = vpop.f32.mrf.mxu0 }
 0x373   : > { %v4702_v51 = vsub.s32 %v9778_v27, %v4667_v19  ;;  %v4530_v62 = vcvt.s32.f32 %v9786_v25  ;;  %v4311_v47 = vrot.slane %v4129_v16, 6  ;;  %v9086_v56 = vsel %vm2769_vm5, %v4903_v14, %v4905_v54  ;;  %v6648_v46 = vpop.f32.mrf.mxu1 }
 0x374   : > { %9787 = vst [vmem:[#allocation12_spill] sm:$0xff] %v9086_v56  ;;  %v6945_v28 = vtrunc.f32 %v4598_v40  ;;  %v4599_v49 = vmul.f32 0.055555556, %v4564_v10  ;;  %v3924_v44 = vrot.slane %v3738_v32, 5  ;;  %v4909_v3 = vrot.slane %v5827_v7, 3  ;;  %v4132_v55 = vpop.f32.mrf.mxu0 }
 0x375   : > { %vm4737_vm0 = vcmp.lt.s32.totalorder %v4702_v51, 16  ;;  %v4565_v18 = vadd.f32 0.5, %v4530_v62  ;;  %v9089_v2 = vsel %vm2769_vm5, %v4905_v54, %v4907_v24  ;;  %v4313_v16 = vrot.slane %v4132_v55, 6  ;;  %v3743_v10 = vpop.f32.mrf.mxu1  ;;  %v9789_v62 = vld [vmem:[#allocation34_spill] sm:$0xff] }
 0x376   : > { %9788 = vst [vmem:[#allocation51_spill] sm:$0xff] %v9089_v2  ;;  %v5828_v27 = vsel %vm4737_vm0, 1.0, %v9637_v39  ;;  %v6946_v19 = vcvt.f32.s32 %v6945_v28  ;;  %v6947_v35 = vtrunc.f32 %v4599_v49  ;;  %v4034_v45 = vadd.f32 %v3924_v44, %v8492_v31  ;;  %v6738_v54 = vpop.f32.mrf.mxu0 }
 0x377   : > { %v4911_v14 = vrot.slane %v5828_v27, 3  ;;  %v4600_v56 = vmul.f32 0.055555556, %v4565_v18  ;;  %v4312_v40 = vsel %vm4309_vm7, %v4310_v33, %v4311_v47  ;;  %v4531_v32 = vcvt.s32.f32 %v9789_v62  ;;  %v6651_v46 = vpop.f32.mrf.mxu1 }
 0x378   : > { %v4668_v7 = vmul.u32 18, %v6946_v19  ;;  %v6948_v51 = vcvt.f32.s32 %v6947_v35  ;;  %v4420_v28 = vadd.f32 %v4310_v33, %v4034_v45  ;;  %v3925_v49 = vrot.slane %v3743_v10, 5  ;;  %v4137_v55 = vpop.f32.mrf.mxu0 }
 0x379   : > { %v4314_v31 = vsel %vm4309_vm7, %v4311_v47, %v4313_v16  ;;  %v9102_v18 = vsel %vm2769_vm5, %v4907_v24, %v4909_v3  ;;  %v9105_v27 = vsel %vm2769_vm5, %v4909_v3, %v4911_v14  ;;  %v6949_v54 = vtrunc.f32 %v4600_v56  ;;  %v3746_v10 = vpop.f32.mrf.mxu1 }
 0x37a   : > { %v4703_v2 = vsub.s32 %v9779_v48, %v4668_v7  ;;  %v4669_v30 = vmul.u32 18, %v6948_v51  ;;  %4458 = vst.msk [vmem:[%s9096_s30 - $0x5] sm:$0xe0] %vm4457_vm8, %v4420_v28  ;;  %v9790_v35 = vrot.slane %v8655_v9, 3  ;;  %v3926_v19 = vsel %vm3923_vm9, %v3924_v44, %v3925_v49  ;;  %v6741_v46 = vpop.f32.mrf.mxu0 }
 0x37b   : > { %v4315_v47 = vrot.slane %v4137_v55, 6  ;;  %v9113_v45 = vadd.f32 0.5, %v4531_v32  ;;  %v4035_v24 = vadd.f32 %v3926_v19, %v8503_v52  ;;  %v6950_v48 = vcvt.f32.s32 %v6949_v54 }
 0x37c   : > { %v4958_v33 = vmul.f32 %v9790_v35, %v4420_v28  ;;  %vm4738_vm11 = vcmp.lt.s32.totalorder %v4703_v2, 16  ;;  %v4704_v3 = vsub.s32 %v9783_v8, %v4669_v30  ;;  %v3927_v51 = vrot.slane %v3746_v10, 5  ;;  %v6652_v35 = vpop.f32.mrf.mxu1  ;;  %v4140_v44 = vpop.f32.mrf.mxu0 }
 0x37d   : > { %v4316_v9 = vsel %vm4309_vm7, %v4313_v16, %v4315_v47  ;;  %v4421_v28 = vadd.f32 %v4312_v40, %v4035_v24  ;;  %v5829_v32 = vsel %vm4738_vm11, 1.0, %v9637_v39  ;;  %v4670_v55 = vmul.u32 18, %v6950_v48 }
 0x37e   : > { %v5032_v56 = vrot.slane %v4958_v33, 5  ;;  %v5220_v7 = vmul.f32 %v4958_v33, %v4958_v33  ;;  %vm4739_vm12 = vcmp.lt.s32.totalorder %v4704_v3, 16  ;;  %v3928_v19 = vsel %vm3923_vm9, %v3925_v49, %v3927_v51  ;;  %v3751_v54 = vpop.f32.mrf.mxu1  ;;  %v6742_v16 = vpop.f32.mrf.mxu0 }
 0x37f   : > { %v4317_v2 = vrot.slane %v4140_v44, 6  ;;  %v4913_v46 = vrot.slane %v5829_v32, 3  ;;  %4459 = vst.msk [vmem:[%s9096_s30 + $0x3] sm:$0xff] %vm1112_vm2, %v4421_v28  ;;  %v4959_v8 = vmul.f32 %v8699_v59, %v4421_v28  ;;  %v4036_v30 = vadd.f32 %v3928_v19, %v8512_v57 }
 0x380   : > { %v5294_v52 = vrot.slane %v5220_v7, 5  ;;  %v5830_v40 = vsel %vm4739_vm12, 1.0, %v9637_v39  ;;  %v4705_v33 = vsub.s32 %v9786_v25, %v4670_v55  ;;  %v3929_v24 = vrot.slane %v3751_v54, 5  ;;  %v6655_v59 = vpop.f32.mrf.mxu1  ;;  %v4145_v28 = vpop.f32.mrf.mxu0 }
 0x381   : > { %v4318_v10 = vsel %vm4309_vm7, %v4315_v47, %v4317_v2  ;;  %v9128_v49 = vsel %vm2769_vm5, %v4911_v14, %v4913_v46  ;;  %v4915_v3 = vrot.slane %v5830_v40, 3  ;;  %v5033_v48 = vrot.slane %v4959_v8, 5 }
 0x382   : > { %v5221_v7 = vmul.f32 %v4959_v8, %v4959_v8  ;;  %v4422_v35 = vadd.f32 %v4314_v31, %v4036_v30  ;;  %vm4740_vm13 = vcmp.lt.s32.totalorder %v4705_v33, 16  ;;  %v3930_v57 = vsel %vm3923_vm9, %v3927_v51, %v3929_v24  ;;  %v3754_v19 = vpop.f32.mrf.mxu1  ;;  %v6745_v8 = vpop.f32.mrf.mxu0 }
 0x383   : > { %v4319_v44 = vrot.slane %v4145_v28, 6  ;;  %v9132_v32 = vsel %vm2769_vm5, %v4913_v46, %v4915_v3  ;;  %v9135_v25 = vsel %vm4740_vm13, 1.0, %v9637_v39  ;;  %v5034_v47 = vsel %vm3923_vm9, %v5032_v56, %v5033_v48 }
 0x384   : > { %v5295_v14 = vrot.slane %v5221_v7, 5  ;;  %4460 = vst.msk [vmem:[%s9096_s30 + $0xb] sm:$0xff] %vm1112_vm2, %v4422_v35  ;;  %v4960_v55 = vmul.f32 %v8704_v1, %v4422_v35  ;;  %v4037_v31 = vadd.f32 %v3930_v57, %v8521_v60  ;;  %v5141_v51 = vsel %vm1112_vm2, %v5034_v47, 0.0  ;;  %v6656_v7 = vpop.f32.mrf.mxu1  ;;  %v4148_v59 = vpop.f32.mrf.mxu0 }
 0x385   : > { %v3931_v30 = vrot.slane %v3754_v19, 5  ;;  %v4320_v46 = vsel %vm4309_vm7, %v4317_v2, %v4319_v44  ;;  %v4917_v54 = vrot.slane %v9135_v25, 3  ;;  %v4321_v35 = vrot.slane %v4148_v59, 6 }
 0x386   : > { %v5296_v16 = vsel %vm3923_vm9, %v5294_v52, %v5295_v14  ;;  %v5035_v56 = vrot.slane %v4960_v55, 5  ;;  %v5222_v40 = vmul.f32 %v4960_v55, %v4960_v55  ;;  %v4423_v33 = vadd.f32 %v4316_v9, %v4037_v31  ;;  %v3759_v47 = vpop.f32.mrf.mxu1  ;;  %v6746_v55 = vpop.f32.mrf.mxu0 }
 0x387   : > { %v5403_v1 = vsel %vm1112_vm2, %v5296_v16, 0.0  ;;  %v3932_v60 = vsel %vm3923_vm9, %v3929_v24, %v3931_v30  ;;  %v9151_v28 = vsel %vm2769_vm5, %v4915_v3, %v4917_v54  ;;  %v3933_v24 = vrot.slane %v3759_v47, 5 }
 0x388   : > { %v5036_v2 = vsel %vm3923_vm9, %v5033_v48, %v5035_v56  ;;  %v5297_v57 = vrot.slane %v5222_v40, 5  ;;  %4461 = vst.msk [vmem:[%s9096_s30 + $0x13] sm:$0xff] %vm1112_vm2, %v4423_v33  ;;  %v4961_v52 = vmul.f32 %v8764_v0, %v4423_v33  ;;  %v4038_v9 = vadd.f32 %v3932_v60, %v8530_v17  ;;  %v6659_v7 = vpop.f32.mrf.mxu1  ;;  %v4153_v59 = vpop.f32.mrf.mxu0 }
 0x389   : > { %v5142_v31 = vsel %vm1112_vm2, %v5036_v2, 0.0  ;;  %v4322_v19 = vsel %vm4309_vm7, %v4319_v44, %v4321_v35  ;;  %v4601_v8 = vmul.f32 0.055555556, %v9113_v45  ;;  %v3934_v33 = vsel %vm3923_vm9, %v3931_v30, %v3933_v24 }
 0x38a   : > { %v5143_v3 = vadd.f32 %v5142_v31, %v5141_v51  ;;  %v5298_v16 = vsel %vm3923_vm9, %v5295_v14, %v5297_v57  ;;  %v5037_v48 = vrot.slane %v4961_v52, 5  ;;  %v5223_v40 = vmul.f32 %v4961_v52, %v4961_v52  ;;  %v3762_v51 = vpop.f32.mrf.mxu1  ;;  %v6749_v55 = vpop.f32.mrf.mxu0 }
 0x38b   : > { %v5404_v0 = vsel %vm1112_vm2, %v5298_v16, 0.0  ;;  %v4424_v17 = vadd.f32 %v4318_v10, %v4038_v9  ;;  %v4323_v60 = vrot.slane %v4153_v59, 6  ;;  %v4039_v45 = vadd.f32 %v3934_v33, %v8539_v37 }
 0x38c   : > { %v5405_v2 = vadd.f32 %v5404_v0, %v5403_v1  ;;  %v5038_v47 = vsel %vm3923_vm9, %v5035_v56, %v5037_v48  ;;  %v5299_v44 = vrot.slane %v5223_v40, 5  ;;  %v3935_v31 = vrot.slane %v3762_v51, 5  ;;  %v6660_v56 = vpop.f32.mrf.mxu1  ;;  %v4156_v16 = vpop.f32.mrf.mxu0 }
 0x38d   : > { %v5144_v14 = vsel %vm1112_vm2, %v5038_v47, 0.0  ;;  %4462 = vst.msk [vmem:[%s9096_s30 + $0x1b] sm:$0xff] %vm1112_vm2, %v4424_v17  ;;  %v4962_v52 = vmul.f32 %v8767_v11, %v4424_v17  ;;  %v4324_v10 = vsel %vm4309_vm7, %v4321_v35, %v4323_v60  ;;  %v4425_v9 = vadd.f32 %v4320_v46, %v4039_v45 }
 0x38e   : > { %v5145_v30 = vadd.f32 %v5144_v14, %v5143_v3  ;;  %v5300_v1 = vsel %vm3923_vm9, %v5297_v57, %v5299_v44  ;;  %v6951_v40 = vtrunc.f32 %v4601_v8  ;;  %v3936_v0 = vsel %vm3923_vm9, %v3933_v24, %v3935_v31  ;;  %v3767_v3 = vpop.f32.mrf.mxu1  ;;  %v6750_v57 = vpop.f32.mrf.mxu0 }
 0x38f   : > { %v5406_v37 = vsel %vm1112_vm2, %v5300_v1, 0.0  ;;  %v5039_v7 = vrot.slane %v4962_v52, 5  ;;  %v5224_v59 = vmul.f32 %v4962_v52, %v4962_v52  ;;  %4463 = vst.msk [vmem:[%s9096_s30 + $0x23] sm:$0xff] %vm1112_vm2, %v4425_v9  ;;  %v4963_v11 = vmul.f32 %v8774_v58, %v4425_v9 }
 0x390   : > { %v5407_v33 = vadd.f32 %v5406_v37, %v5405_v2  ;;  %v4040_v35 = vadd.f32 %v3936_v0, %v8548_v4  ;;  %v4325_v17 = vrot.slane %v4156_v16, 6  ;;  %v3937_v8 = vrot.slane %v3767_v3, 5  ;;  %v6663_v14 = vpop.f32.mrf.mxu1  ;;  %v4161_v52 = vpop.f32.mrf.mxu0 }
 0x391   : > { %v5040_v46 = vsel %vm3923_vm9, %v5037_v48, %v5039_v7  ;;  %v5301_v47 = vrot.slane %v5224_v59, 5  ;;  %v9179_v45 = vcvt.f32.s32 %v6951_v40  ;;  %v5041_v24 = vrot.slane %v4963_v11, 5 }
 0x392   : > { %v5146_v51 = vsel %vm1112_vm2, %v5040_v46, 0.0  ;;  %v5225_v2 = vmul.f32 %v4963_v11, %v4963_v11  ;;  %v4426_v55 = vadd.f32 %v4322_v19, %v4040_v35  ;;  %v3938_v1 = vsel %vm3923_vm9, %v3935_v31, %v3937_v8  ;;  %v3770_v37 = vpop.f32.mrf.mxu1  ;;  %v6753_v19 = vpop.f32.mrf.mxu0 }
 0x393   : > { %v5147_v58 = vadd.f32 %v5146_v51, %v5145_v30  ;;  %v5302_v4 = vsel %vm3923_vm9, %v5299_v44, %v5301_v47  ;;  %v4326_v9 = vsel %vm4309_vm7, %v4323_v60, %v4325_v17  ;;  %v5042_v56 = vsel %vm3923_vm9, %v5039_v7, %v5041_v24 }
 0x394   : > { %v5408_v48 = vsel %vm1112_vm2, %v5302_v4, 0.0  ;;  %v5303_v16 = vrot.slane %v5225_v2, 5  ;;  %4464 = vst.msk [vmem:[%s9096_s30 + $0x2b] sm:$0xff] %vm1112_vm2, %v4426_v55  ;;  %v4964_v40 = vmul.f32 %v8783_v21, %v4426_v55  ;;  %v5148_v30 = vsel %vm1112_vm2, %v5042_v56, 0.0  ;;  %v6664_v7 = vpop.f32.mrf.mxu1  ;;  %v4164_v3 = vpop.f32.mrf.mxu0 }
 0x395   : > { %v5409_v59 = vadd.f32 %v5408_v48, %v5407_v33  ;;  %v4041_v44 = vadd.f32 %v3938_v1, %v8557_v6  ;;  %v3939_v0 = vrot.slane %v3770_v37, 5  ;;  %v5149_v31 = vadd.f32 %v5148_v30, %v5147_v58 }
 0x396   : > { %v5304_v60 = vsel %vm3923_vm9, %v5301_v47, %v5303_v16  ;;  %v5043_v11 = vrot.slane %v4964_v40, 5  ;;  %v5226_v35 = vmul.f32 %v4964_v40, %v4964_v40  ;;  %v4327_v51 = vrot.slane %v4161_v52, 6  ;;  %v3775_v14 = vpop.f32.mrf.mxu1  ;;  %v6754_v58 = vpop.f32.mrf.mxu0 }
 0x397   : > { %v5410_v57 = vsel %vm1112_vm2, %v5304_v60, 0.0  ;;  %v4427_v46 = vadd.f32 %v4324_v10, %v4041_v44  ;;  %v3940_v21 = vsel %vm3923_vm9, %v3937_v8, %v3939_v0  ;;  %v3941_v1 = vrot.slane %v3775_v14, 5 }
 0x398   : > { %v5411_v33 = vadd.f32 %v5410_v57, %v5409_v59  ;;  %v5044_v2 = vsel %vm3923_vm9, %v5041_v24, %v5043_v11  ;;  %v5305_v55 = vrot.slane %v5226_v35, 5  ;;  %v4042_v6 = vadd.f32 %v3940_v21, %v8566_v53  ;;  %v6667_v56 = vpop.f32.mrf.mxu1  ;;  %v4169_v40 = vpop.f32.mrf.mxu0 }
 0x399   : > { %v5150_v47 = vsel %vm1112_vm2, %v5044_v2, 0.0  ;;  %4465 = vst.msk [vmem:[%s9096_s30 + $0x33] sm:$0xff] %vm1112_vm2, %v4427_v46  ;;  %v4965_v4 = vmul.f32 %v8793_v63, %v4427_v46  ;;  %v4328_v10 = vsel %vm4309_vm7, %v4325_v17, %v4327_v51  ;;  %v4329_v24 = vrot.slane %v4164_v3, 6 }
 0x39a   : > { %v5151_v8 = vadd.f32 %v5150_v47, %v5149_v31  ;;  %v5306_v52 = vsel %vm3923_vm9, %v5303_v16, %v5305_v55  ;;  %v4428_v48 = vadd.f32 %v4326_v9, %v4042_v6  ;;  %v3942_v59 = vsel %vm3923_vm9, %v3939_v0, %v3941_v1  ;;  %v3778_v16 = vpop.f32.mrf.mxu1  ;;  %v6757_v9 = vpop.f32.mrf.mxu0 }
 0x39b   : > { %v5412_v53 = vsel %vm1112_vm2, %v5306_v52, 0.0  ;;  %v5045_v37 = vrot.slane %v4965_v4, 5  ;;  %v5227_v19 = vmul.f32 %v4965_v4, %v4965_v4  ;;  %v4043_v17 = vadd.f32 %v3942_v59, %v8579_v5  ;;  %v9791_v52 = vld [vmem:[#allocation54_spill] sm:$0xff]  ;;  %v9792_v9 = vld [vmem:[#allocation43_spill] sm:$0xff] }
 0x39c   : > { %v5413_v30 = vadd.f32 %v5412_v53, %v5411_v33  ;;  %4466 = vst.msk [vmem:[%s9096_s30 + $0x3b] sm:$0xff] %vm1112_vm2, %v4428_v48  ;;  %v4966_v63 = vmul.f32 %v8853_v12, %v4428_v48  ;;  %v4330_v44 = vsel %vm4309_vm7, %v4327_v51, %v4329_v24  ;;  %v3943_v35 = vrot.slane %v3778_v16, 5  ;;  %v6668_v21 = vpop.f32.mrf.mxu1  ;;  %v4172_v33 = vpop.f32.mrf.mxu0 }
 0x39d   : > { %v5046_v31 = vsel %vm3923_vm9, %v5043_v11, %v5045_v37  ;;  %v5307_v60 = vrot.slane %v5227_v19, 5  ;;  %v4331_v7 = vrot.slane %v4169_v40, 6  ;;  %v4429_v46 = vadd.f32 %v4328_v10, %v4043_v17 }
 0x39e   : > { %v5152_v3 = vsel %vm1112_vm2, %v5046_v31, 0.0  ;;  %v5047_v0 = vrot.slane %v4966_v63, 5  ;;  %v5228_v57 = vmul.f32 %v4966_v63, %v4966_v63  ;;  %v3944_v51 = vsel %vm3923_vm9, %v3941_v1, %v3943_v35  ;;  %v3783_v47 = vpop.f32.mrf.mxu1  ;;  %v6758_v4 = vpop.f32.mrf.mxu0 }
 0x39f   : > { %v5153_v12 = vadd.f32 %v5152_v3, %v5151_v8  ;;  %v5308_v5 = vsel %vm3923_vm9, %v5305_v55, %v5307_v60  ;;  %v4332_v2 = vsel %vm4309_vm7, %v4329_v24, %v4331_v7  ;;  %4467 = vst.msk [vmem:[%s9096_s30 + $0x43] sm:$0xff] %vm1112_vm2, %v4429_v46  ;;  %v4967_v58 = vmul.f32 %v8856_v43, %v4429_v46  ;;  %v9793_v46 = vld [vmem:[#allocation21_spill] sm:$0xff] }
 0x3a0   : > { %v5414_v11 = vsel %vm1112_vm2, %v5308_v5, 0.0  ;;  %v5048_v6 = vsel %vm3923_vm9, %v5045_v37, %v5047_v0  ;;  %v5309_v14 = vrot.slane %v5228_v57, 5  ;;  %v4044_v55 = vadd.f32 %v3944_v51, %v9791_v52  ;;  %v6671_v53 = vpop.f32.mrf.mxu1  ;;  %v4177_v37 = vpop.f32.mrf.mxu0 }
 0x3a1   : > { %v5415_v10 = vadd.f32 %v5414_v11, %v5413_v30  ;;  %v5154_v8 = vsel %vm1112_vm2, %v5048_v6, 0.0  ;;  %v3945_v48 = vrot.slane %v3783_v47, 5  ;;  %v5049_v56 = vrot.slane %v4967_v58, 5 }
 0x3a2   : > { %v5155_v1 = vadd.f32 %v5154_v8, %v5153_v12  ;;  %v5310_v24 = vsel %vm3923_vm9, %v5307_v60, %v5309_v14  ;;  %v5229_v40 = vmul.f32 %v4967_v58, %v4967_v58  ;;  %v4430_v59 = vadd.f32 %v4330_v44, %v4044_v55  ;;  %v3786_v3 = vpop.f32.mrf.mxu1  ;;  %v6761_v57 = vpop.f32.mrf.mxu0  ;;  %v9794_v8 = vld [vmem:[#allocation22_spill] sm:$0xff] }
 0x3a3   : > { %v5416_v19 = vsel %vm1112_vm2, %v5310_v24, 0.0  ;;  %v3946_v43 = vsel %vm3923_vm9, %v3943_v35, %v3945_v48  ;;  %v4333_v63 = vrot.slane %v4172_v33, 6  ;;  %v5050_v17 = vsel %vm3923_vm9, %v5047_v0, %v5049_v56 }
 0x3a4   : > { %v5417_v30 = vadd.f32 %v5416_v19, %v5415_v10  ;;  %v5311_v16 = vrot.slane %v5229_v40, 5  ;;  %v4045_v31 = vadd.f32 %v3946_v43, %v9792_v9  ;;  %v5156_v60 = vsel %vm1112_vm2, %v5050_v17, 0.0  ;;  %4468 = vst.msk [vmem:[%s9096_s30 + $0x4b] sm:$0xff] %vm1112_vm2, %v4430_v59  ;;  %v6672_v51 = vpop.f32.mrf.mxu1  ;;  %v4180_v11 = vpop.f32.mrf.mxu0 }
 0x3a5   : > { %v4968_v21 = vmul.f32 %v9793_v46, %v4430_v59  ;;  %v4334_v44 = vsel %vm4309_vm7, %v4331_v7, %v4333_v63  ;;  %v3947_v12 = vrot.slane %v3786_v3, 5  ;;  %v5157_v35 = vadd.f32 %v5156_v60, %v5155_v1  ;;  %v9795_v7 = vld [vmem:[#allocation44_spill] sm:$0xff] }
 0x3a6   : > { %v5312_v33 = vsel %vm3923_vm9, %v5309_v14, %v5311_v16  ;;  %v4431_v5 = vadd.f32 %v4332_v2, %v4045_v31  ;;  %v4335_v0 = vrot.slane %v4177_v37, 6  ;;  %v3791_v14 = vpop.f32.mrf.mxu1  ;;  %v6762_v2 = vpop.f32.mrf.mxu0  ;;  %v4337_v37 = vrot.slane %v4180_v11, 6 }
 0x3a7   : > { %v5418_v6 = vsel %vm1112_vm2, %v5312_v33, 0.0  ;;  %v5051_v58 = vrot.slane %v4968_v21, 5  ;;  %v5230_v47 = vmul.f32 %v4968_v21, %v4968_v21  ;;  %v3948_v4 = vsel %vm3923_vm9, %v3945_v48, %v3947_v12 }
 0x3a8   : > { %v5419_v10 = vadd.f32 %v5418_v6, %v5417_v30  ;;  %4469 = vst.msk [vmem:[%s9096_s30 + $0x53] sm:$0xff] %vm1112_vm2, %v4431_v5  ;;  %v4969_v52 = vmul.f32 %v9794_v8, %v4431_v5  ;;  %v4046_v55 = vadd.f32 %v3948_v4, %v9795_v7  ;;  %v4336_v1 = vsel %vm4309_vm7, %v4333_v63, %v4335_v0  ;;  %v6675_v30 = vpop.f32.mrf.mxu1  ;;  %v4185_v17 = vpop.f32.mrf.mxu0  ;;  %v9796_v5 = vld [vmem:[#allocation45_spill] sm:$0xff] }
 0x3a9   : > { %v5052_v24 = vsel %vm3923_vm9, %v5049_v56, %v5051_v58  ;;  %v5313_v40 = vrot.slane %v5230_v47, 5  ;;  %v3949_v53 = vrot.slane %v3791_v14, 5  ;;  %v4338_v3 = vsel %vm4309_vm7, %v4335_v0, %v4337_v37  ;;  %v9797_v14 = vld [vmem:[#allocation46_spill] sm:$0xff] }
 0x3aa   : > { %v5158_v19 = vsel %vm1112_vm2, %v5052_v24, 0.0  ;;  %v5053_v48 = vrot.slane %v4969_v52, 5  ;;  %v5231_v59 = vmul.f32 %v4969_v52, %v4969_v52  ;;  %v4432_v43 = vadd.f32 %v4334_v44, %v4046_v55  ;;  %v3794_v21 = vpop.f32.mrf.mxu1  ;;  %v6765_v44 = vpop.f32.mrf.mxu0 }
 0x3ab   : > { %v5159_v9 = vadd.f32 %v5158_v19, %v5157_v35  ;;  %v5314_v31 = vsel %vm3923_vm9, %v5311_v16, %v5313_v40  ;;  %v3950_v63 = vsel %vm3923_vm9, %v3947_v12, %v3949_v53  ;;  %v3951_v51 = vrot.slane %v3794_v21, 5 }
 0x3ac   : > { %v5420_v56 = vsel %vm1112_vm2, %v5314_v31, 0.0  ;;  %v5054_v57 = vsel %vm3923_vm9, %v5051_v58, %v5053_v48  ;;  %v5315_v60 = vrot.slane %v5231_v59, 5  ;;  %4470 = vst.msk [vmem:[%s9096_s30 + $0x5b] sm:$0xff] %vm1112_vm2, %v4432_v43  ;;  %v4970_v46 = vmul.f32 %v8923_v38, %v4432_v43  ;;  %v6676_v58 = vpop.f32.mrf.mxu1  ;;  %v4188_v47 = vpop.f32.mrf.mxu0 }
 0x3ad   : > { %v5421_v33 = vadd.f32 %v5420_v56, %v5419_v10  ;;  %v5160_v35 = vsel %vm1112_vm2, %v5054_v57, 0.0  ;;  %v4047_v16 = vadd.f32 %v3950_v63, %v9796_v5  ;;  %v3952_v38 = vsel %vm3923_vm9, %v3949_v53, %v3951_v51 }
 0x3ae   : > { %v5161_v12 = vadd.f32 %v5160_v35, %v5159_v9  ;;  %v5316_v0 = vsel %vm3923_vm9, %v5313_v40, %v5315_v60  ;;  %v5055_v11 = vrot.slane %v4970_v46, 5  ;;  %v5232_v6 = vmul.f32 %v4970_v46, %v4970_v46  ;;  %v3799_v24 = vpop.f32.mrf.mxu1  ;;  %v6766_v19 = vpop.f32.mrf.mxu0 }
 0x3af   : > { %v5422_v4 = vsel %vm1112_vm2, %v5316_v0, 0.0  ;;  %v4433_v8 = vadd.f32 %v4336_v1, %v4047_v16  ;;  %v4339_v52 = vrot.slane %v4185_v17, 6  ;;  %v4048_v2 = vadd.f32 %v3952_v38, %v9797_v14 }
 0x3b0   : > { %v5423_v10 = vadd.f32 %v5422_v4, %v5421_v33  ;;  %v5056_v7 = vsel %vm3923_vm9, %v5053_v48, %v5055_v11  ;;  %v5317_v55 = vrot.slane %v5232_v6, 5  ;;  %v3953_v43 = vrot.slane %v3799_v24, 5  ;;  %v6679_v9 = vpop.f32.mrf.mxu1  ;;  %v4193_v31 = vpop.f32.mrf.mxu0 }
 0x3b1   : > { %v5162_v40 = vsel %vm1112_vm2, %v5056_v7, 0.0  ;;  %4471 = vst.msk [vmem:[%s9096_s30 + $0x63] sm:$0xff] %vm1112_vm2, %v4433_v8  ;;  %v4971_v59 = vmul.f32 %v8926_v36, %v4433_v8  ;;  %v4340_v1 = vsel %vm4309_vm7, %v4337_v37, %v4339_v52  ;;  %v4434_v17 = vadd.f32 %v4338_v3, %v4048_v2  ;;  %v9798_v37 = vld [vmem:[#allocation47_spill] sm:$0xff] }
 0x3b2   : > { %v5163_v53 = vadd.f32 %v5162_v40, %v5161_v12  ;;  %v5318_v30 = vsel %vm3923_vm9, %v5315_v60, %v5317_v55  ;;  %v4341_v48 = vrot.slane %v4188_v47, 6  ;;  %v3954_v46 = vsel %vm3923_vm9, %v3951_v51, %v3953_v43  ;;  %v3802_v60 = vpop.f32.mrf.mxu1  ;;  %v6769_v3 = vpop.f32.mrf.mxu0 }
 0x3b3   : > { %v5424_v63 = vsel %vm1112_vm2, %v5318_v30, 0.0  ;;  %v5057_v56 = vrot.slane %v4971_v59, 5  ;;  %v5233_v57 = vmul.f32 %v4971_v59, %v4971_v59  ;;  %4472 = vst.msk [vmem:[%s9096_s30 + $0x6b] sm:$0xff] %vm1112_vm2, %v4434_v17  ;;  %v4972_v36 = vmul.f32 %v8942_v50, %v4434_v17  ;;  %v9799_v59 = vld [vmem:[#allocation18_spill] sm:$0xff] }
 0x3b4   : > { %v5425_v21 = vadd.f32 %v5424_v63, %v5423_v10  ;;  %v4049_v44 = vadd.f32 %v3954_v46, %v9798_v37  ;;  %v4342_v33 = vsel %vm4309_vm7, %v4339_v52, %v4341_v48  ;;  %v3955_v16 = vrot.slane %v3802_v60, 5  ;;  %v6680_v47 = vpop.f32.mrf.mxu1  ;;  %v4196_v4 = vpop.f32.mrf.mxu0 }
 0x3b5   : > { %v5058_v35 = vsel %vm3923_vm9, %v5055_v11, %v5057_v56  ;;  %v5319_v5 = vrot.slane %v5233_v57, 5  ;;  %v4343_v12 = vrot.slane %v4193_v31, 6  ;;  %v5059_v51 = vrot.slane %v4972_v36, 5 }
 0x3b6   : > { %v5164_v0 = vsel %vm1112_vm2, %v5058_v35, 0.0  ;;  %v5234_v6 = vmul.f32 %v4972_v36, %v4972_v36  ;;  %v4435_v58 = vadd.f32 %v4340_v1, %v4049_v44  ;;  %v3956_v38 = vsel %vm3923_vm9, %v3953_v43, %v3955_v16  ;;  %v3807_v2 = vpop.f32.mrf.mxu1  ;;  %v6770_v24 = vpop.f32.mrf.mxu0  ;;  %v9800_v36 = vld [vmem:[#allocation23_spill] sm:$0xff] }
 0x3b7   : > { %v5165_v50 = vadd.f32 %v5164_v0, %v5163_v53  ;;  %v5320_v8 = vsel %vm3923_vm9, %v5317_v55, %v5319_v5  ;;  %v4344_v52 = vsel %vm4309_vm7, %v4341_v48, %v4343_v12  ;;  %v5060_v10 = vsel %vm3923_vm9, %v5057_v56, %v5059_v51 }
 0x3b8   : > { %v5426_v11 = vsel %vm1112_vm2, %v5320_v8, 0.0  ;;  %v5321_v7 = vrot.slane %v5234_v6, 5  ;;  %4473 = vst.msk [vmem:[%s9096_s30 + $0x73] sm:$0xff] %vm1112_vm2, %v4435_v58  ;;  %v4973_v14 = vmul.f32 %v8978_v13, %v4435_v58  ;;  %v5166_v40 = vsel %vm1112_vm2, %v5060_v10, 0.0  ;;  %v6683_v48 = vpop.f32.mrf.mxu1  ;;  %v4201_v9 = vpop.f32.mrf.mxu0 }
 0x3b9   : > { %v5427_v19 = vadd.f32 %v5426_v11, %v5425_v21  ;;  %v4050_v55 = vadd.f32 %v3956_v38, %v9799_v59  ;;  %v3957_v1 = vrot.slane %v3807_v2, 5  ;;  %v5167_v43 = vadd.f32 %v5166_v40, %v5165_v50 }
 0x3ba   : > { %v5322_v53 = vsel %vm3923_vm9, %v5319_v5, %v5321_v7  ;;  %v5061_v30 = vrot.slane %v4973_v14, 5  ;;  %v5235_v17 = vmul.f32 %v4973_v14, %v4973_v14  ;;  %v4345_v56 = vrot.slane %v4196_v4, 6  ;;  %v3810_v44 = vpop.f32.mrf.mxu1  ;;  %v6773_v60 = vpop.f32.mrf.mxu0 }
 0x3bb   : > { %v5428_v31 = vsel %vm1112_vm2, %v5322_v53, 0.0  ;;  %v4436_v63 = vadd.f32 %v4342_v33, %v4050_v55  ;;  %v3958_v13 = vsel %vm3923_vm9, %v3955_v16, %v3957_v1  ;;  %v3959_v5 = vrot.slane %v3810_v44, 5  ;;  %v9802_v44 = vld [vmem:[#allocation48_spill] sm:$0xff] }
 0x3bc   : > { %v5429_v57 = vadd.f32 %v5428_v31, %v5427_v19  ;;  %v5062_v46 = vsel %vm3923_vm9, %v5059_v51, %v5061_v30  ;;  %v5323_v21 = vrot.slane %v5235_v17, 5  ;;  %v4051_v37 = vadd.f32 %v3958_v13, %v9800_v36  ;;  %v6684_v58 = vpop.f32.mrf.mxu1  ;;  %v4204_v47 = vpop.f32.mrf.mxu0 }
 0x3bd   : > { %v5168_v3 = vsel %vm1112_vm2, %v5062_v46, 0.0  ;;  %4474 = vst.msk [vmem:[%s9096_s30 + $0x7b] sm:$0xff] %vm1112_vm2, %v4436_v63  ;;  %v4974_v35 = vmul.f32 %v8994_v23, %v4436_v63  ;;  %v4346_v33 = vsel %vm4309_vm7, %v4343_v12, %v4345_v56  ;;  %v4347_v51 = vrot.slane %v4201_v9, 6  ;;  %v9801_v12 = vld [vmem:[#allocation28_spill] sm:$0xff] }
 0x3be   : > { %v5169_v16 = vadd.f32 %v5168_v3, %v5167_v43  ;;  %v5324_v0 = vsel %vm3923_vm9, %v5321_v7, %v5323_v21  ;;  %v4437_v6 = vadd.f32 %v4344_v52, %v4051_v37  ;;  %v3960_v38 = vsel %vm3923_vm9, %v3957_v1, %v3959_v5  ;;  %v3815_v7 = vpop.f32.mrf.mxu1  ;;  %v6774_v52 = vpop.f32.mrf.mxu0 }
 0x3bf   : > { %v5430_v4 = vsel %vm1112_vm2, %v5324_v0, 0.0  ;;  %v5063_v50 = vrot.slane %v4974_v35, 5  ;;  %v5236_v8 = vmul.f32 %v4974_v35, %v4974_v35  ;;  %v4052_v10 = vadd.f32 %v3960_v38, %v9801_v12 }
 0x3c0   : > { %v5431_v11 = vadd.f32 %v5430_v4, %v5429_v57  ;;  %4475 = vst.msk [vmem:[%s9096_s30 + $0x83] sm:$0xff] %vm1112_vm2, %v4437_v6  ;;  %v4975_v23 = vmul.f32 %v9003_v34, %v4437_v6  ;;  %v4348_v14 = vsel %vm4309_vm7, %v4345_v56, %v4347_v51  ;;  %v3961_v19 = vrot.slane %v3815_v7, 5  ;;  %v6687_v53 = vpop.f32.mrf.mxu1  ;;  %v4209_v17 = vpop.f32.mrf.mxu0 }
 0x3c1   : > { %v5064_v2 = vsel %vm3923_vm9, %v5061_v30, %v5063_v50  ;;  %v5325_v24 = vrot.slane %v5236_v8, 5  ;;  %v4349_v40 = vrot.slane %v4204_v47, 6  ;;  %v4438_v43 = vadd.f32 %v4346_v33, %v4052_v10  ;;  %v9803_v8 = vld [vmem:[#allocation2_spill] sm:$0xff] }
 0x3c2   : > { %v5170_v59 = vsel %vm1112_vm2, %v5064_v2, 0.0  ;;  %v5065_v55 = vrot.slane %v4975_v23, 5  ;;  %v5237_v1 = vmul.f32 %v4975_v23, %v4975_v23  ;;  %v3962_v9 = vsel %vm3923_vm9, %v3959_v5, %v3961_v19  ;;  %v3818_v57 = vpop.f32.mrf.mxu1  ;;  %v6777_v46 = vpop.f32.mrf.mxu0 }
 0x3c3   : > { %v5171_v34 = vadd.f32 %v5170_v59, %v5169_v16  ;;  %v5326_v48 = vsel %vm3923_vm9, %v5323_v21, %v5325_v24  ;;  %v4350_v31 = vsel %vm4309_vm7, %v4347_v51, %v4349_v40  ;;  %4476 = vst.msk [vmem:[%s9096_s30 + $0x8b] sm:$0xff] %vm1112_vm2, %v4438_v43  ;;  %v4976_v56 = vmul.f32 %v9010_v15, %v4438_v43 }
 0x3c4   : > { %v5432_v30 = vsel %vm1112_vm2, %v5326_v48, 0.0  ;;  %v5066_v63 = vsel %vm3923_vm9, %v5063_v50, %v5065_v55  ;;  %v5327_v13 = vrot.slane %v5237_v1, 5  ;;  %v4053_v21 = vadd.f32 %v3962_v9, %v9802_v44  ;;  %v6688_v16 = vpop.f32.mrf.mxu1  ;;  %v4212_v0 = vpop.f32.mrf.mxu0 }
 0x3c5   : > { %v5433_v36 = vadd.f32 %v5432_v30, %v5431_v11  ;;  %v5172_v37 = vsel %vm1112_vm2, %v5066_v63, 0.0  ;;  %v3963_v60 = vrot.slane %v3818_v57, 5  ;;  %v5067_v33 = vrot.slane %v4976_v56, 5 }
 0x3c6   : > { %v5173_v3 = vadd.f32 %v5172_v37, %v5171_v34  ;;  %v5328_v35 = vsel %vm3923_vm9, %v5325_v24, %v5327_v13  ;;  %v5238_v5 = vmul.f32 %v4976_v56, %v4976_v56  ;;  %v4439_v51 = vadd.f32 %v4348_v14, %v4053_v21  ;;  %v3823_v11 = vpop.f32.mrf.mxu1  ;;  %v6778_v23 = vpop.f32.mrf.mxu0 }
 0x3c7   : > { %v5434_v6 = vsel %vm1112_vm2, %v5328_v35, 0.0  ;;  %v3964_v15 = vsel %vm3923_vm9, %v3961_v19, %v3963_v60  ;;  %v4351_v58 = vrot.slane %v4209_v17, 6  ;;  %v5068_v4 = vsel %vm3923_vm9, %v5065_v55, %v5067_v33 }
 0x3c8   : > { %v5435_v47 = vadd.f32 %v5434_v6, %v5433_v36  ;;  %v5329_v50 = vrot.slane %v5238_v5, 5  ;;  %v4054_v38 = vadd.f32 %v3964_v15, %v9803_v8  ;;  %v5174_v12 = vsel %vm1112_vm2, %v5068_v4, 0.0  ;;  %4477 = vst.msk [vmem:[%s9096_s30 + $0x93] sm:$0xff] %vm1112_vm2, %v4439_v51  ;;  %v6691_v59 = vpop.f32.mrf.mxu1  ;;  %v4217_v55 = vpop.f32.mrf.mxu0  ;;  %v9805_v4 = vld [vmem:[#allocation6_spill] sm:$0xff] }
 0x3c9   : > { %v4977_v10 = vmul.f32 %v9025_v29, %v4439_v51  ;;  %v4352_v14 = vsel %vm4309_vm7, %v4349_v40, %v4351_v58  ;;  %v3965_v7 = vrot.slane %v3823_v11, 5  ;;  %v5175_v52 = vadd.f32 %v5174_v12, %v5173_v3  ;;  %v9804_v40 = vld [vmem:[#allocation5_spill] sm:$0xff] }
 0x3ca   : > { %v5330_v2 = vsel %vm3923_vm9, %v5327_v13, %v5329_v50  ;;  %v4440_v24 = vadd.f32 %v4350_v31, %v4054_v38  ;;  %v4353_v19 = vrot.slane %v4212_v0, 6  ;;  %v3826_v30 = vpop.f32.mrf.mxu1  ;;  %v6781_v31 = vpop.f32.mrf.mxu0  ;;  %v4355_v57 = vrot.slane %v4217_v55, 6  ;;  %v9806_v55 = vld [vmem:[#allocation9_spill] sm:$0xff] }
 0x3cb   : > { %v5436_v1 = vsel %vm1112_vm2, %v5330_v2, 0.0  ;;  %v5069_v43 = vrot.slane %v4977_v10, 5  ;;  %v5239_v53 = vmul.f32 %v4977_v10, %v4977_v10  ;;  %v3966_v17 = vsel %vm3923_vm9, %v3963_v60, %v3965_v7 }
 0x3cc   : > { %v5437_v34 = vadd.f32 %v5436_v1, %v5435_v47  ;;  %4478 = vst.msk [vmem:[%s9096_s30 + $0x9b] sm:$0xff] %vm1112_vm2, %v4440_v24  ;;  %v4978_v29 = vmul.f32 %v9053_v22, %v4440_v24  ;;  %v4055_v48 = vadd.f32 %v3966_v17, %v9804_v40  ;;  %v4354_v9 = vsel %vm4309_vm7, %v4351_v58, %v4353_v19  ;;  %v6692_v21 = vpop.f32.mrf.mxu1  ;;  %v4220_v60 = vpop.f32.mrf.mxu0 }
 0x3cd   : > { %v5070_v63 = vsel %vm3923_vm9, %v5067_v33, %v5069_v43  ;;  %v5331_v13 = vrot.slane %v5239_v53, 5  ;;  %v3967_v56 = vrot.slane %v3826_v30, 5  ;;  %v4356_v5 = vsel %vm4309_vm7, %v4353_v19, %v4355_v57 }
 0x3ce   : > { %v5176_v46 = vsel %vm1112_vm2, %v5070_v63, 0.0  ;;  %v5071_v36 = vrot.slane %v4978_v29, 5  ;;  %v5240_v37 = vmul.f32 %v4978_v29, %v4978_v29  ;;  %v4441_v44 = vadd.f32 %v4352_v14, %v4055_v48  ;;  %v3831_v51 = vpop.f32.mrf.mxu1  ;;  %v6782_v15 = vpop.f32.mrf.mxu0 }
 0x3cf   : > { %v5177_v22 = vadd.f32 %v5176_v46, %v5175_v52  ;;  %v5332_v3 = vsel %vm3923_vm9, %v5329_v50, %v5331_v13  ;;  %v3968_v35 = vsel %vm3923_vm9, %v3965_v7, %v3967_v56  ;;  %v3969_v8 = vrot.slane %v3831_v51, 5 }
 0x3d0   : > { %v5438_v33 = vsel %vm1112_vm2, %v5332_v3, 0.0  ;;  %v5072_v16 = vsel %vm3923_vm9, %v5069_v43, %v5071_v36  ;;  %v5333_v0 = vrot.slane %v5240_v37, 5  ;;  %4479 = vst.msk [vmem:[%s9096_s30 + $0xa3] sm:$0xff] %vm1112_vm2, %v4441_v44  ;;  %v4979_v6 = vmul.f32 %v9058_v20, %v4441_v44  ;;  %v6695_v10 = vpop.f32.mrf.mxu1  ;;  %v4225_v14 = vpop.f32.mrf.mxu0 }
 0x3d1   : > { %v5439_v58 = vadd.f32 %v5438_v33, %v5437_v34  ;;  %v5178_v47 = vsel %vm1112_vm2, %v5072_v16, 0.0  ;;  %v4056_v50 = vadd.f32 %v3968_v35, %v9805_v4  ;;  %v3970_v20 = vsel %vm3923_vm9, %v3967_v56, %v3969_v8 }
 0x3d2   : > { %v5179_v38 = vadd.f32 %v5178_v47, %v5177_v22  ;;  %v5334_v11 = vsel %vm3923_vm9, %v5331_v13, %v5333_v0  ;;  %v5073_v23 = vrot.slane %v4979_v6, 5  ;;  %v5241_v12 = vmul.f32 %v4979_v6, %v4979_v6  ;;  %v3834_v43 = vpop.f32.mrf.mxu1  ;;  %v6785_v53 = vpop.f32.mrf.mxu0 }
 0x3d3   : > { %v5440_v7 = vsel %vm1112_vm2, %v5334_v11, 0.0  ;;  %v4442_v52 = vadd.f32 %v4354_v9, %v4056_v50  ;;  %v4357_v2 = vrot.slane %v4220_v60, 6  ;;  %v4057_v1 = vadd.f32 %v3970_v20, %v9806_v55  ;;  %v9808_v20 = vld [vmem:[#allocation13_spill] sm:$0xff] }
 0x3d4   : > { %v5441_v24 = vadd.f32 %v5440_v7, %v5439_v58  ;;  %v5074_v19 = vsel %vm3923_vm9, %v5071_v36, %v5073_v23  ;;  %v5335_v59 = vrot.slane %v5241_v12, 5  ;;  %v3971_v40 = vrot.slane %v3834_v43, 5  ;;  %v6696_v63 = vpop.f32.mrf.mxu1  ;;  %v4228_v13 = vpop.f32.mrf.mxu0 }
 0x3d5   : > { %v5180_v17 = vsel %vm1112_vm2, %v5074_v19, 0.0  ;;  %4480 = vst.msk [vmem:[%s9096_s30 + $0xab] sm:$0xff] %vm1112_vm2, %v4442_v52  ;;  %v4980_v34 = vmul.f32 %v9061_v26, %v4442_v52  ;;  %v4358_v29 = vsel %vm4309_vm7, %v4355_v57, %v4357_v2  ;;  %v4443_v30 = vadd.f32 %v4356_v5, %v4057_v1  ;;  %v9807_v57 = vld [vmem:[#allocation10_spill] sm:$0xff] }
 0x3d6   : > { %v5181_v48 = vadd.f32 %v5180_v17, %v5179_v38  ;;  %v5336_v9 = vsel %vm3923_vm9, %v5333_v0, %v5335_v59  ;;  %v4359_v31 = vrot.slane %v4225_v14, 6  ;;  %v3972_v37 = vsel %vm3923_vm9, %v3969_v8, %v3971_v40  ;;  %v3839_v22 = vpop.f32.mrf.mxu1  ;;  %v6786_v3 = vpop.f32.mrf.mxu0 }
 0x3d7   : > { %v5442_v56 = vsel %vm1112_vm2, %v5336_v9, 0.0  ;;  %v5075_v46 = vrot.slane %v4980_v34, 5  ;;  %v5242_v36 = vmul.f32 %v4980_v34, %v4980_v34  ;;  %4481 = vst.msk [vmem:[%s9096_s30 + $0xb3] sm:$0xff] %vm1112_vm2, %v4443_v30  ;;  %v4981_v26 = vmul.f32 %v9064_v42, %v4443_v30  ;;  %v9809_v30 = vld [vmem:[#allocation16_spill] sm:$0xff] }
 0x3d8   : > { %v5443_v44 = vadd.f32 %v5442_v56, %v5441_v24  ;;  %v4058_v21 = vadd.f32 %v3972_v37, %v9807_v57  ;;  %v4360_v60 = vsel %vm4309_vm7, %v4357_v2, %v4359_v31  ;;  %v3973_v33 = vrot.slane %v3839_v22, 5  ;;  %v6699_v58 = vpop.f32.mrf.mxu1  ;;  %v4233_v47 = vpop.f32.mrf.mxu0 }
 0x3d9   : > { %v5076_v35 = vsel %vm3923_vm9, %v5073_v23, %v5075_v46  ;;  %v5337_v5 = vrot.slane %v5242_v36, 5  ;;  %v4361_v16 = vrot.slane %v4228_v13, 6  ;;  %v5077_v6 = vrot.slane %v4981_v26, 5 }
 0x3da   : > { %v5182_v0 = vsel %vm1112_vm2, %v5076_v35, 0.0  ;;  %v5243_v51 = vmul.f32 %v4981_v26, %v4981_v26  ;;  %v4444_v15 = vadd.f32 %v4358_v29, %v4058_v21  ;;  %v3974_v50 = vsel %vm3923_vm9, %v3971_v40, %v3973_v33  ;;  %v3842_v10 = vpop.f32.mrf.mxu1  ;;  %v6789_v14 = vpop.f32.mrf.mxu0 }
 0x3db   : > { %v5183_v42 = vadd.f32 %v5182_v0, %v5181_v48  ;;  %v5338_v4 = vsel %vm3923_vm9, %v5335_v59, %v5337_v5  ;;  %v4362_v8 = vsel %vm4309_vm7, %v4359_v31, %v4361_v16  ;;  %v5078_v11 = vsel %vm3923_vm9, %v5075_v46, %v5077_v6 }
 0x3dc   : > { %v5444_v38 = vsel %vm1112_vm2, %v5338_v4, 0.0  ;;  %v5339_v23 = vrot.slane %v5243_v51, 5  ;;  %4482 = vst.msk [vmem:[%s9096_s30 + $0xbb] sm:$0xff] %vm1112_vm2, %v4444_v15  ;;  %v4982_v12 = vmul.f32 %v9067_v61, %v4444_v15  ;;  %v5184_v52 = vsel %vm1112_vm2, %v5078_v11, 0.0  ;;  %v6700_v43 = vpop.f32.mrf.mxu1  ;;  %v4236_v53 = vpop.f32.mrf.mxu0 }
 0x3dd   : > { %v5445_v7 = vadd.f32 %v5444_v38, %v5443_v44  ;;  %v4059_v2 = vadd.f32 %v3974_v50, %v9808_v20  ;;  %v3975_v24 = vrot.slane %v3842_v10, 5  ;;  %v5185_v19 = vadd.f32 %v5184_v52, %v5183_v42 }
 0x3de   : > { %v5340_v59 = vsel %vm3923_vm9, %v5337_v5, %v5339_v23  ;;  %v5079_v55 = vrot.slane %v4982_v12, 5  ;;  %v5244_v1 = vmul.f32 %v4982_v12, %v4982_v12  ;;  %v4363_v29 = vrot.slane %v4233_v47, 6  ;;  %v3847_v63 = vpop.f32.mrf.mxu1  ;;  %v6790_v13 = vpop.f32.mrf.mxu0 }
 0x3df   : > { %v5446_v17 = vsel %vm1112_vm2, %v5340_v59, 0.0  ;;  %v4445_v34 = vadd.f32 %v4360_v60, %v4059_v2  ;;  %v3976_v61 = vsel %vm3923_vm9, %v3973_v33, %v3975_v24  ;;  %v3977_v37 = vrot.slane %v3847_v63, 5 }
 0x3e0   : > { %v5447_v40 = vadd.f32 %v5446_v17, %v5445_v7  ;;  %v5080_v48 = vsel %vm3923_vm9, %v5077_v6, %v5079_v55  ;;  %v5341_v9 = vrot.slane %v5244_v1, 5  ;;  %v4060_v31 = vadd.f32 %v3976_v61, %v9809_v30  ;;  %v6703_v60 = vpop.f32.mrf.mxu1  ;;  %v4241_v22 = vpop.f32.mrf.mxu0  ;;  %v9813_v61 = vld [vmem:[#allocation26_spill] sm:$0xff] }
 0x3e1   : > { %v5186_v56 = vsel %vm1112_vm2, %v5080_v48, 0.0  ;;  %4483 = vst.msk [vmem:[%s9096_s30 + $0xc3] sm:$0xff] %vm1112_vm2, %v4445_v34  ;;  %v4983_v46 = vmul.f32 %v9073_v41, %v4445_v34  ;;  %v4364_v36 = vsel %vm4309_vm7, %v4361_v16, %v4363_v29  ;;  %v4365_v21 = vrot.slane %v4236_v53, 6  ;;  %v9810_v41 = vld [vmem:[#allocation42_spill] sm:$0xff]  ;;  %v9811_v16 = vld [vmem:[#allocation17_spill] sm:$0xff] }
 0x3e2   : > { %v5187_v44 = vadd.f32 %v5186_v56, %v5185_v19  ;;  %v5342_v26 = vsel %vm3923_vm9, %v5339_v23, %v5341_v9  ;;  %v4446_v57 = vadd.f32 %v4362_v8, %v4060_v31  ;;  %v3978_v33 = vsel %vm3923_vm9, %v3975_v24, %v3977_v37  ;;  %v3850_v58 = vpop.f32.mrf.mxu1  ;;  %v6793_v47 = vpop.f32.mrf.mxu0 }
 0x3e3   : > { %v5448_v3 = vsel %vm1112_vm2, %v5342_v26, 0.0  ;;  %v5081_v35 = vrot.slane %v4983_v46, 5  ;;  %v5245_v5 = vmul.f32 %v4983_v46, %v4983_v46  ;;  %v4061_v51 = vadd.f32 %v3978_v33, %v9811_v16 }
 0x3e4   : > { %v5449_v0 = vadd.f32 %v5448_v3, %v5447_v40  ;;  %4484 = vst.msk [vmem:[%s9096_s30 + $0xcb] sm:$0xff] %vm1112_vm2, %v4446_v57  ;;  %v4984_v6 = vmul.f32 %v9810_v41, %v4446_v57  ;;  %v4366_v15 = vsel %vm4309_vm7, %v4363_v29, %v4365_v21  ;;  %v3979_v50 = vrot.slane %v3850_v58, 5  ;;  %v6704_v10 = vpop.f32.mrf.mxu1  ;;  %v4244_v14 = vpop.f32.mrf.mxu0 }
 0x3e5   : > { %v5082_v42 = vsel %vm3923_vm9, %v5079_v55, %v5081_v35  ;;  %v5343_v4 = vrot.slane %v5245_v5, 5  ;;  %v4367_v8 = vrot.slane %v4241_v22, 6  ;;  %v4447_v12 = vadd.f32 %v4364_v36, %v4061_v51  ;;  %v9812_v55 = vld [vmem:[#allocation36_spill] sm:$0xff] }
 0x3e6   : > { %v5188_v38 = vsel %vm1112_vm2, %v5082_v42, 0.0  ;;  %v5083_v11 = vrot.slane %v4984_v6, 5  ;;  %v5246_v23 = vmul.f32 %v4984_v6, %v4984_v6  ;;  %v3980_v20 = vsel %vm3923_vm9, %v3977_v37, %v3979_v50  ;;  %v3855_v43 = vpop.f32.mrf.mxu1  ;;  %v6794_v53 = vpop.f32.mrf.mxu0  ;;  %v9815_v5 = vld [vmem:[#allocation12_spill] sm:$0xff] }
 0x3e7   : > { %v5189_v7 = vadd.f32 %v5188_v38, %v5187_v44  ;;  %v5344_v52 = vsel %vm3923_vm9, %v5341_v9, %v5343_v4  ;;  %v4368_v2 = vsel %vm4309_vm7, %v4365_v21, %v4367_v8  ;;  %4485 = vst.msk [vmem:[%s9096_s30 + $0xd3] sm:$0xff] %vm1112_vm2, %v4447_v12  ;;  %v4985_v1 = vmul.f32 %v9812_v55, %v4447_v12  ;;  %v9814_v21 = vld [vmem:[#allocation27_spill] sm:$0xff] }
 0x3e8   : > { %v5450_v24 = vsel %vm1112_vm2, %v5344_v52, 0.0  ;;  %v5084_v19 = vsel %vm3923_vm9, %v5081_v35, %v5083_v11  ;;  %v5345_v59 = vrot.slane %v5246_v23, 5  ;;  %v4062_v29 = vadd.f32 %v3980_v20, %v9813_v61  ;;  %v6707_v63 = vpop.f32.mrf.mxu1  ;;  %v4249_v13 = vpop.f32.mrf.mxu0  ;;  %v9816_v23 = vld [vmem:[#allocation51_spill] sm:$0xff] }
 0x3e9   : > { %v5451_v17 = vadd.f32 %v5450_v24, %v5449_v0  ;;  %v5190_v34 = vsel %vm1112_vm2, %v5084_v19, 0.0  ;;  %v3981_v40 = vrot.slane %v3855_v43, 5  ;;  %v5085_v30 = vrot.slane %v4985_v1, 5 }
 0x3ea   : > { %v5191_v48 = vadd.f32 %v5190_v34, %v5189_v7  ;;  %v5346_v9 = vsel %vm3923_vm9, %v5343_v4, %v5345_v59  ;;  %v5247_v31 = vmul.f32 %v4985_v1, %v4985_v1  ;;  %v4448_v46 = vadd.f32 %v4366_v15, %v4062_v29  ;;  %v3858_v22 = vpop.f32.mrf.mxu1  ;;  %v6797_v3 = vpop.f32.mrf.mxu0 }
 0x3eb   : > { %v5452_v56 = vsel %vm1112_vm2, %v5346_v9, 0.0  ;;  %v3982_v36 = vsel %vm3923_vm9, %v3979_v50, %v3981_v40  ;;  %v4369_v37 = vrot.slane %v4244_v14, 6  ;;  %v5086_v26 = vsel %vm3923_vm9, %v5083_v11, %v5085_v30 }
 0x3ec   : > { %v5453_v44 = vadd.f32 %v5452_v56, %v5451_v17  ;;  %v5347_v57 = vrot.slane %v5247_v31, 5  ;;  %v4063_v60 = vadd.f32 %v3982_v36, %v9814_v21  ;;  %v5192_v35 = vsel %vm1112_vm2, %v5086_v26, 0.0  ;;  %4486 = vst.msk [vmem:[%s9096_s30 + $0xdb] sm:$0xff] %vm1112_vm2, %v4448_v46  ;;  %v6708_v58 = vpop.f32.mrf.mxu1  ;;  %v4252_v47 = vpop.f32.mrf.mxu0  ;;  %v9818_v36 = vld [vmem:[#allocation11_spill] sm:$0xff] }
 0x3ed   : > { %v4986_v33 = vmul.f32 %v9815_v5, %v4448_v46  ;;  %v4370_v0 = vsel %vm4309_vm7, %v4367_v8, %v4369_v37  ;;  %v3983_v41 = vrot.slane %v3858_v22, 5  ;;  %v5193_v6 = vadd.f32 %v5192_v35, %v5191_v48  ;;  %v9817_v8 = vld [vmem:[#allocation31_spill] sm:$0xff] }
 0x3ee   : > { %v5348_v16 = vsel %vm3923_vm9, %v5345_v59, %v5347_v57  ;;  %v4449_v51 = vadd.f32 %v4368_v2, %v4063_v60  ;;  %v4371_v15 = vrot.slane %v4249_v13, 6  ;;  %v3863_v7 = vpop.f32.mrf.mxu1  ;;  %v6798_v52 = vpop.f32.mrf.mxu0  ;;  %v4373_v19 = vrot.slane %v4252_v47, 6 }
 0x3ef   : > { %v5454_v42 = vsel %vm1112_vm2, %v5348_v16, 0.0  ;;  %v5087_v4 = vrot.slane %v4986_v33, 5  ;;  %v5248_v50 = vmul.f32 %v4986_v33, %v4986_v33  ;;  %v3984_v38 = vsel %vm3923_vm9, %v3981_v40, %v3983_v41  ;;  %v9819_v16 = vld [vmem:[#allocation32_spill] sm:$0xff] }
 0x3f0   : > { %v5455_v11 = vadd.f32 %v5454_v42, %v5453_v44  ;;  %4487 = vst.msk [vmem:[%s9096_s30 + $0xe3] sm:$0xff] %vm1112_vm2, %v4449_v51  ;;  %v4987_v12 = vmul.f32 %v9816_v23, %v4449_v51  ;;  %v4064_v10 = vadd.f32 %v3984_v38, %v9817_v8  ;;  %v4372_v14 = vsel %vm4309_vm7, %v4369_v37, %v4371_v15  ;;  %v6711_v53 = vpop.f32.mrf.mxu1  ;;  %v4257_v17 = vpop.f32.mrf.mxu0 }
 0x3f1   : > { %v5088_v20 = vsel %vm3923_vm9, %v5085_v30, %v5087_v4  ;;  %v5349_v2 = vrot.slane %v5248_v50, 5  ;;  %v3985_v24 = vrot.slane %v3863_v7, 5  ;;  %v4374_v40 = vsel %vm4309_vm7, %v4371_v15, %v4373_v19 }
 0x3f2   : > { %v5194_v59 = vsel %vm1112_vm2, %v5088_v20, 0.0  ;;  %v5089_v55 = vrot.slane %v4987_v12, 5  ;;  %v5249_v1 = vmul.f32 %v4987_v12, %v4987_v12  ;;  %v4450_v43 = vadd.f32 %v4370_v0, %v4064_v10  ;;  %v3866_v63 = vpop.f32.mrf.mxu1  ;;  %v6801_v13 = vpop.f32.mrf.mxu0 }
 0x3f3   : > { %v5195_v34 = vadd.f32 %v5194_v59, %v5193_v6  ;;  %v5350_v61 = vsel %vm3923_vm9, %v5347_v57, %v5349_v2  ;;  %v3986_v29 = vsel %vm3923_vm9, %v3983_v41, %v3985_v24  ;;  %v3987_v44 = vrot.slane %v3866_v63, 5 }
 0x3f4   : > { %v5456_v48 = vsel %vm1112_vm2, %v5350_v61, 0.0  ;;  %v5090_v9 = vsel %vm3923_vm9, %v5087_v4, %v5089_v55  ;;  %v5351_v30 = vrot.slane %v5249_v1, 5  ;;  %4488 = vst.msk [vmem:[%s9096_s30 + $0xeb] sm:$0xff] %vm1112_vm2, %v4450_v43  ;;  %v4988_v31 = vmul.f32 %v9102_v18, %v4450_v43  ;;  %v6712_v22 = vpop.f32.mrf.mxu1  ;;  %v4260_v3 = vpop.f32.mrf.mxu0 }
 0x3f5   : > { %v5457_v56 = vadd.f32 %v5456_v48, %v5455_v11  ;;  %v5196_v46 = vsel %vm1112_vm2, %v5090_v9, 0.0  ;;  %v4065_v37 = vadd.f32 %v3986_v29, %v9818_v36  ;;  %v3988_v18 = vsel %vm3923_vm9, %v3985_v24, %v3987_v44  ;;  %v9820_v24 = vld [vmem:[#allocation41_spill] sm:$0xff] }
 0x3f6   : > { %v5197_v26 = vadd.f32 %v5196_v46, %v5195_v34  ;;  %v5352_v57 = vsel %vm3923_vm9, %v5349_v2, %v5351_v30  ;;  %v5091_v21 = vrot.slane %v4988_v31, 5  ;;  %v5250_v60 = vmul.f32 %v4988_v31, %v4988_v31  ;;  %v3871_v15 = vpop.f32.mrf.mxu1  ;;  %v6802_v58 = vpop.f32.mrf.mxu0 }
 0x3f7   : > { %v5458_v35 = vsel %vm1112_vm2, %v5352_v57, 0.0  ;;  %v4451_v5 = vadd.f32 %v4372_v14, %v4065_v37  ;;  %v4375_v33 = vrot.slane %v4257_v17, 6  ;;  %v4066_v51 = vadd.f32 %v3988_v18, %v9819_v16 }
 0x3f8   : > { %v5459_v0 = vadd.f32 %v5458_v35, %v5457_v56  ;;  %v5092_v41 = vsel %vm3923_vm9, %v5089_v55, %v5091_v21  ;;  %v5353_v6 = vrot.slane %v5250_v60, 5  ;;  %v3989_v50 = vrot.slane %v3871_v15, 5  ;;  %v6715_v8 = vpop.f32.mrf.mxu1  ;;  %v9443_v10 = vpop.f32.mrf.mxu0  ;;  %v9821_v60 = vld [vmem:[#allocation50_spill] sm:$0xff] }
 0x3f9   : > { %v5198_v47 = vsel %vm1112_vm2, %v5092_v41, 0.0  ;;  %4489 = vst.msk [vmem:[%s9096_s30 + $0xf3] sm:$0xff] %vm1112_vm2, %v4451_v5  ;;  %v4989_v42 = vmul.f32 %v9105_v27, %v4451_v5  ;;  %v4376_v4 = vsel %vm4309_vm7, %v4373_v19, %v4375_v33  ;;  %v4452_v23 = vadd.f32 %v4374_v40, %v4066_v51 }
 0x3fa   : > { %v5199_v38 = vadd.f32 %v5198_v47, %v5197_v26  ;;  %v5354_v11 = vsel %vm3923_vm9, %v5351_v30, %v5353_v6  ;;  %v4377_v12 = vrot.slane %v4260_v3, 6  ;;  %v3990_v20 = vsel %vm3923_vm9, %v3987_v44, %v3989_v50  ;;  %v3874_v55 = vpop.f32.mrf.mxu1  ;;  %v6805_v1 = vpop.f32.mrf.mxu0  ;;  %v9822_v47 = vld [vmem:[#allocation49_spill] sm:$0xff] }
 0x3fb   : > { %v5460_v14 = vsel %vm1112_vm2, %v5354_v11, 0.0  ;;  %v5093_v7 = vrot.slane %v4989_v42, 5  ;;  %v5251_v52 = vmul.f32 %v4989_v42, %v4989_v42  ;;  %4490 = vst.msk [vmem:[%s9096_s30 + $0xfb] sm:$0xff] %vm1112_vm2, %v4452_v23  ;;  %v4990_v27 = vmul.f32 %v9128_v49, %v4452_v23 }
 0x3fc   : > { %v5461_v2 = vadd.f32 %v5460_v14, %v5459_v0  ;;  %v4067_v19 = vadd.f32 %v3990_v20, %v9820_v24  ;;  %v4378_v59 = vsel %vm4309_vm7, %v4375_v33, %v4377_v12  ;;  %v3991_v17 = vrot.slane %v3874_v55, 5  ;;  %v6716_v9 = vpop.f32.mrf.mxu1  ;;  %v4268_v49 = vpop.f32.mrf.mxu0 }
 0x3fd   : > { %v5094_v43 = vsel %vm3923_vm9, %v5091_v21, %v5093_v7  ;;  %v5355_v53 = vrot.slane %v5251_v52, 5  ;;  %v4379_v34 = vrot.slane %v9443_v10, 6  ;;  %v5095_v29 = vrot.slane %v4990_v27, 5 }
 0x3fe   : > { %v5200_v61 = vsel %vm1112_vm2, %v5094_v43, 0.0  ;;  %v5252_v40 = vmul.f32 %v4990_v27, %v4990_v27  ;;  %v4453_v48 = vadd.f32 %v4376_v4, %v4067_v19  ;;  %v3992_v63 = vsel %vm3923_vm9, %v3989_v50, %v3991_v17  ;;  %v3879_v44 = vpop.f32.mrf.mxu1  ;;  %v6806_v26 = vpop.f32.mrf.mxu0 }
 0x3ff   : > { %v5201_v30 = vadd.f32 %v5200_v61, %v5199_v38  ;;  %v5356_v31 = vsel %vm3923_vm9, %v5353_v6, %v5355_v53  ;;  %v4380_v13 = vsel %vm4309_vm7, %v4377_v12, %v4379_v34  ;;  %v5096_v46 = vsel %vm3923_vm9, %v5093_v7, %v5095_v29 }
 0x400   : > { %v5462_v56 = vsel %vm1112_vm2, %v5356_v31, 0.0  ;;  %v5357_v36 = vrot.slane %v5252_v40, 5  ;;  %4491 = vst.msk [vmem:[%s9096_s30 + $0x103] sm:$0xff] %vm1112_vm2, %v4453_v48  ;;  %v4991_v37 = vmul.f32 %v9132_v32, %v4453_v48  ;;  %v5202_v21 = vsel %vm1112_vm2, %v5096_v46, 0.0  ;;  %v6719_v0 = vpop.f32.mrf.mxu1 }
 0x401   : > { %v5463_v57 = vadd.f32 %v5462_v56, %v5461_v2  ;;  %v4068_v22 = vadd.f32 %v3992_v63, %v9821_v60  ;;  %v3993_v3 = vrot.slane %v3879_v44, 5  ;;  %v5203_v35 = vadd.f32 %v5202_v21, %v5201_v30 }
 0x402   : > { %v5358_v5 = vsel %vm3923_vm9, %v5355_v53, %v5357_v36  ;;  %v5097_v18 = vrot.slane %v4991_v37, 5  ;;  %v5253_v33 = vmul.f32 %v4991_v37, %v4991_v37  ;;  %v4671_v16 = vmul.u32 18, %v9179_v45  ;;  %v3882_v4 = vpop.f32.mrf.mxu1 }
 0x403   : > { %v5464_v41 = vsel %vm1112_vm2, %v5358_v5, 0.0  ;;  %v4454_v6 = vadd.f32 %v4378_v59, %v4068_v22  ;;  %v3994_v32 = vsel %vm3923_vm9, %v3991_v17, %v3993_v3  ;;  %v4381_v23 = vrot.slane %v4268_v49, 6  ;;  %v9823_v59 = vld [vmem:[#allocation35_spill] sm:$0xff] }
 0x404   : > { %v5465_v51 = vadd.f32 %v5464_v41, %v5463_v57  ;;  %v5098_v15 = vsel %vm3923_vm9, %v5095_v29, %v5097_v18  ;;  %v5359_v58 = vrot.slane %v5253_v33, 5  ;;  %v4069_v42 = vadd.f32 %v3994_v32, %v9822_v47  ;;  %v6720_v14 = vpop.f32.mrf.mxu1 }
 0x405   : > { %v5204_v50 = vsel %vm1112_vm2, %v5098_v15, 0.0  ;;  %4492 = vst.msk [vmem:[%s9096_s30 + $0x10b] sm:$0xff] %vm1112_vm2, %v4454_v6  ;;  %v4992_v38 = vmul.f32 %v9151_v28, %v4454_v6  ;;  %v4706_v11 = vsub.s32 %v9789_v62, %v4671_v16  ;;  %v3995_v10 = vrot.slane %v3882_v4, 5 }
 0x406   : > { %v5205_v12 = vadd.f32 %v5204_v50, %v5203_v35  ;;  %v5360_v45 = vsel %vm3923_vm9, %v5357_v36, %v5359_v58  ;;  %v4455_v8 = vadd.f32 %v4380_v13, %v4069_v42  ;;  %v4382_v43 = vsel %vm4309_vm7, %v4379_v34, %v4381_v23 }
 0x407   : > { %v5466_v7 = vsel %vm1112_vm2, %v5360_v45, 0.0  ;;  %v5099_v52 = vrot.slane %v4992_v38, 5  ;;  %v5254_v20 = vmul.f32 %v4992_v38, %v4992_v38  ;;  %vm4741_vm14 = vcmp.lt.s32.totalorder %v4706_v11, 16 }
 0x408   : > { %v5467_v2 = vadd.f32 %v5466_v7, %v5465_v51  ;;  %4493 = vst.msk [vmem:[%s9096_s30 + $0x113] sm:$0xff] %vm1112_vm2, %v4455_v8  ;;  %v5832_v27 = vsel %vm4741_vm14, 1.0, %v9637_v39  ;;  %v3996_v62 = vsel %vm3923_vm9, %v3993_v3, %v3995_v10  ;;  %vm4494_vm15 = vcmask 61440  }
 0x409   : > { %v5100_v28 = vsel %vm3923_vm9, %v5097_v18, %v5099_v52  ;;  %v5361_v24 = vrot.slane %v5254_v20, 5  ;;  %v4919_v19 = vrot.slane %v5832_v27, 3  ;;  %v4070_v55 = vadd.f32 %v3996_v62, %v9823_v59 }
 0x40a   : > { %v5206_v1 = vsel %vm1112_vm2, %v5100_v28, 0.0 }
 0x40b   : > { %v5207_v53 = vadd.f32 %v5206_v1, %v5205_v12  ;;  %v5362_v17 = vsel %vm3923_vm9, %v5359_v58, %v5361_v24  ;;  %v4920_v39 = vsel %vm2769_vm5, %v4917_v54, %v4919_v19  ;;  %v4456_v61 = vadd.f32 %v4382_v43, %v4070_v55 }
 0x40c   : > { %v5468_v29 = vsel %vm1112_vm2, %v5362_v17, 0.0  ;;  %v4993_v40 = vmul.f32 %v4920_v39, %v4455_v8  ;;  %vm5218_vm5 = vcmask 57344  }
 0x40d   : > { %v5469_v48 = vadd.f32 %v5468_v29, %v5467_v2  ;;  %4495 = vst.msk [vmem:[%s9096_s30 + $0x11b] sm:$0x1f] %vm4494_vm15, %v4456_v61  ;;  %v4994_v9 = vmul.f32 %v4919_v19, %v4456_v61 }
 0x40e   : > { %v5101_v49 = vrot.slane %v4993_v40, 5  ;;  %v5255_v30 = vmul.f32 %v4993_v40, %v4993_v40 }
 0x40f   : > { %v5103_v31 = vrot.slane %v4994_v9, 5  ;;  %v5256_v63 = vmul.f32 %v4994_v9, %v4994_v9 }
 0x410   : > { %v5102_v34 = vsel %vm3923_vm9, %v5099_v52, %v5101_v49  ;;  %v5363_v13 = vrot.slane %v5255_v30, 5 }
 0x411   : > { %v5208_v56 = vsel %vm1112_vm2, %v5102_v34, 0.0  ;;  %v5104_v25 = vsel %vm3923_vm9, %v5101_v49, %v5103_v31  ;;  %v5365_v54 = vrot.slane %v5256_v63, 5 }
 0x412   : > { %v5209_v46 = vadd.f32 %v5208_v56, %v5207_v53  ;;  %v5364_v36 = vsel %vm3923_vm9, %v5361_v24, %v5363_v13  ;;  %v5210_v37 = vsel %vm1112_vm2, %v5104_v25, 0.0 }
 0x413   : > { %v5470_v44 = vsel %vm1112_vm2, %v5364_v36, 0.0  ;;  %v5366_v26 = vsel %vm3923_vm9, %v5363_v13, %v5365_v54 }
 0x414   : > { %v5471_v57 = vadd.f32 %v5470_v44, %v5469_v48  ;;  %v5211_v21 = vadd.f32 %v5210_v37, %v5209_v46  ;;  %v5472_v60 = vsel %vm1112_vm2, %v5366_v26, 0.0 }
 0x416   : > { %v5212_v22 = vrot.slane %v5211_v21, 4  ;;  %v5473_v3 = vadd.f32 %v5472_v60, %v5471_v57 }
 0x418   : > { %v5213_v35 = vadd.f32 %v5212_v22, %v5211_v21  ;;  %v5474_v5 = vrot.slane %v5473_v3, 4 }
 0x41a   : > { %v5214_v18 = vrot.slane %v5213_v35, 2  ;;  %v5475_v33 = vadd.f32 %v5474_v5, %v5473_v3 }
 0x41c   : > { %v5215_v0 = vadd.f32 %v5214_v18, %v5213_v35  ;;  %v5476_v41 = vrot.slane %v5475_v33, 2 }
 0x41e   : > { %v5216_v6 = vrot.slane %v5215_v0, 1  ;;  %v5477_v32 = vadd.f32 %v5476_v41, %v5475_v33 }
 0x420   : > { %v5217_v16 = vadd.f32 %v5216_v6, %v5215_v0  ;;  %v5478_v51 = vrot.slane %v5477_v32, 1 }
 0x422   : > { %5219 = vst.msk [vmem:[%s235_s9] sm:$0x1] %vm5218_vm5, %v5217_v16  ;;  %v5479_v15 = vadd.f32 %v5478_v51, %v5477_v32 }
 0x424   : > { %5480 = vst.msk [vmem:[%s235_s9 + $0x1] sm:$0x1] %vm5218_vm5, %v5479_v15 }
 0x425 PF: > { %s16_s18 = sadd.s32 1, %s6972_s18  }
 0x426   : > { %p13_p4 = scmp.ge.s32.totalorder %s16_s18, 4  }
 0x428   :  { %15 = sbr.rel (!%p13_p4) target bundleno = 1 (0x1), region = 86 }

</bundles_post_ra>
